<compile_context>
chip_gen: v7x
topology: tpu7x:2x2x1
jax: 0.10.0
libtpu: 0.0.40
codegen_flags: <defaults>
</compile_context>

<pallas_src>
import functools
import math

import jax
import jax.numpy as jnp
from jax.experimental import pallas as pl
from jax.experimental.pallas import tpu as pltpu


def _softmax_last(x):
    m = jnp.max(x, axis=-1, keepdims=True)
    e = jnp.exp(x - m)
    return e / jnp.sum(e, axis=-1, keepdims=True)


def mc_occ_lstm_kernel(xm_ref, xa_ref, yf_ref,
                       wr_a_ref, wr_c_ref, br_ref,
                       wio_a_ref, wio_c_ref, bio_ref,
                       kmat_ref, kt_ref, jmt_ref,
                       wih_ref, whh_ref, bdec_ref,
                       wfc_ref, bfc_ref,
                       out_ref,
                       *, x_horizon, y_horizon, hidden, diff_whole):
    H = hidden
    B = xm_ref.shape[1]

    # ---- load all (tiny) weights once; they stay resident in VMEM/vregs.
    wr_a = wr_a_ref[...]          # (A, H*H)   redistribution gate, aux part
    wr_c = wr_c_ref[...]          # (H, H*H)   redistribution gate, cell part
    br = br_ref[...]              # (1, H*H)
    wio_a = wio_a_ref[...]        # (A, 2H)    [in_gate | out_gate], aux part
    wio_c = wio_c_ref[...]        # (H, 2H)
    bio = bio_ref[...]            # (1, 2H)
    kmat = kmat_ref[...]          # (H, H*H)   kmat[k, p] = (p // H == k)
    kt = kt_ref[...]              # (H*H, H)   kmat^T
    jmt = jmt_ref[...]            # (H*H, H)   jmt[p, j] = (p %  H == j)

    # ================= encoder: Mass-Conserving LSTM =================
    def enc_step(t, c):
        xa_t = xa_ref[t]                                       # (B, A)
        xm_t = xm_ref[t]                                       # (B, 1)
        if diff_whole:
            xm_t = xm_t * 0.5 + 0.5
        c_sum = jnp.sum(c, axis=-1, keepdims=True)
        scale = jnp.where(c_sum == 0.0, jnp.ones_like(c_sum), c_sum)
        c_n = c / scale                                        # normalised cell state

        # Redistribution gate, lane-flat (B, H*H). Per-source-cell softmax and
        # the contraction sum_k c_k * r[k, :] are done with 0/1 indicator
        # matmuls (no in-kernel 3-D reshape). Subtracting the per-row max is
        # shift-invariant within every H-block, so the block softmax is exact.
        s_r = (jnp.dot(xa_t, wr_a, preferred_element_type=jnp.float32)
               + jnp.dot(c_n, wr_c, preferred_element_type=jnp.float32) + br)
        s_r = s_r - jnp.max(s_r, axis=-1, keepdims=True)
        e_r = jnp.exp(s_r)                                                    # (B, H*H)
        denom = jnp.dot(e_r, kt, preferred_element_type=jnp.float32)          # (B, H)
        q = c / denom                                                         # c_k / denom_k
        q_full = jnp.dot(q, kmat, preferred_element_type=jnp.float32)         # (B, H*H)
        c_redis = jnp.dot(e_r * q_full, jmt, preferred_element_type=jnp.float32)  # (B, H) = c @ r

        # input gate (softmax over cells) and output gate (sigmoid), fused linear.
        s_io = (jnp.dot(xa_t, wio_a, preferred_element_type=jnp.float32)
                + jnp.dot(c_n, wio_c, preferred_element_type=jnp.float32) + bio)   # (B, 2H)
        i_soft = _softmax_last(s_io[:, :H])
        o_sig = jax.nn.sigmoid(s_io[:, H:])

        c_new = c_redis + xm_t * i_soft
        h = o_sig * c_new
        return c_new - h                                       # mass left in the cells

    c_last = jax.lax.fori_loop(0, x_horizon, enc_step,
                               jnp.zeros((B, H), jnp.float32), unroll=True)

    # ================= decoder: standard LSTM + fc head =================
    # h0 = zeros, c0 = final MC-LSTM cell state (num_layers=1, unidirectional).
    wih = wih_ref[...]            # (F, 4H)
    whh = whh_ref[...]            # (H, 4H)
    bdec = bdec_ref[...]          # (1, 4H)  (b_ih + b_hh pre-folded)
    wfc = wfc_ref[...]            # (H, y_size)
    bfc = bfc_ref[...]            # (1, y_size)

    def dec_step(t, carry):
        h, c = carry
        x_t = yf_ref[t]                                                         # (B, F)
        gates = (jnp.dot(x_t, wih, preferred_element_type=jnp.float32)
                 + jnp.dot(h, whh, preferred_element_type=jnp.float32) + bdec)  # (B, 4H)
        sig = jax.nn.sigmoid(gates)          # one full-width EUP pass
        tnh = jnp.tanh(gates)                # one full-width EUP pass
        i_g = sig[:, 0:H]
        f_g = sig[:, H:2 * H]
        g_g = tnh[:, 2 * H:3 * H]
        o_g = sig[:, 3 * H:4 * H]
        c_new = f_g * c + i_g * g_g
        h_new = o_g * jnp.tanh(c_new)
        out_ref[t] = (jnp.dot(h_new, wfc, preferred_element_type=jnp.float32) + bfc)
        return (h_new, c_new)

    jax.lax.fori_loop(0, y_horizon, dec_step,
                      (jnp.zeros((B, H), jnp.float32), c_last), unroll=True)


def _block_indicator_mats(H):
    """0/1 matrices used to do the blocked softmax / c @ r contraction lane-flat."""
    p = jnp.arange(H * H)
    ar = jnp.arange(H)[None, :]
    kt = ((p // H)[:, None] == ar).astype(jnp.float32)    # (H*H, H): p's source block
    jmt = ((p % H)[:, None] == ar).astype(jnp.float32)    # (H*H, H): p's target cell
    kmat = kt.T                                           # (H, H*H)
    return kmat, kt, jmt


def mass_conserving_occ_lstm_forward(x, y_features, params, hp, room_id=None):
    """Mirrors MassConservingOccLSTM.forward for the supported config."""
    if "coursenumber" in hp["features"]:
        # TODO(synk): course_embedding branch needs data/helpers_occpred.json + embedding lookup.
        raise NotImplementedError("coursenumber feature not supported")
    if hp["bidirectional"] or hp["num_layers"] != 1:
        # TODO(synk): bidirectional / multi-layer decoder LSTM not implemented in the fused kernel.
        raise NotImplementedError("only num_layers=1, unidirectional decoder supported")
    if hp["occcount"]:
        raise NotImplementedError("occcount path raises in the reference module as well")

    H = hp["hidden_size"][0]
    B, L, _ = x.shape
    T = y_features.shape[1]
    y_size = hp["y_size"]

    # time-major layouts so the kernel indexes the leading (untiled) axis only.
    xm_tm = jnp.transpose(x[:, :, 0:1], (1, 0, 2))        # (L, B, 1)
    xa_tm = jnp.transpose(x[:, :, 1:], (1, 0, 2))         # (L, B, A)
    yf_tm = jnp.transpose(y_features, (1, 0, 2))          # (T, B, F)

    enc, dec, fc = params["encoder"], params["decoder"], params["fc"]
    kmat, kt, jmt = _block_indicator_mats(H)

    kernel = functools.partial(mc_occ_lstm_kernel,
                               x_horizon=L, y_horizon=T, hidden=H,
                               diff_whole=(hp["differencing"] == "whole"))
    vmem = pl.BlockSpec(memory_space=pltpu.MemorySpace.VMEM)
    inputs = (xm_tm, xa_tm, yf_tm,
              enc["wr_a"], enc["wr_c"], enc["br"],
              enc["wio_a"], enc["wio_c"], enc["bio"],
              kmat, kt, jmt,
              dec["wih_t"], dec["whh_t"], dec["b"],
              fc["w_t"], fc["b"])

    out_tm = pl.pallas_call(
        kernel,
        out_shape=jax.ShapeDtypeStruct((T, B, y_size), jnp.float32),
        in_specs=[vmem] * len(inputs),
        out_specs=vmem,
    )(*inputs)

    pred = jnp.transpose(out_tm, (1, 0, 2))               # (B, T, y_size)
    if pred.shape[-1] == 1:
        pred = jnp.squeeze(pred, -1)
    if pred.shape[-1] == 1:
        pred = jnp.squeeze(pred, -1)
    return pred


def mc_occ_lstm_reference(x, y_features, params, hp):
    """Pure-JAX reference mirroring the PyTorch module math."""
    H = hp["hidden_size"][0]
    B, L, _ = x.shape
    T = y_features.shape[1]
    enc, dec, fc = params["encoder"], params["decoder"], params["fc"]

    xm = x[:, :, 0:1]
    xa = x[:, :, 1:]
    if hp["differencing"] == "whole":
        xm = xm * 0.5 + 0.5

    c = jnp.zeros((B, H), jnp.float32)
    for t in range(L):
        xa_t = xa[:, t, :]
        xm_t = xm[:, t, :]
        c_sum = jnp.sum(c, axis=-1, keepdims=True)
        scale = jnp.where(c_sum == 0.0, jnp.ones_like(c_sum), c_sum)
        c_n = c / scale
        s_r = xa_t @ enc["wr_a"] + c_n @ enc["wr_c"] + enc["br"]
        r = jax.nn.softmax(s_r.reshape(B, H, H), axis=-1)
        s_io = xa_t @ enc["wio_a"] + c_n @ enc["wio_c"] + enc["bio"]
        i = jax.nn.softmax(s_io[:, :H], axis=-1)
        o = jax.nn.sigmoid(s_io[:, H:])
        c_new = jnp.einsum("bk,bkj->bj", c, r) + xm_t * i
        h = o * c_new
        c = c_new - h

    h_d = jnp.zeros((B, H), jnp.float32)
    c_d = c
    preds = []
    for t in range(T):
        x_t = y_features[:, t, :]
        gates = x_t @ dec["wih_t"] + h_d @ dec["whh_t"] + dec["b"]
        i_g = jax.nn.sigmoid(gates[:, :H])
        f_g = jax.nn.sigmoid(gates[:, H:2 * H])
        g_g = jnp.tanh(gates[:, 2 * H:3 * H])
        o_g = jax.nn.sigmoid(gates[:, 3 * H:])
        c_d = f_g * c_d + i_g * g_g
        h_d = o_g * jnp.tanh(c_d)
        preds.append(h_d @ fc["w_t"] + fc["b"])
    pred = jnp.transpose(jnp.stack(preds, axis=0), (1, 0, 2))
    if pred.shape[-1] == 1:
        pred = jnp.squeeze(pred, -1)
    if pred.shape[-1] == 1:
        pred = jnp.squeeze(pred, -1)
    return pred


def init_params(key, hp):
    H = hp["hidden_size"][0]
    A = hp["x_size"] - 1                 # aux_dim of the encoder (mass input is column 0)
    F = hp["y_features_size"]
    y_size = hp["y_size"]
    D = A + H                            # MCGate input dim: [xa, c/scale]
    ks = jax.random.split(key, 9)

    # Encoder MCGate linears (weights stored transposed as (in, out)); bias inits
    # follow MassConservingLSTM.reset_parameters: eye_ / zeros_ / const(-3).
    wstd = 1.0 / math.sqrt(D)
    wr = jax.random.normal(ks[0], (D, H * H), jnp.float32) * wstd
    br = jnp.eye(H, dtype=jnp.float32).reshape(1, H * H)
    wi = jax.random.normal(ks[1], (D, H), jnp.float32) * wstd
    bi = jnp.zeros((1, H), jnp.float32)
    wo = jax.random.normal(ks[2], (D, H), jnp.float32) * wstd
    bo = jnp.full((1, H), -3.0, jnp.float32)
    encoder = dict(
        wr_a=wr[:A], wr_c=wr[A:], br=br,
        wio_a=jnp.concatenate([wi[:A], wo[:A]], axis=1),
        wio_c=jnp.concatenate([wi[A:], wo[A:]], axis=1),
        bio=jnp.concatenate([bi, bo], axis=1),
    )

    # Decoder torch.nn.LSTM params (gate order i,f,g,o), biases pre-folded.
    s = 1.0 / math.sqrt(H)
    wih = jax.random.uniform(ks[3], (F, 4 * H), jnp.float32, -s, s)
    whh = jax.random.uniform(ks[4], (H, 4 * H), jnp.float32, -s, s)
    bih = jax.random.uniform(ks[5], (1, 4 * H), jnp.float32, -s, s)
    bhh = jax.random.uniform(ks[6], (1, 4 * H), jnp.float32, -s, s)
    decoder = dict(wih_t=wih, whh_t=whh, b=bih + bhh)

    wfc = jax.random.uniform(ks[7], (H, y_size), jnp.float32, -s, s)
    bfc = jax.random.uniform(ks[8], (1, y_size), jnp.float32, -s, s)
    fc = dict(w_t=wfc, b=bfc)
    return dict(encoder=encoder, decoder=decoder, fc=fc)


if __name__ == "__main__":
    hp = dict(
        x_size=8, x_horizon=8,
        y_features_size=6, y_horizon=8, y_size=1,
        hidden_size=[32],
        occcount=False, batch_size=2,
        bidirectional=False, num_layers=1,
        differencing="whole",
        features=["occupancy"],          # no 'coursenumber' -> no embedding branch
        device="tpu",
    )

    key = jax.random.PRNGKey(0)
    kp, kx, ky = jax.random.split(key, 3)
    params = init_params(kp, hp)

    B = hp["batch_size"]
    x = jax.random.normal(kx, (B, hp["x_horizon"], hp["x_size"]), jnp.float32)
    y_features = jax.random.normal(ky, (B, hp["y_horizon"], hp["y_features_size"]), jnp.float32)

    pred = mass_conserving_occ_lstm_forward(x, y_features, params, hp)
    pred = jax.block_until_ready(pred)

    ref = mc_occ_lstm_reference(x, y_features, params, hp)
    assert pred.shape == ref.shape == (B, hp["y_horizon"]), (pred.shape, ref.shape)
    # Tolerance covers MXU default-precision differences between the XLA
    # reference matmuls and the Mosaic in-kernel matmuls.
    assert jnp.allclose(pred, ref, rtol=1e-2, atol=1e-2), float(jnp.max(jnp.abs(pred - ref)))

    print("KERNEL_OK")
</pallas_src>

<mosaic_0001>
module attributes {stable_mosaic.version = 11 : i64} {
  func.func @mc_occ_lstm_kernel(%arg0: memref<8x2x1xf32, #tpu.memory_space<vmem>>, %arg1: memref<8x2x7xf32, #tpu.memory_space<vmem>>, %arg2: memref<8x2x6xf32, #tpu.memory_space<vmem>>, %arg3: memref<7x1024xf32, #tpu.memory_space<vmem>>, %arg4: memref<32x1024xf32, #tpu.memory_space<vmem>>, %arg5: memref<1x1024xf32, #tpu.memory_space<vmem>>, %arg6: memref<7x64xf32, #tpu.memory_space<vmem>>, %arg7: memref<32x64xf32, #tpu.memory_space<vmem>>, %arg8: memref<1x64xf32, #tpu.memory_space<vmem>>, %arg9: memref<32x1024xf32, #tpu.memory_space<vmem>>, %arg10: memref<1024x32xf32, #tpu.memory_space<vmem>>, %arg11: memref<1024x32xf32, #tpu.memory_space<vmem>>, %arg12: memref<6x128xf32, #tpu.memory_space<vmem>>, %arg13: memref<32x128xf32, #tpu.memory_space<vmem>>, %arg14: memref<1x128xf32, #tpu.memory_space<vmem>>, %arg15: memref<32x1xf32, #tpu.memory_space<vmem>>, %arg16: memref<1x1xf32, #tpu.memory_space<vmem>>, %arg17: memref<8x2x1xf32, #tpu.memory_space<vmem>>) attributes {dimension_semantics = [], scalar_prefetch = 0 : i64, scratch_operands = 0 : i64, tpu.core_type = #tpu.core_type<tc>} {
    %c0 = arith.constant 0 : index
    %c0_0 = arith.constant 0 : index
    %0 = vector.load %arg3[%c0, %c0_0] : memref<7x1024xf32, #tpu.memory_space<vmem>>, vector<7x1024xf32>
    %c0_1 = arith.constant 0 : index
    %c0_2 = arith.constant 0 : index
    %1 = vector.load %arg4[%c0_1, %c0_2] : memref<32x1024xf32, #tpu.memory_space<vmem>>, vector<32x1024xf32>
    %c0_3 = arith.constant 0 : index
    %c0_4 = arith.constant 0 : index
    %2 = vector.load %arg5[%c0_3, %c0_4] : memref<1x1024xf32, #tpu.memory_space<vmem>>, vector<1x1024xf32>
    %c0_5 = arith.constant 0 : index
    %c0_6 = arith.constant 0 : index
    %3 = vector.load %arg6[%c0_5, %c0_6] : memref<7x64xf32, #tpu.memory_space<vmem>>, vector<7x64xf32>
    %c0_7 = arith.constant 0 : index
    %c0_8 = arith.constant 0 : index
    %4 = vector.load %arg7[%c0_7, %c0_8] : memref<32x64xf32, #tpu.memory_space<vmem>>, vector<32x64xf32>
    %c0_9 = arith.constant 0 : index
    %c0_10 = arith.constant 0 : index
    %5 = vector.load %arg8[%c0_9, %c0_10] : memref<1x64xf32, #tpu.memory_space<vmem>>, vector<1x64xf32>
    %c0_11 = arith.constant 0 : index
    %c0_12 = arith.constant 0 : index
    %6 = vector.load %arg9[%c0_11, %c0_12] : memref<32x1024xf32, #tpu.memory_space<vmem>>, vector<32x1024xf32>
    %c0_13 = arith.constant 0 : index
    %c0_14 = arith.constant 0 : index
    %7 = vector.load %arg10[%c0_13, %c0_14] : memref<1024x32xf32, #tpu.memory_space<vmem>>, vector<1024x32xf32>
    %c0_15 = arith.constant 0 : index
    %c0_16 = arith.constant 0 : index
    %8 = vector.load %arg11[%c0_15, %c0_16] : memref<1024x32xf32, #tpu.memory_space<vmem>>, vector<1024x32xf32>
    %cst = arith.constant 0.000000e+00 : f32
    %9 = vector.broadcast %cst : f32 to vector<2x32xf32>
    %c0_i32 = arith.constant 0 : i32
    %10 = arith.index_cast %c0_i32 : i32 to index
    %c0_17 = arith.constant 0 : index
    %c0_18 = arith.constant 0 : index
    %11 = vector.load %arg1[%10, %c0_17, %c0_18] : memref<8x2x7xf32, #tpu.memory_space<vmem>>, vector<1x2x7xf32>
    %12 = vector.shape_cast %11 : vector<1x2x7xf32> to vector<2x7xf32>
    %13 = arith.index_cast %c0_i32 : i32 to index
    %c0_19 = arith.constant 0 : index
    %c0_20 = arith.constant 0 : index
    %14 = vector.load %arg0[%13, %c0_19, %c0_20] : memref<8x2x1xf32, #tpu.memory_space<vmem>>, vector<1x2x1xf32>
    %15 = vector.shape_cast %14 : vector<1x2x1xf32> to vector<2x1xf32>
    %cst_21 = arith.constant 5.000000e-01 : f32
    %16 = vector.broadcast %cst_21 : f32 to vector<2x1xf32>
    %17 = arith.mulf %15, %16 : vector<2x1xf32>
    %cst_22 = arith.constant 5.000000e-01 : f32
    %18 = vector.broadcast %cst_22 : f32 to vector<2x1xf32>
    %19 = arith.addf %17, %18 : vector<2x1xf32>
    %cst_23 = arith.constant dense<0.000000e+00> : vector<2xf32>
    %20 = vector.multi_reduction <add>, %9, %cst_23 [1] : vector<2x32xf32> to vector<2xf32>
    %21 = vector.shape_cast %20 : vector<2xf32> to vector<2x1xf32>
    %cst_24 = arith.constant 0.000000e+00 : f32
    %22 = vector.broadcast %cst_24 : f32 to vector<2x1xf32>
    %23 = arith.cmpf oeq, %21, %22 : vector<2x1xf32>
    %cst_25 = arith.constant 1.000000e+00 : f32
    %24 = vector.broadcast %cst_25 : f32 to vector<2x1xf32>
    %25 = arith.select %23, %24, %21 : vector<2x1xi1>, vector<2x1xf32>
    %26 = vector.broadcast %25 : vector<2x1xf32> to vector<2x32xf32>
    %27 = arith.divf %9, %26 : vector<2x32xf32>
    %cst_26 = arith.constant dense<0.000000e+00> : vector<2x1024xf32>
    %28 = tpu.matmul %12, %0, %cst_26 {dimension_numbers = #tpu.dot_dimension_numbers<[1], [0], [0], [1], [0, 0, 1, 1], [], []>} : vector<2x7xf32>, vector<7x1024xf32>, vector<2x1024xf32> -> vector<2x1024xf32>
    %cst_27 = arith.constant dense<0.000000e+00> : vector<2x1024xf32>
    %29 = tpu.matmul %27, %1, %cst_27 {dimension_numbers = #tpu.dot_dimension_numbers<[1], [0], [0], [1], [0, 0, 1, 1], [], []>} : vector<2x32xf32>, vector<32x1024xf32>, vector<2x1024xf32> -> vector<2x1024xf32>
    %30 = arith.addf %28, %29 : vector<2x1024xf32>
    %31 = vector.broadcast %2 : vector<1x1024xf32> to vector<2x1024xf32>
    %32 = arith.addf %30, %31 : vector<2x1024xf32>
    %cst_28 = arith.constant dense<0xFF800000> : vector<2xf32>
    %33 = vector.multi_reduction <maximumf>, %32, %cst_28 [1] : vector<2x1024xf32> to vector<2xf32>
    %34 = vector.shape_cast %33 : vector<2xf32> to vector<2x1xf32>
    %35 = vector.broadcast %34 : vector<2x1xf32> to vector<2x1024xf32>
    %36 = arith.subf %32, %35 : vector<2x1024xf32>
    %37 = math.exp %36 : vector<2x1024xf32>
    %cst_29 = arith.constant dense<0.000000e+00> : vector<2x32xf32>
    %38 = tpu.matmul %37, %7, %cst_29 {dimension_numbers = #tpu.dot_dimension_numbers<[1], [0], [0], [1], [0, 0, 1, 1], [], []>} : vector<2x1024xf32>, vector<1024x32xf32>, vector<2x32xf32> -> vector<2x32xf32>
    %39 = arith.divf %9, %38 : vector<2x32xf32>
    %cst_30 = arith.constant dense<0.000000e+00> : vector<2x1024xf32>
    %40 = tpu.matmul %39, %6, %cst_30 {dimension_numbers = #tpu.dot_dimension_numbers<[1], [0], [0], [1], [0, 0, 1, 1], [], []>} : vector<2x32xf32>, vector<32x1024xf32>, vector<2x1024xf32> -> vector<2x1024xf32>
    %41 = arith.mulf %37, %40 : vector<2x1024xf32>
    %cst_31 = arith.constant dense<0.000000e+00> : vector<2x32xf32>
    %42 = tpu.matmul %41, %8, %cst_31 {dimension_numbers = #tpu.dot_dimension_numbers<[1], [0], [0], [1], [0, 0, 1, 1], [], []>} : vector<2x1024xf32>, vector<1024x32xf32>, vector<2x32xf32> -> vector<2x32xf32>
    %cst_32 = arith.constant dense<0.000000e+00> : vector<2x64xf32>
    %43 = tpu.matmul %12, %3, %cst_32 {dimension_numbers = #tpu.dot_dimension_numbers<[1], [0], [0], [1], [0, 0, 1, 1], [], []>} : vector<2x7xf32>, vector<7x64xf32>, vector<2x64xf32> -> vector<2x64xf32>
    %cst_33 = arith.constant dense<0.000000e+00> : vector<2x64xf32>
    %44 = tpu.matmul %27, %4, %cst_33 {dimension_numbers = #tpu.dot_dimension_numbers<[1], [0], [0], [1], [0, 0, 1, 1], [], []>} : vector<2x32xf32>, vector<32x64xf32>, vector<2x64xf32> -> vector<2x64xf32>
    %45 = arith.addf %43, %44 : vector<2x64xf32>
    %46 = vector.broadcast %5 : vector<1x64xf32> to vector<2x64xf32>
    %47 = arith.addf %45, %46 : vector<2x64xf32>
    %48 = vector.extract_strided_slice %47 {offsets = [0, 0], sizes = [2, 32], strides = [1, 1]} : vector<2x64xf32> to vector<2x32xf32>
    %cst_34 = arith.constant dense<0xFF800000> : vector<2xf32>
    %49 = vector.multi_reduction <maximumf>, %48, %cst_34 [1] : vector<2x32xf32> to vector<2xf32>
    %50 = vector.shape_cast %49 : vector<2xf32> to vector<2x1xf32>
    %51 = vector.broadcast %50 : vector<2x1xf32> to vector<2x32xf32>
    %52 = arith.subf %48, %51 : vector<2x32xf32>
    %53 = math.exp %52 : vector<2x32xf32>
    %cst_35 = arith.constant dense<0.000000e+00> : vector<2xf32>
    %54 = vector.multi_reduction <add>, %53, %cst_35 [1] : vector<2x32xf32> to vector<2xf32>
    %55 = vector.shape_cast %54 : vector<2xf32> to vector<2x1xf32>
    %56 = vector.broadcast %55 : vector<2x1xf32> to vector<2x32xf32>
    %57 = arith.divf %53, %56 : vector<2x32xf32>
    %58 = vector.extract_strided_slice %47 {offsets = [0, 32], sizes = [2, 32], strides = [1, 1]} : vector<2x64xf32> to vector<2x32xf32>
    %59 = arith.negf %58 : vector<2x32xf32>
    %60 = math.exp %59 : vector<2x32xf32>
    %cst_36 = arith.constant 1.000000e+00 : f32
    %61 = vector.broadcast %cst_36 : f32 to vector<2x32xf32>
    %62 = arith.addf %61, %60 : vector<2x32xf32>
    %63 = arith.divf %61, %62 : vector<2x32xf32>
    %64 = vector.broadcast %19 : vector<2x1xf32> to vector<2x32xf32>
    %65 = arith.mulf %64, %57 : vector<2x32xf32>
    %66 = arith.addf %42, %65 : vector<2x32xf32>
    %67 = arith.mulf %63, %66 : vector<2x32xf32>
    %68 = arith.subf %66, %67 : vector<2x32xf32>
    %c1_i32 = arith.constant 1 : i32
    %69 = arith.index_cast %c1_i32 : i32 to index
    %c0_37 = arith.constant 0 : index
    %c0_38 = arith.constant 0 : index
    %70 = vector.load %arg1[%69, %c0_37, %c0_38] : memref<8x2x7xf32, #tpu.memory_space<vmem>>, vector<1x2x7xf32>
    %71 = vector.shape_cast %70 : vector<1x2x7xf32> to vector<2x7xf32>
    %72 = arith.index_cast %c1_i32 : i32 to index
    %c0_39 = arith.constant 0 : index
    %c0_40 = arith.constant 0 : index
    %73 = vector.load %arg0[%72, %c0_39, %c0_40] : memref<8x2x1xf32, #tpu.memory_space<vmem>>, vector<1x2x1xf32>
    %74 = vector.shape_cast %73 : vector<1x2x1xf32> to vector<2x1xf32>
    %cst_41 = arith.constant 5.000000e-01 : f32
    %75 = vector.broadcast %cst_41 : f32 to vector<2x1xf32>
    %76 = arith.mulf %74, %75 : vector<2x1xf32>
    %cst_42 = arith.constant 5.000000e-01 : f32
    %77 = vector.broadcast %cst_42 : f32 to vector<2x1xf32>
    %78 = arith.addf %76, %77 : vector<2x1xf32>
    %cst_43 = arith.constant dense<0.000000e+00> : vector<2xf32>
    %79 = vector.multi_reduction <add>, %68, %cst_43 [1] : vector<2x32xf32> to vector<2xf32>
    %80 = vector.shape_cast %79 : vector<2xf32> to vector<2x1xf32>
    %cst_44 = arith.constant 0.000000e+00 : f32
    %81 = vector.broadcast %cst_44 : f32 to vector<2x1xf32>
    %82 = arith.cmpf oeq, %80, %81 : vector<2x1xf32>
    %cst_45 = arith.constant 1.000000e+00 : f32
    %83 = vector.broadcast %cst_45 : f32 to vector<2x1xf32>
    %84 = arith.select %82, %83, %80 : vector<2x1xi1>, vector<2x1xf32>
    %85 = vector.broadcast %84 : vector<2x1xf32> to vector<2x32xf32>
    %86 = arith.divf %68, %85 : vector<2x32xf32>
    %cst_46 = arith.constant dense<0.000000e+00> : vector<2x1024xf32>
    %87 = tpu.matmul %71, %0, %cst_46 {dimension_numbers = #tpu.dot_dimension_numbers<[1], [0], [0], [1], [0, 0, 1, 1], [], []>} : vector<2x7xf32>, vector<7x1024xf32>, vector<2x1024xf32> -> vector<2x1024xf32>
    %cst_47 = arith.constant dense<0.000000e+00> : vector<2x1024xf32>
    %88 = tpu.matmul %86, %1, %cst_47 {dimension_numbers = #tpu.dot_dimension_numbers<[1], [0], [0], [1], [0, 0, 1, 1], [], []>} : vector<2x32xf32>, vector<32x1024xf32>, vector<2x1024xf32> -> vector<2x1024xf32>
    %89 = arith.addf %87, %88 : vector<2x1024xf32>
    %90 = vector.broadcast %2 : vector<1x1024xf32> to vector<2x1024xf32>
    %91 = arith.addf %89, %90 : vector<2x1024xf32>
    %cst_48 = arith.constant dense<0xFF800000> : vector<2xf32>
    %92 = vector.multi_reduction <maximumf>, %91, %cst_48 [1] : vector<2x1024xf32> to vector<2xf32>
    %93 = vector.shape_cast %92 : vector<2xf32> to vector<2x1xf32>
    %94 = vector.broadcast %93 : vector<2x1xf32> to vector<2x1024xf32>
    %95 = arith.subf %91, %94 : vector<2x1024xf32>
    %96 = math.exp %95 : vector<2x1024xf32>
    %cst_49 = arith.constant dense<0.000000e+00> : vector<2x32xf32>
    %97 = tpu.matmul %96, %7, %cst_49 {dimension_numbers = #tpu.dot_dimension_numbers<[1], [0], [0], [1], [0, 0, 1, 1], [], []>} : vector<2x1024xf32>, vector<1024x32xf32>, vector<2x32xf32> -> vector<2x32xf32>
    %98 = arith.divf %68, %97 : vector<2x32xf32>
    %cst_50 = arith.constant dense<0.000000e+00> : vector<2x1024xf32>
    %99 = tpu.matmul %98, %6, %cst_50 {dimension_numbers = #tpu.dot_dimension_numbers<[1], [0], [0], [1], [0, 0, 1, 1], [], []>} : vector<2x32xf32>, vector<32x1024xf32>, vector<2x1024xf32> -> vector<2x1024xf32>
    %100 = arith.mulf %96, %99 : vector<2x1024xf32>
    %cst_51 = arith.constant dense<0.000000e+00> : vector<2x32xf32>
    %101 = tpu.matmul %100, %8, %cst_51 {dimension_numbers = #tpu.dot_dimension_numbers<[1], [0], [0], [1], [0, 0, 1, 1], [], []>} : vector<2x1024xf32>, vector<1024x32xf32>, vector<2x32xf32> -> vector<2x32xf32>
    %cst_52 = arith.constant dense<0.000000e+00> : vector<2x64xf32>
    %102 = tpu.matmul %71, %3, %cst_52 {dimension_numbers = #tpu.dot_dimension_numbers<[1], [0], [0], [1], [0, 0, 1, 1], [], []>} : vector<2x7xf32>, vector<7x64xf32>, vector<2x64xf32> -> vector<2x64xf32>
    %cst_53 = arith.constant dense<0.000000e+00> : vector<2x64xf32>
    %103 = tpu.matmul %86, %4, %cst_53 {dimension_numbers = #tpu.dot_dimension_numbers<[1], [0], [0], [1], [0, 0, 1, 1], [], []>} : vector<2x32xf32>, vector<32x64xf32>, vector<2x64xf32> -> vector<2x64xf32>
    %104 = arith.addf %102, %103 : vector<2x64xf32>
    %105 = vector.broadcast %5 : vector<1x64xf32> to vector<2x64xf32>
    %106 = arith.addf %104, %105 : vector<2x64xf32>
    %107 = vector.extract_strided_slice %106 {offsets = [0, 0], sizes = [2, 32], strides = [1, 1]} : vector<2x64xf32> to vector<2x32xf32>
    %cst_54 = arith.constant dense<0xFF800000> : vector<2xf32>
    %108 = vector.multi_reduction <maximumf>, %107, %cst_54 [1] : vector<2x32xf32> to vector<2xf32>
    %109 = vector.shape_cast %108 : vector<2xf32> to vector<2x1xf32>
    %110 = vector.broadcast %109 : vector<2x1xf32> to vector<2x32xf32>
    %111 = arith.subf %107, %110 : vector<2x32xf32>
    %112 = math.exp %111 : vector<2x32xf32>
    %cst_55 = arith.constant dense<0.000000e+00> : vector<2xf32>
    %113 = vector.multi_reduction <add>, %112, %cst_55 [1] : vector<2x32xf32> to vector<2xf32>
    %114 = vector.shape_cast %113 : vector<2xf32> to vector<2x1xf32>
    %115 = vector.broadcast %114 : vector<2x1xf32> to vector<2x32xf32>
    %116 = arith.divf %112, %115 : vector<2x32xf32>
    %117 = vector.extract_strided_slice %106 {offsets = [0, 32], sizes = [2, 32], strides = [1, 1]} : vector<2x64xf32> to vector<2x32xf32>
    %118 = arith.negf %117 : vector<2x32xf32>
    %119 = math.exp %118 : vector<2x32xf32>
    %cst_56 = arith.constant 1.000000e+00 : f32
    %120 = vector.broadcast %cst_56 : f32 to vector<2x32xf32>
    %121 = arith.addf %120, %119 : vector<2x32xf32>
    %122 = arith.divf %120, %121 : vector<2x32xf32>
    %123 = vector.broadcast %78 : vector<2x1xf32> to vector<2x32xf32>
    %124 = arith.mulf %123, %116 : vector<2x32xf32>
    %125 = arith.addf %101, %124 : vector<2x32xf32>
    %126 = arith.mulf %122, %125 : vector<2x32xf32>
    %127 = arith.subf %125, %126 : vector<2x32xf32>
    %c2_i32 = arith.constant 2 : i32
    %128 = arith.index_cast %c2_i32 : i32 to index
    %c0_57 = arith.constant 0 : index
    %c0_58 = arith.constant 0 : index
    %129 = vector.load %arg1[%128, %c0_57, %c0_58] : memref<8x2x7xf32, #tpu.memory_space<vmem>>, vector<1x2x7xf32>
    %130 = vector.shape_cast %129 : vector<1x2x7xf32> to vector<2x7xf32>
    %131 = arith.index_cast %c2_i32 : i32 to index
    %c0_59 = arith.constant 0 : index
    %c0_60 = arith.constant 0 : index
    %132 = vector.load %arg0[%131, %c0_59, %c0_60] : memref<8x2x1xf32, #tpu.memory_space<vmem>>, vector<1x2x1xf32>
    %133 = vector.shape_cast %132 : vector<1x2x1xf32> to vector<2x1xf32>
    %cst_61 = arith.constant 5.000000e-01 : f32
    %134 = vector.broadcast %cst_61 : f32 to vector<2x1xf32>
    %135 = arith.mulf %133, %134 : vector<2x1xf32>
    %cst_62 = arith.constant 5.000000e-01 : f32
    %136 = vector.broadcast %cst_62 : f32 to vector<2x1xf32>
    %137 = arith.addf %135, %136 : vector<2x1xf32>
    %cst_63 = arith.constant dense<0.000000e+00> : vector<2xf32>
    %138 = vector.multi_reduction <add>, %127, %cst_63 [1] : vector<2x32xf32> to vector<2xf32>
    %139 = vector.shape_cast %138 : vector<2xf32> to vector<2x1xf32>
    %cst_64 = arith.constant 0.000000e+00 : f32
    %140 = vector.broadcast %cst_64 : f32 to vector<2x1xf32>
    %141 = arith.cmpf oeq, %139, %140 : vector<2x1xf32>
    %cst_65 = arith.constant 1.000000e+00 : f32
    %142 = vector.broadcast %cst_65 : f32 to vector<2x1xf32>
    %143 = arith.select %141, %142, %139 : vector<2x1xi1>, vector<2x1xf32>
    %144 = vector.broadcast %143 : vector<2x1xf32> to vector<2x32xf32>
    %145 = arith.divf %127, %144 : vector<2x32xf32>
    %cst_66 = arith.constant dense<0.000000e+00> : vector<2x1024xf32>
    %146 = tpu.matmul %130, %0, %cst_66 {dimension_numbers = #tpu.dot_dimension_numbers<[1], [0], [0], [1], [0, 0, 1, 1], [], []>} : vector<2x7xf32>, vector<7x1024xf32>, vector<2x1024xf32> -> vector<2x1024xf32>
    %cst_67 = arith.constant dense<0.000000e+00> : vector<2x1024xf32>
    %147 = tpu.matmul %145, %1, %cst_67 {dimension_numbers = #tpu.dot_dimension_numbers<[1], [0], [0], [1], [0, 0, 1, 1], [], []>} : vector<2x32xf32>, vector<32x1024xf32>, vector<2x1024xf32> -> vector<2x1024xf32>
    %148 = arith.addf %146, %147 : vector<2x1024xf32>
    %149 = vector.broadcast %2 : vector<1x1024xf32> to vector<2x1024xf32>
    %150 = arith.addf %148, %149 : vector<2x1024xf32>
    %cst_68 = arith.constant dense<0xFF800000> : vector<2xf32>
    %151 = vector.multi_reduction <maximumf>, %150, %cst_68 [1] : vector<2x1024xf32> to vector<2xf32>
    %152 = vector.shape_cast %151 : vector<2xf32> to vector<2x1xf32>
    %153 = vector.broadcast %152 : vector<2x1xf32> to vector<2x1024xf32>
    %154 = arith.subf %150, %153 : vector<2x1024xf32>
    %155 = math.exp %154 : vector<2x1024xf32>
    %cst_69 = arith.constant dense<0.000000e+00> : vector<2x32xf32>
    %156 = tpu.matmul %155, %7, %cst_69 {dimension_numbers = #tpu.dot_dimension_numbers<[1], [0], [0], [1], [0, 0, 1, 1], [], []>} : vector<2x1024xf32>, vector<1024x32xf32>, vector<2x32xf32> -> vector<2x32xf32>
    %157 = arith.divf %127, %156 : vector<2x32xf32>
    %cst_70 = arith.constant dense<0.000000e+00> : vector<2x1024xf32>
    %158 = tpu.matmul %157, %6, %cst_70 {dimension_numbers = #tpu.dot_dimension_numbers<[1], [0], [0], [1], [0, 0, 1, 1], [], []>} : vector<2x32xf32>, vector<32x1024xf32>, vector<2x1024xf32> -> vector<2x1024xf32>
    %159 = arith.mulf %155, %158 : vector<2x1024xf32>
    %cst_71 = arith.constant dense<0.000000e+00> : vector<2x32xf32>
    %160 = tpu.matmul %159, %8, %cst_71 {dimension_numbers = #tpu.dot_dimension_numbers<[1], [0], [0], [1], [0, 0, 1, 1], [], []>} : vector<2x1024xf32>, vector<1024x32xf32>, vector<2x32xf32> -> vector<2x32xf32>
    %cst_72 = arith.constant dense<0.000000e+00> : vector<2x64xf32>
    %161 = tpu.matmul %130, %3, %cst_72 {dimension_numbers = #tpu.dot_dimension_numbers<[1], [0], [0], [1], [0, 0, 1, 1], [], []>} : vector<2x7xf32>, vector<7x64xf32>, vector<2x64xf32> -> vector<2x64xf32>
    %cst_73 = arith.constant dense<0.000000e+00> : vector<2x64xf32>
    %162 = tpu.matmul %145, %4, %cst_73 {dimension_numbers = #tpu.dot_dimension_numbers<[1], [0], [0], [1], [0, 0, 1, 1], [], []>} : vector<2x32xf32>, vector<32x64xf32>, vector<2x64xf32> -> vector<2x64xf32>
    %163 = arith.addf %161, %162 : vector<2x64xf32>
    %164 = vector.broadcast %5 : vector<1x64xf32> to vector<2x64xf32>
    %165 = arith.addf %163, %164 : vector<2x64xf32>
    %166 = vector.extract_strided_slice %165 {offsets = [0, 0], sizes = [2, 32], strides = [1, 1]} : vector<2x64xf32> to vector<2x32xf32>
    %cst_74 = arith.constant dense<0xFF800000> : vector<2xf32>
    %167 = vector.multi_reduction <maximumf>, %166, %cst_74 [1] : vector<2x32xf32> to vector<2xf32>
    %168 = vector.shape_cast %167 : vector<2xf32> to vector<2x1xf32>
    %169 = vector.broadcast %168 : vector<2x1xf32> to vector<2x32xf32>
    %170 = arith.subf %166, %169 : vector<2x32xf32>
    %171 = math.exp %170 : vector<2x32xf32>
    %cst_75 = arith.constant dense<0.000000e+00> : vector<2xf32>
    %172 = vector.multi_reduction <add>, %171, %cst_75 [1] : vector<2x32xf32> to vector<2xf32>
    %173 = vector.shape_cast %172 : vector<2xf32> to vector<2x1xf32>
    %174 = vector.broadcast %173 : vector<2x1xf32> to vector<2x32xf32>
    %175 = arith.divf %171, %174 : vector<2x32xf32>
    %176 = vector.extract_strided_slice %165 {offsets = [0, 32], sizes = [2, 32], strides = [1, 1]} : vector<2x64xf32> to vector<2x32xf32>
    %177 = arith.negf %176 : vector<2x32xf32>
    %178 = math.exp %177 : vector<2x32xf32>
    %cst_76 = arith.constant 1.000000e+00 : f32
    %179 = vector.broadcast %cst_76 : f32 to vector<2x32xf32>
    %180 = arith.addf %179, %178 : vector<2x32xf32>
    %181 = arith.divf %179, %180 : vector<2x32xf32>
    %182 = vector.broadcast %137 : vector<2x1xf32> to vector<2x32xf32>
    %183 = arith.mulf %182, %175 : vector<2x32xf32>
    %184 = arith.addf %160, %183 : vector<2x32xf32>
    %185 = arith.mulf %181, %184 : vector<2x32xf32>
    %186 = arith.subf %184, %185 : vector<2x32xf32>
    %c3_i32 = arith.constant 3 : i32
    %187 = arith.index_cast %c3_i32 : i32 to index
    %c0_77 = arith.constant 0 : index
    %c0_78 = arith.constant 0 : index
    %188 = vector.load %arg1[%187, %c0_77, %c0_78] : memref<8x2x7xf32, #tpu.memory_space<vmem>>, vector<1x2x7xf32>
    %189 = vector.shape_cast %188 : vector<1x2x7xf32> to vector<2x7xf32>
    %190 = arith.index_cast %c3_i32 : i32 to index
    %c0_79 = arith.constant 0 : index
    %c0_80 = arith.constant 0 : index
    %191 = vector.load %arg0[%190, %c0_79, %c0_80] : memref<8x2x1xf32, #tpu.memory_space<vmem>>, vector<1x2x1xf32>
    %192 = vector.shape_cast %191 : vector<1x2x1xf32> to vector<2x1xf32>
    %cst_81 = arith.constant 5.000000e-01 : f32
    %193 = vector.broadcast %cst_81 : f32 to vector<2x1xf32>
    %194 = arith.mulf %192, %193 : vector<2x1xf32>
    %cst_82 = arith.constant 5.000000e-01 : f32
    %195 = vector.broadcast %cst_82 : f32 to vector<2x1xf32>
    %196 = arith.addf %194, %195 : vector<2x1xf32>
    %cst_83 = arith.constant dense<0.000000e+00> : vector<2xf32>
    %197 = vector.multi_reduction <add>, %186, %cst_83 [1] : vector<2x32xf32> to vector<2xf32>
    %198 = vector.shape_cast %197 : vector<2xf32> to vector<2x1xf32>
    %cst_84 = arith.constant 0.000000e+00 : f32
    %199 = vector.broadcast %cst_84 : f32 to vector<2x1xf32>
    %200 = arith.cmpf oeq, %198, %199 : vector<2x1xf32>
    %cst_85 = arith.constant 1.000000e+00 : f32
    %201 = vector.broadcast %cst_85 : f32 to vector<2x1xf32>
    %202 = arith.select %200, %201, %198 : vector<2x1xi1>, vector<2x1xf32>
    %203 = vector.broadcast %202 : vector<2x1xf32> to vector<2x32xf32>
    %204 = arith.divf %186, %203 : vector<2x32xf32>
    %cst_86 = arith.constant dense<0.000000e+00> : vector<2x1024xf32>
    %205 = tpu.matmul %189, %0, %cst_86 {dimension_numbers = #tpu.dot_dimension_numbers<[1], [0], [0], [1], [0, 0, 1, 1], [], []>} : vector<2x7xf32>, vector<7x1024xf32>, vector<2x1024xf32> -> vector<2x1024xf32>
    %cst_87 = arith.constant dense<0.000000e+00> : vector<2x1024xf32>
    %206 = tpu.matmul %204, %1, %cst_87 {dimension_numbers = #tpu.dot_dimension_numbers<[1], [0], [0], [1], [0, 0, 1, 1], [], []>} : vector<2x32xf32>, vector<32x1024xf32>, vector<2x1024xf32> -> vector<2x1024xf32>
    %207 = arith.addf %205, %206 : vector<2x1024xf32>
    %208 = vector.broadcast %2 : vector<1x1024xf32> to vector<2x1024xf32>
    %209 = arith.addf %207, %208 : vector<2x1024xf32>
    %cst_88 = arith.constant dense<0xFF800000> : vector<2xf32>
    %210 = vector.multi_reduction <maximumf>, %209, %cst_88 [1] : vector<2x1024xf32> to vector<2xf32>
    %211 = vector.shape_cast %210 : vector<2xf32> to vector<2x1xf32>
    %212 = vector.broadcast %211 : vector<2x1xf32> to vector<2x1024xf32>
    %213 = arith.subf %209, %212 : vector<2x1024xf32>
    %214 = math.exp %213 : vector<2x1024xf32>
    %cst_89 = arith.constant dense<0.000000e+00> : vector<2x32xf32>
    %215 = tpu.matmul %214, %7, %cst_89 {dimension_numbers = #tpu.dot_dimension_numbers<[1], [0], [0], [1], [0, 0, 1, 1], [], []>} : vector<2x1024xf32>, vector<1024x32xf32>, vector<2x32xf32> -> vector<2x32xf32>
    %216 = arith.divf %186, %215 : vector<2x32xf32>
    %cst_90 = arith.constant dense<0.000000e+00> : vector<2x1024xf32>
    %217 = tpu.matmul %216, %6, %cst_90 {dimension_numbers = #tpu.dot_dimension_numbers<[1], [0], [0], [1], [0, 0, 1, 1], [], []>} : vector<2x32xf32>, vector<32x1024xf32>, vector<2x1024xf32> -> vector<2x1024xf32>
    %218 = arith.mulf %214, %217 : vector<2x1024xf32>
    %cst_91 = arith.constant dense<0.000000e+00> : vector<2x32xf32>
    %219 = tpu.matmul %218, %8, %cst_91 {dimension_numbers = #tpu.dot_dimension_numbers<[1], [0], [0], [1], [0, 0, 1, 1], [], []>} : vector<2x1024xf32>, vector<1024x32xf32>, vector<2x32xf32> -> vector<2x32xf32>
    %cst_92 = arith.constant dense<0.000000e+00> : vector<2x64xf32>
    %220 = tpu.matmul %189, %3, %cst_92 {dimension_numbers = #tpu.dot_dimension_numbers<[1], [0], [0], [1], [0, 0, 1, 1], [], []>} : vector<2x7xf32>, vector<7x64xf32>, vector<2x64xf32> -> vector<2x64xf32>
    %cst_93 = arith.constant dense<0.000000e+00> : vector<2x64xf32>
    %221 = tpu.matmul %204, %4, %cst_93 {dimension_numbers = #tpu.dot_dimension_numbers<[1], [0], [0], [1], [0, 0, 1, 1], [], []>} : vector<2x32xf32>, vector<32x64xf32>, vector<2x64xf32> -> vector<2x64xf32>
    %222 = arith.addf %220, %221 : vector<2x64xf32>
    %223 = vector.broadcast %5 : vector<1x64xf32> to vector<2x64xf32>
    %224 = arith.addf %222, %223 : vector<2x64xf32>
    %225 = vector.extract_strided_slice %224 {offsets = [0, 0], sizes = [2, 32], strides = [1, 1]} : vector<2x64xf32> to vector<2x32xf32>
    %cst_94 = arith.constant dense<0xFF800000> : vector<2xf32>
    %226 = vector.multi_reduction <maximumf>, %225, %cst_94 [1] : vector<2x32xf32> to vector<2xf32>
    %227 = vector.shape_cast %226 : vector<2xf32> to vector<2x1xf32>
    %228 = vector.broadcast %227 : vector<2x1xf32> to vector<2x32xf32>
    %229 = arith.subf %225, %228 : vector<2x32xf32>
    %230 = math.exp %229 : vector<2x32xf32>
    %cst_95 = arith.constant dense<0.000000e+00> : vector<2xf32>
    %231 = vector.multi_reduction <add>, %230, %cst_95 [1] : vector<2x32xf32> to vector<2xf32>
    %232 = vector.shape_cast %231 : vector<2xf32> to vector<2x1xf32>
    %233 = vector.broadcast %232 : vector<2x1xf32> to vector<2x32xf32>
    %234 = arith.divf %230, %233 : vector<2x32xf32>
    %235 = vector.extract_strided_slice %224 {offsets = [0, 32], sizes = [2, 32], strides = [1, 1]} : vector<2x64xf32> to vector<2x32xf32>
    %236 = arith.negf %235 : vector<2x32xf32>
    %237 = math.exp %236 : vector<2x32xf32>
    %cst_96 = arith.constant 1.000000e+00 : f32
    %238 = vector.broadcast %cst_96 : f32 to vector<2x32xf32>
    %239 = arith.addf %238, %237 : vector<2x32xf32>
    %240 = arith.divf %238, %239 : vector<2x32xf32>
    %241 = vector.broadcast %196 : vector<2x1xf32> to vector<2x32xf32>
    %242 = arith.mulf %241, %234 : vector<2x32xf32>
    %243 = arith.addf %219, %242 : vector<2x32xf32>
    %244 = arith.mulf %240, %243 : vector<2x32xf32>
    %245 = arith.subf %243, %244 : vector<2x32xf32>
    %c4_i32 = arith.constant 4 : i32
    %246 = arith.index_cast %c4_i32 : i32 to index
    %c0_97 = arith.constant 0 : index
    %c0_98 = arith.constant 0 : index
    %247 = vector.load %arg1[%246, %c0_97, %c0_98] : memref<8x2x7xf32, #tpu.memory_space<vmem>>, vector<1x2x7xf32>
    %248 = vector.shape_cast %247 : vector<1x2x7xf32> to vector<2x7xf32>
    %249 = arith.index_cast %c4_i32 : i32 to index
    %c0_99 = arith.constant 0 : index
    %c0_100 = arith.constant 0 : index
    %250 = vector.load %arg0[%249, %c0_99, %c0_100] : memref<8x2x1xf32, #tpu.memory_space<vmem>>, vector<1x2x1xf32>
    %251 = vector.shape_cast %250 : vector<1x2x1xf32> to vector<2x1xf32>
    %cst_101 = arith.constant 5.000000e-01 : f32
    %252 = vector.broadcast %cst_101 : f32 to vector<2x1xf32>
    %253 = arith.mulf %251, %252 : vector<2x1xf32>
    %cst_102 = arith.constant 5.000000e-01 : f32
    %254 = vector.broadcast %cst_102 : f32 to vector<2x1xf32>
    %255 = arith.addf %253, %254 : vector<2x1xf32>
    %cst_103 = arith.constant dense<0.000000e+00> : vector<2xf32>
    %256 = vector.multi_reduction <add>, %245, %cst_103 [1] : vector<2x32xf32> to vector<2xf32>
    %257 = vector.shape_cast %256 : vector<2xf32> to vector<2x1xf32>
    %cst_104 = arith.constant 0.000000e+00 : f32
    %258 = vector.broadcast %cst_104 : f32 to vector<2x1xf32>
    %259 = arith.cmpf oeq, %257, %258 : vector<2x1xf32>
    %cst_105 = arith.constant 1.000000e+00 : f32
    %260 = vector.broadcast %cst_105 : f32 to vector<2x1xf32>
    %261 = arith.select %259, %260, %257 : vector<2x1xi1>, vector<2x1xf32>
    %262 = vector.broadcast %261 : vector<2x1xf32> to vector<2x32xf32>
    %263 = arith.divf %245, %262 : vector<2x32xf32>
    %cst_106 = arith.constant dense<0.000000e+00> : vector<2x1024xf32>
    %264 = tpu.matmul %248, %0, %cst_106 {dimension_numbers = #tpu.dot_dimension_numbers<[1], [0], [0], [1], [0, 0, 1, 1], [], []>} : vector<2x7xf32>, vector<7x1024xf32>, vector<2x1024xf32> -> vector<2x1024xf32>
    %cst_107 = arith.constant dense<0.000000e+00> : vector<2x1024xf32>
    %265 = tpu.matmul %263, %1, %cst_107 {dimension_numbers = #tpu.dot_dimension_numbers<[1], [0], [0], [1], [0, 0, 1, 1], [], []>} : vector<2x32xf32>, vector<32x1024xf32>, vector<2x1024xf32> -> vector<2x1024xf32>
    %266 = arith.addf %264, %265 : vector<2x1024xf32>
    %267 = vector.broadcast %2 : vector<1x1024xf32> to vector<2x1024xf32>
    %268 = arith.addf %266, %267 : vector<2x1024xf32>
    %cst_108 = arith.constant dense<0xFF800000> : vector<2xf32>
    %269 = vector.multi_reduction <maximumf>, %268, %cst_108 [1] : vector<2x1024xf32> to vector<2xf32>
    %270 = vector.shape_cast %269 : vector<2xf32> to vector<2x1xf32>
    %271 = vector.broadcast %270 : vector<2x1xf32> to vector<2x1024xf32>
    %272 = arith.subf %268, %271 : vector<2x1024xf32>
    %273 = math.exp %272 : vector<2x1024xf32>
    %cst_109 = arith.constant dense<0.000000e+00> : vector<2x32xf32>
    %274 = tpu.matmul %273, %7, %cst_109 {dimension_numbers = #tpu.dot_dimension_numbers<[1], [0], [0], [1], [0, 0, 1, 1], [], []>} : vector<2x1024xf32>, vector<1024x32xf32>, vector<2x32xf32> -> vector<2x32xf32>
    %275 = arith.divf %245, %274 : vector<2x32xf32>
    %cst_110 = arith.constant dense<0.000000e+00> : vector<2x1024xf32>
    %276 = tpu.matmul %275, %6, %cst_110 {dimension_numbers = #tpu.dot_dimension_numbers<[1], [0], [0], [1], [0, 0, 1, 1], [], []>} : vector<2x32xf32>, vector<32x1024xf32>, vector<2x1024xf32> -> vector<2x1024xf32>
    %277 = arith.mulf %273, %276 : vector<2x1024xf32>
    %cst_111 = arith.constant dense<0.000000e+00> : vector<2x32xf32>
    %278 = tpu.matmul %277, %8, %cst_111 {dimension_numbers = #tpu.dot_dimension_numbers<[1], [0], [0], [1], [0, 0, 1, 1], [], []>} : vector<2x1024xf32>, vector<1024x32xf32>, vector<2x32xf32> -> vector<2x32xf32>
    %cst_112 = arith.constant dense<0.000000e+00> : vector<2x64xf32>
    %279 = tpu.matmul %248, %3, %cst_112 {dimension_numbers = #tpu.dot_dimension_numbers<[1], [0], [0], [1], [0, 0, 1, 1], [], []>} : vector<2x7xf32>, vector<7x64xf32>, vector<2x64xf32> -> vector<2x64xf32>
    %cst_113 = arith.constant dense<0.000000e+00> : vector<2x64xf32>
    %280 = tpu.matmul %263, %4, %cst_113 {dimension_numbers = #tpu.dot_dimension_numbers<[1], [0], [0], [1], [0, 0, 1, 1], [], []>} : vector<2x32xf32>, vector<32x64xf32>, vector<2x64xf32> -> vector<2x64xf32>
    %281 = arith.addf %279, %280 : vector<2x64xf32>
    %282 = vector.broadcast %5 : vector<1x64xf32> to vector<2x64xf32>
    %283 = arith.addf %281, %282 : vector<2x64xf32>
    %284 = vector.extract_strided_slice %283 {offsets = [0, 0], sizes = [2, 32], strides = [1, 1]} : vector<2x64xf32> to vector<2x32xf32>
    %cst_114 = arith.constant dense<0xFF800000> : vector<2xf32>
    %285 = vector.multi_reduction <maximumf>, %284, %cst_114 [1] : vector<2x32xf32> to vector<2xf32>
    %286 = vector.shape_cast %285 : vector<2xf32> to vector<2x1xf32>
    %287 = vector.broadcast %286 : vector<2x1xf32> to vector<2x32xf32>
    %288 = arith.subf %284, %287 : vector<2x32xf32>
    %289 = math.exp %288 : vector<2x32xf32>
    %cst_115 = arith.constant dense<0.000000e+00> : vector<2xf32>
    %290 = vector.multi_reduction <add>, %289, %cst_115 [1] : vector<2x32xf32> to vector<2xf32>
    %291 = vector.shape_cast %290 : vector<2xf32> to vector<2x1xf32>
    %292 = vector.broadcast %291 : vector<2x1xf32> to vector<2x32xf32>
    %293 = arith.divf %289, %292 : vector<2x32xf32>
    %294 = vector.extract_strided_slice %283 {offsets = [0, 32], sizes = [2, 32], strides = [1, 1]} : vector<2x64xf32> to vector<2x32xf32>
    %295 = arith.negf %294 : vector<2x32xf32>
    %296 = math.exp %295 : vector<2x32xf32>
    %cst_116 = arith.constant 1.000000e+00 : f32
    %297 = vector.broadcast %cst_116 : f32 to vector<2x32xf32>
    %298 = arith.addf %297, %296 : vector<2x32xf32>
    %299 = arith.divf %297, %298 : vector<2x32xf32>
    %300 = vector.broadcast %255 : vector<2x1xf32> to vector<2x32xf32>
    %301 = arith.mulf %300, %293 : vector<2x32xf32>
    %302 = arith.addf %278, %301 : vector<2x32xf32>
    %303 = arith.mulf %299, %302 : vector<2x32xf32>
    %304 = arith.subf %302, %303 : vector<2x32xf32>
    %c5_i32 = arith.constant 5 : i32
    %305 = arith.index_cast %c5_i32 : i32 to index
    %c0_117 = arith.constant 0 : index
    %c0_118 = arith.constant 0 : index
    %306 = vector.load %arg1[%305, %c0_117, %c0_118] : memref<8x2x7xf32, #tpu.memory_space<vmem>>, vector<1x2x7xf32>
    %307 = vector.shape_cast %306 : vector<1x2x7xf32> to vector<2x7xf32>
    %308 = arith.index_cast %c5_i32 : i32 to index
    %c0_119 = arith.constant 0 : index
    %c0_120 = arith.constant 0 : index
    %309 = vector.load %arg0[%308, %c0_119, %c0_120] : memref<8x2x1xf32, #tpu.memory_space<vmem>>, vector<1x2x1xf32>
    %310 = vector.shape_cast %309 : vector<1x2x1xf32> to vector<2x1xf32>
    %cst_121 = arith.constant 5.000000e-01 : f32
    %311 = vector.broadcast %cst_121 : f32 to vector<2x1xf32>
    %312 = arith.mulf %310, %311 : vector<2x1xf32>
    %cst_122 = arith.constant 5.000000e-01 : f32
    %313 = vector.broadcast %cst_122 : f32 to vector<2x1xf32>
    %314 = arith.addf %312, %313 : vector<2x1xf32>
    %cst_123 = arith.constant dense<0.000000e+00> : vector<2xf32>
    %315 = vector.multi_reduction <add>, %304, %cst_123 [1] : vector<2x32xf32> to vector<2xf32>
    %316 = vector.shape_cast %315 : vector<2xf32> to vector<2x1xf32>
    %cst_124 = arith.constant 0.000000e+00 : f32
    %317 = vector.broadcast %cst_124 : f32 to vector<2x1xf32>
    %318 = arith.cmpf oeq, %316, %317 : vector<2x1xf32>
    %cst_125 = arith.constant 1.000000e+00 : f32
    %319 = vector.broadcast %cst_125 : f32 to vector<2x1xf32>
    %320 = arith.select %318, %319, %316 : vector<2x1xi1>, vector<2x1xf32>
    %321 = vector.broadcast %320 : vector<2x1xf32> to vector<2x32xf32>
    %322 = arith.divf %304, %321 : vector<2x32xf32>
    %cst_126 = arith.constant dense<0.000000e+00> : vector<2x1024xf32>
    %323 = tpu.matmul %307, %0, %cst_126 {dimension_numbers = #tpu.dot_dimension_numbers<[1], [0], [0], [1], [0, 0, 1, 1], [], []>} : vector<2x7xf32>, vector<7x1024xf32>, vector<2x1024xf32> -> vector<2x1024xf32>
    %cst_127 = arith.constant dense<0.000000e+00> : vector<2x1024xf32>
    %324 = tpu.matmul %322, %1, %cst_127 {dimension_numbers = #tpu.dot_dimension_numbers<[1], [0], [0], [1], [0, 0, 1, 1], [], []>} : vector<2x32xf32>, vector<32x1024xf32>, vector<2x1024xf32> -> vector<2x1024xf32>
    %325 = arith.addf %323, %324 : vector<2x1024xf32>
    %326 = vector.broadcast %2 : vector<1x1024xf32> to vector<2x1024xf32>
    %327 = arith.addf %325, %326 : vector<2x1024xf32>
    %cst_128 = arith.constant dense<0xFF800000> : vector<2xf32>
    %328 = vector.multi_reduction <maximumf>, %327, %cst_128 [1] : vector<2x1024xf32> to vector<2xf32>
    %329 = vector.shape_cast %328 : vector<2xf32> to vector<2x1xf32>
    %330 = vector.broadcast %329 : vector<2x1xf32> to vector<2x1024xf32>
    %331 = arith.subf %327, %330 : vector<2x1024xf32>
    %332 = math.exp %331 : vector<2x1024xf32>
    %cst_129 = arith.constant dense<0.000000e+00> : vector<2x32xf32>
    %333 = tpu.matmul %332, %7, %cst_129 {dimension_numbers = #tpu.dot_dimension_numbers<[1], [0], [0], [1], [0, 0, 1, 1], [], []>} : vector<2x1024xf32>, vector<1024x32xf32>, vector<2x32xf32> -> vector<2x32xf32>
    %334 = arith.divf %304, %333 : vector<2x32xf32>
    %cst_130 = arith.constant dense<0.000000e+00> : vector<2x1024xf32>
    %335 = tpu.matmul %334, %6, %cst_130 {dimension_numbers = #tpu.dot_dimension_numbers<[1], [0], [0], [1], [0, 0, 1, 1], [], []>} : vector<2x32xf32>, vector<32x1024xf32>, vector<2x1024xf32> -> vector<2x1024xf32>
    %336 = arith.mulf %332, %335 : vector<2x1024xf32>
    %cst_131 = arith.constant dense<0.000000e+00> : vector<2x32xf32>
    %337 = tpu.matmul %336, %8, %cst_131 {dimension_numbers = #tpu.dot_dimension_numbers<[1], [0], [0], [1], [0, 0, 1, 1], [], []>} : vector<2x1024xf32>, vector<1024x32xf32>, vector<2x32xf32> -> vector<2x32xf32>
    %cst_132 = arith.constant dense<0.000000e+00> : vector<2x64xf32>
    %338 = tpu.matmul %307, %3, %cst_132 {dimension_numbers = #tpu.dot_dimension_numbers<[1], [0], [0], [1], [0, 0, 1, 1], [], []>} : vector<2x7xf32>, vector<7x64xf32>, vector<2x64xf32> -> vector<2x64xf32>
    %cst_133 = arith.constant dense<0.000000e+00> : vector<2x64xf32>
    %339 = tpu.matmul %322, %4, %cst_133 {dimension_numbers = #tpu.dot_dimension_numbers<[1], [0], [0], [1], [0, 0, 1, 1], [], []>} : vector<2x32xf32>, vector<32x64xf32>, vector<2x64xf32> -> vector<2x64xf32>
    %340 = arith.addf %338, %339 : vector<2x64xf32>
    %341 = vector.broadcast %5 : vector<1x64xf32> to vector<2x64xf32>
    %342 = arith.addf %340, %341 : vector<2x64xf32>
    %343 = vector.extract_strided_slice %342 {offsets = [0, 0], sizes = [2, 32], strides = [1, 1]} : vector<2x64xf32> to vector<2x32xf32>
    %cst_134 = arith.constant dense<0xFF800000> : vector<2xf32>
    %344 = vector.multi_reduction <maximumf>, %343, %cst_134 [1] : vector<2x32xf32> to vector<2xf32>
    %345 = vector.shape_cast %344 : vector<2xf32> to vector<2x1xf32>
    %346 = vector.broadcast %345 : vector<2x1xf32> to vector<2x32xf32>
    %347 = arith.subf %343, %346 : vector<2x32xf32>
    %348 = math.exp %347 : vector<2x32xf32>
    %cst_135 = arith.constant dense<0.000000e+00> : vector<2xf32>
    %349 = vector.multi_reduction <add>, %348, %cst_135 [1] : vector<2x32xf32> to vector<2xf32>
    %350 = vector.shape_cast %349 : vector<2xf32> to vector<2x1xf32>
    %351 = vector.broadcast %350 : vector<2x1xf32> to vector<2x32xf32>
    %352 = arith.divf %348, %351 : vector<2x32xf32>
    %353 = vector.extract_strided_slice %342 {offsets = [0, 32], sizes = [2, 32], strides = [1, 1]} : vector<2x64xf32> to vector<2x32xf32>
    %354 = arith.negf %353 : vector<2x32xf32>
    %355 = math.exp %354 : vector<2x32xf32>
    %cst_136 = arith.constant 1.000000e+00 : f32
    %356 = vector.broadcast %cst_136 : f32 to vector<2x32xf32>
    %357 = arith.addf %356, %355 : vector<2x32xf32>
    %358 = arith.divf %356, %357 : vector<2x32xf32>
    %359 = vector.broadcast %314 : vector<2x1xf32> to vector<2x32xf32>
    %360 = arith.mulf %359, %352 : vector<2x32xf32>
    %361 = arith.addf %337, %360 : vector<2x32xf32>
    %362 = arith.mulf %358, %361 : vector<2x32xf32>
    %363 = arith.subf %361, %362 : vector<2x32xf32>
    %c6_i32 = arith.constant 6 : i32
    %364 = arith.index_cast %c6_i32 : i32 to index
    %c0_137 = arith.constant 0 : index
    %c0_138 = arith.constant 0 : index
    %365 = vector.load %arg1[%364, %c0_137, %c0_138] : memref<8x2x7xf32, #tpu.memory_space<vmem>>, vector<1x2x7xf32>
    %366 = vector.shape_cast %365 : vector<1x2x7xf32> to vector<2x7xf32>
    %367 = arith.index_cast %c6_i32 : i32 to index
    %c0_139 = arith.constant 0 : index
    %c0_140 = arith.constant 0 : index
    %368 = vector.load %arg0[%367, %c0_139, %c0_140] : memref<8x2x1xf32, #tpu.memory_space<vmem>>, vector<1x2x1xf32>
    %369 = vector.shape_cast %368 : vector<1x2x1xf32> to vector<2x1xf32>
    %cst_141 = arith.constant 5.000000e-01 : f32
    %370 = vector.broadcast %cst_141 : f32 to vector<2x1xf32>
    %371 = arith.mulf %369, %370 : vector<2x1xf32>
    %cst_142 = arith.constant 5.000000e-01 : f32
    %372 = vector.broadcast %cst_142 : f32 to vector<2x1xf32>
    %373 = arith.addf %371, %372 : vector<2x1xf32>
    %cst_143 = arith.constant dense<0.000000e+00> : vector<2xf32>
    %374 = vector.multi_reduction <add>, %363, %cst_143 [1] : vector<2x32xf32> to vector<2xf32>
    %375 = vector.shape_cast %374 : vector<2xf32> to vector<2x1xf32>
    %cst_144 = arith.constant 0.000000e+00 : f32
    %376 = vector.broadcast %cst_144 : f32 to vector<2x1xf32>
    %377 = arith.cmpf oeq, %375, %376 : vector<2x1xf32>
    %cst_145 = arith.constant 1.000000e+00 : f32
    %378 = vector.broadcast %cst_145 : f32 to vector<2x1xf32>
    %379 = arith.select %377, %378, %375 : vector<2x1xi1>, vector<2x1xf32>
    %380 = vector.broadcast %379 : vector<2x1xf32> to vector<2x32xf32>
    %381 = arith.divf %363, %380 : vector<2x32xf32>
    %cst_146 = arith.constant dense<0.000000e+00> : vector<2x1024xf32>
    %382 = tpu.matmul %366, %0, %cst_146 {dimension_numbers = #tpu.dot_dimension_numbers<[1], [0], [0], [1], [0, 0, 1, 1], [], []>} : vector<2x7xf32>, vector<7x1024xf32>, vector<2x1024xf32> -> vector<2x1024xf32>
    %cst_147 = arith.constant dense<0.000000e+00> : vector<2x1024xf32>
    %383 = tpu.matmul %381, %1, %cst_147 {dimension_numbers = #tpu.dot_dimension_numbers<[1], [0], [0], [1], [0, 0, 1, 1], [], []>} : vector<2x32xf32>, vector<32x1024xf32>, vector<2x1024xf32> -> vector<2x1024xf32>
    %384 = arith.addf %382, %383 : vector<2x1024xf32>
    %385 = vector.broadcast %2 : vector<1x1024xf32> to vector<2x1024xf32>
    %386 = arith.addf %384, %385 : vector<2x1024xf32>
    %cst_148 = arith.constant dense<0xFF800000> : vector<2xf32>
    %387 = vector.multi_reduction <maximumf>, %386, %cst_148 [1] : vector<2x1024xf32> to vector<2xf32>
    %388 = vector.shape_cast %387 : vector<2xf32> to vector<2x1xf32>
    %389 = vector.broadcast %388 : vector<2x1xf32> to vector<2x1024xf32>
    %390 = arith.subf %386, %389 : vector<2x1024xf32>
    %391 = math.exp %390 : vector<2x1024xf32>
    %cst_149 = arith.constant dense<0.000000e+00> : vector<2x32xf32>
    %392 = tpu.matmul %391, %7, %cst_149 {dimension_numbers = #tpu.dot_dimension_numbers<[1], [0], [0], [1], [0, 0, 1, 1], [], []>} : vector<2x1024xf32>, vector<1024x32xf32>, vector<2x32xf32> -> vector<2x32xf32>
    %393 = arith.divf %363, %392 : vector<2x32xf32>
    %cst_150 = arith.constant dense<0.000000e+00> : vector<2x1024xf32>
    %394 = tpu.matmul %393, %6, %cst_150 {dimension_numbers = #tpu.dot_dimension_numbers<[1], [0], [0], [1], [0, 0, 1, 1], [], []>} : vector<2x32xf32>, vector<32x1024xf32>, vector<2x1024xf32> -> vector<2x1024xf32>
    %395 = arith.mulf %391, %394 : vector<2x1024xf32>
    %cst_151 = arith.constant dense<0.000000e+00> : vector<2x32xf32>
    %396 = tpu.matmul %395, %8, %cst_151 {dimension_numbers = #tpu.dot_dimension_numbers<[1], [0], [0], [1], [0, 0, 1, 1], [], []>} : vector<2x1024xf32>, vector<1024x32xf32>, vector<2x32xf32> -> vector<2x32xf32>
    %cst_152 = arith.constant dense<0.000000e+00> : vector<2x64xf32>
    %397 = tpu.matmul %366, %3, %cst_152 {dimension_numbers = #tpu.dot_dimension_numbers<[1], [0], [0], [1], [0, 0, 1, 1], [], []>} : vector<2x7xf32>, vector<7x64xf32>, vector<2x64xf32> -> vector<2x64xf32>
    %cst_153 = arith.constant dense<0.000000e+00> : vector<2x64xf32>
    %398 = tpu.matmul %381, %4, %cst_153 {dimension_numbers = #tpu.dot_dimension_numbers<[1], [0], [0], [1], [0, 0, 1, 1], [], []>} : vector<2x32xf32>, vector<32x64xf32>, vector<2x64xf32> -> vector<2x64xf32>
    %399 = arith.addf %397, %398 : vector<2x64xf32>
    %400 = vector.broadcast %5 : vector<1x64xf32> to vector<2x64xf32>
    %401 = arith.addf %399, %400 : vector<2x64xf32>
    %402 = vector.extract_strided_slice %401 {offsets = [0, 0], sizes = [2, 32], strides = [1, 1]} : vector<2x64xf32> to vector<2x32xf32>
    %cst_154 = arith.constant dense<0xFF800000> : vector<2xf32>
    %403 = vector.multi_reduction <maximumf>, %402, %cst_154 [1] : vector<2x32xf32> to vector<2xf32>
    %404 = vector.shape_cast %403 : vector<2xf32> to vector<2x1xf32>
    %405 = vector.broadcast %404 : vector<2x1xf32> to vector<2x32xf32>
    %406 = arith.subf %402, %405 : vector<2x32xf32>
    %407 = math.exp %406 : vector<2x32xf32>
    %cst_155 = arith.constant dense<0.000000e+00> : vector<2xf32>
    %408 = vector.multi_reduction <add>, %407, %cst_155 [1] : vector<2x32xf32> to vector<2xf32>
    %409 = vector.shape_cast %408 : vector<2xf32> to vector<2x1xf32>
    %410 = vector.broadcast %409 : vector<2x1xf32> to vector<2x32xf32>
    %411 = arith.divf %407, %410 : vector<2x32xf32>
    %412 = vector.extract_strided_slice %401 {offsets = [0, 32], sizes = [2, 32], strides = [1, 1]} : vector<2x64xf32> to vector<2x32xf32>
    %413 = arith.negf %412 : vector<2x32xf32>
    %414 = math.exp %413 : vector<2x32xf32>
    %cst_156 = arith.constant 1.000000e+00 : f32
    %415 = vector.broadcast %cst_156 : f32 to vector<2x32xf32>
    %416 = arith.addf %415, %414 : vector<2x32xf32>
    %417 = arith.divf %415, %416 : vector<2x32xf32>
    %418 = vector.broadcast %373 : vector<2x1xf32> to vector<2x32xf32>
    %419 = arith.mulf %418, %411 : vector<2x32xf32>
    %420 = arith.addf %396, %419 : vector<2x32xf32>
    %421 = arith.mulf %417, %420 : vector<2x32xf32>
    %422 = arith.subf %420, %421 : vector<2x32xf32>
    %c7_i32 = arith.constant 7 : i32
    %423 = arith.index_cast %c7_i32 : i32 to index
    %c0_157 = arith.constant 0 : index
    %c0_158 = arith.constant 0 : index
    %424 = vector.load %arg1[%423, %c0_157, %c0_158] : memref<8x2x7xf32, #tpu.memory_space<vmem>>, vector<1x2x7xf32>
    %425 = vector.shape_cast %424 : vector<1x2x7xf32> to vector<2x7xf32>
    %426 = arith.index_cast %c7_i32 : i32 to index
    %c0_159 = arith.constant 0 : index
    %c0_160 = arith.constant 0 : index
    %427 = vector.load %arg0[%426, %c0_159, %c0_160] : memref<8x2x1xf32, #tpu.memory_space<vmem>>, vector<1x2x1xf32>
    %428 = vector.shape_cast %427 : vector<1x2x1xf32> to vector<2x1xf32>
    %cst_161 = arith.constant 5.000000e-01 : f32
    %429 = vector.broadcast %cst_161 : f32 to vector<2x1xf32>
    %430 = arith.mulf %428, %429 : vector<2x1xf32>
    %cst_162 = arith.constant 5.000000e-01 : f32
    %431 = vector.broadcast %cst_162 : f32 to vector<2x1xf32>
    %432 = arith.addf %430, %431 : vector<2x1xf32>
    %cst_163 = arith.constant dense<0.000000e+00> : vector<2xf32>
    %433 = vector.multi_reduction <add>, %422, %cst_163 [1] : vector<2x32xf32> to vector<2xf32>
    %434 = vector.shape_cast %433 : vector<2xf32> to vector<2x1xf32>
    %cst_164 = arith.constant 0.000000e+00 : f32
    %435 = vector.broadcast %cst_164 : f32 to vector<2x1xf32>
    %436 = arith.cmpf oeq, %434, %435 : vector<2x1xf32>
    %cst_165 = arith.constant 1.000000e+00 : f32
    %437 = vector.broadcast %cst_165 : f32 to vector<2x1xf32>
    %438 = arith.select %436, %437, %434 : vector<2x1xi1>, vector<2x1xf32>
    %439 = vector.broadcast %438 : vector<2x1xf32> to vector<2x32xf32>
    %440 = arith.divf %422, %439 : vector<2x32xf32>
    %cst_166 = arith.constant dense<0.000000e+00> : vector<2x1024xf32>
    %441 = tpu.matmul %425, %0, %cst_166 {dimension_numbers = #tpu.dot_dimension_numbers<[1], [0], [0], [1], [0, 0, 1, 1], [], []>} : vector<2x7xf32>, vector<7x1024xf32>, vector<2x1024xf32> -> vector<2x1024xf32>
    %cst_167 = arith.constant dense<0.000000e+00> : vector<2x1024xf32>
    %442 = tpu.matmul %440, %1, %cst_167 {dimension_numbers = #tpu.dot_dimension_numbers<[1], [0], [0], [1], [0, 0, 1, 1], [], []>} : vector<2x32xf32>, vector<32x1024xf32>, vector<2x1024xf32> -> vector<2x1024xf32>
    %443 = arith.addf %441, %442 : vector<2x1024xf32>
    %444 = vector.broadcast %2 : vector<1x1024xf32> to vector<2x1024xf32>
    %445 = arith.addf %443, %444 : vector<2x1024xf32>
    %cst_168 = arith.constant dense<0xFF800000> : vector<2xf32>
    %446 = vector.multi_reduction <maximumf>, %445, %cst_168 [1] : vector<2x1024xf32> to vector<2xf32>
    %447 = vector.shape_cast %446 : vector<2xf32> to vector<2x1xf32>
    %448 = vector.broadcast %447 : vector<2x1xf32> to vector<2x1024xf32>
    %449 = arith.subf %445, %448 : vector<2x1024xf32>
    %450 = math.exp %449 : vector<2x1024xf32>
    %cst_169 = arith.constant dense<0.000000e+00> : vector<2x32xf32>
    %451 = tpu.matmul %450, %7, %cst_169 {dimension_numbers = #tpu.dot_dimension_numbers<[1], [0], [0], [1], [0, 0, 1, 1], [], []>} : vector<2x1024xf32>, vector<1024x32xf32>, vector<2x32xf32> -> vector<2x32xf32>
    %452 = arith.divf %422, %451 : vector<2x32xf32>
    %cst_170 = arith.constant dense<0.000000e+00> : vector<2x1024xf32>
    %453 = tpu.matmul %452, %6, %cst_170 {dimension_numbers = #tpu.dot_dimension_numbers<[1], [0], [0], [1], [0, 0, 1, 1], [], []>} : vector<2x32xf32>, vector<32x1024xf32>, vector<2x1024xf32> -> vector<2x1024xf32>
    %454 = arith.mulf %450, %453 : vector<2x1024xf32>
    %cst_171 = arith.constant dense<0.000000e+00> : vector<2x32xf32>
    %455 = tpu.matmul %454, %8, %cst_171 {dimension_numbers = #tpu.dot_dimension_numbers<[1], [0], [0], [1], [0, 0, 1, 1], [], []>} : vector<2x1024xf32>, vector<1024x32xf32>, vector<2x32xf32> -> vector<2x32xf32>
    %cst_172 = arith.constant dense<0.000000e+00> : vector<2x64xf32>
    %456 = tpu.matmul %425, %3, %cst_172 {dimension_numbers = #tpu.dot_dimension_numbers<[1], [0], [0], [1], [0, 0, 1, 1], [], []>} : vector<2x7xf32>, vector<7x64xf32>, vector<2x64xf32> -> vector<2x64xf32>
    %cst_173 = arith.constant dense<0.000000e+00> : vector<2x64xf32>
    %457 = tpu.matmul %440, %4, %cst_173 {dimension_numbers = #tpu.dot_dimension_numbers<[1], [0], [0], [1], [0, 0, 1, 1], [], []>} : vector<2x32xf32>, vector<32x64xf32>, vector<2x64xf32> -> vector<2x64xf32>
    %458 = arith.addf %456, %457 : vector<2x64xf32>
    %459 = vector.broadcast %5 : vector<1x64xf32> to vector<2x64xf32>
    %460 = arith.addf %458, %459 : vector<2x64xf32>
    %461 = vector.extract_strided_slice %460 {offsets = [0, 0], sizes = [2, 32], strides = [1, 1]} : vector<2x64xf32> to vector<2x32xf32>
    %cst_174 = arith.constant dense<0xFF800000> : vector<2xf32>
    %462 = vector.multi_reduction <maximumf>, %461, %cst_174 [1] : vector<2x32xf32> to vector<2xf32>
    %463 = vector.shape_cast %462 : vector<2xf32> to vector<2x1xf32>
    %464 = vector.broadcast %463 : vector<2x1xf32> to vector<2x32xf32>
    %465 = arith.subf %461, %464 : vector<2x32xf32>
    %466 = math.exp %465 : vector<2x32xf32>
    %cst_175 = arith.constant dense<0.000000e+00> : vector<2xf32>
    %467 = vector.multi_reduction <add>, %466, %cst_175 [1] : vector<2x32xf32> to vector<2xf32>
    %468 = vector.shape_cast %467 : vector<2xf32> to vector<2x1xf32>
    %469 = vector.broadcast %468 : vector<2x1xf32> to vector<2x32xf32>
    %470 = arith.divf %466, %469 : vector<2x32xf32>
    %471 = vector.extract_strided_slice %460 {offsets = [0, 32], sizes = [2, 32], strides = [1, 1]} : vector<2x64xf32> to vector<2x32xf32>
    %472 = arith.negf %471 : vector<2x32xf32>
    %473 = math.exp %472 : vector<2x32xf32>
    %cst_176 = arith.constant 1.000000e+00 : f32
    %474 = vector.broadcast %cst_176 : f32 to vector<2x32xf32>
    %475 = arith.addf %474, %473 : vector<2x32xf32>
    %476 = arith.divf %474, %475 : vector<2x32xf32>
    %477 = vector.broadcast %432 : vector<2x1xf32> to vector<2x32xf32>
    %478 = arith.mulf %477, %470 : vector<2x32xf32>
    %479 = arith.addf %455, %478 : vector<2x32xf32>
    %480 = arith.mulf %476, %479 : vector<2x32xf32>
    %481 = arith.subf %479, %480 : vector<2x32xf32>
    %c8_i32 = arith.constant 8 : i32
    %c0_177 = arith.constant 0 : index
    %c0_178 = arith.constant 0 : index
    %482 = vector.load %arg12[%c0_177, %c0_178] : memref<6x128xf32, #tpu.memory_space<vmem>>, vector<6x128xf32>
    %c0_179 = arith.constant 0 : index
    %c0_180 = arith.constant 0 : index
    %483 = vector.load %arg13[%c0_179, %c0_180] : memref<32x128xf32, #tpu.memory_space<vmem>>, vector<32x128xf32>
    %c0_181 = arith.constant 0 : index
    %c0_182 = arith.constant 0 : index
    %484 = vector.load %arg14[%c0_181, %c0_182] : memref<1x128xf32, #tpu.memory_space<vmem>>, vector<1x128xf32>
    %c0_183 = arith.constant 0 : index
    %c0_184 = arith.constant 0 : index
    %485 = vector.load %arg15[%c0_183, %c0_184] : memref<32x1xf32, #tpu.memory_space<vmem>>, vector<32x1xf32>
    %c0_185 = arith.constant 0 : index
    %c0_186 = arith.constant 0 : index
    %486 = vector.load %arg16[%c0_185, %c0_186] : memref<1x1xf32, #tpu.memory_space<vmem>>, vector<1x1xf32>
    %cst_187 = arith.constant 0.000000e+00 : f32
    %487 = vector.broadcast %cst_187 : f32 to vector<2x32xf32>
    %c0_i32_188 = arith.constant 0 : i32
    %488 = arith.index_cast %c0_i32_188 : i32 to index
    %c0_189 = arith.constant 0 : index
    %c0_190 = arith.constant 0 : index
    %489 = vector.load %arg2[%488, %c0_189, %c0_190] : memref<8x2x6xf32, #tpu.memory_space<vmem>>, vector<1x2x6xf32>
    %490 = vector.shape_cast %489 : vector<1x2x6xf32> to vector<2x6xf32>
    %cst_191 = arith.constant dense<0.000000e+00> : vector<2x128xf32>
    %491 = tpu.matmul %490, %482, %cst_191 {dimension_numbers = #tpu.dot_dimension_numbers<[1], [0], [0], [1], [0, 0, 1, 1], [], []>} : vector<2x6xf32>, vector<6x128xf32>, vector<2x128xf32> -> vector<2x128xf32>
    %cst_192 = arith.constant dense<0.000000e+00> : vector<2x128xf32>
    %492 = tpu.matmul %487, %483, %cst_192 {dimension_numbers = #tpu.dot_dimension_numbers<[1], [0], [0], [1], [0, 0, 1, 1], [], []>} : vector<2x32xf32>, vector<32x128xf32>, vector<2x128xf32> -> vector<2x128xf32>
    %493 = arith.addf %491, %492 : vector<2x128xf32>
    %494 = vector.broadcast %484 : vector<1x128xf32> to vector<2x128xf32>
    %495 = arith.addf %493, %494 : vector<2x128xf32>
    %496 = arith.negf %495 : vector<2x128xf32>
    %497 = math.exp %496 : vector<2x128xf32>
    %cst_193 = arith.constant 1.000000e+00 : f32
    %498 = vector.broadcast %cst_193 : f32 to vector<2x128xf32>
    %499 = arith.addf %498, %497 : vector<2x128xf32>
    %500 = arith.divf %498, %499 : vector<2x128xf32>
    %501 = math.tanh %495 : vector<2x128xf32>
    %502 = vector.extract_strided_slice %500 {offsets = [0, 0], sizes = [2, 32], strides = [1, 1]} : vector<2x128xf32> to vector<2x32xf32>
    %503 = vector.extract_strided_slice %500 {offsets = [0, 32], sizes = [2, 32], strides = [1, 1]} : vector<2x128xf32> to vector<2x32xf32>
    %504 = vector.extract_strided_slice %501 {offsets = [0, 64], sizes = [2, 32], strides = [1, 1]} : vector<2x128xf32> to vector<2x32xf32>
    %505 = vector.extract_strided_slice %500 {offsets = [0, 96], sizes = [2, 32], strides = [1, 1]} : vector<2x128xf32> to vector<2x32xf32>
    %506 = arith.mulf %503, %481 : vector<2x32xf32>
    %507 = arith.mulf %502, %504 : vector<2x32xf32>
    %508 = arith.addf %506, %507 : vector<2x32xf32>
    %509 = math.tanh %508 : vector<2x32xf32>
    %510 = arith.mulf %505, %509 : vector<2x32xf32>
    %cst_194 = arith.constant dense<0.000000e+00> : vector<2x1xf32>
    %511 = tpu.matmul %510, %485, %cst_194 {dimension_numbers = #tpu.dot_dimension_numbers<[1], [0], [0], [1], [0, 0, 1, 1], [], []>} : vector<2x32xf32>, vector<32x1xf32>, vector<2x1xf32> -> vector<2x1xf32>
    %512 = vector.broadcast %486 : vector<1x1xf32> to vector<2x1xf32>
    %513 = arith.addf %511, %512 : vector<2x1xf32>
    %514 = arith.index_cast %c0_i32_188 : i32 to index
    %c0_195 = arith.constant 0 : index
    %c0_196 = arith.constant 0 : index
    %515 = vector.load %arg17[%514, %c0_195, %c0_196] : memref<8x2x1xf32, #tpu.memory_space<vmem>>, vector<1x2x1xf32>
    %516 = vector.shape_cast %515 : vector<1x2x1xf32> to vector<2x1xf32>
    %517 = vector.shape_cast %513 : vector<2x1xf32> to vector<1x2x1xf32>
    tpu.vector_store %arg17[%514, %c0_195, %c0_196], %517 {strides = array<i32>} : memref<8x2x1xf32, #tpu.memory_space<vmem>>, vector<1x2x1xf32>,
    %c1_i32_197 = arith.constant 1 : i32
    %518 = arith.index_cast %c1_i32_197 : i32 to index
    %c0_198 = arith.constant 0 : index
    %c0_199 = arith.constant 0 : index
    %519 = vector.load %arg2[%518, %c0_198, %c0_199] : memref<8x2x6xf32, #tpu.memory_space<vmem>>, vector<1x2x6xf32>
    %520 = vector.shape_cast %519 : vector<1x2x6xf32> to vector<2x6xf32>
    %cst_200 = arith.constant dense<0.000000e+00> : vector<2x128xf32>
    %521 = tpu.matmul %520, %482, %cst_200 {dimension_numbers = #tpu.dot_dimension_numbers<[1], [0], [0], [1], [0, 0, 1, 1], [], []>} : vector<2x6xf32>, vector<6x128xf32>, vector<2x128xf32> -> vector<2x128xf32>
    %cst_201 = arith.constant dense<0.000000e+00> : vector<2x128xf32>
    %522 = tpu.matmul %510, %483, %cst_201 {dimension_numbers = #tpu.dot_dimension_numbers<[1], [0], [0], [1], [0, 0, 1, 1], [], []>} : vector<2x32xf32>, vector<32x128xf32>, vector<2x128xf32> -> vector<2x128xf32>
    %523 = arith.addf %521, %522 : vector<2x128xf32>
    %524 = vector.broadcast %484 : vector<1x128xf32> to vector<2x128xf32>
    %525 = arith.addf %523, %524 : vector<2x128xf32>
    %526 = arith.negf %525 : vector<2x128xf32>
    %527 = math.exp %526 : vector<2x128xf32>
    %cst_202 = arith.constant 1.000000e+00 : f32
    %528 = vector.broadcast %cst_202 : f32 to vector<2x128xf32>
    %529 = arith.addf %528, %527 : vector<2x128xf32>
    %530 = arith.divf %528, %529 : vector<2x128xf32>
    %531 = math.tanh %525 : vector<2x128xf32>
    %532 = vector.extract_strided_slice %530 {offsets = [0, 0], sizes = [2, 32], strides = [1, 1]} : vector<2x128xf32> to vector<2x32xf32>
    %533 = vector.extract_strided_slice %530 {offsets = [0, 32], sizes = [2, 32], strides = [1, 1]} : vector<2x128xf32> to vector<2x32xf32>
    %534 = vector.extract_strided_slice %531 {offsets = [0, 64], sizes = [2, 32], strides = [1, 1]} : vector<2x128xf32> to vector<2x32xf32>
    %535 = vector.extract_strided_slice %530 {offsets = [0, 96], sizes = [2, 32], strides = [1, 1]} : vector<2x128xf32> to vector<2x32xf32>
    %536 = arith.mulf %533, %508 : vector<2x32xf32>
    %537 = arith.mulf %532, %534 : vector<2x32xf32>
    %538 = arith.addf %536, %537 : vector<2x32xf32>
    %539 = math.tanh %538 : vector<2x32xf32>
    %540 = arith.mulf %535, %539 : vector<2x32xf32>
    %cst_203 = arith.constant dense<0.000000e+00> : vector<2x1xf32>
    %541 = tpu.matmul %540, %485, %cst_203 {dimension_numbers = #tpu.dot_dimension_numbers<[1], [0], [0], [1], [0, 0, 1, 1], [], []>} : vector<2x32xf32>, vector<32x1xf32>, vector<2x1xf32> -> vector<2x1xf32>
    %542 = vector.broadcast %486 : vector<1x1xf32> to vector<2x1xf32>
    %543 = arith.addf %541, %542 : vector<2x1xf32>
    %544 = arith.index_cast %c1_i32_197 : i32 to index
    %c0_204 = arith.constant 0 : index
    %c0_205 = arith.constant 0 : index
    %545 = vector.load %arg17[%544, %c0_204, %c0_205] : memref<8x2x1xf32, #tpu.memory_space<vmem>>, vector<1x2x1xf32>
    %546 = vector.shape_cast %545 : vector<1x2x1xf32> to vector<2x1xf32>
    %547 = vector.shape_cast %543 : vector<2x1xf32> to vector<1x2x1xf32>
    tpu.vector_store %arg17[%544, %c0_204, %c0_205], %547 {strides = array<i32>} : memref<8x2x1xf32, #tpu.memory_space<vmem>>, vector<1x2x1xf32>,
    %c2_i32_206 = arith.constant 2 : i32
    %548 = arith.index_cast %c2_i32_206 : i32 to index
    %c0_207 = arith.constant 0 : index
    %c0_208 = arith.constant 0 : index
    %549 = vector.load %arg2[%548, %c0_207, %c0_208] : memref<8x2x6xf32, #tpu.memory_space<vmem>>, vector<1x2x6xf32>
    %550 = vector.shape_cast %549 : vector<1x2x6xf32> to vector<2x6xf32>
    %cst_209 = arith.constant dense<0.000000e+00> : vector<2x128xf32>
    %551 = tpu.matmul %550, %482, %cst_209 {dimension_numbers = #tpu.dot_dimension_numbers<[1], [0], [0], [1], [0, 0, 1, 1], [], []>} : vector<2x6xf32>, vector<6x128xf32>, vector<2x128xf32> -> vector<2x128xf32>
    %cst_210 = arith.constant dense<0.000000e+00> : vector<2x128xf32>
    %552 = tpu.matmul %540, %483, %cst_210 {dimension_numbers = #tpu.dot_dimension_numbers<[1], [0], [0], [1], [0, 0, 1, 1], [], []>} : vector<2x32xf32>, vector<32x128xf32>, vector<2x128xf32> -> vector<2x128xf32>
    %553 = arith.addf %551, %552 : vector<2x128xf32>
    %554 = vector.broadcast %484 : vector<1x128xf32> to vector<2x128xf32>
    %555 = arith.addf %553, %554 : vector<2x128xf32>
    %556 = arith.negf %555 : vector<2x128xf32>
    %557 = math.exp %556 : vector<2x128xf32>
    %cst_211 = arith.constant 1.000000e+00 : f32
    %558 = vector.broadcast %cst_211 : f32 to vector<2x128xf32>
    %559 = arith.addf %558, %557 : vector<2x128xf32>
    %560 = arith.divf %558, %559 : vector<2x128xf32>
    %561 = math.tanh %555 : vector<2x128xf32>
    %562 = vector.extract_strided_slice %560 {offsets = [0, 0], sizes = [2, 32], strides = [1, 1]} : vector<2x128xf32> to vector<2x32xf32>
    %563 = vector.extract_strided_slice %560 {offsets = [0, 32], sizes = [2, 32], strides = [1, 1]} : vector<2x128xf32> to vector<2x32xf32>
    %564 = vector.extract_strided_slice %561 {offsets = [0, 64], sizes = [2, 32], strides = [1, 1]} : vector<2x128xf32> to vector<2x32xf32>
    %565 = vector.extract_strided_slice %560 {offsets = [0, 96], sizes = [2, 32], strides = [1, 1]} : vector<2x128xf32> to vector<2x32xf32>
    %566 = arith.mulf %563, %538 : vector<2x32xf32>
    %567 = arith.mulf %562, %564 : vector<2x32xf32>
    %568 = arith.addf %566, %567 : vector<2x32xf32>
    %569 = math.tanh %568 : vector<2x32xf32>
    %570 = arith.mulf %565, %569 : vector<2x32xf32>
    %cst_212 = arith.constant dense<0.000000e+00> : vector<2x1xf32>
    %571 = tpu.matmul %570, %485, %cst_212 {dimension_numbers = #tpu.dot_dimension_numbers<[1], [0], [0], [1], [0, 0, 1, 1], [], []>} : vector<2x32xf32>, vector<32x1xf32>, vector<2x1xf32> -> vector<2x1xf32>
    %572 = vector.broadcast %486 : vector<1x1xf32> to vector<2x1xf32>
    %573 = arith.addf %571, %572 : vector<2x1xf32>
    %574 = arith.index_cast %c2_i32_206 : i32 to index
    %c0_213 = arith.constant 0 : index
    %c0_214 = arith.constant 0 : index
    %575 = vector.load %arg17[%574, %c0_213, %c0_214] : memref<8x2x1xf32, #tpu.memory_space<vmem>>, vector<1x2x1xf32>
    %576 = vector.shape_cast %575 : vector<1x2x1xf32> to vector<2x1xf32>
    %577 = vector.shape_cast %573 : vector<2x1xf32> to vector<1x2x1xf32>
    tpu.vector_store %arg17[%574, %c0_213, %c0_214], %577 {strides = array<i32>} : memref<8x2x1xf32, #tpu.memory_space<vmem>>, vector<1x2x1xf32>,
    %c3_i32_215 = arith.constant 3 : i32
    %578 = arith.index_cast %c3_i32_215 : i32 to index
    %c0_216 = arith.constant 0 : index
    %c0_217 = arith.constant 0 : index
    %579 = vector.load %arg2[%578, %c0_216, %c0_217] : memref<8x2x6xf32, #tpu.memory_space<vmem>>, vector<1x2x6xf32>
    %580 = vector.shape_cast %579 : vector<1x2x6xf32> to vector<2x6xf32>
    %cst_218 = arith.constant dense<0.000000e+00> : vector<2x128xf32>
    %581 = tpu.matmul %580, %482, %cst_218 {dimension_numbers = #tpu.dot_dimension_numbers<[1], [0], [0], [1], [0, 0, 1, 1], [], []>} : vector<2x6xf32>, vector<6x128xf32>, vector<2x128xf32> -> vector<2x128xf32>
    %cst_219 = arith.constant dense<0.000000e+00> : vector<2x128xf32>
    %582 = tpu.matmul %570, %483, %cst_219 {dimension_numbers = #tpu.dot_dimension_numbers<[1], [0], [0], [1], [0, 0, 1, 1], [], []>} : vector<2x32xf32>, vector<32x128xf32>, vector<2x128xf32> -> vector<2x128xf32>
    %583 = arith.addf %581, %582 : vector<2x128xf32>
    %584 = vector.broadcast %484 : vector<1x128xf32> to vector<2x128xf32>
    %585 = arith.addf %583, %584 : vector<2x128xf32>
    %586 = arith.negf %585 : vector<2x128xf32>
    %587 = math.exp %586 : vector<2x128xf32>
    %cst_220 = arith.constant 1.000000e+00 : f32
    %588 = vector.broadcast %cst_220 : f32 to vector<2x128xf32>
    %589 = arith.addf %588, %587 : vector<2x128xf32>
    %590 = arith.divf %588, %589 : vector<2x128xf32>
    %591 = math.tanh %585 : vector<2x128xf32>
    %592 = vector.extract_strided_slice %590 {offsets = [0, 0], sizes = [2, 32], strides = [1, 1]} : vector<2x128xf32> to vector<2x32xf32>
    %593 = vector.extract_strided_slice %590 {offsets = [0, 32], sizes = [2, 32], strides = [1, 1]} : vector<2x128xf32> to vector<2x32xf32>
    %594 = vector.extract_strided_slice %591 {offsets = [0, 64], sizes = [2, 32], strides = [1, 1]} : vector<2x128xf32> to vector<2x32xf32>
    %595 = vector.extract_strided_slice %590 {offsets = [0, 96], sizes = [2, 32], strides = [1, 1]} : vector<2x128xf32> to vector<2x32xf32>
    %596 = arith.mulf %593, %568 : vector<2x32xf32>
    %597 = arith.mulf %592, %594 : vector<2x32xf32>
    %598 = arith.addf %596, %597 : vector<2x32xf32>
    %599 = math.tanh %598 : vector<2x32xf32>
    %600 = arith.mulf %595, %599 : vector<2x32xf32>
    %cst_221 = arith.constant dense<0.000000e+00> : vector<2x1xf32>
    %601 = tpu.matmul %600, %485, %cst_221 {dimension_numbers = #tpu.dot_dimension_numbers<[1], [0], [0], [1], [0, 0, 1, 1], [], []>} : vector<2x32xf32>, vector<32x1xf32>, vector<2x1xf32> -> vector<2x1xf32>
    %602 = vector.broadcast %486 : vector<1x1xf32> to vector<2x1xf32>
    %603 = arith.addf %601, %602 : vector<2x1xf32>
    %604 = arith.index_cast %c3_i32_215 : i32 to index
    %c0_222 = arith.constant 0 : index
    %c0_223 = arith.constant 0 : index
    %605 = vector.load %arg17[%604, %c0_222, %c0_223] : memref<8x2x1xf32, #tpu.memory_space<vmem>>, vector<1x2x1xf32>
    %606 = vector.shape_cast %605 : vector<1x2x1xf32> to vector<2x1xf32>
    %607 = vector.shape_cast %603 : vector<2x1xf32> to vector<1x2x1xf32>
    tpu.vector_store %arg17[%604, %c0_222, %c0_223], %607 {strides = array<i32>} : memref<8x2x1xf32, #tpu.memory_space<vmem>>, vector<1x2x1xf32>,
    %c4_i32_224 = arith.constant 4 : i32
    %608 = arith.index_cast %c4_i32_224 : i32 to index
    %c0_225 = arith.constant 0 : index
    %c0_226 = arith.constant 0 : index
    %609 = vector.load %arg2[%608, %c0_225, %c0_226] : memref<8x2x6xf32, #tpu.memory_space<vmem>>, vector<1x2x6xf32>
    %610 = vector.shape_cast %609 : vector<1x2x6xf32> to vector<2x6xf32>
    %cst_227 = arith.constant dense<0.000000e+00> : vector<2x128xf32>
    %611 = tpu.matmul %610, %482, %cst_227 {dimension_numbers = #tpu.dot_dimension_numbers<[1], [0], [0], [1], [0, 0, 1, 1], [], []>} : vector<2x6xf32>, vector<6x128xf32>, vector<2x128xf32> -> vector<2x128xf32>
    %cst_228 = arith.constant dense<0.000000e+00> : vector<2x128xf32>
    %612 = tpu.matmul %600, %483, %cst_228 {dimension_numbers = #tpu.dot_dimension_numbers<[1], [0], [0], [1], [0, 0, 1, 1], [], []>} : vector<2x32xf32>, vector<32x128xf32>, vector<2x128xf32> -> vector<2x128xf32>
    %613 = arith.addf %611, %612 : vector<2x128xf32>
    %614 = vector.broadcast %484 : vector<1x128xf32> to vector<2x128xf32>
    %615 = arith.addf %613, %614 : vector<2x128xf32>
    %616 = arith.negf %615 : vector<2x128xf32>
    %617 = math.exp %616 : vector<2x128xf32>
    %cst_229 = arith.constant 1.000000e+00 : f32
    %618 = vector.broadcast %cst_229 : f32 to vector<2x128xf32>
    %619 = arith.addf %618, %617 : vector<2x128xf32>
    %620 = arith.divf %618, %619 : vector<2x128xf32>
    %621 = math.tanh %615 : vector<2x128xf32>
    %622 = vector.extract_strided_slice %620 {offsets = [0, 0], sizes = [2, 32], strides = [1, 1]} : vector<2x128xf32> to vector<2x32xf32>
    %623 = vector.extract_strided_slice %620 {offsets = [0, 32], sizes = [2, 32], strides = [1, 1]} : vector<2x128xf32> to vector<2x32xf32>
    %624 = vector.extract_strided_slice %621 {offsets = [0, 64], sizes = [2, 32], strides = [1, 1]} : vector<2x128xf32> to vector<2x32xf32>
    %625 = vector.extract_strided_slice %620 {offsets = [0, 96], sizes = [2, 32], strides = [1, 1]} : vector<2x128xf32> to vector<2x32xf32>
    %626 = arith.mulf %623, %598 : vector<2x32xf32>
    %627 = arith.mulf %622, %624 : vector<2x32xf32>
    %628 = arith.addf %626, %627 : vector<2x32xf32>
    %629 = math.tanh %628 : vector<2x32xf32>
    %630 = arith.mulf %625, %629 : vector<2x32xf32>
    %cst_230 = arith.constant dense<0.000000e+00> : vector<2x1xf32>
    %631 = tpu.matmul %630, %485, %cst_230 {dimension_numbers = #tpu.dot_dimension_numbers<[1], [0], [0], [1], [0, 0, 1, 1], [], []>} : vector<2x32xf32>, vector<32x1xf32>, vector<2x1xf32> -> vector<2x1xf32>
    %632 = vector.broadcast %486 : vector<1x1xf32> to vector<2x1xf32>
    %633 = arith.addf %631, %632 : vector<2x1xf32>
    %634 = arith.index_cast %c4_i32_224 : i32 to index
    %c0_231 = arith.constant 0 : index
    %c0_232 = arith.constant 0 : index
    %635 = vector.load %arg17[%634, %c0_231, %c0_232] : memref<8x2x1xf32, #tpu.memory_space<vmem>>, vector<1x2x1xf32>
    %636 = vector.shape_cast %635 : vector<1x2x1xf32> to vector<2x1xf32>
    %637 = vector.shape_cast %633 : vector<2x1xf32> to vector<1x2x1xf32>
    tpu.vector_store %arg17[%634, %c0_231, %c0_232], %637 {strides = array<i32>} : memref<8x2x1xf32, #tpu.memory_space<vmem>>, vector<1x2x1xf32>,
    %c5_i32_233 = arith.constant 5 : i32
    %638 = arith.index_cast %c5_i32_233 : i32 to index
    %c0_234 = arith.constant 0 : index
    %c0_235 = arith.constant 0 : index
    %639 = vector.load %arg2[%638, %c0_234, %c0_235] : memref<8x2x6xf32, #tpu.memory_space<vmem>>, vector<1x2x6xf32>
    %640 = vector.shape_cast %639 : vector<1x2x6xf32> to vector<2x6xf32>
    %cst_236 = arith.constant dense<0.000000e+00> : vector<2x128xf32>
    %641 = tpu.matmul %640, %482, %cst_236 {dimension_numbers = #tpu.dot_dimension_numbers<[1], [0], [0], [1], [0, 0, 1, 1], [], []>} : vector<2x6xf32>, vector<6x128xf32>, vector<2x128xf32> -> vector<2x128xf32>
    %cst_237 = arith.constant dense<0.000000e+00> : vector<2x128xf32>
    %642 = tpu.matmul %630, %483, %cst_237 {dimension_numbers = #tpu.dot_dimension_numbers<[1], [0], [0], [1], [0, 0, 1, 1], [], []>} : vector<2x32xf32>, vector<32x128xf32>, vector<2x128xf32> -> vector<2x128xf32>
    %643 = arith.addf %641, %642 : vector<2x128xf32>
    %644 = vector.broadcast %484 : vector<1x128xf32> to vector<2x128xf32>
    %645 = arith.addf %643, %644 : vector<2x128xf32>
    %646 = arith.negf %645 : vector<2x128xf32>
    %647 = math.exp %646 : vector<2x128xf32>
    %cst_238 = arith.constant 1.000000e+00 : f32
    %648 = vector.broadcast %cst_238 : f32 to vector<2x128xf32>
    %649 = arith.addf %648, %647 : vector<2x128xf32>
    %650 = arith.divf %648, %649 : vector<2x128xf32>
    %651 = math.tanh %645 : vector<2x128xf32>
    %652 = vector.extract_strided_slice %650 {offsets = [0, 0], sizes = [2, 32], strides = [1, 1]} : vector<2x128xf32> to vector<2x32xf32>
    %653 = vector.extract_strided_slice %650 {offsets = [0, 32], sizes = [2, 32], strides = [1, 1]} : vector<2x128xf32> to vector<2x32xf32>
    %654 = vector.extract_strided_slice %651 {offsets = [0, 64], sizes = [2, 32], strides = [1, 1]} : vector<2x128xf32> to vector<2x32xf32>
    %655 = vector.extract_strided_slice %650 {offsets = [0, 96], sizes = [2, 32], strides = [1, 1]} : vector<2x128xf32> to vector<2x32xf32>
    %656 = arith.mulf %653, %628 : vector<2x32xf32>
    %657 = arith.mulf %652, %654 : vector<2x32xf32>
    %658 = arith.addf %656, %657 : vector<2x32xf32>
    %659 = math.tanh %658 : vector<2x32xf32>
    %660 = arith.mulf %655, %659 : vector<2x32xf32>
    %cst_239 = arith.constant dense<0.000000e+00> : vector<2x1xf32>
    %661 = tpu.matmul %660, %485, %cst_239 {dimension_numbers = #tpu.dot_dimension_numbers<[1], [0], [0], [1], [0, 0, 1, 1], [], []>} : vector<2x32xf32>, vector<32x1xf32>, vector<2x1xf32> -> vector<2x1xf32>
    %662 = vector.broadcast %486 : vector<1x1xf32> to vector<2x1xf32>
    %663 = arith.addf %661, %662 : vector<2x1xf32>
    %664 = arith.index_cast %c5_i32_233 : i32 to index
    %c0_240 = arith.constant 0 : index
    %c0_241 = arith.constant 0 : index
    %665 = vector.load %arg17[%664, %c0_240, %c0_241] : memref<8x2x1xf32, #tpu.memory_space<vmem>>, vector<1x2x1xf32>
    %666 = vector.shape_cast %665 : vector<1x2x1xf32> to vector<2x1xf32>
    %667 = vector.shape_cast %663 : vector<2x1xf32> to vector<1x2x1xf32>
    tpu.vector_store %arg17[%664, %c0_240, %c0_241], %667 {strides = array<i32>} : memref<8x2x1xf32, #tpu.memory_space<vmem>>, vector<1x2x1xf32>,
    %c6_i32_242 = arith.constant 6 : i32
    %668 = arith.index_cast %c6_i32_242 : i32 to index
    %c0_243 = arith.constant 0 : index
    %c0_244 = arith.constant 0 : index
    %669 = vector.load %arg2[%668, %c0_243, %c0_244] : memref<8x2x6xf32, #tpu.memory_space<vmem>>, vector<1x2x6xf32>
    %670 = vector.shape_cast %669 : vector<1x2x6xf32> to vector<2x6xf32>
    %cst_245 = arith.constant dense<0.000000e+00> : vector<2x128xf32>
    %671 = tpu.matmul %670, %482, %cst_245 {dimension_numbers = #tpu.dot_dimension_numbers<[1], [0], [0], [1], [0, 0, 1, 1], [], []>} : vector<2x6xf32>, vector<6x128xf32>, vector<2x128xf32> -> vector<2x128xf32>
    %cst_246 = arith.constant dense<0.000000e+00> : vector<2x128xf32>
    %672 = tpu.matmul %660, %483, %cst_246 {dimension_numbers = #tpu.dot_dimension_numbers<[1], [0], [0], [1], [0, 0, 1, 1], [], []>} : vector<2x32xf32>, vector<32x128xf32>, vector<2x128xf32> -> vector<2x128xf32>
    %673 = arith.addf %671, %672 : vector<2x128xf32>
    %674 = vector.broadcast %484 : vector<1x128xf32> to vector<2x128xf32>
    %675 = arith.addf %673, %674 : vector<2x128xf32>
    %676 = arith.negf %675 : vector<2x128xf32>
    %677 = math.exp %676 : vector<2x128xf32>
    %cst_247 = arith.constant 1.000000e+00 : f32
    %678 = vector.broadcast %cst_247 : f32 to vector<2x128xf32>
    %679 = arith.addf %678, %677 : vector<2x128xf32>
    %680 = arith.divf %678, %679 : vector<2x128xf32>
    %681 = math.tanh %675 : vector<2x128xf32>
    %682 = vector.extract_strided_slice %680 {offsets = [0, 0], sizes = [2, 32], strides = [1, 1]} : vector<2x128xf32> to vector<2x32xf32>
    %683 = vector.extract_strided_slice %680 {offsets = [0, 32], sizes = [2, 32], strides = [1, 1]} : vector<2x128xf32> to vector<2x32xf32>
    %684 = vector.extract_strided_slice %681 {offsets = [0, 64], sizes = [2, 32], strides = [1, 1]} : vector<2x128xf32> to vector<2x32xf32>
    %685 = vector.extract_strided_slice %680 {offsets = [0, 96], sizes = [2, 32], strides = [1, 1]} : vector<2x128xf32> to vector<2x32xf32>
    %686 = arith.mulf %683, %658 : vector<2x32xf32>
    %687 = arith.mulf %682, %684 : vector<2x32xf32>
    %688 = arith.addf %686, %687 : vector<2x32xf32>
    %689 = math.tanh %688 : vector<2x32xf32>
    %690 = arith.mulf %685, %689 : vector<2x32xf32>
    %cst_248 = arith.constant dense<0.000000e+00> : vector<2x1xf32>
    %691 = tpu.matmul %690, %485, %cst_248 {dimension_numbers = #tpu.dot_dimension_numbers<[1], [0], [0], [1], [0, 0, 1, 1], [], []>} : vector<2x32xf32>, vector<32x1xf32>, vector<2x1xf32> -> vector<2x1xf32>
    %692 = vector.broadcast %486 : vector<1x1xf32> to vector<2x1xf32>
    %693 = arith.addf %691, %692 : vector<2x1xf32>
    %694 = arith.index_cast %c6_i32_242 : i32 to index
    %c0_249 = arith.constant 0 : index
    %c0_250 = arith.constant 0 : index
    %695 = vector.load %arg17[%694, %c0_249, %c0_250] : memref<8x2x1xf32, #tpu.memory_space<vmem>>, vector<1x2x1xf32>
    %696 = vector.shape_cast %695 : vector<1x2x1xf32> to vector<2x1xf32>
    %697 = vector.shape_cast %693 : vector<2x1xf32> to vector<1x2x1xf32>
    tpu.vector_store %arg17[%694, %c0_249, %c0_250], %697 {strides = array<i32>} : memref<8x2x1xf32, #tpu.memory_space<vmem>>, vector<1x2x1xf32>,
    %c7_i32_251 = arith.constant 7 : i32
    %698 = arith.index_cast %c7_i32_251 : i32 to index
    %c0_252 = arith.constant 0 : index
    %c0_253 = arith.constant 0 : index
    %699 = vector.load %arg2[%698, %c0_252, %c0_253] : memref<8x2x6xf32, #tpu.memory_space<vmem>>, vector<1x2x6xf32>
    %700 = vector.shape_cast %699 : vector<1x2x6xf32> to vector<2x6xf32>
    %cst_254 = arith.constant dense<0.000000e+00> : vector<2x128xf32>
    %701 = tpu.matmul %700, %482, %cst_254 {dimension_numbers = #tpu.dot_dimension_numbers<[1], [0], [0], [1], [0, 0, 1, 1], [], []>} : vector<2x6xf32>, vector<6x128xf32>, vector<2x128xf32> -> vector<2x128xf32>
    %cst_255 = arith.constant dense<0.000000e+00> : vector<2x128xf32>
    %702 = tpu.matmul %690, %483, %cst_255 {dimension_numbers = #tpu.dot_dimension_numbers<[1], [0], [0], [1], [0, 0, 1, 1], [], []>} : vector<2x32xf32>, vector<32x128xf32>, vector<2x128xf32> -> vector<2x128xf32>
    %703 = arith.addf %701, %702 : vector<2x128xf32>
    %704 = vector.broadcast %484 : vector<1x128xf32> to vector<2x128xf32>
    %705 = arith.addf %703, %704 : vector<2x128xf32>
    %706 = arith.negf %705 : vector<2x128xf32>
    %707 = math.exp %706 : vector<2x128xf32>
    %cst_256 = arith.constant 1.000000e+00 : f32
    %708 = vector.broadcast %cst_256 : f32 to vector<2x128xf32>
    %709 = arith.addf %708, %707 : vector<2x128xf32>
    %710 = arith.divf %708, %709 : vector<2x128xf32>
    %711 = math.tanh %705 : vector<2x128xf32>
    %712 = vector.extract_strided_slice %710 {offsets = [0, 0], sizes = [2, 32], strides = [1, 1]} : vector<2x128xf32> to vector<2x32xf32>
    %713 = vector.extract_strided_slice %710 {offsets = [0, 32], sizes = [2, 32], strides = [1, 1]} : vector<2x128xf32> to vector<2x32xf32>
    %714 = vector.extract_strided_slice %711 {offsets = [0, 64], sizes = [2, 32], strides = [1, 1]} : vector<2x128xf32> to vector<2x32xf32>
    %715 = vector.extract_strided_slice %710 {offsets = [0, 96], sizes = [2, 32], strides = [1, 1]} : vector<2x128xf32> to vector<2x32xf32>
    %716 = arith.mulf %713, %688 : vector<2x32xf32>
    %717 = arith.mulf %712, %714 : vector<2x32xf32>
    %718 = arith.addf %716, %717 : vector<2x32xf32>
    %719 = math.tanh %718 : vector<2x32xf32>
    %720 = arith.mulf %715, %719 : vector<2x32xf32>
    %cst_257 = arith.constant dense<0.000000e+00> : vector<2x1xf32>
    %721 = tpu.matmul %720, %485, %cst_257 {dimension_numbers = #tpu.dot_dimension_numbers<[1], [0], [0], [1], [0, 0, 1, 1], [], []>} : vector<2x32xf32>, vector<32x1xf32>, vector<2x1xf32> -> vector<2x1xf32>
    %722 = vector.broadcast %486 : vector<1x1xf32> to vector<2x1xf32>
    %723 = arith.addf %721, %722 : vector<2x1xf32>
    %724 = arith.index_cast %c7_i32_251 : i32 to index
    %c0_258 = arith.constant 0 : index
    %c0_259 = arith.constant 0 : index
    %725 = vector.load %arg17[%724, %c0_258, %c0_259] : memref<8x2x1xf32, #tpu.memory_space<vmem>>, vector<1x2x1xf32>
    %726 = vector.shape_cast %725 : vector<1x2x1xf32> to vector<2x1xf32>
    %727 = vector.shape_cast %723 : vector<2x1xf32> to vector<1x2x1xf32>
    tpu.vector_store %arg17[%724, %c0_258, %c0_259], %727 {strides = array<i32>} : memref<8x2x1xf32, #tpu.memory_space<vmem>>, vector<1x2x1xf32>,
    %c8_i32_260 = arith.constant 8 : i32
    return
  }
}

</mosaic_0001>

<bundles_post_ra>
// kernel: tpu_custom_call.1
= control target key start
LH: loop header
LB: loop body
LE: loop exit
PB: predicated region body
PF: predicated region fallthrough
CT: control target
= control target key end

     0   :  { %v26335_v0 = vmov 0.0   ;;  %vm403_vm1 = vcmask 261120   ;;  %vm695_vm2 = vcmask 1046528   ;;  %vm691_vm3 = vcmask 56320   ;;  %s21927_s24 = smov 64   ;;  %s26315_s4 = inlined_call_operand.vmem [shape: f32[32,1024], index: 4, kind: input, shape index: {}]   ;;  %s26316_s3 = inlined_call_operand.vmem [shape: f32[7,1024], index: 3, kind: input, shape index: {}]   ;;  %s26317_s1 = inlined_call_operand.vmem [shape: f32[8,2,7], index: 1, kind: input, shape index: {}]   ;;  %s26318_s10 = inlined_call_operand.vmem [shape: f32[1024,32], index: 10, kind: input, shape index: {}]   ;;  %s26319_s5 = inlined_call_operand.vmem [shape: f32[1,1024], index: 5, kind: input, shape index: {}]   ;;  %s26320_s9 = inlined_call_operand.vmem [shape: f32[32,1024], index: 9, kind: input, shape index: {}]   ;;  %s26321_s7 = inlined_call_operand.vmem [shape: f32[32,64], index: 7, kind: input, shape index: {}]   ;;  %s26322_s11 = inlined_call_operand.vmem [shape: f32[1024,32], index: 11, kind: input, shape index: {}]   ;;  %s26323_s6 = inlined_call_operand.vmem [shape: f32[7,64], index: 6, kind: input, shape index: {}]   ;;  %s26324_s8 = inlined_call_operand.vmem [shape: f32[1,64], index: 8, kind: input, shape index: {}]   ;;  %s26325_s0 = inlined_call_operand.vmem [shape: f32[8,2,1], index: 0, kind: input, shape index: {}]   ;;  %s26326_s13 = inlined_call_operand.vmem [shape: f32[32,128], index: 13, kind: input, shape index: {}]   ;;  %s26327_s12 = inlined_call_operand.vmem [shape: f32[6,128], index: 12, kind: input, shape index: {}]   ;;  %s26328_s2 = inlined_call_operand.vmem [shape: f32[8,2,6], index: 2, kind: input, shape index: {}]   ;;  %s26329_s14 = inlined_call_operand.vmem [shape: f32[1,128], index: 14, kind: input, shape index: {}]   ;;  %s26330_s15 = inlined_call_operand.vmem [shape: f32[32,1], index: 15, kind: input, shape index: {}]   ;;  %s26331_s16 = inlined_call_operand.<no memory space> [shape: f32[1,1], index: 16, kind: input, shape index: {}]   ;;  %s26332_s17 = inlined_call_operand.vmem [shape: f32[8,2,1], index: 17, kind: output, shape index: {}]  }
   0x1   :  { %26731 = sst [smem:[#allocation175_spill]] %s26315_s4  ;;  %397 = vadd.xlane.f32.xlu0 %v26335_v0  ;;  %471 = vmatprep.mubr.f32.mxu0 %v26335_v0  ;;  %v22199_v58 = vld [vmem:[%s26317_s1] sm:$0x3]  ;;  %v154_v63 = vld [vmem:[%s26318_s10 + $0x88] sm:$0xff]  ;;  %vm1053_vm4 = vcmask 1041408   ;;  %vm21923_vm5 = vmmov 0  }
   0x2   :  { %26732 = sst [smem:[#allocation176_spill]] %s26316_s3  ;;  %542 = vmatprep.mubr.f32.mxu1 %v26335_v0  ;;  %s26733_s26 = sld [smem:[#allocation175_spill]]  ;;  %v153_v62 = vld [vmem:[%s26318_s10 + $0x80] sm:$0xff]  ;;  %vm1822_vm6 = vcmask 254976   ;;  %vm13894_vm14 = vcmask 1045504   ;;  %vm13890_vm15 = vcmask 48128  }
   0x3   :  { %s26750_s3 = sld [smem:[#allocation176_spill]]  ;;  %s21926_s4 = smov 96  }
   0x8   :  { %v67_v1 = vld [vmem:[%s26733_s26 + $0x8] sm:$0xff]  ;;  %v69_v3 = vld [vmem:[%s26733_s26 + $0x18] sm:$0xff]  ;;  %v66_v6 = vld [vmem:[%s26733_s26] sm:$0xff] }
   0x9   :  { %v75_v2 = vld [vmem:[%s26733_s26 + $0x48] sm:$0xff]  ;;  %v77_v5 = vld [vmem:[%s26733_s26 + $0x58] sm:$0xff]  ;;  %v74_v7 = vld [vmem:[%s26733_s26 + $0x40] sm:$0xff] }
   0xa   :  { %v22030_v4 = vpack.c.bf16 %v75_v2, %v67_v1  ;;  %v22041_v8 = vpack.c.bf16 %v77_v5, %v69_v3  ;;  %v22043_v9 = vpack.c.bf16 %v74_v7, %v66_v6  ;;  %v68_v10 = vld [vmem:[%s26733_s26 + $0x10] sm:$0xff]  ;;  %v83_v13 = vld [vmem:[%s26733_s26 + $0x88] sm:$0xff]  ;;  %v85_v15 = vld [vmem:[%s26733_s26 + $0x98] sm:$0xff]  ;;  %v22235_v2 = vpack.c.bf16 %v154_v63, %v153_v62 }
   0xb   :  { %v76_v11 = vld [vmem:[%s26733_s26 + $0x50] sm:$0xff]  ;;  %v91_v14 = vld [vmem:[%s26733_s26 + $0xc8] sm:$0xff]  ;;  %v93_v17 = vld [vmem:[%s26733_s26 + $0xd8] sm:$0xff] }
   0xc   :  { %26734 = vst [vmem:[#allocation3_spill] sm:$0xff] %v22030_v4  ;;  %26735 = vst [vmem:[#allocation4_spill] sm:$0xff] %v22041_v8  ;;  %18818 = vmatprep.subr.bf16.mxu0 %v22030_v4  ;;  %v22052_v12 = vpack.c.bf16 %v76_v11, %v68_v10  ;;  %18826 = vmatprep.subr.bf16.mxu1 %v22041_v8  ;;  %v22066_v16 = vpack.c.bf16 %v91_v14, %v83_v13  ;;  %v82_v18 = vld [vmem:[%s26733_s26 + $0x80] sm:$0xff]  ;;  %v84_v22 = vld [vmem:[%s26733_s26 + $0x90] sm:$0xff] }
   0xd   :  { %26736 = vst [vmem:[#allocation5_spill] sm:$0xff] %v22043_v9  ;;  %18820 = vmatpush1.bf16.msra.mxu0 %v22043_v9  ;;  %v90_v19 = vld [vmem:[%s26733_s26 + $0xc0] sm:$0xff]  ;;  %v22077_v20 = vpack.c.bf16 %v93_v17, %v85_v15  ;;  %v92_v23 = vld [vmem:[%s26733_s26 + $0xd0] sm:$0xff]  ;;  %v71_v25 = vld [vmem:[%s26733_s26 + $0x28] sm:$0xff] }
   0xe   :  { %26737 = vst [vmem:[#allocation6_spill] sm:$0xff] %v22052_v12  ;;  %18828 = vmatpush1.bf16.msra.mxu1 %v22052_v12  ;;  %26738 = vst [vmem:[#allocation7_spill] sm:$0xff] %v22066_v16  ;;  %v22079_v21 = vpack.c.bf16 %v90_v19, %v82_v18  ;;  %18822 = vmatprep.subr.bf16.mxu0 %v22066_v16  ;;  %v22088_v24 = vpack.c.bf16 %v92_v23, %v84_v22  ;;  %v79_v26 = vld [vmem:[%s26733_s26 + $0x68] sm:$0xff]  ;;  %v73_v27 = vld [vmem:[%s26733_s26 + $0x38] sm:$0xff] }
   0xf   :  { %26739 = vst [vmem:[#allocation8_spill] sm:$0xff] %v22077_v20  ;;  %18830 = vmatprep.subr.bf16.mxu1 %v22077_v20  ;;  %v22102_v28 = vpack.c.bf16 %v79_v26, %v71_v25  ;;  %v81_v29 = vld [vmem:[%s26733_s26 + $0x78] sm:$0xff]  ;;  %v70_v33 = vld [vmem:[%s26733_s26 + $0x20] sm:$0xff]  ;;  %v72_v35 = vld [vmem:[%s26733_s26 + $0x30] sm:$0xff] }
  0x10   :  { %26740 = vst [vmem:[#allocation9_spill] sm:$0xff] %v22079_v21  ;;  %26741 = vst [vmem:[#allocation10_spill] sm:$0xff] %v22088_v24  ;;  %v22107_v30 = vpack.c.bf16 %v81_v29, %v73_v27  ;;  %v78_v34 = vld [vmem:[%s26733_s26 + $0x60] sm:$0xff]  ;;  %v80_v36 = vld [vmem:[%s26733_s26 + $0x70] sm:$0xff] }
  0x11   :  { %18824 = vmatpush1.bf16.msra.mxu0 %v22079_v21  ;;  %26742 = vst [vmem:[#allocation11_spill] sm:$0xff] %v22102_v28  ;;  %v87_v37 = vld [vmem:[%s26733_s26 + $0xa8] sm:$0xff]  ;;  %v89_v39 = vld [vmem:[%s26733_s26 + $0xb8] sm:$0xff]  ;;  %v22135_v42 = vpack.c.bf16 %v78_v34, %v70_v33  ;;  %v22137_v43 = vpack.c.bf16 %v80_v36, %v72_v35  ;;  %v86_v44 = vld [vmem:[%s26733_s26 + $0xa0] sm:$0xff] }
  0x12   :  { %18832 = vmatpush1.bf16.msra.mxu1 %v22088_v24  ;;  %26743 = vst [vmem:[#allocation12_spill] sm:$0xff] %v22107_v30  ;;  %18834 = vmatprep.subr.bf16.mxu0 %v22102_v28  ;;  %v95_v38 = vld [vmem:[%s26733_s26 + $0xe8] sm:$0xff]  ;;  %v97_v40 = vld [vmem:[%s26733_s26 + $0xf8] sm:$0xff]  ;;  %v94_v48 = vld [vmem:[%s26733_s26 + $0xe0] sm:$0xff] }
  0x13   :  { %18842 = vmatprep.subr.bf16.mxu1 %v22107_v30  ;;  %26744 = vst [vmem:[#allocation13_spill] sm:$0xff] %v22135_v42  ;;  %26745 = vst [vmem:[#allocation14_spill] sm:$0xff] %v22137_v43  ;;  %v22144_v46 = vpack.c.bf16 %v95_v38, %v87_v37  ;;  %v22146_v47 = vpack.c.bf16 %v97_v40, %v89_v39  ;;  %v88_v49 = vld [vmem:[%s26733_s26 + $0xb0] sm:$0xff]  ;;  %v22163_v51 = vpack.c.bf16 %v94_v48, %v86_v44  ;;  %v59_v53 = vld [vmem:[%s26750_s3 + $0x8] sm:$0x7f] }
  0x14   :  { %v96_v50 = vld [vmem:[%s26733_s26 + $0xf0] sm:$0xff]  ;;  %v63_v54 = vld [vmem:[%s26750_s3 + $0x28] sm:$0x7f]  ;;  %v58_v55 = vld [vmem:[%s26750_s3] sm:$0x7f]  ;;  %26751 = vst [vmem:[#allocation19_spill] sm:$0xff] %v22235_v2 }
  0x15   :  { %26746 = vst [vmem:[#allocation15_spill] sm:$0xff] %v22144_v46  ;;  %26747 = vst [vmem:[#allocation16_spill] sm:$0xff] %v22146_v47  ;;  %v22165_v52 = vpack.c.bf16 %v96_v50, %v88_v49  ;;  %v61_v56 = vld [vmem:[%s26750_s3 + $0x18] sm:$0x7f]  ;;  %v62_v57 = vld [vmem:[%s26750_s3 + $0x20] sm:$0x7f] }
  0x16   :  { %26748 = vst [vmem:[#allocation17_spill] sm:$0xff] %v22163_v51  ;;  %v60_v59 = vld [vmem:[%s26750_s3 + $0x10] sm:$0x7f]  ;;  %v65_v60 = vld [vmem:[%s26750_s3 + $0x38] sm:$0x7f]  ;;  %v185_v1 = vld [vmem:[%s26318_s10 + $0x180] sm:$0xff] }
  0x17   :  { %26749 = vst [vmem:[#allocation18_spill] sm:$0xff] %v22165_v52  ;;  %v64_v61 = vld [vmem:[%s26750_s3 + $0x30] sm:$0x7f]  ;;  %v186_v3 = vld [vmem:[%s26318_s10 + $0x188] sm:$0xff]  ;;  %v137_v5 = vld [vmem:[%s26318_s10] sm:$0xff] }
  0x18   :  { %v138_v6 = vld [vmem:[%s26318_s10 + $0x8] sm:$0xff]  ;;  %v22246_v7 = vpack.c.bf16 %v186_v3, %v185_v1  ;;  %v169_v11 = vld [vmem:[%s26318_s10 + $0x100] sm:$0xff]  ;;  %v155_v14 = vld [vmem:[%s26318_s10 + $0x90] sm:$0xff] }
  0x19   :  { %v22248_v10 = vpack.c.bf16 %v138_v6, %v137_v5  ;;  %v170_v13 = vld [vmem:[%s26318_s10 + $0x108] sm:$0xff]  ;;  %v156_v17 = vld [vmem:[%s26318_s10 + $0x98] sm:$0xff]  ;;  %v187_v18 = vld [vmem:[%s26318_s10 + $0x190] sm:$0xff] }
  0x1a   :  { %26752 = vst [vmem:[#allocation20_spill] sm:$0xff] %v22246_v7  ;;  %v22260_v15 = vpack.c.bf16 %v170_v13, %v169_v11  ;;  %v188_v19 = vld [vmem:[%s26318_s10 + $0x198] sm:$0xff]  ;;  %v22273_v22 = vpack.c.bf16 %v156_v17, %v155_v14  ;;  %v139_v25 = vld [vmem:[%s26318_s10 + $0x10] sm:$0xff]  ;;  %v158_v33 = vld [vmem:[%s26318_s10 + $0xa8] sm:$0xff] }
  0x1b   :  { %26753 = vst [vmem:[#allocation21_spill] sm:$0xff] %v22248_v10  ;;  %v22275_v23 = vpack.c.bf16 %v188_v19, %v187_v18  ;;  %v140_v26 = vld [vmem:[%s26318_s10 + $0x18] sm:$0xff]  ;;  %v171_v27 = vld [vmem:[%s26318_s10 + $0x110] sm:$0xff]  ;;  %v189_v36 = vld [vmem:[%s26318_s10 + $0x1a0] sm:$0xff]  ;;  %v1005_v19 = vlaneseq }
  0x1c   :  { %26754 = vst [vmem:[#allocation22_spill] sm:$0xff] %v22260_v15  ;;  %26755 = vst [vmem:[#allocation23_spill] sm:$0xff] %v22273_v22  ;;  %v22287_v29 = vpack.c.bf16 %v140_v26, %v139_v25  ;;  %v190_v37 = vld [vmem:[%s26318_s10 + $0x1a8] sm:$0xff]  ;;  %v141_v38 = vld [vmem:[%s26318_s10 + $0x20] sm:$0xff] }
  0x1d   :  { %26756 = vst [vmem:[#allocation24_spill] sm:$0xff] %v22275_v23  ;;  %v22313_v39 = vpack.c.bf16 %v190_v37, %v189_v36  ;;  %v142_v40 = vld [vmem:[%s26318_s10 + $0x28] sm:$0xff]  ;;  %v159_v49 = vld [vmem:[%s26318_s10 + $0xb0] sm:$0xff]  ;;  %v160_v50 = vld [vmem:[%s26318_s10 + $0xb8] sm:$0xff]  ;;  %v1006_v25 = vshrl.u32 %v1005_v19, 7 }
  0x1e   :  { %26757 = vst [vmem:[#allocation25_spill] sm:$0xff] %v22287_v29  ;;  %v174_v44 = vld [vmem:[%s26318_s10 + $0x128] sm:$0xff]  ;;  %v22325_v48 = vpack.c.bf16 %v142_v40, %v141_v38  ;;  %v176_v62 = vld [vmem:[%s26318_s10 + $0x138] sm:$0xff]  ;;  %v161_v63 = vld [vmem:[%s26318_s10 + $0xc0] sm:$0xff] }
  0x1f   :  { %26760 = vst [vmem:[#allocation28_spill] sm:$0xff] %v22313_v39  ;;  %v162_v1 = vld [vmem:[%s26318_s10 + $0xc8] sm:$0xff]  ;;  %v193_v3 = vld [vmem:[%s26318_s10 + $0x1c0] sm:$0xff]  ;;  %v1007_v26 = vsub.s32 0, %v1006_v25  ;;  %v1015_v36 = vsub.s32 2, %v1006_v25  ;;  %v1019_v38 = vsub.s32 3, %v1006_v25 }
  0x20   :  { %26761 = vst [vmem:[#allocation29_spill] sm:$0xff] %v22325_v48  ;;  %v194_v5 = vld [vmem:[%s26318_s10 + $0x1c8] sm:$0xff]  ;;  %v22379_v13 = vpack.c.bf16 %v162_v1, %v161_v63 }
  0x21   :  { %v22382_v14 = vpack.c.bf16 %v194_v5, %v193_v3 }
  0x22   :  { %26767 = vst [vmem:[#allocation35_spill] sm:$0xff] %v22379_v13 }
  0x23   :  { %26768 = vst [vmem:[#allocation36_spill] sm:$0xff] %v22382_v14 }
  0x8e   :  { %v398_v31 = vpop.xlane.xlu0 %397 }
  0x8f   :  { %vm399_vm0 = vcmp.eq.f32.partialorder %v398_v31, 0.0 }
  0x90   :  { %v400_v32 = vsel %vm399_vm0, 1.0, %v398_v31  ;;  %v172_v31 = vld [vmem:[%s26318_s10 + $0x118] sm:$0xff]  ;;  %vm14084_vm0 = vcmask 1024  }
  0x91   :  { %21594 = vrcp.f32 %v400_v32  ;;  %v157_v32 = vld [vmem:[%s26318_s10 + $0xa0] sm:$0xff]  ;;  %v22300_v34 = vpack.c.bf16 %v172_v31, %v171_v27  ;;  %v1023_v27 = vsub.s32 4, %v1006_v25 }
  0x92   :  { %v22302_v35 = vpack.c.bf16 %v158_v33, %v157_v32  ;;  %v98_v31 = vld [vmem:[%s26319_s5] sm:$0xff]  ;;  %v1011_v32 = vsub.s32 1, %v1006_v25  ;;  %v1027_v33 = vsub.s32 5, %v1006_v25 }
  0x93   :  { %26758 = vst [vmem:[#allocation26_spill] sm:$0xff] %v22300_v34  ;;  %v22401_v1 = vrot.slane %v98_v31, %v1019_v38 }
  0x94   :  { %26759 = vst [vmem:[#allocation27_spill] sm:$0xff] %v22302_v35 }
  0x95   :  { %26774 = vst [vmem:[#allocation42_spill] sm:$0xff] %v22401_v1 }
  0x9b   :  { %v21595_v41 = vpop.eup %21594 }
  0x9c   :  { %v22142_v45 = vmul.f32 0.0, %v21595_v41  ;;  %v173_v41 = vld [vmem:[%s26318_s10 + $0x120] sm:$0xff] }
  0x9e   :  { %15819 = vmatmul.mubr.msk.f32.vlgmr.msra.gmra.mrb[0].mxu0 %vm403_vm1, %v22142_v45  ;;  %15820 = vmatmul.mubr.msk.f32.vlgmr.msra.gmra.mrb[0].mxu1 %vm403_vm1, %v22142_v45 }
  0x9f   :  { %18836 = vmatpush1.bf16.msra.mxu0 %v22135_v42  ;;  %18844 = vmatpush1.bf16.msra.mxu1 %v22137_v43 }
  0xa0   :  { %18838 = vmatprep.subr.bf16.mxu0 %v22144_v46  ;;  %18846 = vmatprep.subr.bf16.mxu1 %v22146_v47 }
  0xa1   :  { %613 = vmatprep.mubr.f32.mxu0 %v26335_v0  ;;  %684 = vmatprep.mubr.f32.mxu1 %v26335_v0 }
  0xa3   :  { %18840 = vmatpush1.bf16.msra.mxu0 %v22163_v51  ;;  %18848 = vmatpush1.bf16.msra.mxu1 %v22165_v52 }
  0xa4   :  { %15823 = vmatprep.subr.msk.mxu1 %vm695_vm2, %v59_v53  ;;  %15829 = vmatprep.subr.msk.mxu0 %vm695_vm2, %v63_v54  ;;  %v191_v53 = vld [vmem:[%s26318_s10 + $0x1b0] sm:$0xff]  ;;  %v22338_v54 = vpack.c.bf16 %v174_v44, %v173_v41  ;;  %v22391_v41 = vrot.slane %v98_v31, %v1007_v26 }
  0xa6   :  { %15821 = vmatmul.mubr.msk.f32.vlgmr.msra.gmra.mrb[2].mxu0 %vm403_vm1, %v22142_v45  ;;  %15822 = vmatmul.mubr.msk.f32.vlgmr.msra.gmra.mrb[2].mxu1 %vm403_vm1, %v22142_v45  ;;  %26762 = vst [vmem:[#allocation30_spill] sm:$0xff] %v22338_v54  ;;  %26769 = vst [vmem:[#allocation37_spill] sm:$0xff] %v22391_v41 }
  0xa7   :  { %15824 = vmatpush1.msk.msra.mxu1 %vm695_vm2, %v58_v55  ;;  %784 = vmatprep.mubr.f32.mxu1 %v26335_v0  ;;  %v22340_v55 = vpack.c.bf16 %v160_v50, %v159_v49  ;;  %v22393_v49 = vrot.slane %v98_v31, %v1023_v27  ;;  %v1031_v50 = vsub.s32 6, %v1006_v25 }
  0xa8   :  { %15826 = vmatprep.subr.msk.mxu1 %vm695_vm2, %v61_v56  ;;  %15830 = vmatpush1.msk.msra.mxu0 %vm695_vm2, %v62_v57  ;;  %v192_v56 = vld [vmem:[%s26318_s10 + $0x1b8] sm:$0xff]  ;;  %v143_v57 = vld [vmem:[%s26318_s10 + $0x30] sm:$0xff] }
  0xa9   :  { %926 = vmatprep.mubr.f32.mxu0 %v26335_v0  ;;  %18850 = vmatprep.subr.bf16.mxu0 %v22235_v2  ;;  %26763 = vst [vmem:[#allocation31_spill] sm:$0xff] %v22340_v55  ;;  %26770 = vst [vmem:[#allocation38_spill] sm:$0xff] %v22393_v49  ;;  %v22406_v19 = vrot.slane %v98_v31, %v1031_v50 }
  0xaa   :  { %15825 = vmatmul.mubr.msk.f32.vlgmr.msra.gmra.mrb[4].mxu1 %vm691_vm3, %v22199_v58 }
  0xab   :  { %15827 = vmatpush1.msk.msra.mxu1 %vm695_vm2, %v60_v59  ;;  %855 = vmatprep.mubr.f32.mxu1 %v26335_v0  ;;  %v144_v59 = vld [vmem:[%s26318_s10 + $0x38] sm:$0xff]  ;;  %26775 = vst [vmem:[#allocation43_spill] sm:$0xff] %v22406_v19 }
  0xac   :  { %15832 = vmatprep.subr.msk.mxu1 %vm695_vm2, %v65_v60  ;;  %v22352_v60 = vpack.c.bf16 %v192_v56, %v191_v53  ;;  %v22373_v6 = vpack.c.bf16 %v144_v59, %v143_v57  ;;  %v22395_v56 = vrot.slane %v98_v31, %v1011_v32  ;;  %v22397_v57 = vrot.slane %v98_v31, %v1027_v33 }
  0xad   :  { %v1035_v59 = vsub.s32 7, %v1006_v25 }
  0xae   :  { %15828 = vmatmul.mubr.msk.f32.vlgmr.msra.gmra.mrb[0].mxu1 %vm691_vm3, %v22199_v58  ;;  %15831 = vmatmul.mubr.msk.f32.vlgmr.msra.gmra.mrb[2].mxu0 %vm691_vm3, %v22199_v58  ;;  %26764 = vst [vmem:[#allocation32_spill] sm:$0xff] %v22352_v60  ;;  %26765 = vst [vmem:[#allocation33_spill] sm:$0xff] %v22373_v6 }
  0xaf   :  { %15833 = vmatpush1.msk.msra.mxu1 %vm695_vm2, %v64_v61  ;;  %997 = vmatprep.mubr.f32.mxu1 %v26335_v0  ;;  %v175_v61 = vld [vmem:[%s26318_s10 + $0x130] sm:$0xff]  ;;  %26771 = vst [vmem:[#allocation39_spill] sm:$0xff] %v22395_v56  ;;  %26772 = vst [vmem:[#allocation40_spill] sm:$0xff] %v22397_v57  ;;  %v22417_v27 = vrot.slane %v98_v31, %v1035_v59 }
  0xb0   :  { %18882 = vmatprep.subr.bf16.mxu1 %v22246_v7  ;;  %18852 = vmatpush3.bf16.msra.mxu0 %v22248_v10  ;;  %v22377_v11 = vpack.c.bf16 %v176_v62, %v175_v61  ;;  %v22399_v61 = vrot.slane %v98_v31, %v1015_v36 }
  0xb1   :  { %18854 = vmatprep.subr.bf16.mxu0 %v22273_v22  ;;  %26776 = vst [vmem:[#allocation44_spill] sm:$0xff] %v22417_v27 }
  0xb2   :  { %15834 = vmatmul.mubr.msk.f32.vlgmr.msra.gmra.mrb[2].mxu1 %vm691_vm3, %v22199_v58  ;;  %26766 = vst [vmem:[#allocation34_spill] sm:$0xff] %v22377_v11  ;;  %26773 = vst [vmem:[#allocation41_spill] sm:$0xff] %v22399_v61 }
  0xb3   :  { %18884 = vmatpush3.bf16.msra.mxu1 %v22260_v15 }
  0xb4   :  { %18886 = vmatprep.subr.bf16.mxu1 %v22275_v23  ;;  %18856 = vmatpush3.bf16.msra.mxu0 %v22287_v29 }
  0xb5   :  { %18858 = vmatprep.subr.bf16.mxu0 %v22302_v35 }
  0xb7   :  { %18888 = vmatpush3.bf16.msra.mxu1 %v22300_v34 }
  0xb8   :  { %18890 = vmatprep.subr.bf16.mxu1 %v22313_v39  ;;  %18860 = vmatpush3.bf16.msra.mxu0 %v22325_v48 }
  0xb9   :  { %18862 = vmatprep.subr.bf16.mxu0 %v22340_v55 }
  0xbb   :  { %18892 = vmatpush3.bf16.msra.mxu1 %v22338_v54 }
  0xbc   :  { %18894 = vmatprep.subr.bf16.mxu1 %v22352_v60  ;;  %18864 = vmatpush3.bf16.msra.mxu0 %v22373_v6 }
  0xbd   :  { %18866 = vmatprep.subr.bf16.mxu0 %v22379_v13 }
  0xbf   :  { %18896 = vmatpush3.bf16.msra.mxu1 %v22377_v11 }
  0xc0   :  { %18898 = vmatprep.subr.bf16.mxu1 %v22382_v14 }
 0x171   :  { %v473_v17 = vpop.f32.mrb[0].mxu0 }
 0x172   :  { %v475_v18 = vpop.f32.mrb[1].mxu0 }
 0x17d   :  { %v786_v37 = vpop.f32.mrb[4].mxu1 }
 0x17e   :  { %v787_v40 = vadd.f32 %v786_v37, %v473_v17  ;;  %v788_v44 = vpop.f32.mrb[5].mxu1 }
 0x17f   :  { %v789_v53 = vadd.f32 %v788_v44, %v475_v18 }
 0x180   :  { %v22409_v18 = vadd.f32 %v22391_v41, %v787_v40 }
 0x181   :  { %v857_v62 = vpop.f32.mrb[0].mxu1  ;;  %v928_v63 = vpop.f32.mrb[2].mxu0  ;;  %v22412_v26 = vadd.f32 %v22395_v56, %v789_v53  ;;  %v152_v56 = vld [vmem:[%s26318_s10 + $0x78] sm:$0xff] }
 0x182   :  { %v22404_v3 = vadd.f32 %v22393_v49, %v928_v63  ;;  %v859_v5 = vpop.f32.mrb[1].mxu1  ;;  %v930_v17 = vpop.f32.mrb[3].mxu0  ;;  %v22420_v32 = vadd.f32 %v22399_v61, %v857_v62  ;;  %v1054_v31 = vsel %vm1053_vm4, %v22409_v18, -inf  ;;  %v183_v61 = vld [vmem:[%s26318_s10 + $0x170] sm:$0xff] }
 0x183   :  { %v22415_v25 = vadd.f32 %v22397_v57, %v930_v17  ;;  %v22425_v36 = vadd.f32 %v22401_v1, %v859_v5  ;;  %v1055_v50 = vsel %vm1053_vm4, %v22412_v26, -inf }
 0x184   :  { %v1058_v33 = vsel %vm1053_vm4, %v22404_v3, -inf  ;;  %v1056_v59 = vsel %vm1053_vm4, %v22420_v32, -inf }
 0x185   :  { %v1060_v37 = vsel %vm1053_vm4, %v22415_v25, -inf  ;;  %v999_v38 = vpop.f32.mrb[2].mxu1  ;;  %v1059_v62 = vmax.f32 %v1054_v31, %v1058_v33  ;;  %v1057_v17 = vsel %vm1053_vm4, %v22425_v36, -inf  ;;  %v145_v33 = vld [vmem:[%s26318_s10 + $0x40] sm:$0xff] }
 0x186   :  { %v22430_v40 = vadd.f32 %v22406_v19, %v999_v38  ;;  %v1001_v44 = vpop.f32.mrb[3].mxu1  ;;  %v1061_v63 = vmax.f32 %v1055_v50, %v1060_v37  ;;  %v146_v37 = vld [vmem:[%s26318_s10 + $0x48] sm:$0xff]  ;;  %v177_v31 = vld [vmem:[%s26318_s10 + $0x140] sm:$0xff] }
 0x187   :  { %v22437_v53 = vadd.f32 %v22417_v27, %v1001_v44  ;;  %v22456_v50 = vpack.c.bf16 %v146_v37, %v145_v33  ;;  %v179_v33 = vld [vmem:[%s26318_s10 + $0x150] sm:$0xff]  ;;  %v180_v37 = vld [vmem:[%s26318_s10 + $0x158] sm:$0xff] }
 0x188   :  { %v1062_v5 = vsel %vm1053_vm4, %v22430_v40, -inf  ;;  %v1066_v19 = vmax.f32 %v1059_v62, %v1061_v63  ;;  %v196_v63 = vld [vmem:[%s26318_s10 + $0x1d8] sm:$0xff]  ;;  %v167_v27 = vld [vmem:[%s26318_s10 + $0xf0] sm:$0xff] }
 0x189   :  { %v1063_v38 = vmax.f32 %v1056_v59, %v1062_v5  ;;  %v1064_v0 = vsel %vm1053_vm4, %v22437_v53, -inf  ;;  %26777 = vst [vmem:[#allocation45_spill] sm:$0xff] %v22456_v50  ;;  %18868 = vmatpush3.bf16.msra.mxu0 %v22456_v50  ;;  %v195_v59 = vld [vmem:[%s26318_s10 + $0x1d0] sm:$0xff] }
 0x18a   :  { %v1065_v57 = vmax.f32 %v1057_v17, %v1064_v0  ;;  %v178_v0 = vld [vmem:[%s26318_s10 + $0x148] sm:$0xff]  ;;  %v147_v5 = vld [vmem:[%s26318_s10 + $0x50] sm:$0xff]  ;;  %v148_v17 = vld [vmem:[%s26318_s10 + $0x58] sm:$0xff] }
 0x18c   :  { %v1067_v49 = vmax.f32 %v1063_v38, %v1065_v57  ;;  %v163_v57 = vld [vmem:[%s26318_s10 + $0xd0] sm:$0xff]  ;;  %v22485_v38 = vpack.c.bf16 %v196_v63, %v195_v59  ;;  %v198_v63 = vld [vmem:[%s26318_s10 + $0x1e8] sm:$0xff] }
 0x18e   :  { %v1068_v44 = vmax.f32 %v1066_v19, %v1067_v49  ;;  %v22461_v49 = vpack.c.bf16 %v178_v0, %v177_v31  ;;  %v164_v19 = vld [vmem:[%s26318_s10 + $0xd8] sm:$0xff]  ;;  %26780 = vst [vmem:[#allocation48_spill] sm:$0xff] %v22485_v38  ;;  %v22496_v31 = vpack.c.bf16 %v180_v37, %v179_v33  ;;  %v165_v0 = vld [vmem:[%s26318_s10 + $0xe0] sm:$0xff] }
 0x18f   :  { %v22474_v62 = vpack.c.bf16 %v164_v19, %v163_v57  ;;  %v166_v57 = vld [vmem:[%s26318_s10 + $0xe8] sm:$0xff]  ;;  %v197_v19 = vld [vmem:[%s26318_s10 + $0x1e0] sm:$0xff] }
 0x190   :  { %1069 = vmax.xlane.f32.xlu0 %v1068_v44  ;;  %26778 = vst [vmem:[#allocation46_spill] sm:$0xff] %v22461_v49  ;;  %18900 = vmatpush3.bf16.msra.mxu1 %v22461_v49  ;;  %v22487_v44 = vpack.c.bf16 %v148_v17, %v147_v5  ;;  %26782 = vst [vmem:[#allocation50_spill] sm:$0xff] %v22496_v31  ;;  %v22510_v59 = vpack.c.bf16 %v166_v57, %v165_v0  ;;  %v149_v5 = vld [vmem:[%s26318_s10 + $0x60] sm:$0xff]  ;;  %v150_v17 = vld [vmem:[%s26318_s10 + $0x68] sm:$0xff] }
 0x191   :  { %26779 = vst [vmem:[#allocation47_spill] sm:$0xff] %v22474_v62  ;;  %18870 = vmatprep.subr.bf16.mxu0 %v22474_v62  ;;  %18902 = vmatprep.subr.bf16.mxu1 %v22485_v38  ;;  %v22521_v33 = vpack.c.bf16 %v198_v63, %v197_v19  ;;  %v22523_v37 = vpack.c.bf16 %v150_v17, %v149_v5  ;;  %v181_v0 = vld [vmem:[%s26318_s10 + $0x160] sm:$0xff]  ;;  %v182_v57 = vld [vmem:[%s26318_s10 + $0x168] sm:$0xff]  ;;  %v168_v19 = vld [vmem:[%s26318_s10 + $0xf8] sm:$0xff] }
 0x192   :  { %26781 = vst [vmem:[#allocation49_spill] sm:$0xff] %v22487_v44  ;;  %18872 = vmatpush3.bf16.msra.mxu0 %v22487_v44  ;;  %26783 = vst [vmem:[#allocation51_spill] sm:$0xff] %v22510_v59  ;;  %v22535_v1 = vpack.c.bf16 %v182_v57, %v181_v0  ;;  %v199_v63 = vld [vmem:[%s26318_s10 + $0x1f0] sm:$0xff]  ;;  %v200_v5 = vld [vmem:[%s26318_s10 + $0x1f8] sm:$0xff]  ;;  %v22548_v17 = vpack.c.bf16 %v168_v19, %v167_v27 }
 0x193   :  { %26784 = vst [vmem:[#allocation52_spill] sm:$0xff] %v22521_v33  ;;  %26785 = vst [vmem:[#allocation53_spill] sm:$0xff] %v22523_v37  ;;  %18874 = vmatprep.subr.bf16.mxu0 %v22510_v59  ;;  %v22550_v0 = vpack.c.bf16 %v200_v5, %v199_v63  ;;  %v151_v57 = vld [vmem:[%s26318_s10 + $0x70] sm:$0xff]  ;;  %v184_v27 = vld [vmem:[%s26318_s10 + $0x178] sm:$0xff] }
 0x194   :  { %18904 = vmatpush3.bf16.msra.mxu1 %v22496_v31  ;;  %26786 = vst [vmem:[#allocation54_spill] sm:$0xff] %v22535_v1  ;;  %26787 = vst [vmem:[#allocation55_spill] sm:$0xff] %v22548_v17  ;;  %v22562_v41 = vpack.c.bf16 %v152_v56, %v151_v57  ;;  %v22569_v19 = vpack.c.bf16 %v184_v27, %v183_v61  ;;  %v217_v63 = vld [vmem:[%s26318_s10 + $0x280] sm:$0xff]  ;;  %v218_v5 = vld [vmem:[%s26318_s10 + $0x288] sm:$0xff] }
 0x195   :  { %18906 = vmatprep.subr.bf16.mxu1 %v22521_v33  ;;  %26788 = vst [vmem:[#allocation56_spill] sm:$0xff] %v22550_v0  ;;  %v249_v56 = vld [vmem:[%s26318_s10 + $0x380] sm:$0xff]  ;;  %v22581_v57 = vpack.c.bf16 %v218_v5, %v217_v63  ;;  %v250_v61 = vld [vmem:[%s26318_s10 + $0x388] sm:$0xff]  ;;  %v207_v44 = vld [vmem:[%s26318_s10 + $0x230] sm:$0xff] }
 0x196   :  { %18876 = vmatpush3.bf16.msra.mxu0 %v22523_v37  ;;  %26789 = vst [vmem:[#allocation57_spill] sm:$0xff] %v22562_v41  ;;  %26790 = vst [vmem:[#allocation58_spill] sm:$0xff] %v22569_v19  ;;  %v22587_v27 = vpack.c.bf16 %v250_v61, %v249_v56  ;;  %v235_v37 = vld [vmem:[%s26318_s10 + $0x310] sm:$0xff]  ;;  %v253_v33 = vld [vmem:[%s26318_s10 + $0x3a0] sm:$0xff] }
 0x197   :  { %18878 = vmatprep.subr.bf16.mxu0 %v22548_v17  ;;  %26791 = vst [vmem:[#allocation59_spill] sm:$0xff] %v22581_v57 }
 0x198   :  { %18908 = vmatpush3.bf16.msra.mxu1 %v22535_v1  ;;  %26792 = vst [vmem:[#allocation60_spill] sm:$0xff] %v22587_v27 }
 0x199   :  { %18910 = vmatprep.subr.bf16.mxu1 %v22550_v0 }
 0x19a   :  { %18880 = vmatpush3.bf16.msra.mxu0 %v22562_v41 }
 0x19b   :  { %18914 = vmatprep.subr.bf16.mxu0 %v22581_v57 }
 0x19c   :  { %18912 = vmatpush3.bf16.msra.mxu1 %v22569_v19 }
 0x19d   :  { %18946 = vmatprep.subr.bf16.mxu1 %v22587_v27 }
 0x21d   :  { %v22591_v0 = vpop.xlane.xlu0 %1069 }
 0x21e   :  { %v1071_v17 = vsub.f32 %v22409_v18, %v22591_v0  ;;  %v1072_v63 = vsub.f32 %v22412_v26, %v22591_v0  ;;  %v1073_v5 = vsub.f32 %v22420_v32, %v22591_v0  ;;  %v1074_v19 = vsub.f32 %v22425_v36, %v22591_v0  ;;  %v201_v32 = vld [vmem:[%s26318_s10 + $0x200] sm:$0xff]  ;;  %v219_v36 = vld [vmem:[%s26318_s10 + $0x290] sm:$0xff] }
 0x21f   :  { %v1076_v56 = vsub.f32 %v22415_v25, %v22591_v0  ;;  %v1078_v41 = vsub.f32 %v22437_v53, %v22591_v0  ;;  %v202_v25 = vld [vmem:[%s26318_s10 + $0x208] sm:$0xff]  ;;  %v220_v53 = vld [vmem:[%s26318_s10 + $0x298] sm:$0xff] }
 0x220   :  { %v1079_v61 = vmul.f32 1.442695, %v1071_v17  ;;  %v1081_v57 = vmul.f32 1.442695, %v1072_v63  ;;  %v1083_v27 = vmul.f32 1.442695, %v1073_v5  ;;  %v22635_v5 = vpack.c.bf16 %v220_v53, %v219_v36 }
 0x221   :  { %v1085_v1 = vmul.f32 1.442695, %v1074_v19  ;;  %v1089_v18 = vmul.f32 1.442695, %v1076_v56  ;;  %v1093_v26 = vmul.f32 1.442695, %v1078_v41  ;;  %v22625_v19 = vpack.c.bf16 %v202_v25, %v201_v32 }
 0x222   :  { %21596 = vpow2.f32 %v1079_v61  ;;  %v233_v41 = vld [vmem:[%s26318_s10 + $0x300] sm:$0xff]  ;;  %26794 = vst [vmem:[#allocation62_spill] sm:$0xff] %v22635_v5  ;;  %v203_v56 = vld [vmem:[%s26318_s10 + $0x210] sm:$0xff]  ;;  %v204_v61 = vld [vmem:[%s26318_s10 + $0x218] sm:$0xff] }
 0x223   :  { %21598 = vpow2.f32 %v1081_v57  ;;  %26793 = vst [vmem:[#allocation61_spill] sm:$0xff] %v22625_v19  ;;  %v251_v57 = vld [vmem:[%s26318_s10 + $0x390] sm:$0xff]  ;;  %v221_v32 = vld [vmem:[%s26318_s10 + $0x2a0] sm:$0xff]  ;;  %v222_v25 = vld [vmem:[%s26318_s10 + $0x2a8] sm:$0xff] }
 0x224   :  { %21600 = vpow2.f32 %v1083_v27  ;;  %v252_v27 = vld [vmem:[%s26318_s10 + $0x398] sm:$0xff]  ;;  %v22679_v59 = vpack.c.bf16 %v222_v25, %v221_v32 }
 0x225   :  { %21602 = vpow2.f32 %v1085_v1  ;;  %v234_v1 = vld [vmem:[%s26318_s10 + $0x308] sm:$0xff]  ;;  %v22657_v53 = vpack.c.bf16 %v252_v27, %v251_v57  ;;  %v224_v32 = vld [vmem:[%s26318_s10 + $0x2b8] sm:$0xff] }
 0x226   :  { %21604 = vpow2.f32 %v1089_v18  ;;  %v254_v57 = vld [vmem:[%s26318_s10 + $0x3a8] sm:$0xff]  ;;  %26798 = vst [vmem:[#allocation66_spill] sm:$0xff] %v22679_v59 }
 0x227   :  { %21606 = vpow2.f32 %v1093_v26  ;;  %v22646_v26 = vpack.c.bf16 %v234_v1, %v233_v41  ;;  %26796 = vst [vmem:[#allocation64_spill] sm:$0xff] %v22657_v53  ;;  %v236_v41 = vld [vmem:[%s26318_s10 + $0x318] sm:$0xff]  ;;  %v22667_v1 = vpack.c.bf16 %v204_v61, %v203_v56  ;;  %v205_v56 = vld [vmem:[%s26318_s10 + $0x220] sm:$0xff]  ;;  %v206_v61 = vld [vmem:[%s26318_s10 + $0x228] sm:$0xff]  ;;  %v22700_v31 = vpack.c.bf16 %v254_v57, %v253_v33 }
 0x228   :  { %v256_v33 = vld [vmem:[%s26318_s10 + $0x3b8] sm:$0xff] }
 0x229   :  { %26795 = vst [vmem:[#allocation63_spill] sm:$0xff] %v22646_v26  ;;  %26797 = vst [vmem:[#allocation65_spill] sm:$0xff] %v22667_v1 }
 0x22a   :  { %26800 = vst [vmem:[#allocation68_spill] sm:$0xff] %v22700_v31 }
 0x22c   :  { %v22623_v17 = vpop.eup %21596 }
 0x22d   :  { %v22633_v63 = vpop.eup %21598 }
 0x22e   :  { %v22643_v18 = vpop.eup %21600  ;;  %1159 = vmatprep.mubr.f32.mxu0 %v22633_v63 }
 0x22f   :  { %v22654_v36 = vpop.eup %21602  ;;  %1160 = vmatmul.mubr.f32.vlgmr.msra.gmra.mrb[4].mxu0 %v22623_v17 }
 0x230   :  { %1229 = vmatprep.mubr.f32.mxu1 %v22654_v36  ;;  %18916 = vmatpush3.bf16.msra.mxu0 %v22625_v19  ;;  %v22675_v27 = vpop.eup %21604  ;;  %v22689_v19 = vpack.c.bf16 %v236_v41, %v235_v37  ;;  %v238_v37 = vld [vmem:[%s26318_s10 + $0x328] sm:$0xff]  ;;  %v22710_v41 = vpack.c.bf16 %v206_v61, %v205_v56  ;;  %v208_v56 = vld [vmem:[%s26318_s10 + $0x238] sm:$0xff] }
 0x231   :  { %1230 = vmatmul.mubr.f32.vlgmr.msra.gmra.mrb[6].mxu1 %v22643_v18  ;;  %18918 = vmatprep.subr.bf16.mxu0 %v22635_v5  ;;  %v223_v5 = vld [vmem:[%s26318_s10 + $0x2b0] sm:$0xff]  ;;  %v22697_v25 = vpop.eup %21606 }
 0x232   :  { %18948 = vmatpush3.bf16.msra.mxu1 %v22646_v26  ;;  %1299 = vmatprep.mubr.f32.mxu0 %v22675_v27  ;;  %26799 = vst [vmem:[#allocation67_spill] sm:$0xff] %v22689_v19  ;;  %v237_v26 = vld [vmem:[%s26318_s10 + $0x320] sm:$0xff]  ;;  %26801 = vst [vmem:[#allocation69_spill] sm:$0xff] %v22710_v41  ;;  %v22719_v57 = vpack.c.bf16 %v224_v32, %v223_v5  ;;  %v226_v5 = vld [vmem:[%s26318_s10 + $0x2c8] sm:$0xff] }
 0x233   :  { %18950 = vmatprep.subr.bf16.mxu1 %v22657_v53  ;;  %1369 = vmatprep.mubr.f32.mxu1 %v22697_v25  ;;  %v255_v53 = vld [vmem:[%s26318_s10 + $0x3b0] sm:$0xff]  ;;  %v22728_v61 = vpack.c.bf16 %v238_v37, %v237_v26  ;;  %v240_v26 = vld [vmem:[%s26318_s10 + $0x338] sm:$0xff]  ;;  %v22746_v37 = vpack.c.bf16 %v208_v56, %v207_v44  ;;  %v210_v44 = vld [vmem:[%s26318_s10 + $0x248] sm:$0xff] }
 0x234   :  { %18920 = vmatpush3.bf16.msra.mxu0 %v22667_v1  ;;  %26802 = vst [vmem:[#allocation70_spill] sm:$0xff] %v22719_v57  ;;  %v225_v1 = vld [vmem:[%s26318_s10 + $0x2c0] sm:$0xff]  ;;  %v22737_v32 = vpack.c.bf16 %v256_v33, %v255_v53  ;;  %v258_v53 = vld [vmem:[%s26318_s10 + $0x3c8] sm:$0xff] }
 0x235   :  { %18922 = vmatprep.subr.bf16.mxu0 %v22679_v59  ;;  %26803 = vst [vmem:[#allocation71_spill] sm:$0xff] %v22728_v61  ;;  %v239_v59 = vld [vmem:[%s26318_s10 + $0x330] sm:$0xff]  ;;  %26805 = vst [vmem:[#allocation73_spill] sm:$0xff] %v22746_v37  ;;  %v22755_v33 = vpack.c.bf16 %v226_v5, %v225_v1  ;;  %v228_v1 = vld [vmem:[%s26318_s10 + $0x2d8] sm:$0xff] }
 0x236   :  { %18952 = vmatpush3.bf16.msra.mxu1 %v22689_v19  ;;  %26804 = vst [vmem:[#allocation72_spill] sm:$0xff] %v22737_v32  ;;  %v257_v19 = vld [vmem:[%s26318_s10 + $0x3c0] sm:$0xff]  ;;  %v22764_v56 = vpack.c.bf16 %v240_v26, %v239_v59  ;;  %v242_v59 = vld [vmem:[%s26318_s10 + $0x348] sm:$0xff]  ;;  %v1075_v26 = vsub.f32 %v22404_v3, %v22591_v0  ;;  %v211_v3 = vld [vmem:[%s26318_s10 + $0x250] sm:$0xff] }
 0x237   :  { %18954 = vmatprep.subr.bf16.mxu1 %v22700_v31  ;;  %26806 = vst [vmem:[#allocation74_spill] sm:$0xff] %v22755_v33  ;;  %v209_v31 = vld [vmem:[%s26318_s10 + $0x240] sm:$0xff]  ;;  %v22773_v5 = vpack.c.bf16 %v258_v53, %v257_v19  ;;  %v259_v19 = vld [vmem:[%s26318_s10 + $0x3d0] sm:$0xff]  ;;  %v260_v53 = vld [vmem:[%s26318_s10 + $0x3d8] sm:$0xff] }
 0x238   :  { %18924 = vmatpush3.bf16.msra.mxu0 %v22710_v41  ;;  %26807 = vst [vmem:[#allocation75_spill] sm:$0xff] %v22764_v56  ;;  %v227_v41 = vld [vmem:[%s26318_s10 + $0x2d0] sm:$0xff] }
 0x239   :  { %18926 = vmatprep.subr.bf16.mxu0 %v22719_v57  ;;  %26808 = vst [vmem:[#allocation76_spill] sm:$0xff] %v22773_v5  ;;  %v241_v57 = vld [vmem:[%s26318_s10 + $0x340] sm:$0xff] }
 0x23a   :  { %18956 = vmatpush3.bf16.msra.mxu1 %v22728_v61  ;;  %v22784_v61 = vpack.c.bf16 %v210_v44, %v209_v31  ;;  %v212_v31 = vld [vmem:[%s26318_s10 + $0x258] sm:$0xff]  ;;  %v1077_v44 = vsub.f32 %v22430_v40, %v22591_v0  ;;  %v243_v40 = vld [vmem:[%s26318_s10 + $0x350] sm:$0xff] }
 0x23b   :  { %18958 = vmatprep.subr.bf16.mxu1 %v22737_v32  ;;  %v22793_v32 = vpack.c.bf16 %v228_v1, %v227_v41  ;;  %v229_v41 = vld [vmem:[%s26318_s10 + $0x2e0] sm:$0xff]  ;;  %v230_v1 = vld [vmem:[%s26318_s10 + $0x2e8] sm:$0xff]  ;;  %v244_v0 = vld [vmem:[%s26318_s10 + $0x358] sm:$0xff] }
 0x23c   :  { %18928 = vmatpush3.bf16.msra.mxu0 %v22746_v37  ;;  %26809 = vst [vmem:[#allocation77_spill] sm:$0xff] %v22784_v61  ;;  %v22804_v37 = vpack.c.bf16 %v242_v59, %v241_v57  ;;  %v1087_v57 = vmul.f32 1.442695, %v1075_v26  ;;  %v22822_v59 = vpack.c.bf16 %v212_v31, %v211_v3  ;;  %v213_v26 = vld [vmem:[%s26318_s10 + $0x260] sm:$0xff]  ;;  %v214_v3 = vld [vmem:[%s26318_s10 + $0x268] sm:$0xff] }
 0x23d   :  { %18930 = vmatprep.subr.bf16.mxu0 %v22755_v33  ;;  %26810 = vst [vmem:[#allocation78_spill] sm:$0xff] %v22793_v32  ;;  %v22813_v33 = vpack.c.bf16 %v260_v53, %v259_v19  ;;  %v262_v19 = vld [vmem:[%s26318_s10 + $0x3e8] sm:$0xff]  ;;  %v22831_v53 = vpack.c.bf16 %v230_v1, %v229_v41  ;;  %v1091_v31 = vmul.f32 1.442695, %v1077_v44  ;;  %v232_v41 = vld [vmem:[%s26318_s10 + $0x2f8] sm:$0xff]  ;;  %v245_v44 = vld [vmem:[%s26318_s10 + $0x360] sm:$0xff] }
 0x23e   :  { %18960 = vmatpush3.bf16.msra.mxu1 %v22764_v56  ;;  %26811 = vst [vmem:[#allocation79_spill] sm:$0xff] %v22804_v37  ;;  %26813 = vst [vmem:[#allocation81_spill] sm:$0xff] %v22822_v59  ;;  %v261_v56 = vld [vmem:[%s26318_s10 + $0x3e0] sm:$0xff]  ;;  %21608 = vpow2.f32 %v1087_v57  ;;  %v215_v57 = vld [vmem:[%s26318_s10 + $0x270] sm:$0xff] }
 0x23f   :  { %18962 = vmatprep.subr.bf16.mxu1 %v22773_v5  ;;  %26812 = vst [vmem:[#allocation80_spill] sm:$0xff] %v22813_v33  ;;  %26814 = vst [vmem:[#allocation82_spill] sm:$0xff] %v22831_v53  ;;  %v231_v5 = vld [vmem:[%s26318_s10 + $0x2f0] sm:$0xff]  ;;  %v22849_v1 = vpack.c.bf16 %v262_v19, %v261_v56  ;;  %v264_v56 = vld [vmem:[%s26318_s10 + $0x3f8] sm:$0xff]  ;;  %21610 = vpow2.f32 %v1091_v31 }
 0x240   :  { %18932 = vmatpush3.bf16.msra.mxu0 %v22784_v61  ;;  %v22840_v61 = vpack.c.bf16 %v244_v0, %v243_v40  ;;  %v246_v40 = vld [vmem:[%s26318_s10 + $0x368] sm:$0xff]  ;;  %v22858_v0 = vpack.c.bf16 %v214_v3, %v213_v26  ;;  %v22867_v19 = vpack.c.bf16 %v232_v41, %v231_v5  ;;  %v216_v26 = vld [vmem:[%s26318_s10 + $0x278] sm:$0xff]  ;;  %v247_v5 = vld [vmem:[%s26318_s10 + $0x370] sm:$0xff] }
 0x241   :  { %18934 = vmatprep.subr.bf16.mxu0 %v22793_v32  ;;  %26816 = vst [vmem:[#allocation84_spill] sm:$0xff] %v22849_v1  ;;  %v22876_v3 = vpack.c.bf16 %v246_v40, %v245_v44  ;;  %v248_v41 = vld [vmem:[%s26318_s10 + $0x378] sm:$0xff]  ;;  %v26823_v40 = vmov 0.0  }
 0x242   :  { %18964 = vmatpush3.bf16.msra.mxu1 %v22804_v37  ;;  %26815 = vst [vmem:[#allocation83_spill] sm:$0xff] %v22840_v61  ;;  %26817 = vst [vmem:[#allocation85_spill] sm:$0xff] %v22858_v0  ;;  %v263_v37 = vld [vmem:[%s26318_s10 + $0x3f0] sm:$0xff]  ;;  %v22892_v31 = vpack.c.bf16 %v248_v41, %v247_v5  ;;  %v116_v41 = vld [vmem:[%s26320_s9 + $0x58] sm:$0xff]  ;;  %s21925_s10 = smov 32  }
 0x243   :  { %18966 = vmatprep.subr.bf16.mxu1 %v22813_v33  ;;  %26818 = vst [vmem:[#allocation86_spill] sm:$0xff] %v22867_v19  ;;  %26819 = vst [vmem:[#allocation87_spill] sm:$0xff] %v22876_v3 }
 0x244   :  { %18936 = vmatpush3.bf16.msra.mxu0 %v22822_v59  ;;  %v22879_v59 = vpack.c.bf16 %v264_v56, %v263_v37  ;;  %26822 = vst [vmem:[#allocation90_spill] sm:$0xff] %v22892_v31  ;;  %v106_v56 = vld [vmem:[%s26320_s9 + $0x8] sm:$0xff] }
 0x245   :  { %18938 = vmatprep.subr.bf16.mxu0 %v22831_v53  ;;  %v22888_v53 = vpack.c.bf16 %v216_v26, %v215_v57  ;;  %v114_v57 = vld [vmem:[%s26320_s9 + $0x48] sm:$0xff]  ;;  %v108_v26 = vld [vmem:[%s26320_s9 + $0x18] sm:$0xff] }
 0x246   :  { %18968 = vmatpush3.bf16.msra.mxu1 %v22840_v61  ;;  %26820 = vst [vmem:[#allocation88_spill] sm:$0xff] %v22879_v59  ;;  %v22914_v5 = vpack.c.bf16 %v114_v57, %v106_v56  ;;  %v107_v56 = vld [vmem:[%s26320_s9 + $0x10] sm:$0xff] }
 0x247   :  { %18970 = vmatprep.subr.bf16.mxu1 %v22849_v1  ;;  %26821 = vst [vmem:[#allocation89_spill] sm:$0xff] %v22888_v53  ;;  %v115_v57 = vld [vmem:[%s26320_s9 + $0x50] sm:$0xff] }
 0x248   :  { %18940 = vmatpush3.bf16.msra.mxu0 %v22858_v0  ;;  %v22896_v37 = vpop.eup %21608  ;;  %26824 = vst [vmem:[#allocation91_spill] sm:$0xff] %v22914_v5 }
 0x249   :  { %18942 = vmatprep.subr.bf16.mxu0 %v22867_v19  ;;  %v22900_v44 = vpop.eup %21610  ;;  %v22936_v19 = vpack.c.bf16 %v115_v57, %v107_v56  ;;  %v132_v56 = vld [vmem:[%s26320_s9 + $0xd8] sm:$0xff]  ;;  %v121_v57 = vld [vmem:[%s26320_s9 + $0x80] sm:$0xff] }
 0x24a   :  { %18972 = vmatpush3.bf16.msra.mxu1 %v22876_v3 }
 0x24b   :  { %18974 = vmatprep.subr.bf16.mxu1 %v22879_v59  ;;  %v22925_v59 = vpack.c.bf16 %v116_v41, %v108_v26  ;;  %26827 = vst [vmem:[#allocation94_spill] sm:$0xff] %v22936_v19  ;;  %v124_v26 = vld [vmem:[%s26320_s9 + $0x98] sm:$0xff] }
 0x24c   :  { %18944 = vmatpush3.bf16.msra.mxu0 %v22888_v53  ;;  %v113_v53 = vld [vmem:[%s26320_s9 + $0x40] sm:$0xff] }
 0x24d   :  { %26825 = vst [vmem:[#allocation92_spill] sm:$0xff] %v22925_v59  ;;  %18978 = vmatprep.subr.bf16.mxu0 %v22914_v5 }
 0x24e   :  { %18976 = vmatpush3.bf16.msra.mxu1 %v22892_v31  ;;  %v105_v31 = vld [vmem:[%s26320_s9] sm:$0xff] }
 0x24f   :  { %1300 = vmatmul.mubr.f32.vlgmr.msra.gmra.mrb[6].mxu0 %v22896_v37  ;;  %v22927_v3 = vpack.c.bf16 %v113_v53, %v105_v31  ;;  %18986 = vmatprep.subr.bf16.mxu1 %v22925_v59  ;;  %v122_v53 = vld [vmem:[%s26320_s9 + $0x88] sm:$0xff]  ;;  %v22961_v59 = vpack.c.bf16 %v132_v56, %v124_v26  ;;  %v112_v26 = vld [vmem:[%s26320_s9 + $0x38] sm:$0xff] }
 0x250   :  { %1444 = vmatprep.mubr.f32.mxu0 %v26823_v40  ;;  %v130_v31 = vld [vmem:[%s26320_s9 + $0xc8] sm:$0xff]  ;;  %v120_v56 = vld [vmem:[%s26320_s9 + $0x78] sm:$0xff] }
 0x251   :  { %1370 = vmatmul.mubr.f32.vlgmr.msra.gmra.mrb[8].mxu1 %v22900_v44  ;;  %26826 = vst [vmem:[#allocation93_spill] sm:$0xff] %v22927_v3  ;;  %18980 = vmatpush1.bf16.msra.mxu0 %v22927_v3  ;;  %v22950_v41 = vpack.c.bf16 %v130_v31, %v122_v53  ;;  %v129_v3 = vld [vmem:[%s26320_s9 + $0xc0] sm:$0xff]  ;;  %26829 = vst [vmem:[#allocation96_spill] sm:$0xff] %v22961_v59  ;;  %v123_v53 = vld [vmem:[%s26320_s9 + $0x90] sm:$0xff] }
 0x252   :  { %1515 = vmatprep.mubr.f32.mxu1 %v26823_v40  ;;  %18988 = vmatpush1.bf16.msra.mxu1 %v22936_v19  ;;  %v22963_v5 = vpack.c.bf16 %v129_v3, %v121_v57  ;;  %v131_v31 = vld [vmem:[%s26320_s9 + $0xd0] sm:$0xff]  ;;  %v110_v19 = vld [vmem:[%s26320_s9 + $0x28] sm:$0xff] }
 0x253   :  { %26828 = vst [vmem:[#allocation95_spill] sm:$0xff] %v22950_v41  ;;  %18982 = vmatprep.subr.bf16.mxu0 %v22950_v41  ;;  %v22975_v0 = vpack.c.bf16 %v131_v31, %v123_v53  ;;  %v118_v3 = vld [vmem:[%s26320_s9 + $0x68] sm:$0xff]  ;;  %18990 = vmatprep.subr.bf16.mxu1 %v22961_v59  ;;  %v22990_v53 = vpack.c.bf16 %v120_v56, %v112_v26 }
 0x254   :  { %26830 = vst [vmem:[#allocation97_spill] sm:$0xff] %v22963_v5  ;;  %v22988_v57 = vpack.c.bf16 %v118_v3, %v110_v19 }
 0x255   :  { %26831 = vst [vmem:[#allocation98_spill] sm:$0xff] %v22975_v0  ;;  %18984 = vmatpush1.bf16.msra.mxu0 %v22963_v5  ;;  %26833 = vst [vmem:[#allocation100_spill] sm:$0xff] %v22990_v53 }
 0x256   :  { %26832 = vst [vmem:[#allocation99_spill] sm:$0xff] %v22988_v57  ;;  %18992 = vmatpush1.bf16.msra.mxu1 %v22975_v0  ;;  %18994 = vmatprep.subr.bf16.mxu0 %v22988_v57  ;;  %v26844_v0 = vmov 0.0|0.0  }
 0x257   :  { %19002 = vmatprep.subr.bf16.mxu1 %v22990_v53  ;;  %v109_v53 = vld [vmem:[%s26320_s9 + $0x20] sm:$0xff] }
 0x302   :  { %v16113_v31 = vpop.f32.mrb[4].mxu0 }
 0x303   :  { %v16114_v41 = vpop.f32.mrb[5].mxu0 }
 0x304   :  { %v16148_v1 = vpop.f32.mrb[6].mxu1  ;;  %v16115_v61 = vadd.f32 %v16114_v41, %v16113_v31  ;;  %v117_v41 = vld [vmem:[%s26320_s9 + $0x60] sm:$0xff] }
 0x305   :  { %v16149_v33 = vpop.f32.mrb[7].mxu1  ;;  %v125_v31 = vld [vmem:[%s26320_s9 + $0xa0] sm:$0xff] }
 0x306   :  { %v16150_v32 = vadd.f32 %v16149_v33, %v16148_v1  ;;  %v136_v33 = vld [vmem:[%s26320_s9 + $0xf8] sm:$0xff]  ;;  %v23019_v1 = vpack.c.bf16 %v117_v41, %v109_v53  ;;  %v127_v53 = vld [vmem:[%s26320_s9 + $0xb0] sm:$0xff] }
 0x307   :  { %v135_v41 = vld [vmem:[%s26320_s9 + $0xf0] sm:$0xff] }
 0x308   :  { %v1232_v38 = vadd.f32 %v16150_v32, %v16115_v61  ;;  %v111_v61 = vld [vmem:[%s26320_s9 + $0x30] sm:$0xff]  ;;  %v128_v32 = vld [vmem:[%s26320_s9 + $0xb8] sm:$0xff]  ;;  %26834 = vst [vmem:[#allocation101_spill] sm:$0xff] %v23019_v1 }
 0x322   :  { %v16183_v59 = vpop.f32.mrb[6].mxu0 }
 0x323   :  { %v16184_v62 = vpop.f32.mrb[7].mxu0 }
 0x324   :  { %v16218_v5 = vpop.f32.mrb[8].mxu1  ;;  %v16185_v19 = vadd.f32 %v16184_v62, %v16183_v59  ;;  %v119_v62 = vld [vmem:[%s26320_s9 + $0x70] sm:$0xff] }
 0x325   :  { %v16219_v3 = vpop.f32.mrb[9].mxu1 }
 0x326   :  { %v1302_v26 = vadd.f32 %v16185_v19, %v1232_v38  ;;  %v16220_v56 = vadd.f32 %v16219_v3, %v16218_v5  ;;  %v134_v38 = vld [vmem:[%s26320_s9 + $0xe8] sm:$0xff]  ;;  %v23021_v5 = vpack.c.bf16 %v119_v62, %v111_v61  ;;  %v23045_v62 = vpack.c.bf16 %v135_v41, %v127_v53  ;;  %v99_v53 = vld [vmem:[%s26323_s6] sm:$0x7f] }
 0x327   :  { %v26463_v41 = vmov 0.0|0.0  }
 0x328   :  { %v1372_v49 = vadd.f32 %v16220_v56, %v1302_v26  ;;  %26835 = vst [vmem:[#allocation102_spill] sm:$0xff] %v23021_v5  ;;  %v23028_v26 = vpack.c.bf16 %v136_v33, %v128_v32  ;;  %v133_v56 = vld [vmem:[%s26320_s9 + $0xe0] sm:$0xff]  ;;  %26839 = vst [vmem:[#allocation106_spill] sm:$0xff] %v23045_v62  ;;  %v282_v33 = vld [vmem:[%s26322_s11 + $0x88] sm:$0xff] }
 0x329   :  { %v23043_v61 = vpack.c.bf16 %v133_v56, %v125_v31  ;;  %v281_v32 = vld [vmem:[%s26322_s11 + $0x80] sm:$0xff]  ;;  %v102_v31 = vld [vmem:[%s26321_s7 + $0x10] sm:$0xff]  ;;  %v103_v56 = vld [vmem:[%s26321_s7 + $0x18] sm:$0xff] }
 0x32a   :  { %21612 = vrcp.f32 %v1372_v49  ;;  %v126_v49 = vld [vmem:[%s26320_s9 + $0xa8] sm:$0xff]  ;;  %26837 = vst [vmem:[#allocation104_spill] sm:$0xff] %v23028_v26 }
 0x32b   :  { %v23026_v3 = vpack.c.bf16 %v134_v38, %v126_v49  ;;  %26838 = vst [vmem:[#allocation105_spill] sm:$0xff] %v23043_v61  ;;  %v100_v49 = vld [vmem:[%s26321_s7] sm:$0xff]  ;;  %v101_v38 = vld [vmem:[%s26321_s7 + $0x8] sm:$0xff] }
 0x32d   :  { %26836 = vst [vmem:[#allocation103_spill] sm:$0xff] %v23026_v3 }
 0x334   :  { %v21613_v59 = vpop.eup %21612 }
 0x335   :  { %v1376_v19 = vmul.f32 0.0, %v21613_v59  ;;  %v23065_v59 = vpack.c.bf16 %v101_v38, %v100_v49  ;;  %v313_v49 = vld [vmem:[%s26322_s11 + $0x180] sm:$0xff] }
 0x336   :  { %v265_v38 = vld [vmem:[%s26322_s11] sm:$0xff] }
 0x337   :  { %15835 = vmatmul.mubr.msk.f32.vlgmr.msra.gmra.mrb[8].mxu0 %vm403_vm1, %v1376_v19  ;;  %15836 = vmatmul.mubr.msk.f32.vlgmr.msra.gmra.mrb[10].mxu1 %vm403_vm1, %v1376_v19  ;;  %26840 = vst [vmem:[#allocation107_spill] sm:$0xff] %v23065_v59 }
 0x338   :  { %18996 = vmatpush1.bf16.msra.mxu0 %v23019_v1  ;;  %19004 = vmatpush1.bf16.msra.mxu1 %v23021_v5  ;;  %v297_v5 = vld [vmem:[%s26322_s11 + $0x100] sm:$0xff]  ;;  %v298_v1 = vld [vmem:[%s26322_s11 + $0x108] sm:$0xff] }
 0x339   :  { %18998 = vmatprep.subr.bf16.mxu0 %v23026_v3  ;;  %19006 = vmatprep.subr.bf16.mxu1 %v23028_v26  ;;  %v283_v26 = vld [vmem:[%s26322_s11 + $0x90] sm:$0xff]  ;;  %v284_v3 = vld [vmem:[%s26322_s11 + $0x98] sm:$0xff] }
 0x33a   :  { %1586 = vmatprep.mubr.f32.mxu0 %v26823_v40  ;;  %1657 = vmatprep.mubr.f32.mxu1 %v26823_v40 }
 0x33c   :  { %19000 = vmatpush1.bf16.msra.mxu0 %v23043_v61  ;;  %19008 = vmatpush1.bf16.msra.mxu1 %v23045_v62  ;;  %v266_v62 = vld [vmem:[%s26322_s11 + $0x8] sm:$0xff]  ;;  %v23087_v61 = vpack.c.bf16 %v282_v33, %v281_v32  ;;  %v23101_v32 = vpack.c.bf16 %v103_v56, %v102_v31  ;;  %v23117_v31 = vpack.c.bf16 %v284_v3, %v283_v26  ;;  %v267_v56 = vld [vmem:[%s26322_s11 + $0x10] sm:$0xff]  ;;  %v316_v3 = vld [vmem:[%s26322_s11 + $0x198] sm:$0xff] }
 0x33d   :  { %19009 = vmatprep.subr.bf16.mxu0 %v26463_v41  ;;  %18484 = vmatprep.subr.mxu1 %v26823_v40  ;;  %v314_v41 = vld [vmem:[%s26322_s11 + $0x188] sm:$0xff]  ;;  %v23104_v33 = vpack.c.bf16 %v266_v62, %v265_v38  ;;  %v315_v62 = vld [vmem:[%s26322_s11 + $0x190] sm:$0xff]  ;;  %v285_v26 = vld [vmem:[%s26322_s11 + $0xa0] sm:$0xff] }
 0x33e   :  { %26841 = vst [vmem:[#allocation108_spill] sm:$0xff] %v23087_v61  ;;  %26842 = vst [vmem:[#allocation109_spill] sm:$0xff] %v23101_v32 }
 0x33f   :  { %15837 = vmatmul.mubr.msk.f32.vlgmr.msra.gmra.mrb[10].mxu0 %vm403_vm1, %v1376_v19  ;;  %15838 = vmatmul.mubr.msk.f32.vlgmr.msra.gmra.mrb[12].mxu1 %vm403_vm1, %v1376_v19  ;;  %26843 = vst [vmem:[#allocation110_spill] sm:$0xff] %v23104_v33  ;;  %v23115_v19 = vpack.c.bf16 %v314_v41, %v313_v49  ;;  %26846 = vst [vmem:[#allocation112_spill] sm:$0xff] %v23117_v31  ;;  %v286_v41 = vld [vmem:[%s26322_s11 + $0xa8] sm:$0xff]  ;;  %v23144_v49 = vpack.c.bf16 %v298_v1, %v297_v5  ;;  %v317_v1 = vld [vmem:[%s26322_s11 + $0x1a0] sm:$0xff] }
 0x340   :  { %19011 = vmatpush3.bf16.msra.mxu0 %v23065_v59  ;;  %18485 = vmatpush3.msk.msra.mxu1 %vm695_vm2, %v99_v53  ;;  %v268_v53 = vld [vmem:[%s26322_s11 + $0x18] sm:$0xff]  ;;  %v269_v5 = vld [vmem:[%s26322_s11 + $0x20] sm:$0xff] }
 0x341   :  { %19012 = vmatprep.subr.bf16.mxu0 %v26844_v0  ;;  %18486 = vmatprep.mubr.msk.f32.mxu1 %vm21923_vm5, %v26823_v40  ;;  %26845 = vst [vmem:[#allocation111_spill] sm:$0xff] %v23115_v19  ;;  %26847 = vst [vmem:[#allocation113_spill] sm:$0xff] %v23144_v49  ;;  %v23146_v38 = vpack.c.bf16 %v268_v53, %v267_v56  ;;  %v300_v59 = vld [vmem:[%s26322_s11 + $0x118] sm:$0xff]  ;;  %v270_v56 = vld [vmem:[%s26322_s11 + $0x28] sm:$0xff] }
 0x342   :  { %18481 = vmatprep.mubr.msk.f32.mxu0 %vm21923_vm5, %v26823_v40  ;;  %19016 = vmatprep.subr.bf16.mxu1 %v23087_v61  ;;  %v299_v61 = vld [vmem:[%s26322_s11 + $0x110] sm:$0xff]  ;;  %v318_v53 = vld [vmem:[%s26322_s11 + $0x1a8] sm:$0xff] }
 0x343   :  { %18487 = vmatmul.mubr.msk.f32.vlgmr.msra.gmra.mrb[14].mxu1 %vm691_vm3, %v22199_v58  ;;  %26848 = vst [vmem:[#allocation114_spill] sm:$0xff] %v23146_v38  ;;  %v23156_v58 = vpack.c.bf16 %v316_v3, %v315_v62  ;;  %v287_v62 = vld [vmem:[%s26322_s11 + $0xb0] sm:$0xff]  ;;  %v288_v3 = vld [vmem:[%s26322_s11 + $0xb8] sm:$0xff] }
 0x344   :  { %19014 = vmatpush3.bf16.msra.mxu0 %v23101_v32  ;;  %19018 = vmatpush3.bf16.msra.mxu1 %v23104_v33  ;;  %v23158_v32 = vpack.c.bf16 %v286_v41, %v285_v26  ;;  %v23182_v26 = vpack.c.bf16 %v300_v59, %v299_v61  ;;  %v23184_v41 = vpack.c.bf16 %v270_v56, %v269_v5  ;;  %v319_v61 = vld [vmem:[%s26322_s11 + $0x1b0] sm:$0xff]  ;;  %v272_v5 = vld [vmem:[%s26322_s11 + $0x38] sm:$0xff] }
 0x345   :  { %19048 = vmatprep.subr.bf16.mxu0 %v23115_v19  ;;  %19020 = vmatprep.subr.bf16.mxu1 %v23117_v31  ;;  %26849 = vst [vmem:[#allocation115_spill] sm:$0xff] %v23156_v58  ;;  %v301_v31 = vld [vmem:[%s26322_s11 + $0x120] sm:$0xff]  ;;  %v302_v19 = vld [vmem:[%s26322_s11 + $0x128] sm:$0xff]  ;;  %v271_v59 = vld [vmem:[%s26322_s11 + $0x30] sm:$0xff] }
 0x346   :  { %26850 = vst [vmem:[#allocation116_spill] sm:$0xff] %v23158_v32  ;;  %26851 = vst [vmem:[#allocation117_spill] sm:$0xff] %v23182_v26  ;;  %v320_v56 = vld [vmem:[%s26322_s11 + $0x1b8] sm:$0xff] }
 0x347   :  { %18482 = vmatmul.mubr.msk.f32.vlgmr.msra.gmra.mrb[12].mxu0 %vm403_vm1, %v22142_v45  ;;  %26852 = vst [vmem:[#allocation118_spill] sm:$0xff] %v23184_v41  ;;  %v23194_v45 = vpack.c.bf16 %v318_v53, %v317_v1  ;;  %v289_v1 = vld [vmem:[%s26322_s11 + $0xc0] sm:$0xff]  ;;  %v290_v53 = vld [vmem:[%s26322_s11 + $0xc8] sm:$0xff]  ;;  %v332_v33 = vld [vmem:[%s26322_s11 + $0x218] sm:$0xff] }
 0x348   :  { %19050 = vmatpush3.bf16.msra.mxu0 %v23144_v49  ;;  %19022 = vmatpush3.bf16.msra.mxu1 %v23146_v38  ;;  %v23196_v49 = vpack.c.bf16 %v288_v3, %v287_v62  ;;  %v23218_v62 = vpack.c.bf16 %v302_v19, %v301_v31  ;;  %v23220_v3 = vpack.c.bf16 %v272_v5, %v271_v59  ;;  %v321_v19 = vld [vmem:[%s26322_s11 + $0x1c0] sm:$0xff]  ;;  %v274_v59 = vld [vmem:[%s26322_s11 + $0x48] sm:$0xff] }
 0x349   :  { %19052 = vmatprep.subr.bf16.mxu0 %v23156_v58  ;;  %19024 = vmatprep.subr.bf16.mxu1 %v23158_v32  ;;  %26853 = vst [vmem:[#allocation119_spill] sm:$0xff] %v23194_v45  ;;  %v303_v32 = vld [vmem:[%s26322_s11 + $0x130] sm:$0xff]  ;;  %v304_v58 = vld [vmem:[%s26322_s11 + $0x138] sm:$0xff]  ;;  %v23230_v38 = vpack.c.bf16 %v320_v56, %v319_v61  ;;  %v273_v31 = vld [vmem:[%s26322_s11 + $0x40] sm:$0xff] }
 0x34a   :  { %26854 = vst [vmem:[#allocation120_spill] sm:$0xff] %v23196_v49  ;;  %26855 = vst [vmem:[#allocation121_spill] sm:$0xff] %v23218_v62  ;;  %v322_v5 = vld [vmem:[%s26322_s11 + $0x1c8] sm:$0xff]  ;;  %v291_v61 = vld [vmem:[%s26322_s11 + $0xd0] sm:$0xff] }
 0x34b   :  { %26856 = vst [vmem:[#allocation122_spill] sm:$0xff] %v23220_v3  ;;  %26857 = vst [vmem:[#allocation123_spill] sm:$0xff] %v23230_v38  ;;  %v292_v56 = vld [vmem:[%s26322_s11 + $0xd8] sm:$0xff] }
 0x34c   :  { %19054 = vmatpush3.bf16.msra.mxu0 %v23182_v26  ;;  %19026 = vmatpush3.bf16.msra.mxu1 %v23184_v41  ;;  %v23232_v26 = vpack.c.bf16 %v290_v53, %v289_v1  ;;  %v23254_v1 = vpack.c.bf16 %v304_v58, %v303_v32  ;;  %v23256_v53 = vpack.c.bf16 %v274_v59, %v273_v31  ;;  %v323_v32 = vld [vmem:[%s26322_s11 + $0x1d0] sm:$0xff]  ;;  %v276_v31 = vld [vmem:[%s26322_s11 + $0x58] sm:$0xff] }
 0x34d   :  { %19056 = vmatprep.subr.bf16.mxu0 %v23194_v45  ;;  %19028 = vmatprep.subr.bf16.mxu1 %v23196_v49  ;;  %v305_v49 = vld [vmem:[%s26322_s11 + $0x140] sm:$0xff]  ;;  %v306_v45 = vld [vmem:[%s26322_s11 + $0x148] sm:$0xff]  ;;  %v23266_v41 = vpack.c.bf16 %v322_v5, %v321_v19  ;;  %v275_v58 = vld [vmem:[%s26322_s11 + $0x50] sm:$0xff] }
 0x34e   :  { %26858 = vst [vmem:[#allocation124_spill] sm:$0xff] %v23232_v26  ;;  %26859 = vst [vmem:[#allocation125_spill] sm:$0xff] %v23254_v1  ;;  %v324_v59 = vld [vmem:[%s26322_s11 + $0x1d8] sm:$0xff]  ;;  %v293_v19 = vld [vmem:[%s26322_s11 + $0xe0] sm:$0xff] }
 0x34f   :  { %26860 = vst [vmem:[#allocation126_spill] sm:$0xff] %v23256_v53  ;;  %26861 = vst [vmem:[#allocation127_spill] sm:$0xff] %v23266_v41  ;;  %v294_v5 = vld [vmem:[%s26322_s11 + $0xe8] sm:$0xff] }
 0x350   :  { %19058 = vmatpush3.bf16.msra.mxu0 %v23218_v62  ;;  %19030 = vmatpush3.bf16.msra.mxu1 %v23220_v3  ;;  %v23268_v62 = vpack.c.bf16 %v292_v56, %v291_v61  ;;  %v23290_v61 = vpack.c.bf16 %v306_v45, %v305_v49  ;;  %v23292_v56 = vpack.c.bf16 %v276_v31, %v275_v58  ;;  %v277_v49 = vld [vmem:[%s26322_s11 + $0x60] sm:$0xff]  ;;  %v278_v45 = vld [vmem:[%s26322_s11 + $0x68] sm:$0xff] }
 0x351   :  { %19060 = vmatprep.subr.bf16.mxu0 %v23230_v38  ;;  %19032 = vmatprep.subr.bf16.mxu1 %v23232_v26  ;;  %v307_v26 = vld [vmem:[%s26322_s11 + $0x150] sm:$0xff]  ;;  %v23299_v38 = vpack.c.bf16 %v324_v59, %v323_v32  ;;  %v23304_v3 = vpack.c.bf16 %v294_v5, %v293_v19  ;;  %v325_v58 = vld [vmem:[%s26322_s11 + $0x1e0] sm:$0xff]  ;;  %v326_v32 = vld [vmem:[%s26322_s11 + $0x1e8] sm:$0xff]  ;;  %v23322_v59 = vpack.c.bf16 %v278_v45, %v277_v49 }
 0x352   :  { %26862 = vst [vmem:[#allocation128_spill] sm:$0xff] %v23268_v62  ;;  %26863 = vst [vmem:[#allocation129_spill] sm:$0xff] %v23290_v61  ;;  %v23326_v19 = vpack.c.bf16 %v326_v32, %v325_v58  ;;  %v309_v5 = vld [vmem:[%s26322_s11 + $0x160] sm:$0xff]  ;;  %v296_v49 = vld [vmem:[%s26322_s11 + $0xf8] sm:$0xff] }
 0x353   :  { %26864 = vst [vmem:[#allocation130_spill] sm:$0xff] %v23292_v56  ;;  %26865 = vst [vmem:[#allocation131_spill] sm:$0xff] %v23299_v38  ;;  %v327_v45 = vld [vmem:[%s26322_s11 + $0x1f0] sm:$0xff] }
 0x354   :  { %19062 = vmatpush3.bf16.msra.mxu0 %v23254_v1  ;;  %19034 = vmatpush3.bf16.msra.mxu1 %v23256_v53  ;;  %v308_v1 = vld [vmem:[%s26322_s11 + $0x158] sm:$0xff]  ;;  %26866 = vst [vmem:[#allocation132_spill] sm:$0xff] %v23304_v3  ;;  %26868 = vst [vmem:[#allocation134_spill] sm:$0xff] %v23322_v59  ;;  %v279_v32 = vld [vmem:[%s26322_s11 + $0x70] sm:$0xff] }
 0x355   :  { %19064 = vmatprep.subr.bf16.mxu0 %v23266_v41  ;;  %19036 = vmatprep.subr.bf16.mxu1 %v23268_v62  ;;  %v23320_v31 = vpack.c.bf16 %v308_v1, %v307_v26  ;;  %26869 = vst [vmem:[#allocation135_spill] sm:$0xff] %v23326_v19  ;;  %v295_v1 = vld [vmem:[%s26322_s11 + $0xf0] sm:$0xff] }
 0x356   :  { %v23349_v58 = vpack.c.bf16 %v296_v49, %v295_v1  ;;  %v311_v1 = vld [vmem:[%s26322_s11 + $0x170] sm:$0xff]  ;;  %v312_v49 = vld [vmem:[%s26322_s11 + $0x178] sm:$0xff] }
 0x357   :  { %26867 = vst [vmem:[#allocation133_spill] sm:$0xff] %v23320_v31  ;;  %v331_v53 = vld [vmem:[%s26322_s11 + $0x210] sm:$0xff] }
 0x358   :  { %19066 = vmatpush3.bf16.msra.mxu0 %v23290_v61  ;;  %19038 = vmatpush3.bf16.msra.mxu1 %v23292_v56  ;;  %v310_v61 = vld [vmem:[%s26322_s11 + $0x168] sm:$0xff]  ;;  %26871 = vst [vmem:[#allocation137_spill] sm:$0xff] %v23349_v58 }
 0x359   :  { %19068 = vmatprep.subr.bf16.mxu0 %v23299_v38  ;;  %19040 = vmatprep.subr.bf16.mxu1 %v23304_v3  ;;  %v23336_v26 = vpack.c.bf16 %v310_v61, %v309_v5  ;;  %v328_v61 = vld [vmem:[%s26322_s11 + $0x1f8] sm:$0xff] }
 0x35a   :  { %v280_v5 = vld [vmem:[%s26322_s11 + $0x78] sm:$0xff] }
 0x35b   :  { %26870 = vst [vmem:[#allocation136_spill] sm:$0xff] %v23336_v26 }
 0x35c   :  { %19070 = vmatpush3.bf16.msra.mxu0 %v23320_v31  ;;  %19042 = vmatpush3.bf16.msra.mxu1 %v23322_v59  ;;  %v23371_v59 = vpack.c.bf16 %v312_v49, %v311_v1  ;;  %v345_v31 = vld [vmem:[%s26322_s11 + $0x280] sm:$0xff] }
 0x35d   :  { %19072 = vmatprep.subr.bf16.mxu0 %v23326_v19  ;;  %v23362_v19 = vpack.c.bf16 %v280_v5, %v279_v32  ;;  %19044 = vmatprep.subr.bf16.mxu1 %v23349_v58  ;;  %v378_v5 = vld [vmem:[%s26322_s11 + $0x388] sm:$0xff]  ;;  %v329_v49 = vld [vmem:[%s26322_s11 + $0x200] sm:$0xff] }
 0x35e   :  { %26874 = vst [vmem:[#allocation140_spill] sm:$0xff] %v23371_v59 }
 0x35f   :  { %26873 = vst [vmem:[#allocation139_spill] sm:$0xff] %v23362_v19 }
 0x360   :  { %19074 = vmatpush3.bf16.msra.mxu0 %v23336_v26  ;;  %v23360_v26 = vpack.c.bf16 %v328_v61, %v327_v45  ;;  %v346_v45 = vld [vmem:[%s26322_s11 + $0x288] sm:$0xff]  ;;  %v377_v61 = vld [vmem:[%s26322_s11 + $0x380] sm:$0xff]  ;;  %19046 = vmatpush3.bf16.msra.mxu1 %v23362_v19  ;;  %v380_v19 = vld [vmem:[%s26322_s11 + $0x398] sm:$0xff] }
 0x361   :  { %v23384_v32 = vpack.c.bf16 %v346_v45, %v345_v31  ;;  %v23390_v1 = vpack.c.bf16 %v378_v5, %v377_v61  ;;  %v330_v31 = vld [vmem:[%s26322_s11 + $0x208] sm:$0xff]  ;;  %v361_v45 = vld [vmem:[%s26322_s11 + $0x300] sm:$0xff]  ;;  %v347_v5 = vld [vmem:[%s26322_s11 + $0x290] sm:$0xff] }
 0x362   :  { %26872 = vst [vmem:[#allocation138_spill] sm:$0xff] %v23360_v26  ;;  %19076 = vmatprep.subr.bf16.mxu0 %v23360_v26  ;;  %v362_v61 = vld [vmem:[%s26322_s11 + $0x308] sm:$0xff]  ;;  %v379_v26 = vld [vmem:[%s26322_s11 + $0x390] sm:$0xff]  ;;  %v23420_v62 = vpack.c.bf16 %v330_v31, %v329_v49  ;;  %v352_v31 = vld [vmem:[%s26322_s11 + $0x2b8] sm:$0xff] }
 0x363   :  { %26875 = vst [vmem:[#allocation141_spill] sm:$0xff] %v23384_v32  ;;  %26876 = vst [vmem:[#allocation142_spill] sm:$0xff] %v23390_v1  ;;  %19080 = vmatprep.subr.bf16.mxu1 %v23384_v32  ;;  %v348_v32 = vld [vmem:[%s26322_s11 + $0x298] sm:$0xff]  ;;  %v23422_v41 = vpack.c.bf16 %v362_v61, %v361_v45  ;;  %v383_v45 = vld [vmem:[%s26322_s11 + $0x3b0] sm:$0xff] }
 0x364   :  { %19078 = vmatpush3.bf16.msra.mxu0 %v23371_v59  ;;  %26877 = vst [vmem:[#allocation143_spill] sm:$0xff] %v23420_v62  ;;  %v23432_v50 = vpack.c.bf16 %v348_v32, %v347_v5  ;;  %v351_v32 = vld [vmem:[%s26322_s11 + $0x2b0] sm:$0xff]  ;;  %v384_v61 = vld [vmem:[%s26322_s11 + $0x3b8] sm:$0xff] }
 0x365   :  { %19112 = vmatprep.subr.bf16.mxu0 %v23390_v1  ;;  %26878 = vst [vmem:[#allocation144_spill] sm:$0xff] %v23422_v41 }
 0x366   :  { %26879 = vst [vmem:[#allocation145_spill] sm:$0xff] %v23432_v50 }
 0x40a   :  { %v1446_v1 = vpop.f32.mrb[8].mxu0  ;;  %v1517_v59 = vpop.f32.mrb[10].mxu1 }
 0x40b   :  { %v1448_v58 = vpop.f32.mrb[9].mxu0  ;;  %v1519_v3 = vpop.f32.mrb[11].mxu1  ;;  %v1664_v0 = vmul.f32 %v22623_v17, %v1446_v1  ;;  %v1666_v57 = vmul.f32 %v22643_v18, %v1517_v59  ;;  %v350_v17 = vld [vmem:[%s26322_s11 + $0x2a8] sm:$0xff]  ;;  %v381_v18 = vld [vmem:[%s26322_s11 + $0x3a0] sm:$0xff] }
 0x40c   :  { %v1665_v38 = vmul.f32 %v22633_v63, %v1448_v58  ;;  %v1667_v56 = vmul.f32 %v22654_v36, %v1519_v3  ;;  %v23434_v63 = vpack.c.bf16 %v380_v19, %v379_v26  ;;  %v363_v36 = vld [vmem:[%s26322_s11 + $0x310] sm:$0xff]  ;;  %v364_v3 = vld [vmem:[%s26322_s11 + $0x318] sm:$0xff]  ;;  %v349_v58 = vld [vmem:[%s26322_s11 + $0x2a0] sm:$0xff] }
 0x40d   :  { %v382_v59 = vld [vmem:[%s26322_s11 + $0x3a8] sm:$0xff]  ;;  %v333_v19 = vld [vmem:[%s26322_s11 + $0x220] sm:$0xff] }
 0x40e   :  { %26880 = vst [vmem:[#allocation146_spill] sm:$0xff] %v23434_v63  ;;  %1910 = vmatprep.mubr.f32.mxu1 %v1665_v38  ;;  %1980 = vmatprep.mubr.f32.mxu0 %v1667_v56  ;;  %v23456_v38 = vpack.c.bf16 %v332_v33, %v331_v53  ;;  %v23458_v56 = vpack.c.bf16 %v364_v3, %v363_v36  ;;  %v334_v26 = vld [vmem:[%s26322_s11 + $0x228] sm:$0xff]  ;;  %v365_v33 = vld [vmem:[%s26322_s11 + $0x320] sm:$0xff] }
 0x40f   :  { %1911 = vmatmul.mubr.f32.vlgmr.msra.gmra.mrb[16].mxu1 %v1664_v0  ;;  %1981 = vmatmul.mubr.f32.vlgmr.msra.gmra.mrb[14].mxu0 %v1666_v57  ;;  %v23468_v0 = vpack.c.bf16 %v350_v17, %v349_v58  ;;  %v23470_v57 = vpack.c.bf16 %v382_v59, %v381_v18  ;;  %v366_v53 = vld [vmem:[%s26322_s11 + $0x328] sm:$0xff]  ;;  %v23494_v3 = vpack.c.bf16 %v334_v26, %v333_v19  ;;  %v335_v59 = vld [vmem:[%s26322_s11 + $0x230] sm:$0xff]  ;;  %v368_v26 = vld [vmem:[%s26322_s11 + $0x338] sm:$0xff] }
 0x410   :  { %19082 = vmatpush3.bf16.msra.mxu1 %v23420_v62  ;;  %19114 = vmatpush3.bf16.msra.mxu0 %v23422_v41  ;;  %26881 = vst [vmem:[#allocation147_spill] sm:$0xff] %v23456_v38  ;;  %26882 = vst [vmem:[#allocation148_spill] sm:$0xff] %v23458_v56  ;;  %v23500_v18 = vpack.c.bf16 %v366_v53, %v365_v33  ;;  %v367_v19 = vld [vmem:[%s26322_s11 + $0x330] sm:$0xff]  ;;  %v353_v33 = vld [vmem:[%s26322_s11 + $0x2c0] sm:$0xff] }
 0x411   :  { %19084 = vmatprep.subr.bf16.mxu1 %v23432_v50  ;;  %19116 = vmatprep.subr.bf16.mxu0 %v23434_v63  ;;  %26883 = vst [vmem:[#allocation149_spill] sm:$0xff] %v23468_v0  ;;  %26884 = vst [vmem:[#allocation150_spill] sm:$0xff] %v23470_v57  ;;  %v336_v63 = vld [vmem:[%s26322_s11 + $0x238] sm:$0xff] }
 0x412   :  { %v23481_v1 = vpop.f32.mrb[10].mxu0  ;;  %v23483_v49 = vpop.f32.mrb[12].mxu1  ;;  %26885 = vst [vmem:[#allocation151_spill] sm:$0xff] %v23494_v3  ;;  %26886 = vst [vmem:[#allocation152_spill] sm:$0xff] %v23500_v18 }
 0x413   :  { %v1590_v5 = vpop.f32.mrb[11].mxu0  ;;  %v1661_v36 = vpop.f32.mrb[13].mxu1 }
 0x414   :  { %v1669_v58 = vmul.f32 %v22675_v27, %v1590_v5  ;;  %v1671_v17 = vmul.f32 %v22697_v25, %v1661_v36  ;;  %19086 = vmatpush3.bf16.msra.mxu1 %v23456_v38  ;;  %19118 = vmatpush3.bf16.msra.mxu0 %v23458_v56  ;;  %v23510_v27 = vpack.c.bf16 %v352_v31, %v351_v32  ;;  %v354_v32 = vld [vmem:[%s26322_s11 + $0x2c8] sm:$0xff]  ;;  %v385_v31 = vld [vmem:[%s26322_s11 + $0x3c0] sm:$0xff] }
 0x415   :  { %19088 = vmatprep.subr.bf16.mxu1 %v23468_v0  ;;  %19120 = vmatprep.subr.bf16.mxu0 %v23470_v57  ;;  %v23512_v25 = vpack.c.bf16 %v384_v61, %v383_v45  ;;  %v386_v45 = vld [vmem:[%s26322_s11 + $0x3c8] sm:$0xff]  ;;  %v23534_v5 = vpack.c.bf16 %v336_v63, %v335_v59  ;;  %v23536_v36 = vpack.c.bf16 %v368_v26, %v367_v19  ;;  %v369_v63 = vld [vmem:[%s26322_s11 + $0x340] sm:$0xff] }
 0x416   :  { %26887 = vst [vmem:[#allocation153_spill] sm:$0xff] %v23510_v27  ;;  %2050 = vmatprep.mubr.f32.mxu1 %v1669_v58  ;;  %2120 = vmatprep.mubr.f32.mxu0 %v1671_v17  ;;  %v1811_v53 = vpop.f32.mrb[14].mxu1  ;;  %v337_v58 = vld [vmem:[%s26322_s11 + $0x240] sm:$0xff]  ;;  %v23543_v17 = vpack.c.bf16 %v354_v32, %v353_v33  ;;  %v23545_v57 = vpack.c.bf16 %v386_v45, %v385_v31  ;;  %v370_v59 = vld [vmem:[%s26322_s11 + $0x348] sm:$0xff]  ;;  %v355_v33 = vld [vmem:[%s26322_s11 + $0x2d0] sm:$0xff] }
 0x417   :  { %26888 = vst [vmem:[#allocation154_spill] sm:$0xff] %v23512_v25  ;;  %v18488_v61 = vpop.f32.mrb[15].mxu1  ;;  %26889 = vst [vmem:[#allocation155_spill] sm:$0xff] %v23534_v5  ;;  %v23559_v19 = vld [vmem:[%s26324_s8] ss:$0 sm:$0xff]  ;;  %v356_v32 = vld [vmem:[%s26322_s11 + $0x2d8] sm:$0xff] }
 0x418   :  { %19090 = vmatpush3.bf16.msra.mxu1 %v23494_v3  ;;  %19122 = vmatpush3.bf16.msra.mxu0 %v23500_v18  ;;  %26890 = vst [vmem:[#allocation156_spill] sm:$0xff] %v23536_v36  ;;  %26891 = vst [vmem:[#allocation157_spill] sm:$0xff] %v23543_v17  ;;  %v338_v61 = vld [vmem:[%s26322_s11 + $0x248] sm:$0xff]  ;;  %v23577_v3 = vpack.c.bf16 %v370_v59, %v369_v63  ;;  %v372_v63 = vld [vmem:[%s26322_s11 + $0x358] sm:$0xff] }
 0x419   :  { %19092 = vmatprep.subr.bf16.mxu1 %v23510_v27  ;;  %19124 = vmatprep.subr.bf16.mxu0 %v23512_v25  ;;  %26892 = vst [vmem:[#allocation158_spill] sm:$0xff] %v23545_v57  ;;  %26893 = vst [vmem:[#allocation159_spill] sm:$0xff] %v23559_v19  ;;  %v387_v25 = vld [vmem:[%s26322_s11 + $0x3d0] sm:$0xff]  ;;  %v388_v27 = vld [vmem:[%s26322_s11 + $0x3d8] sm:$0xff]  ;;  %v23575_v18 = vpack.c.bf16 %v338_v61, %v337_v58  ;;  %v23590_v58 = vpack.c.bf16 %v356_v32, %v355_v33 }
 0x41a   :  { %v1738_v26 = vpop.f32.mrb[12].mxu0  ;;  %26895 = vst [vmem:[#allocation161_spill] sm:$0xff] %v23577_v3  ;;  %v371_v61 = vld [vmem:[%s26322_s11 + $0x350] sm:$0xff]  ;;  %v357_v59 = vld [vmem:[%s26322_s11 + $0x2e0] sm:$0xff]  ;;  %v390_v32 = vld [vmem:[%s26322_s11 + $0x3e8] sm:$0xff] }
 0x41b   :  { %v1812_v31 = vadd.f32 %v1811_v53, %v1738_v26  ;;  %v18483_v45 = vpop.f32.mrb[13].mxu0  ;;  %26894 = vst [vmem:[#allocation160_spill] sm:$0xff] %v23575_v18  ;;  %v339_v53 = vld [vmem:[%s26322_s11 + $0x250] sm:$0xff]  ;;  %v340_v26 = vld [vmem:[%s26322_s11 + $0x258] sm:$0xff]  ;;  %26896 = vst [vmem:[#allocation162_spill] sm:$0xff] %v23590_v58 }
 0x41c   :  { %19094 = vmatpush3.bf16.msra.mxu1 %v23534_v5  ;;  %19126 = vmatpush3.bf16.msra.mxu0 %v23536_v36  ;;  %v389_v33 = vld [vmem:[%s26322_s11 + $0x3e0] sm:$0xff]  ;;  %v342_v36 = vld [vmem:[%s26322_s11 + $0x268] sm:$0xff] }
 0x41d   :  { %v23586_v45 = vadd.f32 %v23559_v19, %v1812_v31  ;;  %19096 = vmatprep.subr.bf16.mxu1 %v23543_v17  ;;  %19128 = vmatprep.subr.bf16.mxu0 %v23545_v57  ;;  %v23601_v31 = vpack.c.bf16 %v388_v27, %v387_v25  ;;  %v358_v57 = vld [vmem:[%s26322_s11 + $0x2e8] sm:$0xff]  ;;  %v23616_v27 = vpack.c.bf16 %v340_v26, %v339_v53  ;;  %v341_v19 = vld [vmem:[%s26322_s11 + $0x260] sm:$0xff] }
 0x41e   :  { %v23618_v25 = vpack.c.bf16 %v372_v63, %v371_v61  ;;  %v23627_v5 = vpack.c.bf16 %v358_v57, %v357_v59  ;;  %v373_v53 = vld [vmem:[%s26322_s11 + $0x360] sm:$0xff]  ;;  %v374_v26 = vld [vmem:[%s26322_s11 + $0x368] sm:$0xff]  ;;  %v359_v61 = vld [vmem:[%s26322_s11 + $0x2f0] sm:$0xff]  ;;  %v23652_v59 = vpack.c.bf16 %v342_v36, %v341_v19 }
 0x41f   :  { %26897 = vst [vmem:[#allocation163_spill] sm:$0xff] %v23601_v31  ;;  %v1823_v17 = vsel %vm1822_vm6, %v23586_v45, -inf  ;;  %26898 = vst [vmem:[#allocation164_spill] sm:$0xff] %v23616_v27  ;;  %v360_v57 = vld [vmem:[%s26322_s11 + $0x2f8] sm:$0xff]  ;;  %v375_v36 = vld [vmem:[%s26322_s11 + $0x370] sm:$0xff] }
 0x420   :  { %19098 = vmatpush3.bf16.msra.mxu1 %v23575_v18  ;;  %19130 = vmatpush3.bf16.msra.mxu0 %v23577_v3  ;;  %26899 = vst [vmem:[#allocation165_spill] sm:$0xff] %v23618_v25  ;;  %26900 = vst [vmem:[#allocation166_spill] sm:$0xff] %v23627_v5  ;;  %v23629_v18 = vpack.c.bf16 %v390_v32, %v389_v33  ;;  %v392_v63 = vld [vmem:[%s26322_s11 + $0x3f8] sm:$0xff]  ;;  %v23654_v33 = vpack.c.bf16 %v374_v26, %v373_v53  ;;  %v343_v32 = vld [vmem:[%s26322_s11 + $0x270] sm:$0xff] }
 0x421   :  { %1824 = vmax.xlane.f32.xlu1 %v1823_v17  ;;  %19100 = vmatprep.subr.bf16.mxu1 %v23590_v58  ;;  %v391_v17 = vld [vmem:[%s26322_s11 + $0x3f0] sm:$0xff]  ;;  %26902 = vst [vmem:[#allocation168_spill] sm:$0xff] %v23652_v59  ;;  %v376_v19 = vld [vmem:[%s26322_s11 + $0x378] sm:$0xff] }
 0x422   :  { %26901 = vst [vmem:[#allocation167_spill] sm:$0xff] %v23629_v18  ;;  %19132 = vmatprep.subr.bf16.mxu0 %v23601_v31  ;;  %26903 = vst [vmem:[#allocation169_spill] sm:$0xff] %v23654_v33  ;;  %v23661_v31 = vpack.c.bf16 %v360_v57, %v359_v61  ;;  %v23663_v58 = vpack.c.bf16 %v392_v63, %v391_v17  ;;  %v23678_v26 = vpack.c.bf16 %v376_v19, %v375_v36 }
 0x423   :  { %v1668_v61 = vmul.f32 %v22896_v37, %v23481_v1  ;;  %v1670_v57 = vmul.f32 %v22900_v44, %v23483_v49  ;;  %v21924_v37 = vmov 0   ;;  %v394_v44 = vld [vmem:[%s26325_s0] sm:$0x3] }
 0x424   :  { %19102 = vmatpush3.bf16.msra.mxu1 %v23616_v27  ;;  %19134 = vmatpush3.bf16.msra.mxu0 %v23618_v25  ;;  %26904 = vst [vmem:[#allocation170_spill] sm:$0xff] %v23661_v31  ;;  %26905 = vst [vmem:[#allocation171_spill] sm:$0xff] %v23663_v58  ;;  %v344_v25 = vld [vmem:[%s26322_s11 + $0x278] sm:$0xff]  ;;  %v395_v1 = vmul.f32 0.5, %v394_v44 }
 0x425   :  { %19104 = vmatprep.subr.bf16.mxu1 %v23627_v5  ;;  %19136 = vmatprep.subr.bf16.mxu0 %v23629_v18  ;;  %v23676_v53 = vpack.c.bf16 %v344_v25, %v343_v32  ;;  %26907 = vst [vmem:[#allocation173_spill] sm:$0xff] %v23678_v26 }
 0x426   :  { %21592 = vset.pattern.permute.xlu0 %v21924_v37  ;;  %21593 = vset.pattern.permute.xlu1 %v21924_v37  ;;  %v396_v49 = vadd.f32 0.5, %v395_v1 }
 0x427   :  { %26906 = vst [vmem:[#allocation172_spill] sm:$0xff] %v23676_v53 }
 0x428   :  { %19106 = vmatpush3.bf16.msra.mxu1 %v23652_v59  ;;  %19138 = vmatpush3.bf16.msra.mxu0 %v23654_v33 }
 0x429   :  { %19108 = vmatprep.subr.bf16.mxu1 %v23661_v31  ;;  %19140 = vmatprep.subr.bf16.mxu0 %v23663_v58 }
 0x42a   :  { %1842 = vperm.xlu0 %21592, %v396_v49  }
 0x42c   :  { %19110 = vmatpush3.bf16.msra.mxu1 %v23676_v53  ;;  %19142 = vmatpush3.bf16.msra.mxu0 %v23678_v26 }
 0x42d   :  { %19144 = vmatprep.subr.bf16.mxu1 %v22030_v4  ;;  %19152 = vmatprep.subr.bf16.mxu0 %v22041_v8 }
 0x42f   :  { %2051 = vmatmul.mubr.f32.vlgmr.msra.gmra.mrb[18].mxu1 %v1668_v61  ;;  %2121 = vmatmul.mubr.f32.vlgmr.msra.gmra.mrb[16].mxu0 %v1670_v57 }
 0x430   :  { %19146 = vmatpush1.bf16.msra.mxu1 %v22043_v9  ;;  %19154 = vmatpush1.bf16.msra.mxu0 %v22052_v12 }
 0x431   :  { %19148 = vmatprep.subr.bf16.mxu1 %v22066_v16  ;;  %19156 = vmatprep.subr.bf16.mxu0 %v22077_v20 }
 0x432   :  { %2216 = vmatprep.mubr.f32.mxu1 %v26823_v40  ;;  %2287 = vmatprep.mubr.f32.mxu0 %v26823_v40 }
 0x434   :  { %19150 = vmatpush1.bf16.msra.mxu1 %v22079_v21  ;;  %19158 = vmatpush1.bf16.msra.mxu0 %v22088_v24 }
 0x435   :  { %19160 = vmatprep.subr.bf16.mxu1 %v22102_v28  ;;  %19168 = vmatprep.subr.bf16.mxu0 %v22107_v30 }
 0x4ae   :  { %v1825_v25 = vpop.xlane.xlu1 %1824 }
 0x4af   :  { %v1826_v17 = vsub.f32 %v23586_v45, %v1825_v25 }
 0x4b1   :  { %v1827_v63 = vmul.f32 1.442695, %v1826_v17  ;;  %v1843_v17 = vpop.permute.xlu0 %1842 }
 0x4b3   :  { %21614 = vpow2.f32 %v1827_v63 }
 0x4bd   :  { %v21615_v32 = vpop.eup %21614 }
 0x4be   :  { %v1829_v36 = vsel %vm1822_vm6, %v21615_v32, 0.0 }
 0x4bf   :  { %1830 = vadd.xlane.f32.xlu1 %v1829_v36 }
 0x4e2   :  { %v16260_v19 = vpop.f32.mrb[16].mxu1  ;;  %v16295_v61 = vpop.f32.mrb[14].mxu0 }
 0x4e3   :  { %v16261_v57 = vpop.f32.mrb[17].mxu1  ;;  %v16296_v30 = vpop.f32.mrb[15].mxu0 }
 0x4e4   :  { %v16262_v28 = vadd.f32 %v16261_v57, %v16260_v19  ;;  %v16297_v24 = vadd.f32 %v16296_v30, %v16295_v61  ;;  %v15843_v30 = vmul.f32 -1.442695, %v23586_v45  ;;  %v23737_v45 = vld [vmem:[%s26750_s3 + $0x18] sm:$0x7f] }
 0x502   :  { %v16330_v21 = vpop.f32.mrb[18].mxu1  ;;  %v16365_v37 = vpop.f32.mrb[16].mxu0 }
 0x503   :  { %v16331_v44 = vpop.f32.mrb[19].mxu1  ;;  %v16366_v1 = vpop.f32.mrb[17].mxu0 }
 0x504   :  { %v16332_v49 = vadd.f32 %v16331_v44, %v16330_v21  ;;  %v16367_v20 = vadd.f32 %v16366_v1, %v16365_v37  ;;  %v23748_v37 = vld [vmem:[%s26750_s3] sm:$0x7f]  ;;  %v23755_v44 = vld [vmem:[%s26750_s3 + $0x10] sm:$0x7f] }
 0x505   :  { %v23762_v1 = vld [vmem:[%s26317_s1 + $0x2] sm:$0x3] }
 0x54c   :  { %v1831_v16 = vpop.xlane.xlu1 %1830 }
 0x54d   :  { %21616 = vrcp.f32 %v1831_v16 }
 0x54e   :  { %21618 = vpow2.f32 %v15843_v30  ;;  %v26910_v30 = vld [vmem:[#allocation46_spill] sm:$0xff] }
 0x557   :  { %v21617_v25 = vpop.eup %21616 }
 0x558   :  { %v1833_v63 = vmul.f32 %v21617_v25, %v21615_v32  ;;  %v21619_v19 = vpop.eup %21618  ;;  %v23776_v25 = vld [vmem:[%s26750_s3 + $0x38] sm:$0x7f] }
 0x559   :  { %v1837_v61 = vadd.f32 1.0, %v21619_v19  ;;  %v26911_v19 = vld [vmem:[#allocation47_spill] sm:$0xff] }
 0x55a   :  { %v1845_v12 = vmul.f32 %v1843_v17, %v1833_v63  ;;  %v23787_v17 = vld [vmem:[%s26750_s3 + $0x20] sm:$0x7f]  ;;  %v23794_v63 = vld [vmem:[%s26750_s3 + $0x30] sm:$0x7f] }
 0x55b   :  { %21620 = vrcp.f32 %v1837_v61  ;;  %26908 = vst [vmem:[#allocation174_spill] sm:$0xff] %v23794_v63  ;;  %v26912_v61 = vld [vmem:[#allocation48_spill] sm:$0xff] }
 0x55c   :  { %v1913_v9 = vadd.f32 %v16262_v28, %v1845_v12 }
 0x55e   :  { %v1983_v36 = vadd.f32 %v16297_v24, %v1913_v9 }
 0x560   :  { %v2053_v8 = vadd.f32 %v16332_v49, %v1983_v36  ;;  %v23769_v49 = vld [vmem:[%s26750_s3 + $0x28] sm:$0x7f]  ;;  %v26909_v36 = vld [vmem:[#allocation45_spill] sm:$0xff] }
 0x562   :  { %v2123_v4 = vadd.f32 %v16367_v20, %v2053_v8 }
 0x564   :  { %2127 = vrot.lane.b32.xlu1 %v2123_v4, %s21925_s10 }
 0x565   :  { %v21621_v21 = vpop.eup %21620 }
 0x5d6   :  { %v2128_v57 = vpop.permute.xlu1 %2127 }
 0x5d7   :  { %v2130_v16 = vmul.f32 %v21621_v21, %v2128_v57  ;;  %v26913_v21 = vld [vmem:[#allocation49_spill] sm:$0xff]  ;;  %v26914_v57 = vld [vmem:[#allocation50_spill] sm:$0xff] }
 0x5d9   :  { %2132 = vrot.lane.b32.xlu1 %v2130_v16, %s21926_s4  ;;  %v26915_v16 = vld [vmem:[#allocation51_spill] sm:$0xff] }
 0x64b   :  { %v2133_v32 = vpop.permute.xlu1 %2132 }
 0x64c   :  { %v23708_v12 = vsub.f32 %v2123_v4, %v2133_v32  ;;  %v23730_v4 = vld [vmem:[%s26750_s3 + $0x8] sm:$0x7f] }
 0x64d   :  { %v26916_v32 = vld [vmem:[#allocation52_spill] sm:$0xff] }
 0x64e   :  { %v2142_v8 = vsel %vm1822_vm6, %v23708_v12, 0.0 }
 0x64f   :  { %2143 = vadd.xlane.f32.xlu1 %v2142_v8  ;;  %v26917_v8 = vld [vmem:[#allocation53_spill] sm:$0xff] }
 0x6dc   :  { %v2144_v9 = vpop.xlane.xlu1 %2143 }
 0x6dd   :  { %vm2145_vm7 = vcmp.eq.f32.partialorder %v2144_v9, 0.0 }
 0x6de   :  { %v2146_v20 = vsel %vm2145_vm7, 1.0, %v2144_v9  ;;  %v26918_v9 = vld [vmem:[#allocation54_spill] sm:$0xff] }
 0x6df   :  { %21622 = vrcp.f32 %v2146_v20  ;;  %v26919_v20 = vld [vmem:[#allocation55_spill] sm:$0xff] }
 0x6e9   :  { %v21623_v24 = vpop.eup %21622 }
 0x6ea   :  { %v23713_v28 = vmul.f32 %v21623_v24, %v23708_v12  ;;  %v26920_v24 = vld [vmem:[#allocation56_spill] sm:$0xff] }
 0x6ec   :  { %15846 = vmatmul.mubr.msk.f32.vlgmr.msra.gmra.mrb[20].mxu1 %vm403_vm1, %v23713_v28  ;;  %15847 = vmatmul.mubr.msk.f32.vlgmr.msra.gmra.mrb[18].mxu0 %vm403_vm1, %v23713_v28 }
 0x6ed   :  { %19162 = vmatpush1.bf16.msra.mxu1 %v22135_v42  ;;  %19170 = vmatpush1.bf16.msra.mxu0 %v22137_v43 }
 0x6ee   :  { %19164 = vmatprep.subr.bf16.mxu1 %v22144_v46  ;;  %19172 = vmatprep.subr.bf16.mxu0 %v22146_v47 }
 0x6ef   :  { %2358 = vmatprep.mubr.f32.mxu1 %v26823_v40  ;;  %2429 = vmatprep.mubr.f32.mxu0 %v26823_v40 }
 0x6f1   :  { %19166 = vmatpush1.bf16.msra.mxu1 %v22163_v51  ;;  %19174 = vmatpush1.bf16.msra.mxu0 %v22165_v52 }
 0x6f2   :  { %15850 = vmatprep.subr.msk.mxu1 %vm695_vm2, %v23730_v4  ;;  %15853 = vmatprep.subr.msk.mxu0 %vm695_vm2, %v23737_v45 }
 0x6f4   :  { %15848 = vmatmul.mubr.msk.f32.vlgmr.msra.gmra.mrb[22].mxu1 %vm403_vm1, %v23713_v28  ;;  %15849 = vmatmul.mubr.msk.f32.vlgmr.msra.gmra.mrb[20].mxu0 %vm403_vm1, %v23713_v28 }
 0x6f5   :  { %15851 = vmatpush1.msk.msra.mxu1 %vm695_vm2, %v23748_v37  ;;  %15854 = vmatpush1.msk.msra.mxu0 %vm695_vm2, %v23755_v44 }
 0x6f6   :  { %2503 = vmatprep.mubr.f32.mxu1 %v26823_v40  ;;  %2574 = vmatprep.mubr.f32.mxu0 %v26823_v40 }
 0x6f7   :  { %15856 = vmatprep.subr.msk.mxu1 %vm695_vm2, %v23769_v49  ;;  %15859 = vmatprep.subr.msk.mxu0 %vm695_vm2, %v23776_v25 }
 0x6f8   :  { %15852 = vmatmul.mubr.msk.f32.vlgmr.msra.gmra.mrb[20].mxu1 %vm691_vm3, %v23762_v1  ;;  %15855 = vmatmul.mubr.msk.f32.vlgmr.msra.gmra.mrb[18].mxu0 %vm691_vm3, %v23762_v1 }
 0x6f9   :  { %15857 = vmatpush1.msk.msra.mxu1 %vm695_vm2, %v23787_v17  ;;  %15860 = vmatpush1.msk.msra.mxu0 %vm695_vm2, %v23794_v63 }
 0x6fa   :  { %2645 = vmatprep.mubr.f32.mxu1 %v26823_v40  ;;  %2716 = vmatprep.mubr.f32.mxu0 %v26823_v40 }
 0x6fb   :  { %19176 = vmatprep.subr.bf16.mxu1 %v22235_v2  ;;  %19208 = vmatprep.subr.bf16.mxu0 %v22246_v7 }
 0x6fc   :  { %15858 = vmatmul.mubr.msk.f32.vlgmr.msra.gmra.mrb[22].mxu1 %vm691_vm3, %v23762_v1  ;;  %15861 = vmatmul.mubr.msk.f32.vlgmr.msra.gmra.mrb[20].mxu0 %vm691_vm3, %v23762_v1 }
 0x6fd   :  { %19178 = vmatpush3.bf16.msra.mxu1 %v22248_v10  ;;  %19210 = vmatpush3.bf16.msra.mxu0 %v22260_v15 }
 0x6fe   :  { %19180 = vmatprep.subr.bf16.mxu1 %v22273_v22  ;;  %19212 = vmatprep.subr.bf16.mxu0 %v22275_v23 }
 0x701   :  { %19182 = vmatpush3.bf16.msra.mxu1 %v22287_v29  ;;  %19214 = vmatpush3.bf16.msra.mxu0 %v22300_v34 }
 0x702   :  { %19184 = vmatprep.subr.bf16.mxu1 %v22302_v35  ;;  %19216 = vmatprep.subr.bf16.mxu0 %v22313_v39 }
 0x705   :  { %19186 = vmatpush3.bf16.msra.mxu1 %v22325_v48  ;;  %19218 = vmatpush3.bf16.msra.mxu0 %v22338_v54 }
 0x706   :  { %19188 = vmatprep.subr.bf16.mxu1 %v22340_v55  ;;  %19220 = vmatprep.subr.bf16.mxu0 %v22352_v60  ;;  %v26929_v55 = vld [vmem:[#allocation38_spill] sm:$0xff] }
 0x709   :  { %19190 = vmatpush3.bf16.msra.mxu1 %v22373_v6  ;;  %19222 = vmatpush3.bf16.msra.mxu0 %v22377_v11  ;;  %v26927_v11 = vld [vmem:[#allocation39_spill] sm:$0xff]  ;;  %v26928_v6 = vld [vmem:[#allocation42_spill] sm:$0xff] }
 0x70a   :  { %19192 = vmatprep.subr.bf16.mxu1 %v22379_v13  ;;  %19224 = vmatprep.subr.bf16.mxu0 %v22382_v14  ;;  %v26925_v14 = vld [vmem:[#allocation37_spill] sm:$0xff] }
 0x70b   :  { %v26926_v13 = vld [vmem:[#allocation41_spill] sm:$0xff] }
 0x70d   :  { %19194 = vmatpush3.bf16.msra.mxu1 %v26909_v36  ;;  %19226 = vmatpush3.bf16.msra.mxu0 %v26910_v30  ;;  %v26921_v30 = vld [vmem:[#allocation57_spill] sm:$0xff] }
 0x70e   :  { %19196 = vmatprep.subr.bf16.mxu1 %v26911_v19  ;;  %19228 = vmatprep.subr.bf16.mxu0 %v26912_v61  ;;  %v26922_v19 = vld [vmem:[#allocation58_spill] sm:$0xff]  ;;  %v26923_v61 = vld [vmem:[#allocation59_spill] sm:$0xff] }
 0x711   :  { %19198 = vmatpush3.bf16.msra.mxu1 %v26913_v21  ;;  %19230 = vmatpush3.bf16.msra.mxu0 %v26914_v57  ;;  %v26924_v21 = vld [vmem:[#allocation60_spill] sm:$0xff] }
 0x712   :  { %19200 = vmatprep.subr.bf16.mxu1 %v26915_v16  ;;  %19232 = vmatprep.subr.bf16.mxu0 %v26916_v32 }
 0x715   :  { %19202 = vmatpush3.bf16.msra.mxu1 %v26917_v8  ;;  %19234 = vmatpush3.bf16.msra.mxu0 %v26918_v9 }
 0x716   :  { %19204 = vmatprep.subr.bf16.mxu1 %v26919_v20  ;;  %19236 = vmatprep.subr.bf16.mxu0 %v26920_v24 }
 0x719   :  { %19206 = vmatpush3.bf16.msra.mxu1 %v26921_v30  ;;  %19238 = vmatpush3.bf16.msra.mxu0 %v26922_v19 }
 0x71a   :  { %19240 = vmatprep.subr.bf16.mxu1 %v26923_v61  ;;  %19272 = vmatprep.subr.bf16.mxu0 %v26924_v21  ;;  %v26930_v61 = vld [vmem:[#allocation43_spill] sm:$0xff] }
 0x7cb   :  { %v2505_v57 = vpop.f32.mrb[20].mxu1  ;;  %v2576_v16 = vpop.f32.mrb[18].mxu0 }
 0x7cc   :  { %v2507_v36 = vpop.f32.mrb[21].mxu1  ;;  %v2578_v32 = vpop.f32.mrb[19].mxu0  ;;  %v2723_v8 = vadd.f32 %v2505_v57, %v26925_v14  ;;  %v2725_v9 = vadd.f32 %v2576_v16, %v26926_v13  ;;  %v26931_v14 = vld [vmem:[#allocation40_spill] sm:$0xff] }
 0x7cd   :  { %v2724_v20 = vadd.f32 %v2507_v36, %v26927_v11  ;;  %v2726_v24 = vadd.f32 %v2578_v32, %v26928_v6  ;;  %v26932_v13 = vld [vmem:[#allocation44_spill] sm:$0xff] }
 0x7ce   :  { %v2731_v39 = vsel %vm1053_vm4, %v2723_v8, -inf  ;;  %v2733_v57 = vsel %vm1053_vm4, %v2725_v9, -inf }
 0x7cf   :  { %v2647_v60 = vpop.f32.mrb[22].mxu1  ;;  %v2718_v30 = vpop.f32.mrb[20].mxu0  ;;  %v2732_v32 = vsel %vm1053_vm4, %v2724_v20, -inf  ;;  %v2734_v6 = vsel %vm1053_vm4, %v2726_v24, -inf }
 0x7d0   :  { %v23843_v19 = vadd.f32 %v2647_v60, %v26929_v55  ;;  %v23846_v54 = vadd.f32 %v2718_v30, %v26930_v61  ;;  %v2649_v21 = vpop.f32.mrb[23].mxu1  ;;  %v2720_v48 = vpop.f32.mrb[21].mxu0 }
 0x7d1   :  { %v2728_v16 = vadd.f32 %v2649_v21, %v26931_v14  ;;  %v2730_v36 = vadd.f32 %v2720_v48, %v26932_v13 }
 0x7d2   :  { %v2735_v60 = vsel %vm1053_vm4, %v23843_v19, -inf  ;;  %v2739_v30 = vsel %vm1053_vm4, %v23846_v54, -inf }
 0x7d3   :  { %v2736_v61 = vmax.f32 %v2731_v39, %v2735_v60  ;;  %v2740_v55 = vmax.f32 %v2733_v57, %v2739_v30  ;;  %v2737_v11 = vsel %vm1053_vm4, %v2728_v16, -inf  ;;  %v2741_v35 = vsel %vm1053_vm4, %v2730_v36, -inf }
 0x7d4   :  { %v2738_v34 = vmax.f32 %v2732_v32, %v2737_v11  ;;  %v2742_v21 = vmax.f32 %v2734_v6, %v2741_v35  ;;  %v26936_v11 = vld [vmem:[#allocation64_spill] sm:$0xff]  ;;  %v26946_v32 = vld [vmem:[#allocation74_spill] sm:$0xff] }
 0x7d6   :  { %v2743_v14 = vmax.f32 %v2736_v61, %v2738_v34  ;;  %v2744_v48 = vmax.f32 %v2740_v55, %v2742_v21  ;;  %v26940_v61 = vld [vmem:[#allocation68_spill] sm:$0xff] }
 0x7d8   :  { %v2745_v13 = vmax.f32 %v2743_v14, %v2744_v48  ;;  %v26938_v14 = vld [vmem:[#allocation66_spill] sm:$0xff]  ;;  %v26947_v48 = vld [vmem:[#allocation75_spill] sm:$0xff] }
 0x7da   :  { %2746 = vmax.xlane.f32.xlu0 %v2745_v13  ;;  %v26937_v13 = vld [vmem:[#allocation65_spill] sm:$0xff] }
 0x867   :  { %v2747_v29 = vpop.xlane.xlu0 %2746 }
 0x868   :  { %v2748_v23 = vsub.f32 %v2723_v8, %v2747_v29  ;;  %v2749_v22 = vsub.f32 %v2724_v20, %v2747_v29  ;;  %v2750_v15 = vsub.f32 %v2725_v9, %v2747_v29  ;;  %v2751_v10 = vsub.f32 %v2726_v24, %v2747_v29  ;;  %v26941_v8 = vld [vmem:[#allocation69_spill] sm:$0xff]  ;;  %v26942_v9 = vld [vmem:[#allocation70_spill] sm:$0xff]  ;;  %v26943_v20 = vld [vmem:[#allocation71_spill] sm:$0xff] }
 0x869   :  { %v2753_v7 = vsub.f32 %v2728_v16, %v2747_v29  ;;  %v2755_v57 = vsub.f32 %v2730_v36, %v2747_v29  ;;  %v26944_v24 = vld [vmem:[#allocation72_spill] sm:$0xff]  ;;  %v2752_v16 = vsub.f32 %v23843_v19, %v2747_v29  ;;  %v26945_v36 = vld [vmem:[#allocation73_spill] sm:$0xff]  ;;  %v2754_v21 = vsub.f32 %v23846_v54, %v2747_v29  ;;  %v26955_v29 = vld [vmem:[#allocation83_spill] sm:$0xff] }
 0x86a   :  { %v2756_v2 = vmul.f32 1.442695, %v2748_v23  ;;  %v2758_v63 = vmul.f32 1.442695, %v2749_v22  ;;  %v2760_v39 = vmul.f32 1.442695, %v2750_v15 }
 0x86b   :  { %v2762_v60 = vmul.f32 1.442695, %v2751_v10  ;;  %v2766_v30 = vmul.f32 1.442695, %v2753_v7  ;;  %v2770_v34 = vmul.f32 1.442695, %v2755_v57 }
 0x86c   :  { %21624 = vpow2.f32 %v2756_v2  ;;  %v26933_v2 = vld [vmem:[#allocation61_spill] sm:$0xff]  ;;  %v26934_v10 = vld [vmem:[#allocation62_spill] sm:$0xff]  ;;  %v26935_v15 = vld [vmem:[#allocation63_spill] sm:$0xff]  ;;  %v2764_v57 = vmul.f32 1.442695, %v2752_v16 }
 0x86d   :  { %21626 = vpow2.f32 %v2758_v63  ;;  %v26939_v63 = vld [vmem:[#allocation67_spill] sm:$0xff]  ;;  %v26953_v19 = vld [vmem:[#allocation81_spill] sm:$0xff]  ;;  %v26956_v54 = vld [vmem:[#allocation84_spill] sm:$0xff] }
 0x86e   :  { %21628 = vpow2.f32 %v2760_v39  ;;  %v26948_v39 = vld [vmem:[#allocation76_spill] sm:$0xff]  ;;  %v26957_v16 = vld [vmem:[#allocation85_spill] sm:$0xff] }
 0x86f   :  { %21630 = vpow2.f32 %v2762_v60  ;;  %v26949_v60 = vld [vmem:[#allocation77_spill] sm:$0xff] }
 0x870   :  { %21632 = vpow2.f32 %v2766_v30  ;;  %v26950_v30 = vld [vmem:[#allocation78_spill] sm:$0xff] }
 0x871   :  { %21634 = vpow2.f32 %v2770_v34  ;;  %v2768_v34 = vmul.f32 1.442695, %v2754_v21  ;;  %v26960_v21 = vld [vmem:[#allocation88_spill] sm:$0xff] }
 0x872   :  { %21636 = vpow2.f32 %v2764_v57  ;;  %v26962_v57 = vld [vmem:[#allocation91_spill] sm:$0xff] }
 0x873   :  { %21638 = vpow2.f32 %v2768_v34  ;;  %v26964_v34 = vld [vmem:[#allocation92_spill] sm:$0xff] }
 0x876   :  { %v23860_v35 = vpop.eup %21624 }
 0x877   :  { %v23862_v55 = vpop.eup %21626 }
 0x878   :  { %v23864_v6 = vpop.eup %21628  ;;  %2836 = vmatprep.mubr.f32.mxu1 %v23862_v55 }
 0x879   :  { %v23867_v22 = vpop.eup %21630  ;;  %2837 = vmatmul.mubr.f32.vlgmr.msra.gmra.mrb[24].mxu1 %v23860_v35 }
 0x87a   :  { %2906 = vmatprep.mubr.f32.mxu0 %v23867_v22  ;;  %19242 = vmatpush3.bf16.msra.mxu1 %v26933_v2  ;;  %v23872_v7 = vpop.eup %21632 }
 0x87b   :  { %2907 = vmatmul.mubr.f32.vlgmr.msra.gmra.mrb[22].mxu0 %v23864_v6  ;;  %19244 = vmatprep.subr.bf16.mxu1 %v26934_v10  ;;  %v23878_v23 = vpop.eup %21634 }
 0x87c   :  { %19274 = vmatpush3.bf16.msra.mxu0 %v26935_v15  ;;  %2976 = vmatprep.mubr.f32.mxu1 %v23872_v7 }
 0x87d   :  { %19276 = vmatprep.subr.bf16.mxu0 %v26936_v11  ;;  %3046 = vmatprep.mubr.f32.mxu0 %v23878_v23 }
 0x87e   :  { %19246 = vmatpush3.bf16.msra.mxu1 %v26937_v13 }
 0x87f   :  { %19248 = vmatprep.subr.bf16.mxu1 %v26938_v14 }
 0x880   :  { %19278 = vmatpush3.bf16.msra.mxu0 %v26939_v63 }
 0x881   :  { %19280 = vmatprep.subr.bf16.mxu0 %v26940_v61 }
 0x882   :  { %19250 = vmatpush3.bf16.msra.mxu1 %v26941_v8 }
 0x883   :  { %19252 = vmatprep.subr.bf16.mxu1 %v26942_v9 }
 0x884   :  { %19282 = vmatpush3.bf16.msra.mxu0 %v26943_v20  ;;  %v26951_v20 = vld [vmem:[#allocation79_spill] sm:$0xff] }
 0x885   :  { %19284 = vmatprep.subr.bf16.mxu0 %v26944_v24  ;;  %v26952_v24 = vld [vmem:[#allocation80_spill] sm:$0xff] }
 0x886   :  { %19254 = vmatpush3.bf16.msra.mxu1 %v26945_v36 }
 0x887   :  { %19256 = vmatprep.subr.bf16.mxu1 %v26946_v32  ;;  %v26954_v32 = vld [vmem:[#allocation82_spill] sm:$0xff] }
 0x888   :  { %19286 = vmatpush3.bf16.msra.mxu0 %v26947_v48 }
 0x889   :  { %19288 = vmatprep.subr.bf16.mxu0 %v26948_v39 }
 0x88a   :  { %19258 = vmatpush3.bf16.msra.mxu1 %v26949_v60  ;;  %v26958_v60 = vld [vmem:[#allocation86_spill] sm:$0xff] }
 0x88b   :  { %19260 = vmatprep.subr.bf16.mxu1 %v26950_v30  ;;  %v26959_v30 = vld [vmem:[#allocation87_spill] sm:$0xff] }
 0x88c   :  { %19290 = vmatpush3.bf16.msra.mxu0 %v26951_v20  ;;  %v26961_v20 = vld [vmem:[#allocation89_spill] sm:$0xff] }
 0x88d   :  { %19292 = vmatprep.subr.bf16.mxu0 %v26952_v24 }
 0x88e   :  { %19262 = vmatpush3.bf16.msra.mxu1 %v26953_v19  ;;  %v23910_v19 = vpop.eup %21636 }
 0x88f   :  { %19264 = vmatprep.subr.bf16.mxu1 %v26954_v32  ;;  %v26963_v32 = vld [vmem:[#allocation90_spill] sm:$0xff] }
 0x890   :  { %19294 = vmatpush3.bf16.msra.mxu0 %v26955_v29 }
 0x891   :  { %19296 = vmatprep.subr.bf16.mxu0 %v26956_v54  ;;  %v23915_v54 = vpop.eup %21638 }
 0x892   :  { %19266 = vmatpush3.bf16.msra.mxu1 %v26957_v16  ;;  %v26965_v16 = vld [vmem:[#allocation93_spill] sm:$0xff] }
 0x893   :  { %19268 = vmatprep.subr.bf16.mxu1 %v26958_v60  ;;  %v26972_v60 = vld [vmem:[#allocation100_spill] sm:$0xff] }
 0x894   :  { %19298 = vmatpush3.bf16.msra.mxu0 %v26959_v30  ;;  %v26970_v30 = vld [vmem:[#allocation99_spill] sm:$0xff] }
 0x895   :  { %19300 = vmatprep.subr.bf16.mxu0 %v26960_v21  ;;  %v26966_v21 = vld [vmem:[#allocation95_spill] sm:$0xff] }
 0x896   :  { %19270 = vmatpush3.bf16.msra.mxu1 %v26961_v20  ;;  %v26967_v20 = vld [vmem:[#allocation94_spill] sm:$0xff] }
 0x897   :  { %19304 = vmatprep.subr.bf16.mxu1 %v26962_v57  ;;  %v26968_v57 = vld [vmem:[#allocation96_spill] sm:$0xff] }
 0x898   :  { %19302 = vmatpush3.bf16.msra.mxu0 %v26963_v32  ;;  %v26969_v32 = vld [vmem:[#allocation97_spill] sm:$0xff] }
 0x899   :  { %2977 = vmatmul.mubr.f32.vlgmr.msra.gmra.mrb[26].mxu1 %v23910_v19  ;;  %19312 = vmatprep.subr.bf16.mxu0 %v26964_v34  ;;  %v26971_v34 = vld [vmem:[#allocation98_spill] sm:$0xff] }
 0x89a   :  { %19306 = vmatpush1.bf16.msra.mxu1 %v26965_v16  ;;  %3121 = vmatprep.mubr.f32.mxu1 %v26823_v40 }
 0x89b   :  { %3047 = vmatmul.mubr.f32.vlgmr.msra.gmra.mrb[24].mxu0 %v23915_v54  ;;  %19308 = vmatprep.subr.bf16.mxu1 %v26966_v21 }
 0x89c   :  { %19314 = vmatpush1.bf16.msra.mxu0 %v26967_v20  ;;  %3192 = vmatprep.mubr.f32.mxu0 %v26823_v40 }
 0x89d   :  { %19316 = vmatprep.subr.bf16.mxu0 %v26968_v57 }
 0x89e   :  { %19310 = vmatpush1.bf16.msra.mxu1 %v26969_v32 }
 0x89f   :  { %19320 = vmatprep.subr.bf16.mxu1 %v26970_v30 }
 0x8a0   :  { %19318 = vmatpush1.bf16.msra.mxu0 %v26971_v34 }
 0x8a1   :  { %19328 = vmatprep.subr.bf16.mxu0 %v26972_v60 }
 0x94c   :  { %v16400_v16 = vpop.f32.mrb[24].mxu1 }
 0x94d   :  { %v16401_v29 = vpop.f32.mrb[25].mxu1 }
 0x94e   :  { %v16435_v24 = vpop.f32.mrb[22].mxu0  ;;  %v16402_v39 = vadd.f32 %v16401_v29, %v16400_v16  ;;  %v26973_v29 = vld [vmem:[#allocation101_spill] sm:$0xff] }
 0x94f   :  { %v16436_v48 = vpop.f32.mrb[23].mxu0  ;;  %v26987_v16 = vld [vmem:[#allocation113_spill] sm:$0xff] }
 0x950   :  { %v16437_v21 = vadd.f32 %v16436_v48, %v16435_v24  ;;  %v26974_v24 = vld [vmem:[#allocation102_spill] sm:$0xff]  ;;  %v26975_v48 = vld [vmem:[#allocation103_spill] sm:$0xff] }
 0x952   :  { %v2909_v36 = vadd.f32 %v16437_v21, %v16402_v39  ;;  %v26976_v39 = vld [vmem:[#allocation104_spill] sm:$0xff]  ;;  %v26988_v21 = vld [vmem:[#allocation114_spill] sm:$0xff] }
 0x96c   :  { %v16470_v20 = vpop.f32.mrb[26].mxu1 }
 0x96d   :  { %v16471_v9 = vpop.f32.mrb[27].mxu1 }
 0x96e   :  { %v16505_v8 = vpop.f32.mrb[24].mxu0  ;;  %v16472_v61 = vadd.f32 %v16471_v9, %v16470_v20  ;;  %v26982_v9 = vld [vmem:[#allocation108_spill] sm:$0xff]  ;;  %v26983_v20 = vld [vmem:[#allocation109_spill] sm:$0xff] }
 0x96f   :  { %v16506_v57 = vpop.f32.mrb[25].mxu0 }
 0x970   :  { %v2979_v63 = vadd.f32 %v16472_v61, %v2909_v36  ;;  %v16507_v32 = vadd.f32 %v16506_v57, %v16505_v8  ;;  %v26980_v61 = vld [vmem:[#allocation107_spill] sm:$0xff]  ;;  %v26984_v36 = vld [vmem:[#allocation110_spill] sm:$0xff] }
 0x971   :  { %v23947_v8 = vld [vmem:[%s26323_s6] sm:$0x7f] }
 0x972   :  { %v3049_v14 = vadd.f32 %v16507_v32, %v2979_v63  ;;  %v26978_v63 = vld [vmem:[#allocation106_spill] sm:$0xff]  ;;  %26981 = vst [vmem:[#allocation61_spill] sm:$0xff] %v23947_v8  ;;  %v26985_v32 = vld [vmem:[#allocation111_spill] sm:$0xff] }
 0x973   :  { %v26989_v57 = vld [vmem:[#allocation115_spill] sm:$0xff] }
 0x974   :  { %21640 = vrcp.f32 %v3049_v14  ;;  %v26977_v14 = vld [vmem:[#allocation105_spill] sm:$0xff] }
 0x97e   :  { %v21641_v30 = vpop.eup %21640 }
 0x97f   :  { %v3053_v34 = vmul.f32 %v21641_v30, %v23708_v12  ;;  %v26979_v12 = vmov 0.0|0.0   ;;  %v26986_v30 = vld [vmem:[#allocation112_spill] sm:$0xff] }
 0x981   :  { %15862 = vmatmul.mubr.msk.f32.vlgmr.msra.gmra.mrb[28].mxu1 %vm403_vm1, %v3053_v34  ;;  %15863 = vmatmul.mubr.msk.f32.vlgmr.msra.gmra.mrb[26].mxu0 %vm403_vm1, %v3053_v34 }
 0x982   :  { %19322 = vmatpush1.bf16.msra.mxu1 %v26973_v29  ;;  %19330 = vmatpush1.bf16.msra.mxu0 %v26974_v24 }
 0x983   :  { %19324 = vmatprep.subr.bf16.mxu1 %v26975_v48  ;;  %19332 = vmatprep.subr.bf16.mxu0 %v26976_v39 }
 0x984   :  { %3263 = vmatprep.mubr.f32.mxu1 %v26823_v40  ;;  %3334 = vmatprep.mubr.f32.mxu0 %v26823_v40 }
 0x986   :  { %19326 = vmatpush1.bf16.msra.mxu1 %v26977_v14  ;;  %19334 = vmatpush1.bf16.msra.mxu0 %v26978_v63 }
 0x987   :  { %19335 = vmatprep.subr.bf16.mxu1 %v26979_v12  ;;  %18500 = vmatprep.subr.mxu0 %v26823_v40 }
 0x989   :  { %15864 = vmatmul.mubr.msk.f32.vlgmr.msra.gmra.mrb[30].mxu1 %vm403_vm1, %v3053_v34  ;;  %15865 = vmatmul.mubr.msk.f32.vlgmr.msra.gmra.mrb[28].mxu0 %vm403_vm1, %v3053_v34  ;;  %v26990_v34 = vld [vmem:[#allocation116_spill] sm:$0xff] }
 0x98a   :  { %19337 = vmatpush3.bf16.msra.mxu1 %v26980_v61  ;;  %18501 = vmatpush3.msk.msra.mxu0 %vm695_vm2, %v23947_v8 }
 0x98b   :  { %19338 = vmatprep.subr.bf16.mxu1 %v26979_v12  ;;  %18502 = vmatprep.mubr.msk.f32.mxu0 %vm21923_vm5, %v26823_v40 }
 0x98c   :  { %18497 = vmatprep.mubr.msk.f32.mxu1 %vm21923_vm5, %v26823_v40  ;;  %19342 = vmatprep.subr.bf16.mxu0 %v26982_v9  ;;  %v26996_v9 = vld [vmem:[#allocation122_spill] sm:$0xff] }
 0x98d   :  { %18503 = vmatmul.mubr.msk.f32.vlgmr.msra.gmra.mrb[30].mxu0 %vm691_vm3, %v23762_v1  ;;  %v26991_v1 = vld [vmem:[#allocation117_spill] sm:$0xff] }
 0x98e   :  { %19340 = vmatpush3.bf16.msra.mxu1 %v26983_v20  ;;  %19344 = vmatpush3.bf16.msra.mxu0 %v26984_v36  ;;  %v26992_v20 = vld [vmem:[#allocation118_spill] sm:$0xff]  ;;  %v26993_v36 = vld [vmem:[#allocation119_spill] sm:$0xff] }
 0x98f   :  { %19374 = vmatprep.subr.bf16.mxu1 %v26985_v32  ;;  %19346 = vmatprep.subr.bf16.mxu0 %v26986_v30  ;;  %v26994_v32 = vld [vmem:[#allocation120_spill] sm:$0xff]  ;;  %v26995_v30 = vld [vmem:[#allocation121_spill] sm:$0xff] }
 0x991   :  { %18498 = vmatmul.mubr.msk.f32.vlgmr.msra.gmra.mrb[32].mxu1 %vm403_vm1, %v23713_v28  ;;  %v26997_v28 = vld [vmem:[#allocation123_spill] sm:$0xff] }
 0x992   :  { %19376 = vmatpush3.bf16.msra.mxu1 %v26987_v16  ;;  %19348 = vmatpush3.bf16.msra.mxu0 %v26988_v21  ;;  %v26998_v16 = vld [vmem:[#allocation124_spill] sm:$0xff]  ;;  %v26999_v21 = vld [vmem:[#allocation125_spill] sm:$0xff] }
 0x993   :  { %19378 = vmatprep.subr.bf16.mxu1 %v26989_v57  ;;  %19350 = vmatprep.subr.bf16.mxu0 %v26990_v34  ;;  %v27000_v57 = vld [vmem:[#allocation126_spill] sm:$0xff]  ;;  %v27001_v34 = vld [vmem:[#allocation127_spill] sm:$0xff] }
 0x996   :  { %19380 = vmatpush3.bf16.msra.mxu1 %v26991_v1  ;;  %19352 = vmatpush3.bf16.msra.mxu0 %v26992_v20  ;;  %v27002_v1 = vld [vmem:[#allocation128_spill] sm:$0xff]  ;;  %v27003_v20 = vld [vmem:[#allocation129_spill] sm:$0xff] }
 0x997   :  { %19382 = vmatprep.subr.bf16.mxu1 %v26993_v36  ;;  %19354 = vmatprep.subr.bf16.mxu0 %v26994_v32  ;;  %v27004_v36 = vld [vmem:[#allocation130_spill] sm:$0xff]  ;;  %v27005_v32 = vld [vmem:[#allocation131_spill] sm:$0xff] }
 0x99a   :  { %19384 = vmatpush3.bf16.msra.mxu1 %v26995_v30  ;;  %19356 = vmatpush3.bf16.msra.mxu0 %v26996_v9  ;;  %v27006_v30 = vld [vmem:[#allocation132_spill] sm:$0xff]  ;;  %v27007_v9 = vld [vmem:[#allocation133_spill] sm:$0xff] }
 0x99b   :  { %19386 = vmatprep.subr.bf16.mxu1 %v26997_v28  ;;  %19358 = vmatprep.subr.bf16.mxu0 %v26998_v16  ;;  %v27008_v28 = vld [vmem:[#allocation134_spill] sm:$0xff]  ;;  %v27009_v16 = vld [vmem:[#allocation135_spill] sm:$0xff] }
 0x99e   :  { %19388 = vmatpush3.bf16.msra.mxu1 %v26999_v21  ;;  %19360 = vmatpush3.bf16.msra.mxu0 %v27000_v57  ;;  %v27010_v21 = vld [vmem:[#allocation137_spill] sm:$0xff]  ;;  %v27011_v57 = vld [vmem:[#allocation136_spill] sm:$0xff] }
 0x99f   :  { %19390 = vmatprep.subr.bf16.mxu1 %v27001_v34  ;;  %19362 = vmatprep.subr.bf16.mxu0 %v27002_v1  ;;  %v27012_v34 = vld [vmem:[#allocation139_spill] sm:$0xff]  ;;  %v27013_v1 = vld [vmem:[#allocation138_spill] sm:$0xff] }
 0x9a2   :  { %19392 = vmatpush3.bf16.msra.mxu1 %v27003_v20  ;;  %19364 = vmatpush3.bf16.msra.mxu0 %v27004_v36  ;;  %v27014_v20 = vld [vmem:[#allocation141_spill] sm:$0xff]  ;;  %v27015_v36 = vld [vmem:[#allocation140_spill] sm:$0xff] }
 0x9a3   :  { %19394 = vmatprep.subr.bf16.mxu1 %v27005_v32  ;;  %19366 = vmatprep.subr.bf16.mxu0 %v27006_v30  ;;  %v27016_v32 = vld [vmem:[#allocation142_spill] sm:$0xff] }
 0x9a6   :  { %19396 = vmatpush3.bf16.msra.mxu1 %v27007_v9  ;;  %19368 = vmatpush3.bf16.msra.mxu0 %v27008_v28 }
 0x9a7   :  { %19398 = vmatprep.subr.bf16.mxu1 %v27009_v16  ;;  %19370 = vmatprep.subr.bf16.mxu0 %v27010_v21 }
 0x9aa   :  { %19400 = vmatpush3.bf16.msra.mxu1 %v27011_v57  ;;  %19372 = vmatpush3.bf16.msra.mxu0 %v27012_v34 }
 0x9ab   :  { %19402 = vmatprep.subr.bf16.mxu1 %v27013_v1  ;;  %19406 = vmatprep.subr.bf16.mxu0 %v27014_v20 }
 0x9ae   :  { %19404 = vmatpush3.bf16.msra.mxu1 %v27015_v36 }
 0x9af   :  { %19438 = vmatprep.subr.bf16.mxu1 %v27016_v32  ;;  %v27017_v32 = vld [vmem:[#allocation146_spill] sm:$0xff] }
 0xa54   :  { %v3123_v30 = vpop.f32.mrb[28].mxu1  ;;  %v3194_v9 = vpop.f32.mrb[26].mxu0 }
 0xa55   :  { %v3125_v8 = vpop.f32.mrb[29].mxu1  ;;  %v3196_v28 = vpop.f32.mrb[27].mxu0  ;;  %v3341_v57 = vmul.f32 %v23860_v35, %v3123_v30  ;;  %v3343_v34 = vmul.f32 %v23864_v6, %v3194_v9  ;;  %v27018_v9 = vld [vmem:[#allocation150_spill] sm:$0xff] }
 0xa56   :  { %v3342_v16 = vmul.f32 %v23862_v55, %v3125_v8  ;;  %v3344_v21 = vmul.f32 %v23867_v22, %v3196_v28 }
 0xa58   :  { %3577 = vmatprep.mubr.f32.mxu0 %v3342_v16  ;;  %3647 = vmatprep.mubr.f32.mxu1 %v3344_v21  ;;  %v27019_v21 = vld [vmem:[#allocation151_spill] sm:$0xff] }
 0xa59   :  { %3578 = vmatmul.mubr.f32.vlgmr.msra.gmra.mrb[32].mxu0 %v3341_v57  ;;  %3648 = vmatmul.mubr.f32.vlgmr.msra.gmra.mrb[34].mxu1 %v3343_v34  ;;  %v27020_v57 = vld [vmem:[#allocation152_spill] sm:$0xff]  ;;  %v27021_v34 = vld [vmem:[#allocation153_spill] sm:$0xff] }
 0xa5a   :  { %19408 = vmatpush3.bf16.msra.mxu0 %v23420_v62  ;;  %19440 = vmatpush3.bf16.msra.mxu1 %v23422_v41 }
 0xa5b   :  { %19410 = vmatprep.subr.bf16.mxu0 %v23432_v50  ;;  %19442 = vmatprep.subr.bf16.mxu1 %v27017_v32 }
 0xa5c   :  { %v3265_v36 = vpop.f32.mrb[30].mxu1  ;;  %v3336_v55 = vpop.f32.mrb[28].mxu0 }
 0xa5d   :  { %v3267_v8 = vpop.f32.mrb[31].mxu1  ;;  %v3338_v22 = vpop.f32.mrb[29].mxu0 }
 0xa5e   :  { %v3346_v35 = vmul.f32 %v23872_v7, %v3267_v8  ;;  %v3348_v6 = vmul.f32 %v23878_v23, %v3338_v22  ;;  %19412 = vmatpush3.bf16.msra.mxu0 %v23456_v38  ;;  %19444 = vmatpush3.bf16.msra.mxu1 %v23458_v56  ;;  %v27022_v7 = vld [vmem:[#allocation154_spill] sm:$0xff]  ;;  %v27023_v22 = vld [vmem:[#allocation155_spill] sm:$0xff] }
 0xa5f   :  { %19414 = vmatprep.subr.bf16.mxu0 %v23468_v0  ;;  %19446 = vmatprep.subr.bf16.mxu1 %v27018_v9  ;;  %v27024_v0 = vld [vmem:[#allocation156_spill] sm:$0xff]  ;;  %v27025_v9 = vld [vmem:[#allocation159_spill] sm:$0xff] }
 0xa60   :  { %3717 = vmatprep.mubr.f32.mxu0 %v3346_v35  ;;  %3787 = vmatprep.mubr.f32.mxu1 %v3348_v6  ;;  %v3485_v30 = vpop.f32.mrb[30].mxu0  ;;  %v27026_v6 = vld [vmem:[#allocation157_spill] sm:$0xff] }
 0xa61   :  { %v18504_v16 = vpop.f32.mrb[31].mxu0 }
 0xa62   :  { %19416 = vmatpush3.bf16.msra.mxu0 %v27019_v21  ;;  %19448 = vmatpush3.bf16.msra.mxu1 %v27020_v57  ;;  %v27027_v16 = vld [vmem:[#allocation158_spill] sm:$0xff] }
 0xa63   :  { %19418 = vmatprep.subr.bf16.mxu0 %v27021_v34  ;;  %19450 = vmatprep.subr.bf16.mxu1 %v27022_v7  ;;  %v27028_v34 = vld [vmem:[#allocation160_spill] sm:$0xff] }
 0xa64   :  { %v3415_v23 = vpop.f32.mrb[32].mxu1 }
 0xa65   :  { %v3486_v28 = vadd.f32 %v3485_v30, %v3415_v23  ;;  %v18499_v8 = vpop.f32.mrb[33].mxu1  ;;  %v27029_v30 = vld [vmem:[#allocation162_spill] sm:$0xff]  ;;  %v27030_v23 = vld [vmem:[#allocation163_spill] sm:$0xff] }
 0xa66   :  { %19420 = vmatpush3.bf16.msra.mxu0 %v27023_v22  ;;  %19452 = vmatpush3.bf16.msra.mxu1 %v27024_v0  ;;  %v27032_v8 = vld [vmem:[#allocation3_spill] sm:$0xff] }
 0xa67   :  { %v24016_v35 = vadd.f32 %v27025_v9, %v3486_v28  ;;  %19422 = vmatprep.subr.bf16.mxu0 %v27026_v6  ;;  %19454 = vmatprep.subr.bf16.mxu1 %v27027_v16  ;;  %v27031_v9 = vld [vmem:[#allocation165_spill] sm:$0xff]  ;;  %v3347_v28 = vmul.f32 %v23915_v54, %v3336_v55  ;;  %v27039_v54 = vld [vmem:[#allocation10_spill] sm:$0xff]  ;;  %v27041_v55 = vld [vmem:[#allocation12_spill] sm:$0xff] }
 0xa69   :  { %v3490_v57 = vsel %vm1822_vm6, %v24016_v35, -inf }
 0xa6a   :  { %19424 = vmatpush3.bf16.msra.mxu0 %v27028_v34  ;;  %19456 = vmatpush3.bf16.msra.mxu1 %v23577_v3 }
 0xa6b   :  { %3491 = vmax.xlane.f32.xlu1 %v3490_v57  ;;  %19426 = vmatprep.subr.bf16.mxu0 %v27029_v30  ;;  %v3345_v57 = vmul.f32 %v23910_v19, %v3265_v36  ;;  %v27038_v19 = vld [vmem:[#allocation9_spill] sm:$0xff]  ;;  %v27040_v36 = vld [vmem:[#allocation11_spill] sm:$0xff] }
 0xa6c   :  { %19458 = vmatprep.subr.bf16.mxu1 %v27030_v23 }
 0xa6e   :  { %19428 = vmatpush3.bf16.msra.mxu0 %v23616_v27  ;;  %19460 = vmatpush3.bf16.msra.mxu1 %v27031_v9 }
 0xa6f   :  { %19430 = vmatprep.subr.bf16.mxu0 %v23627_v5  ;;  %19462 = vmatprep.subr.bf16.mxu1 %v23629_v18  ;;  %v27033_v5 = vld [vmem:[#allocation4_spill] sm:$0xff] }
 0xa72   :  { %19432 = vmatpush3.bf16.msra.mxu0 %v23652_v59  ;;  %19464 = vmatpush3.bf16.msra.mxu1 %v23654_v33  ;;  %v27034_v59 = vld [vmem:[#allocation5_spill] sm:$0xff]  ;;  %v27035_v33 = vld [vmem:[#allocation6_spill] sm:$0xff] }
 0xa73   :  { %19434 = vmatprep.subr.bf16.mxu0 %v23661_v31  ;;  %19466 = vmatprep.subr.bf16.mxu1 %v23663_v58  ;;  %v27036_v31 = vld [vmem:[#allocation7_spill] sm:$0xff]  ;;  %v27037_v58 = vld [vmem:[#allocation8_spill] sm:$0xff] }
 0xa76   :  { %19436 = vmatpush3.bf16.msra.mxu0 %v23676_v53  ;;  %19468 = vmatpush3.bf16.msra.mxu1 %v23678_v26 }
 0xa77   :  { %19470 = vmatprep.subr.bf16.mxu0 %v27032_v8  ;;  %19478 = vmatprep.subr.bf16.mxu1 %v27033_v5 }
 0xa79   :  { %3718 = vmatmul.mubr.f32.vlgmr.msra.gmra.mrb[34].mxu0 %v3345_v57  ;;  %3788 = vmatmul.mubr.f32.vlgmr.msra.gmra.mrb[36].mxu1 %v3347_v28 }
 0xa7a   :  { %19472 = vmatpush1.bf16.msra.mxu0 %v27034_v59  ;;  %19480 = vmatpush1.bf16.msra.mxu1 %v27035_v33  ;;  %v15845_v59 = vld [vmem:[%s26325_s0 + $0x2] sm:$0x3] }
 0xa7b   :  { %19474 = vmatprep.subr.bf16.mxu0 %v27036_v31  ;;  %19482 = vmatprep.subr.bf16.mxu1 %v27037_v58 }
 0xa7c   :  { %3883 = vmatprep.mubr.f32.mxu0 %v26823_v40  ;;  %3954 = vmatprep.mubr.f32.mxu1 %v26823_v40 }
 0xa7e   :  { %19476 = vmatpush1.bf16.msra.mxu0 %v27038_v19  ;;  %19484 = vmatpush1.bf16.msra.mxu1 %v27039_v54  ;;  %v2140_v19 = vmul.f32 0.5, %v15845_v59 }
 0xa7f   :  { %19486 = vmatprep.subr.bf16.mxu0 %v27040_v36  ;;  %19494 = vmatprep.subr.bf16.mxu1 %v27041_v55 }
 0xa80   :  { %v2141_v5 = vadd.f32 0.5, %v2140_v19 }
 0xaf8   :  { %v3492_v57 = vpop.xlane.xlu1 %3491 }
 0xaf9   :  { %v3493_v28 = vsub.f32 %v24016_v35, %v3492_v57 }
 0xafb   :  { %v3494_v33 = vmul.f32 1.442695, %v3493_v28 }
 0xafd   :  { %21642 = vpow2.f32 %v3494_v33 }
 0xb07   :  { %v21643_v31 = vpop.eup %21642 }
 0xb08   :  { %v3496_v58 = vsel %vm1822_vm6, %v21643_v31, 0.0 }
 0xb09   :  { %3497 = vadd.xlane.f32.xlu1 %v3496_v58 }
 0xb1a   :  { %3509 = vperm.xlu1 %21593, %v2141_v5  }
 0xb2c   :  { %v16547_v54 = vpop.f32.mrb[32].mxu0  ;;  %v16582_v36 = vpop.f32.mrb[34].mxu1 }
 0xb2d   :  { %v16548_v8 = vpop.f32.mrb[33].mxu0  ;;  %v16583_v55 = vpop.f32.mrb[35].mxu1 }
 0xb2e   :  { %v16549_v26 = vadd.f32 %v16548_v8, %v16547_v54  ;;  %v16584_v53 = vadd.f32 %v16583_v55, %v16582_v36  ;;  %v15869_v8 = vmul.f32 -1.442695, %v24016_v35  ;;  %v24092_v35 = vld [vmem:[%s26317_s1 + $0x4] sm:$0x3] }
 0xb4c   :  { %v16617_v57 = vpop.f32.mrb[34].mxu0  ;;  %v16652_v28 = vpop.f32.mrb[36].mxu1 }
 0xb4d   :  { %v16618_v33 = vpop.f32.mrb[35].mxu0  ;;  %v16653_v18 = vpop.f32.mrb[37].mxu1 }
 0xb4e   :  { %v16619_v9 = vadd.f32 %v16618_v33, %v16617_v57  ;;  %v16654_v27 = vadd.f32 %v16653_v18, %v16652_v28  ;;  %v27053_v33 = vld [vmem:[#allocation29_spill] sm:$0xff] }
 0xb96   :  { %v3498_v58 = vpop.xlane.xlu1 %3497 }
 0xb97   :  { %21644 = vrcp.f32 %v3498_v58  ;;  %v27054_v58 = vld [vmem:[#allocation30_spill] sm:$0xff] }
 0xb98   :  { %21646 = vpow2.f32 %v15869_v8  ;;  %v27058_v8 = vld [vmem:[#allocation34_spill] sm:$0xff] }
 0xb9a   :  { %v3510_v30 = vpop.permute.xlu1 %3509 }
 0xba1   :  { %v21645_v23 = vpop.eup %21644 }
 0xba2   :  { %v3500_v3 = vmul.f32 %v21645_v23, %v21643_v31  ;;  %v21647_v54 = vpop.eup %21646  ;;  %v27051_v23 = vld [vmem:[#allocation27_spill] sm:$0xff] }
 0xba3   :  { %v3504_v36 = vadd.f32 1.0, %v21647_v54  ;;  %v27059_v54 = vld [vmem:[#allocation35_spill] sm:$0xff] }
 0xba4   :  { %v3512_v59 = vmul.f32 %v3510_v30, %v3500_v3  ;;  %v27050_v30 = vld [vmem:[#allocation26_spill] sm:$0xff] }
 0xba5   :  { %21648 = vrcp.f32 %v3504_v36  ;;  %v27060_v36 = vld [vmem:[#allocation36_spill] sm:$0xff] }
 0xba6   :  { %v3580_v19 = vadd.f32 %v16549_v26, %v3512_v59  ;;  %v27055_v59 = vld [vmem:[#allocation31_spill] sm:$0xff] }
 0xba8   :  { %v3650_v5 = vadd.f32 %v16584_v53, %v3580_v19  ;;  %v27056_v19 = vld [vmem:[#allocation32_spill] sm:$0xff] }
 0xbaa   :  { %v3720_v34 = vadd.f32 %v16619_v9, %v3650_v5  ;;  %v27052_v9 = vld [vmem:[#allocation28_spill] sm:$0xff]  ;;  %v27057_v5 = vld [vmem:[#allocation33_spill] sm:$0xff] }
 0xbac   :  { %v3790_v16 = vadd.f32 %v16654_v27, %v3720_v34 }
 0xbae   :  { %3794 = vrot.lane.b32.xlu0 %v3790_v16, %s21925_s10 }
 0xbaf   :  { %v21649_v55 = vpop.eup %21648 }
 0xc20   :  { %v3795_v18 = vpop.permute.xlu0 %3794 }
 0xc21   :  { %v3797_v57 = vmul.f32 %v21649_v55, %v3795_v18  ;;  %v27061_v55 = vld [vmem:[#allocation45_spill] sm:$0xff]  ;;  %v27062_v18 = vld [vmem:[#allocation46_spill] sm:$0xff] }
 0xc23   :  { %3799 = vrot.lane.b32.xlu1 %v3797_v57, %s21926_s4  ;;  %v27063_v57 = vld [vmem:[#allocation47_spill] sm:$0xff] }
 0xc95   :  { %v3800_v28 = vpop.permute.xlu1 %3799 }
 0xc96   :  { %v24058_v31 = vsub.f32 %v3790_v16, %v3800_v28  ;;  %v27049_v16 = vld [vmem:[#allocation25_spill] sm:$0xff]  ;;  %v27064_v28 = vld [vmem:[#allocation48_spill] sm:$0xff] }
 0xc98   :  { %v3809_v3 = vsel %vm1822_vm6, %v24058_v31, 0.0 }
 0xc99   :  { %3810 = vadd.xlane.f32.xlu1 %v3809_v3  ;;  %v27065_v3 = vld [vmem:[#allocation49_spill] sm:$0xff] }
 0xd26   :  { %v3811_v27 = vpop.xlane.xlu1 %3810 }
 0xd27   :  { %vm3812_vm8 = vcmp.eq.f32.partialorder %v3811_v27, 0.0 }
 0xd28   :  { %v3813_v53 = vsel %vm3812_vm8, 1.0, %v3811_v27  ;;  %v27066_v27 = vld [vmem:[#allocation50_spill] sm:$0xff] }
 0xd29   :  { %21650 = vrcp.f32 %v3813_v53  ;;  %v27067_v53 = vld [vmem:[#allocation51_spill] sm:$0xff] }
 0xd33   :  { %v21651_v26 = vpop.eup %21650 }
 0xd34   :  { %v24063_v34 = vmul.f32 %v21651_v26, %v24058_v31  ;;  %v27068_v26 = vld [vmem:[#allocation52_spill] sm:$0xff] }
 0xd36   :  { %15872 = vmatmul.mubr.msk.f32.vlgmr.msra.gmra.mrb[36].mxu0 %vm403_vm1, %v24063_v34  ;;  %15873 = vmatmul.mubr.msk.f32.vlgmr.msra.gmra.mrb[38].mxu1 %vm403_vm1, %v24063_v34 }
 0xd37   :  { %19488 = vmatpush1.bf16.msra.mxu0 %v22135_v42  ;;  %19496 = vmatpush1.bf16.msra.mxu1 %v22137_v43 }
 0xd38   :  { %19490 = vmatprep.subr.bf16.mxu0 %v22144_v46  ;;  %19498 = vmatprep.subr.bf16.mxu1 %v22146_v47 }
 0xd39   :  { %4025 = vmatprep.mubr.f32.mxu0 %v26823_v40  ;;  %4096 = vmatprep.mubr.f32.mxu1 %v26823_v40 }
 0xd3b   :  { %19492 = vmatpush1.bf16.msra.mxu0 %v22163_v51  ;;  %19500 = vmatpush1.bf16.msra.mxu1 %v22165_v52 }
 0xd3c   :  { %15876 = vmatprep.subr.msk.mxu0 %vm695_vm2, %v23730_v4  ;;  %15879 = vmatprep.subr.msk.mxu1 %vm695_vm2, %v23737_v45  ;;  %v27042_v4 = vld [vmem:[#allocation174_spill] sm:$0xff]  ;;  %v27043_v45 = vld [vmem:[#allocation19_spill] sm:$0xff] }
 0xd3e   :  { %15874 = vmatmul.mubr.msk.f32.vlgmr.msra.gmra.mrb[38].mxu0 %vm403_vm1, %v24063_v34  ;;  %15875 = vmatmul.mubr.msk.f32.vlgmr.msra.gmra.mrb[40].mxu1 %vm403_vm1, %v24063_v34 }
 0xd3f   :  { %15877 = vmatpush1.msk.msra.mxu0 %vm695_vm2, %v23748_v37  ;;  %15880 = vmatpush1.msk.msra.mxu1 %vm695_vm2, %v23755_v44  ;;  %v27044_v37 = vld [vmem:[#allocation20_spill] sm:$0xff]  ;;  %v27045_v44 = vld [vmem:[#allocation21_spill] sm:$0xff] }
 0xd40   :  { %4170 = vmatprep.mubr.f32.mxu0 %v26823_v40  ;;  %4241 = vmatprep.mubr.f32.mxu1 %v26823_v40 }
 0xd41   :  { %15882 = vmatprep.subr.msk.mxu0 %vm695_vm2, %v23769_v49  ;;  %15885 = vmatprep.subr.msk.mxu1 %vm695_vm2, %v23776_v25  ;;  %v27046_v49 = vld [vmem:[#allocation22_spill] sm:$0xff]  ;;  %v27047_v25 = vld [vmem:[#allocation23_spill] sm:$0xff] }
 0xd42   :  { %15878 = vmatmul.mubr.msk.f32.vlgmr.msra.gmra.mrb[36].mxu0 %vm691_vm3, %v24092_v35  ;;  %15881 = vmatmul.mubr.msk.f32.vlgmr.msra.gmra.mrb[38].mxu1 %vm691_vm3, %v24092_v35 }
 0xd43   :  { %15883 = vmatpush1.msk.msra.mxu0 %vm695_vm2, %v23787_v17  ;;  %15886 = vmatpush1.msk.msra.mxu1 %vm695_vm2, %v27042_v4  ;;  %v27048_v17 = vld [vmem:[#allocation24_spill] sm:$0xff]  ;;  %v27069_v4 = vld [vmem:[#allocation53_spill] sm:$0xff] }
 0xd44   :  { %4312 = vmatprep.mubr.f32.mxu0 %v26823_v40  ;;  %4383 = vmatprep.mubr.f32.mxu1 %v26823_v40 }
 0xd45   :  { %19502 = vmatprep.subr.bf16.mxu0 %v27043_v45  ;;  %19534 = vmatprep.subr.bf16.mxu1 %v27044_v37 }
 0xd46   :  { %15884 = vmatmul.mubr.msk.f32.vlgmr.msra.gmra.mrb[38].mxu0 %vm691_vm3, %v24092_v35  ;;  %15887 = vmatmul.mubr.msk.f32.vlgmr.msra.gmra.mrb[40].mxu1 %vm691_vm3, %v24092_v35 }
 0xd47   :  { %19504 = vmatpush3.bf16.msra.mxu0 %v27045_v44  ;;  %19536 = vmatpush3.bf16.msra.mxu1 %v27046_v49  ;;  %v15871_v49 = vld [vmem:[%s26325_s0 + $0x4] sm:$0x3] }
 0xd48   :  { %19506 = vmatprep.subr.bf16.mxu0 %v27047_v25  ;;  %19538 = vmatprep.subr.bf16.mxu1 %v27048_v17  ;;  %v3807_v44 = vmul.f32 0.5, %v15871_v49 }
 0xd4a   :  { %v3808_v37 = vadd.f32 0.5, %v3807_v44 }
 0xd4b   :  { %19508 = vmatpush3.bf16.msra.mxu0 %v27049_v16  ;;  %19540 = vmatpush3.bf16.msra.mxu1 %v27050_v30 }
 0xd4c   :  { %19510 = vmatprep.subr.bf16.mxu0 %v27051_v23  ;;  %19542 = vmatprep.subr.bf16.mxu1 %v27052_v9  ;;  %v27081_v9 = vld [vmem:[#allocation38_spill] sm:$0xff] }
 0xd4f   :  { %19512 = vmatpush3.bf16.msra.mxu0 %v27053_v33  ;;  %19544 = vmatpush3.bf16.msra.mxu1 %v27054_v58  ;;  %v27080_v58 = vld [vmem:[#allocation42_spill] sm:$0xff] }
 0xd50   :  { %19514 = vmatprep.subr.bf16.mxu0 %v27055_v59  ;;  %19546 = vmatprep.subr.bf16.mxu1 %v27056_v19  ;;  %v27078_v19 = vld [vmem:[#allocation41_spill] sm:$0xff]  ;;  %v27079_v59 = vld [vmem:[#allocation39_spill] sm:$0xff] }
 0xd53   :  { %19516 = vmatpush3.bf16.msra.mxu0 %v27057_v5  ;;  %19548 = vmatpush3.bf16.msra.mxu1 %v27058_v8  ;;  %v27077_v5 = vld [vmem:[#allocation37_spill] sm:$0xff] }
 0xd54   :  { %19518 = vmatprep.subr.bf16.mxu0 %v27059_v54  ;;  %19550 = vmatprep.subr.bf16.mxu1 %v27060_v36  ;;  %v27070_v54 = vld [vmem:[#allocation54_spill] sm:$0xff]  ;;  %v27071_v36 = vld [vmem:[#allocation55_spill] sm:$0xff] }
 0xd57   :  { %19520 = vmatpush3.bf16.msra.mxu0 %v27061_v55  ;;  %19552 = vmatpush3.bf16.msra.mxu1 %v27062_v18  ;;  %v27072_v55 = vld [vmem:[#allocation56_spill] sm:$0xff]  ;;  %v27073_v18 = vld [vmem:[#allocation57_spill] sm:$0xff] }
 0xd58   :  { %19522 = vmatprep.subr.bf16.mxu0 %v27063_v57  ;;  %19554 = vmatprep.subr.bf16.mxu1 %v27064_v28  ;;  %v27074_v57 = vld [vmem:[#allocation58_spill] sm:$0xff]  ;;  %v27075_v28 = vld [vmem:[#allocation59_spill] sm:$0xff] }
 0xd5b   :  { %19524 = vmatpush3.bf16.msra.mxu0 %v27065_v3  ;;  %19556 = vmatpush3.bf16.msra.mxu1 %v27066_v27  ;;  %v27076_v3 = vld [vmem:[#allocation60_spill] sm:$0xff] }
 0xd5c   :  { %19526 = vmatprep.subr.bf16.mxu0 %v27067_v53  ;;  %19558 = vmatprep.subr.bf16.mxu1 %v27068_v26 }
 0xd5f   :  { %19528 = vmatpush3.bf16.msra.mxu0 %v27069_v4  ;;  %19560 = vmatpush3.bf16.msra.mxu1 %v27070_v54 }
 0xd60   :  { %19530 = vmatprep.subr.bf16.mxu0 %v27071_v36  ;;  %19562 = vmatprep.subr.bf16.mxu1 %v27072_v55 }
 0xd63   :  { %19532 = vmatpush3.bf16.msra.mxu0 %v27073_v18  ;;  %19564 = vmatpush3.bf16.msra.mxu1 %v27074_v57 }
 0xd64   :  { %19566 = vmatprep.subr.bf16.mxu0 %v27075_v28  ;;  %19598 = vmatprep.subr.bf16.mxu1 %v27076_v3  ;;  %v27082_v28 = vld [vmem:[#allocation43_spill] sm:$0xff] }
 0xe15   :  { %v4172_v27 = vpop.f32.mrb[36].mxu0  ;;  %v4243_v53 = vpop.f32.mrb[38].mxu1 }
 0xe16   :  { %v4174_v8 = vpop.f32.mrb[37].mxu0  ;;  %v4245_v26 = vpop.f32.mrb[39].mxu1  ;;  %v4390_v4 = vadd.f32 %v4172_v27, %v27077_v5  ;;  %v4392_v54 = vadd.f32 %v4243_v53, %v27078_v19  ;;  %v27083_v5 = vld [vmem:[#allocation40_spill] sm:$0xff] }
 0xe17   :  { %v4391_v36 = vadd.f32 %v4174_v8, %v27079_v59  ;;  %v4393_v55 = vadd.f32 %v4245_v26, %v27080_v58  ;;  %v27084_v19 = vld [vmem:[#allocation44_spill] sm:$0xff] }
 0xe18   :  { %v4398_v16 = vsel %vm1053_vm4, %v4390_v4, -inf  ;;  %v4400_v27 = vsel %vm1053_vm4, %v4392_v54, -inf }
 0xe19   :  { %v4314_v33 = vpop.f32.mrb[38].mxu0  ;;  %v4385_v18 = vpop.f32.mrb[40].mxu1  ;;  %v4399_v26 = vsel %vm1053_vm4, %v4391_v36, -inf  ;;  %v4401_v58 = vsel %vm1053_vm4, %v4393_v55, -inf }
 0xe1a   :  { %v24153_v57 = vadd.f32 %v4314_v33, %v27081_v9  ;;  %v24156_v23 = vadd.f32 %v4385_v18, %v27082_v28  ;;  %v4316_v3 = vpop.f32.mrb[39].mxu0  ;;  %v4387_v30 = vpop.f32.mrb[41].mxu1 }
 0xe1b   :  { %v4395_v53 = vadd.f32 %v4316_v3, %v27083_v5  ;;  %v4397_v8 = vadd.f32 %v4387_v30, %v27084_v19 }
 0xe1c   :  { %v4402_v33 = vsel %vm1053_vm4, %v24153_v57, -inf  ;;  %v4406_v18 = vsel %vm1053_vm4, %v24156_v23, -inf }
 0xe1d   :  { %v4403_v28 = vmax.f32 %v4398_v16, %v4402_v33  ;;  %v4407_v9 = vmax.f32 %v4400_v27, %v4406_v18  ;;  %v4404_v59 = vsel %vm1053_vm4, %v4395_v53, -inf  ;;  %v4408_v17 = vsel %vm1053_vm4, %v4397_v8, -inf }
 0xe1e   :  { %v4405_v25 = vmax.f32 %v4399_v26, %v4404_v59  ;;  %v4409_v3 = vmax.f32 %v4401_v58, %v4408_v17 }
 0xe20   :  { %v4410_v5 = vmax.f32 %v4403_v28, %v4405_v25  ;;  %v4411_v30 = vmax.f32 %v4407_v9, %v4409_v3  ;;  %v27088_v28 = vld [vmem:[#allocation69_spill] sm:$0xff] }
 0xe21   :  { %v27092_v3 = vld [vmem:[#allocation73_spill] sm:$0xff] }
 0xe22   :  { %v4412_v19 = vmax.f32 %v4410_v5, %v4411_v30  ;;  %v27093_v30 = vld [vmem:[#allocation74_spill] sm:$0xff] }
 0xe24   :  { %4413 = vmax.xlane.f32.xlu0 %v4412_v19 }
 0xe3a   :  { %5176 = vperm.xlu0 %21592, %v3808_v37  }
 0xeb1   :  { %v4414_v45 = vpop.xlane.xlu0 %4413 }
 0xeb2   :  { %v4415_v16 = vsub.f32 %v4390_v4, %v4414_v45  ;;  %v4416_v27 = vsub.f32 %v4391_v36, %v4414_v45  ;;  %v4417_v33 = vsub.f32 %v4392_v54, %v4414_v45  ;;  %v4418_v18 = vsub.f32 %v4393_v55, %v4414_v45  ;;  %v27085_v54 = vld [vmem:[#allocation66_spill] sm:$0xff]  ;;  %v27086_v36 = vld [vmem:[#allocation67_spill] sm:$0xff]  ;;  %v27087_v55 = vld [vmem:[#allocation68_spill] sm:$0xff] }
 0xeb3   :  { %v4420_v52 = vsub.f32 %v4395_v53, %v4414_v45  ;;  %v4422_v25 = vsub.f32 %v4397_v8, %v4414_v45  ;;  %v27089_v4 = vld [vmem:[#allocation70_spill] sm:$0xff]  ;;  %v27090_v53 = vld [vmem:[#allocation71_spill] sm:$0xff]  ;;  %v27091_v8 = vld [vmem:[#allocation72_spill] sm:$0xff]  ;;  %v4419_v26 = vsub.f32 %v24153_v57, %v4414_v45 }
 0xeb4   :  { %v4423_v51 = vmul.f32 1.442695, %v4415_v16  ;;  %v4425_v59 = vmul.f32 1.442695, %v4416_v27  ;;  %v4427_v17 = vmul.f32 1.442695, %v4417_v33  ;;  %v4421_v16 = vsub.f32 %v24156_v23, %v4414_v45 }
 0xeb5   :  { %v4429_v9 = vmul.f32 1.442695, %v4418_v18  ;;  %v4433_v58 = vmul.f32 1.442695, %v4420_v52  ;;  %v4437_v19 = vmul.f32 1.442695, %v4422_v25 }
 0xeb6   :  { %21652 = vpow2.f32 %v4423_v51  ;;  %v27094_v27 = vld [vmem:[#allocation75_spill] sm:$0xff]  ;;  %v27095_v33 = vld [vmem:[#allocation76_spill] sm:$0xff]  ;;  %v4431_v18 = vmul.f32 1.442695, %v4419_v26  ;;  %v4435_v25 = vmul.f32 1.442695, %v4421_v16 }
 0xeb7   :  { %21654 = vpow2.f32 %v4425_v59  ;;  %v27096_v59 = vld [vmem:[#allocation77_spill] sm:$0xff]  ;;  %v27102_v45 = vld [vmem:[#allocation83_spill] sm:$0xff]  ;;  %v27103_v23 = vld [vmem:[#allocation84_spill] sm:$0xff] }
 0xeb8   :  { %21656 = vpow2.f32 %v4427_v17  ;;  %v27097_v17 = vld [vmem:[#allocation78_spill] sm:$0xff]  ;;  %v27100_v57 = vld [vmem:[#allocation81_spill] sm:$0xff]  ;;  %v27107_v16 = vld [vmem:[#allocation88_spill] sm:$0xff] }
 0xeb9   :  { %21658 = vpow2.f32 %v4429_v9  ;;  %v27098_v9 = vld [vmem:[#allocation79_spill] sm:$0xff]  ;;  %v27104_v26 = vld [vmem:[#allocation85_spill] sm:$0xff] }
 0xeba   :  { %21660 = vpow2.f32 %v4433_v58  ;;  %v27099_v58 = vld [vmem:[#allocation80_spill] sm:$0xff] }
 0xebb   :  { %21662 = vpow2.f32 %v4437_v19  ;;  %v27101_v19 = vld [vmem:[#allocation82_spill] sm:$0xff] }
 0xebc   :  { %21664 = vpow2.f32 %v4431_v18  ;;  %v27109_v18 = vld [vmem:[#allocation91_spill] sm:$0xff] }
 0xebd   :  { %21666 = vpow2.f32 %v4435_v25  ;;  %v27111_v25 = vld [vmem:[#allocation92_spill] sm:$0xff] }
 0xec0   :  { %v24173_v37 = vpop.eup %21652 }
 0xec1   :  { %v24175_v44 = vpop.eup %21654 }
 0xec2   :  { %v24177_v49 = vpop.eup %21656  ;;  %4503 = vmatprep.mubr.f32.mxu0 %v24175_v44 }
 0xec3   :  { %v24180_v5 = vpop.eup %21658  ;;  %4504 = vmatmul.mubr.f32.vlgmr.msra.gmra.mrb[40].mxu0 %v24173_v37 }
 0xec4   :  { %4573 = vmatprep.mubr.f32.mxu1 %v24180_v5  ;;  %19568 = vmatpush3.bf16.msra.mxu0 %v26933_v2  ;;  %v24185_v51 = vpop.eup %21660 }
 0xec5   :  { %4574 = vmatmul.mubr.f32.vlgmr.msra.gmra.mrb[42].mxu1 %v24177_v49  ;;  %19570 = vmatprep.subr.bf16.mxu0 %v26934_v10  ;;  %v24191_v52 = vpop.eup %21662 }
 0xec6   :  { %19600 = vmatpush3.bf16.msra.mxu1 %v26935_v15  ;;  %4643 = vmatprep.mubr.f32.mxu0 %v24185_v51 }
 0xec7   :  { %19602 = vmatprep.subr.bf16.mxu1 %v26936_v11  ;;  %4713 = vmatprep.mubr.f32.mxu1 %v24191_v52 }
 0xec8   :  { %19572 = vmatpush3.bf16.msra.mxu0 %v26937_v13 }
 0xec9   :  { %19574 = vmatprep.subr.bf16.mxu0 %v27085_v54 }
 0xeca   :  { %19604 = vmatpush3.bf16.msra.mxu1 %v27086_v36 }
 0xecb   :  { %19606 = vmatprep.subr.bf16.mxu1 %v27087_v55 }
 0xecc   :  { %19576 = vmatpush3.bf16.msra.mxu0 %v27088_v28 }
 0xecd   :  { %19578 = vmatprep.subr.bf16.mxu0 %v27089_v4 }
 0xece   :  { %19608 = vmatpush3.bf16.msra.mxu1 %v27090_v53 }
 0xecf   :  { %19610 = vmatprep.subr.bf16.mxu1 %v27091_v8 }
 0xed0   :  { %19580 = vmatpush3.bf16.msra.mxu0 %v27092_v3 }
 0xed1   :  { %19582 = vmatprep.subr.bf16.mxu0 %v27093_v30 }
 0xed2   :  { %19612 = vmatpush3.bf16.msra.mxu1 %v27094_v27 }
 0xed3   :  { %19614 = vmatprep.subr.bf16.mxu1 %v27095_v33 }
 0xed4   :  { %19584 = vmatpush3.bf16.msra.mxu0 %v27096_v59  ;;  %v27105_v59 = vld [vmem:[#allocation86_spill] sm:$0xff] }
 0xed5   :  { %19586 = vmatprep.subr.bf16.mxu0 %v27097_v17  ;;  %v27106_v17 = vld [vmem:[#allocation87_spill] sm:$0xff] }
 0xed6   :  { %19616 = vmatpush3.bf16.msra.mxu1 %v27098_v9  ;;  %v27108_v9 = vld [vmem:[#allocation89_spill] sm:$0xff] }
 0xed7   :  { %19618 = vmatprep.subr.bf16.mxu1 %v27099_v58 }
 0xed8   :  { %19588 = vmatpush3.bf16.msra.mxu0 %v27100_v57  ;;  %v24223_v57 = vpop.eup %21664 }
 0xed9   :  { %19590 = vmatprep.subr.bf16.mxu0 %v27101_v19  ;;  %v27110_v19 = vld [vmem:[#allocation90_spill] sm:$0xff] }
 0xeda   :  { %19620 = vmatpush3.bf16.msra.mxu1 %v27102_v45 }
 0xedb   :  { %19622 = vmatprep.subr.bf16.mxu1 %v27103_v23  ;;  %v24228_v23 = vpop.eup %21666 }
 0xedc   :  { %19592 = vmatpush3.bf16.msra.mxu0 %v27104_v26  ;;  %v27112_v26 = vld [vmem:[#allocation93_spill] sm:$0xff] }
 0xedd   :  { %19594 = vmatprep.subr.bf16.mxu0 %v27105_v59 }
 0xede   :  { %19624 = vmatpush3.bf16.msra.mxu1 %v27106_v17  ;;  %v27117_v17 = vld [vmem:[#allocation99_spill] sm:$0xff] }
 0xedf   :  { %19626 = vmatprep.subr.bf16.mxu1 %v27107_v16  ;;  %v27113_v16 = vld [vmem:[#allocation95_spill] sm:$0xff] }
 0xee0   :  { %19596 = vmatpush3.bf16.msra.mxu0 %v27108_v9  ;;  %v27114_v9 = vld [vmem:[#allocation94_spill] sm:$0xff] }
 0xee1   :  { %19630 = vmatprep.subr.bf16.mxu0 %v27109_v18  ;;  %v27115_v18 = vld [vmem:[#allocation96_spill] sm:$0xff] }
 0xee2   :  { %19628 = vmatpush3.bf16.msra.mxu1 %v27110_v19  ;;  %v27116_v19 = vld [vmem:[#allocation97_spill] sm:$0xff] }
 0xee3   :  { %4644 = vmatmul.mubr.f32.vlgmr.msra.gmra.mrb[42].mxu0 %v24223_v57  ;;  %19638 = vmatprep.subr.bf16.mxu1 %v27111_v25  ;;  %v27118_v25 = vld [vmem:[#allocation98_spill] sm:$0xff] }
 0xee4   :  { %19632 = vmatpush1.bf16.msra.mxu0 %v27112_v26  ;;  %4788 = vmatprep.mubr.f32.mxu0 %v26823_v40 }
 0xee5   :  { %4714 = vmatmul.mubr.f32.vlgmr.msra.gmra.mrb[44].mxu1 %v24228_v23  ;;  %19634 = vmatprep.subr.bf16.mxu0 %v27113_v16 }
 0xee6   :  { %19640 = vmatpush1.bf16.msra.mxu1 %v27114_v9  ;;  %4859 = vmatprep.mubr.f32.mxu1 %v26823_v40 }
 0xee7   :  { %19642 = vmatprep.subr.bf16.mxu1 %v27115_v18 }
 0xee8   :  { %19636 = vmatpush1.bf16.msra.mxu0 %v27116_v19 }
 0xee9   :  { %19646 = vmatprep.subr.bf16.mxu0 %v27117_v17 }
 0xeea   :  { %19644 = vmatpush1.bf16.msra.mxu1 %v27118_v25 }
 0xeeb   :  { %19654 = vmatprep.subr.bf16.mxu1 %v26972_v60 }
 0xf96   :  { %v16687_v26 = vpop.f32.mrb[40].mxu0 }
 0xf97   :  { %v16688_v59 = vpop.f32.mrb[41].mxu0 }
 0xf98   :  { %v16722_v45 = vpop.f32.mrb[42].mxu1  ;;  %v16689_v58 = vadd.f32 %v16688_v59, %v16687_v26  ;;  %v27127_v59 = vld [vmem:[#allocation115_spill] sm:$0xff]  ;;  %v27134_v26 = vld [vmem:[#allocation122_spill] sm:$0xff] }
 0xf99   :  { %v16723_v33 = vpop.f32.mrb[43].mxu1 }
 0xf9a   :  { %v16724_v16 = vadd.f32 %v16723_v33, %v16722_v45  ;;  %v27126_v33 = vld [vmem:[#allocation114_spill] sm:$0xff]  ;;  %v27133_v45 = vld [vmem:[#allocation121_spill] sm:$0xff] }
 0xf9c   :  { %v4576_v27 = vadd.f32 %v16724_v16, %v16689_v58  ;;  %v27131_v58 = vld [vmem:[#allocation119_spill] sm:$0xff]  ;;  %v27136_v16 = vld [vmem:[#allocation124_spill] sm:$0xff] }
 0xfb6   :  { %v16757_v9 = vpop.f32.mrb[42].mxu0 }
 0xfb7   :  { %v16758_v30 = vpop.f32.mrb[43].mxu0 }
 0xfb8   :  { %v16792_v3 = vpop.f32.mrb[44].mxu1  ;;  %v16759_v8 = vadd.f32 %v16758_v30, %v16757_v9  ;;  %v27124_v30 = vld [vmem:[#allocation112_spill] sm:$0xff]  ;;  %v27130_v9 = vld [vmem:[#allocation118_spill] sm:$0xff] }
 0xfb9   :  { %v16793_v18 = vpop.f32.mrb[45].mxu1 }
 0xfba   :  { %v4646_v53 = vadd.f32 %v16759_v8, %v4576_v27  ;;  %v16794_v19 = vadd.f32 %v16793_v18, %v16792_v3  ;;  %v27122_v8 = vld [vmem:[#allocation110_spill] sm:$0xff]  ;;  %v27123_v3 = vld [vmem:[#allocation111_spill] sm:$0xff]  ;;  %v27125_v27 = vld [vmem:[#allocation113_spill] sm:$0xff] }
 0xfbb   :  { %v27137_v18 = vld [vmem:[#allocation125_spill] sm:$0xff] }
 0xfbc   :  { %v4716_v4 = vadd.f32 %v16794_v19, %v4646_v53  ;;  %v27121_v53 = vld [vmem:[#allocation109_spill] sm:$0xff]  ;;  %v27132_v19 = vld [vmem:[#allocation120_spill] sm:$0xff] }
 0xfbe   :  { %21668 = vrcp.f32 %v4716_v4  ;;  %v27120_v4 = vld [vmem:[#allocation108_spill] sm:$0xff] }
 0xfc8   :  { %v21669_v17 = vpop.eup %21668 }
 0xfc9   :  { %v4720_v25 = vmul.f32 %v21669_v17, %v24058_v31  ;;  %v27119_v31 = vld [vmem:[#allocation61_spill] sm:$0xff]  ;;  %v27128_v17 = vld [vmem:[#allocation116_spill] sm:$0xff] }
 0xfcb   :  { %15888 = vmatmul.mubr.msk.f32.vlgmr.msra.gmra.mrb[44].mxu0 %vm403_vm1, %v4720_v25  ;;  %15889 = vmatmul.mubr.msk.f32.vlgmr.msra.gmra.mrb[46].mxu1 %vm403_vm1, %v4720_v25 }
 0xfcc   :  { %19648 = vmatpush1.bf16.msra.mxu0 %v26973_v29  ;;  %19656 = vmatpush1.bf16.msra.mxu1 %v26974_v24 }
 0xfcd   :  { %19650 = vmatprep.subr.bf16.mxu0 %v26975_v48  ;;  %19658 = vmatprep.subr.bf16.mxu1 %v26976_v39 }
 0xfce   :  { %4930 = vmatprep.mubr.f32.mxu0 %v26823_v40  ;;  %5001 = vmatprep.mubr.f32.mxu1 %v26823_v40 }
 0xfd0   :  { %19652 = vmatpush1.bf16.msra.mxu0 %v26977_v14  ;;  %19660 = vmatpush1.bf16.msra.mxu1 %v26978_v63 }
 0xfd1   :  { %19661 = vmatprep.subr.bf16.mxu0 %v26979_v12  ;;  %18516 = vmatprep.subr.mxu1 %v26823_v40 }
 0xfd3   :  { %15890 = vmatmul.mubr.msk.f32.vlgmr.msra.gmra.mrb[46].mxu0 %vm403_vm1, %v4720_v25  ;;  %15891 = vmatmul.mubr.msk.f32.vlgmr.msra.gmra.mrb[48].mxu1 %vm403_vm1, %v4720_v25  ;;  %v27138_v25 = vld [vmem:[#allocation126_spill] sm:$0xff] }
 0xfd4   :  { %19663 = vmatpush3.bf16.msra.mxu0 %v26980_v61  ;;  %18517 = vmatpush3.msk.msra.mxu1 %vm695_vm2, %v27119_v31  ;;  %v27139_v31 = vld [vmem:[#allocation127_spill] sm:$0xff] }
 0xfd5   :  { %19664 = vmatprep.subr.bf16.mxu0 %v26979_v12  ;;  %18518 = vmatprep.mubr.msk.f32.mxu1 %vm21923_vm5, %v26823_v40 }
 0xfd6   :  { %18513 = vmatprep.mubr.msk.f32.mxu0 %vm21923_vm5, %v26823_v40  ;;  %19668 = vmatprep.subr.bf16.mxu1 %v27120_v4 }
 0xfd7   :  { %18519 = vmatmul.mubr.msk.f32.vlgmr.msra.gmra.mrb[50].mxu1 %vm691_vm3, %v24092_v35  ;;  %v27129_v35 = vld [vmem:[#allocation117_spill] sm:$0xff] }
 0xfd8   :  { %19666 = vmatpush3.bf16.msra.mxu0 %v27121_v53  ;;  %19670 = vmatpush3.bf16.msra.mxu1 %v27122_v8 }
 0xfd9   :  { %19700 = vmatprep.subr.bf16.mxu0 %v27123_v3  ;;  %19672 = vmatprep.subr.bf16.mxu1 %v27124_v30 }
 0xfdb   :  { %18514 = vmatmul.mubr.msk.f32.vlgmr.msra.gmra.mrb[48].mxu0 %vm403_vm1, %v24063_v34  ;;  %v27135_v34 = vld [vmem:[#allocation123_spill] sm:$0xff] }
 0xfdc   :  { %19702 = vmatpush3.bf16.msra.mxu0 %v27125_v27  ;;  %19674 = vmatpush3.bf16.msra.mxu1 %v27126_v33 }
 0xfdd   :  { %19704 = vmatprep.subr.bf16.mxu0 %v27127_v59  ;;  %19676 = vmatprep.subr.bf16.mxu1 %v27128_v17 }
 0xfe0   :  { %19706 = vmatpush3.bf16.msra.mxu0 %v27129_v35  ;;  %19678 = vmatpush3.bf16.msra.mxu1 %v27130_v9  ;;  %v27140_v35 = vld [vmem:[#allocation128_spill] sm:$0xff]  ;;  %v27141_v9 = vld [vmem:[#allocation129_spill] sm:$0xff] }
 0xfe1   :  { %19708 = vmatprep.subr.bf16.mxu0 %v27131_v58  ;;  %19680 = vmatprep.subr.bf16.mxu1 %v27132_v19  ;;  %v27142_v58 = vld [vmem:[#allocation130_spill] sm:$0xff]  ;;  %v27143_v19 = vld [vmem:[#allocation131_spill] sm:$0xff] }
 0xfe4   :  { %19710 = vmatpush3.bf16.msra.mxu0 %v27133_v45  ;;  %19682 = vmatpush3.bf16.msra.mxu1 %v27134_v26  ;;  %v27144_v45 = vld [vmem:[#allocation132_spill] sm:$0xff]  ;;  %v27145_v26 = vld [vmem:[#allocation133_spill] sm:$0xff] }
 0xfe5   :  { %19712 = vmatprep.subr.bf16.mxu0 %v27135_v34  ;;  %19684 = vmatprep.subr.bf16.mxu1 %v27136_v16  ;;  %v27146_v34 = vld [vmem:[#allocation134_spill] sm:$0xff]  ;;  %v27147_v16 = vld [vmem:[#allocation135_spill] sm:$0xff] }
 0xfe8   :  { %19714 = vmatpush3.bf16.msra.mxu0 %v27137_v18  ;;  %19686 = vmatpush3.bf16.msra.mxu1 %v27138_v25  ;;  %v27148_v18 = vld [vmem:[#allocation137_spill] sm:$0xff]  ;;  %v27149_v25 = vld [vmem:[#allocation136_spill] sm:$0xff] }
 0xfe9   :  { %19716 = vmatprep.subr.bf16.mxu0 %v27139_v31  ;;  %19688 = vmatprep.subr.bf16.mxu1 %v27140_v35  ;;  %v27150_v31 = vld [vmem:[#allocation139_spill] sm:$0xff] }
 0xfec   :  { %19718 = vmatpush3.bf16.msra.mxu0 %v27141_v9  ;;  %19690 = vmatpush3.bf16.msra.mxu1 %v27142_v58  ;;  %v27151_v58 = vld [vmem:[#allocation140_spill] sm:$0xff] }
 0xfed   :  { %19720 = vmatprep.subr.bf16.mxu0 %v27143_v19  ;;  %19692 = vmatprep.subr.bf16.mxu1 %v27144_v45  ;;  %v27152_v19 = vld [vmem:[#allocation142_spill] sm:$0xff] }
 0xff0   :  { %19722 = vmatpush3.bf16.msra.mxu0 %v27145_v26  ;;  %19694 = vmatpush3.bf16.msra.mxu1 %v27146_v34 }
 0xff1   :  { %19724 = vmatprep.subr.bf16.mxu0 %v27147_v16  ;;  %19696 = vmatprep.subr.bf16.mxu1 %v27148_v18 }
 0xff4   :  { %19726 = vmatpush3.bf16.msra.mxu0 %v27149_v25  ;;  %19698 = vmatpush3.bf16.msra.mxu1 %v27150_v31 }
 0xff5   :  { %19728 = vmatprep.subr.bf16.mxu0 %v27013_v1  ;;  %19732 = vmatprep.subr.bf16.mxu1 %v27014_v20 }
 0xff8   :  { %19730 = vmatpush3.bf16.msra.mxu0 %v27151_v58 }
 0xff9   :  { %19764 = vmatprep.subr.bf16.mxu0 %v27152_v19 }
0x109e   :  { %v4790_v45 = vpop.f32.mrb[44].mxu0  ;;  %v4861_v26 = vpop.f32.mrb[46].mxu1 }
0x109f   :  { %v4792_v9 = vpop.f32.mrb[45].mxu0  ;;  %v4863_v34 = vpop.f32.mrb[47].mxu1  ;;  %v5008_v25 = vmul.f32 %v24173_v37, %v4790_v45  ;;  %v5010_v31 = vmul.f32 %v24177_v49, %v4861_v26  ;;  %v27153_v45 = vld [vmem:[#allocation149_spill] sm:$0xff]  ;;  %v27154_v26 = vld [vmem:[#allocation150_spill] sm:$0xff] }
0x10a0   :  { %v5009_v16 = vmul.f32 %v24175_v44, %v4792_v9  ;;  %v5011_v18 = vmul.f32 %v24180_v5, %v4863_v34 }
0x10a2   :  { %5244 = vmatprep.mubr.f32.mxu1 %v5009_v16  ;;  %5314 = vmatprep.mubr.f32.mxu0 %v5011_v18  ;;  %v27155_v18 = vld [vmem:[#allocation152_spill] sm:$0xff] }
0x10a3   :  { %5245 = vmatmul.mubr.f32.vlgmr.msra.gmra.mrb[52].mxu1 %v5008_v25  ;;  %5315 = vmatmul.mubr.f32.vlgmr.msra.gmra.mrb[50].mxu0 %v5010_v31  ;;  %v27156_v25 = vld [vmem:[#allocation153_spill] sm:$0xff] }
0x10a4   :  { %19734 = vmatpush3.bf16.msra.mxu1 %v23420_v62  ;;  %19766 = vmatpush3.bf16.msra.mxu0 %v23422_v41 }
0x10a5   :  { %19736 = vmatprep.subr.bf16.mxu1 %v23432_v50  ;;  %19768 = vmatprep.subr.bf16.mxu0 %v27017_v32 }
0x10a6   :  { %v4932_v19 = vpop.f32.mrb[46].mxu0  ;;  %v5003_v44 = vpop.f32.mrb[48].mxu1 }
0x10a7   :  { %v4934_v9 = vpop.f32.mrb[47].mxu0  ;;  %v5005_v5 = vpop.f32.mrb[49].mxu1 }
0x10a8   :  { %v5013_v37 = vmul.f32 %v24185_v51, %v4934_v9  ;;  %v5015_v49 = vmul.f32 %v24191_v52, %v5005_v5  ;;  %19738 = vmatpush3.bf16.msra.mxu1 %v23456_v38  ;;  %19770 = vmatpush3.bf16.msra.mxu0 %v23458_v56  ;;  %v24326_v9 = vld [vmem:[%s26324_s8] ss:$0 sm:$0xff] }
0x10a9   :  { %19740 = vmatprep.subr.bf16.mxu1 %v27153_v45  ;;  %19772 = vmatprep.subr.bf16.mxu0 %v27154_v26  ;;  %27157 = vst [vmem:[#allocation62_spill] sm:$0xff] %v24326_v9 }
0x10aa   :  { %5384 = vmatprep.mubr.f32.mxu1 %v5013_v37  ;;  %5454 = vmatprep.mubr.f32.mxu0 %v5015_v49  ;;  %v5152_v34 = vpop.f32.mrb[50].mxu1  ;;  %v27158_v37 = vld [vmem:[#allocation158_spill] sm:$0xff] }
0x10ab   :  { %v18520_v16 = vpop.f32.mrb[51].mxu1 }
0x10ac   :  { %19742 = vmatpush3.bf16.msra.mxu1 %v27019_v21  ;;  %19774 = vmatpush3.bf16.msra.mxu0 %v27155_v18  ;;  %v27160_v16 = vld [vmem:[#allocation161_spill] sm:$0xff] }
0x10ad   :  { %19744 = vmatprep.subr.bf16.mxu1 %v27156_v25  ;;  %19776 = vmatprep.subr.bf16.mxu0 %v27022_v7 }
0x10ae   :  { %v5082_v51 = vpop.f32.mrb[48].mxu0 }
0x10af   :  { %v5153_v52 = vadd.f32 %v5152_v34, %v5082_v51  ;;  %v18515_v31 = vpop.f32.mrb[49].mxu0  ;;  %v27159_v34 = vld [vmem:[#allocation160_spill] sm:$0xff]  ;;  %v27161_v51 = vld [vmem:[#allocation162_spill] sm:$0xff] }
0x10b0   :  { %19746 = vmatpush3.bf16.msra.mxu1 %v27023_v22  ;;  %19778 = vmatpush3.bf16.msra.mxu0 %v27024_v0  ;;  %v27162_v31 = vld [vmem:[#allocation163_spill] sm:$0xff]  ;;  %v27163_v0 = vld [vmem:[#allocation164_spill] sm:$0xff]  ;;  %v27168_v22 = vld [vmem:[#allocation169_spill] sm:$0xff] }
0x10b1   :  { %v24329_v5 = vadd.f32 %v24326_v9, %v5153_v52  ;;  %19748 = vmatprep.subr.bf16.mxu1 %v27026_v6  ;;  %19780 = vmatprep.subr.bf16.mxu0 %v27158_v37  ;;  %v27164_v52 = vld [vmem:[#allocation165_spill] sm:$0xff]  ;;  %v27165_v9 = vld [vmem:[#allocation166_spill] sm:$0xff]  ;;  %v27166_v6 = vld [vmem:[#allocation167_spill] sm:$0xff] }
0x10b2   :  { %v27167_v37 = vld [vmem:[#allocation168_spill] sm:$0xff] }
0x10b3   :  { %v5157_v49 = vsel %vm1822_vm6, %v24329_v5, -inf }
0x10b4   :  { %19750 = vmatpush3.bf16.msra.mxu1 %v27159_v34  ;;  %19782 = vmatpush3.bf16.msra.mxu0 %v27160_v16  ;;  %v27169_v34 = vld [vmem:[#allocation170_spill] sm:$0xff]  ;;  %v27170_v16 = vld [vmem:[#allocation171_spill] sm:$0xff] }
0x10b5   :  { %5158 = vmax.xlane.f32.xlu1 %v5157_v49  ;;  %19752 = vmatprep.subr.bf16.mxu1 %v27161_v51  ;;  %v27171_v49 = vld [vmem:[#allocation172_spill] sm:$0xff]  ;;  %v27172_v51 = vld [vmem:[#allocation173_spill] sm:$0xff] }
0x10b6   :  { %19784 = vmatprep.subr.bf16.mxu0 %v27162_v31  ;;  %v27173_v31 = vld [vmem:[#allocation3_spill] sm:$0xff] }
0x10b8   :  { %19754 = vmatpush3.bf16.msra.mxu1 %v27163_v0  ;;  %19786 = vmatpush3.bf16.msra.mxu0 %v27164_v52  ;;  %v5012_v0 = vmul.f32 %v24223_v57, %v4932_v19  ;;  %v5014_v52 = vmul.f32 %v24228_v23, %v5003_v44  ;;  %v27179_v57 = vld [vmem:[#allocation9_spill] sm:$0xff]  ;;  %v27180_v23 = vld [vmem:[#allocation10_spill] sm:$0xff]  ;;  %v27181_v19 = vld [vmem:[#allocation11_spill] sm:$0xff] }
0x10b9   :  { %19756 = vmatprep.subr.bf16.mxu1 %v27165_v9  ;;  %19788 = vmatprep.subr.bf16.mxu0 %v27166_v6  ;;  %v27174_v9 = vld [vmem:[#allocation4_spill] sm:$0xff] }
0x10bc   :  { %19758 = vmatpush3.bf16.msra.mxu1 %v27167_v37  ;;  %19790 = vmatpush3.bf16.msra.mxu0 %v27168_v22  ;;  %v27175_v37 = vld [vmem:[#allocation5_spill] sm:$0xff]  ;;  %v27176_v22 = vld [vmem:[#allocation6_spill] sm:$0xff] }
0x10bd   :  { %19760 = vmatprep.subr.bf16.mxu1 %v27169_v34  ;;  %19792 = vmatprep.subr.bf16.mxu0 %v27170_v16  ;;  %v27177_v34 = vld [vmem:[#allocation7_spill] sm:$0xff]  ;;  %v27178_v16 = vld [vmem:[#allocation8_spill] sm:$0xff] }
0x10c0   :  { %19762 = vmatpush3.bf16.msra.mxu1 %v27171_v49  ;;  %19794 = vmatpush3.bf16.msra.mxu0 %v27172_v51 }
0x10c1   :  { %19796 = vmatprep.subr.bf16.mxu1 %v27173_v31  ;;  %19804 = vmatprep.subr.bf16.mxu0 %v27174_v9 }
0x10c3   :  { %5385 = vmatmul.mubr.f32.vlgmr.msra.gmra.mrb[54].mxu1 %v5012_v0  ;;  %5455 = vmatmul.mubr.f32.vlgmr.msra.gmra.mrb[52].mxu0 %v5014_v52  ;;  %v27182_v0 = vld [vmem:[#allocation12_spill] sm:$0xff] }
0x10c4   :  { %19798 = vmatpush1.bf16.msra.mxu1 %v27175_v37  ;;  %19806 = vmatpush1.bf16.msra.mxu0 %v27176_v22 }
0x10c5   :  { %19800 = vmatprep.subr.bf16.mxu1 %v27177_v34  ;;  %19808 = vmatprep.subr.bf16.mxu0 %v27178_v16 }
0x10c6   :  { %5550 = vmatprep.mubr.f32.mxu1 %v26823_v40  ;;  %5621 = vmatprep.mubr.f32.mxu0 %v26823_v40 }
0x10c8   :  { %19802 = vmatpush1.bf16.msra.mxu1 %v27179_v57  ;;  %19810 = vmatpush1.bf16.msra.mxu0 %v27180_v23 }
0x10c9   :  { %19812 = vmatprep.subr.bf16.mxu1 %v27181_v19  ;;  %19820 = vmatprep.subr.bf16.mxu0 %v27182_v0 }
0x1142   :  { %v5159_v44 = vpop.xlane.xlu1 %5158 }
0x1143   :  { %v5160_v52 = vsub.f32 %v24329_v5, %v5159_v44 }
0x1145   :  { %v5161_v22 = vmul.f32 1.442695, %v5160_v52  ;;  %v5177_v52 = vpop.permute.xlu0 %5176 }
0x1147   :  { %21670 = vpow2.f32 %v5161_v22 }
0x1151   :  { %v21671_v34 = vpop.eup %21670 }
0x1152   :  { %v5163_v16 = vsel %vm1822_vm6, %v21671_v34, 0.0 }
0x1153   :  { %5164 = vadd.xlane.f32.xlu1 %v5163_v16 }
0x1176   :  { %v16834_v37 = vpop.f32.mrb[52].mxu1  ;;  %v16869_v9 = vpop.f32.mrb[50].mxu0 }
0x1177   :  { %v16835_v31 = vpop.f32.mrb[53].mxu1  ;;  %v16870_v51 = vpop.f32.mrb[51].mxu0 }
0x1178   :  { %v16836_v57 = vadd.f32 %v16835_v31, %v16834_v37  ;;  %v16871_v49 = vadd.f32 %v16870_v51, %v16869_v9  ;;  %v15895_v9 = vmul.f32 -1.442695, %v24329_v5 }
0x1196   :  { %v16904_v23 = vpop.f32.mrb[54].mxu1  ;;  %v16939_v6 = vpop.f32.mrb[52].mxu0 }
0x1197   :  { %v16905_v19 = vpop.f32.mrb[55].mxu1  ;;  %v16940_v7 = vpop.f32.mrb[53].mxu0 }
0x1198   :  { %v16906_v0 = vadd.f32 %v16905_v19, %v16904_v23  ;;  %v16941_v25 = vadd.f32 %v16940_v7, %v16939_v6  ;;  %v24397_v23 = vld [vmem:[%s26750_s3 + $0x18] sm:$0x7f]  ;;  %v24408_v19 = vld [vmem:[%s26750_s3] sm:$0x7f] }
0x1199   :  { %27186 = vst [vmem:[#allocation64_spill] sm:$0xff] %v24397_v23  ;;  %27187 = vst [vmem:[#allocation65_spill] sm:$0xff] %v24408_v19 }
0x11e0   :  { %v5165_v18 = vpop.xlane.xlu1 %5164 }
0x11e1   :  { %21672 = vrcp.f32 %v5165_v18 }
0x11e2   :  { %21674 = vpow2.f32 %v15895_v9  ;;  %v24454_v9 = vld [vmem:[%s26750_s3 + $0x30] sm:$0x7f] }
0x11e3   :  { %27192 = vst [vmem:[#allocation159_spill] sm:$0xff] %v24454_v9 }
0x11eb   :  { %v21673_v44 = vpop.eup %21672 }
0x11ec   :  { %v5167_v22 = vmul.f32 %v21673_v44, %v21671_v34  ;;  %v21675_v37 = vpop.eup %21674  ;;  %v24422_v44 = vld [vmem:[%s26317_s1 + $0x6] sm:$0x3] }
0x11ed   :  { %v5171_v51 = vadd.f32 1.0, %v21675_v37  ;;  %v27193_v37 = vld [vmem:[#allocation19_spill] sm:$0xff] }
0x11ee   :  { %v5179_v21 = vmul.f32 %v5177_v52, %v5167_v22  ;;  %v24429_v22 = vld [vmem:[%s26750_s3 + $0x28] sm:$0x7f]  ;;  %v24436_v52 = vld [vmem:[%s26750_s3 + $0x38] sm:$0x7f] }
0x11ef   :  { %21676 = vrcp.f32 %v5171_v51  ;;  %27189 = vst [vmem:[#allocation101_spill] sm:$0xff] %v24429_v22  ;;  %27190 = vst [vmem:[#allocation102_spill] sm:$0xff] %v24436_v52  ;;  %v27194_v51 = vld [vmem:[#allocation20_spill] sm:$0xff] }
0x11f0   :  { %v5247_v26 = vadd.f32 %v16836_v57, %v5179_v21  ;;  %v24390_v57 = vld [vmem:[%s26750_s3 + $0x8] sm:$0x7f] }
0x11f1   :  { %27185 = vst [vmem:[#allocation63_spill] sm:$0xff] %v24390_v57 }
0x11f2   :  { %v5317_v16 = vadd.f32 %v16871_v49, %v5247_v26  ;;  %v27184_v49 = vld [vmem:[#allocation18_spill] sm:$0xff] }
0x11f4   :  { %v5387_v45 = vadd.f32 %v16906_v0, %v5317_v16  ;;  %v24415_v0 = vld [vmem:[%s26750_s3 + $0x10] sm:$0x7f]  ;;  %v24447_v16 = vld [vmem:[%s26750_s3 + $0x20] sm:$0x7f] }
0x11f5   :  { %27188 = vst [vmem:[#allocation100_spill] sm:$0xff] %v24415_v0  ;;  %27191 = vst [vmem:[#allocation103_spill] sm:$0xff] %v24447_v16 }
0x11f6   :  { %v5457_v56 = vadd.f32 %v16941_v25, %v5387_v45 }
0x11f8   :  { %5461 = vrot.lane.b32.xlu1 %v5457_v56, %s21925_s10 }
0x11f9   :  { %v21677_v31 = vpop.eup %21676 }
0x126a   :  { %v5462_v7 = vpop.permute.xlu1 %5461 }
0x126b   :  { %v5464_v6 = vmul.f32 %v21677_v31, %v5462_v7  ;;  %v27195_v31 = vld [vmem:[#allocation21_spill] sm:$0xff]  ;;  %v27196_v7 = vld [vmem:[#allocation22_spill] sm:$0xff] }
0x126d   :  { %5466 = vrot.lane.b32.xlu1 %v5464_v6, %s21926_s4  ;;  %v27197_v6 = vld [vmem:[#allocation23_spill] sm:$0xff] }
0x12df   :  { %v5467_v18 = vpop.permute.xlu1 %5466 }
0x12e0   :  { %v24368_v34 = vsub.f32 %v5457_v56, %v5467_v18  ;;  %v27183_v56 = vld [vmem:[#allocation17_spill] sm:$0xff]  ;;  %v27198_v18 = vld [vmem:[#allocation24_spill] sm:$0xff] }
0x12e2   :  { %v5476_v21 = vsel %vm1822_vm6, %v24368_v34, 0.0 }
0x12e3   :  { %5477 = vadd.xlane.f32.xlu0 %v5476_v21  ;;  %v27199_v21 = vld [vmem:[#allocation25_spill] sm:$0xff] }
0x1370   :  { %v5478_v45 = vpop.xlane.xlu0 %5477 }
0x1371   :  { %vm5479_vm9 = vcmp.eq.f32.partialorder %v5478_v45, 0.0 }
0x1372   :  { %v5480_v26 = vsel %vm5479_vm9, 1.0, %v5478_v45  ;;  %v27200_v45 = vld [vmem:[#allocation26_spill] sm:$0xff] }
0x1373   :  { %21678 = vrcp.f32 %v5480_v26  ;;  %v27201_v26 = vld [vmem:[#allocation27_spill] sm:$0xff] }
0x137d   :  { %v21679_v25 = vpop.eup %21678 }
0x137e   :  { %v24373_v5 = vmul.f32 %v21679_v25, %v24368_v34  ;;  %v27202_v25 = vld [vmem:[#allocation28_spill] sm:$0xff] }
0x1380   :  { %15898 = vmatmul.mubr.msk.f32.vlgmr.msra.gmra.mrb[56].mxu1 %vm403_vm1, %v24373_v5  ;;  %15899 = vmatmul.mubr.msk.f32.vlgmr.msra.gmra.mrb[54].mxu0 %vm403_vm1, %v24373_v5 }
0x1381   :  { %19814 = vmatpush1.bf16.msra.mxu1 %v22135_v42  ;;  %19822 = vmatpush1.bf16.msra.mxu0 %v22137_v43  ;;  %v15897_v42 = vld [vmem:[%s26325_s0 + $0x6] sm:$0x3] }
0x1382   :  { %19816 = vmatprep.subr.bf16.mxu1 %v22144_v46  ;;  %19824 = vmatprep.subr.bf16.mxu0 %v22146_v47  ;;  %v5474_v38 = vmul.f32 0.5, %v15897_v42 }
0x1383   :  { %5692 = vmatprep.mubr.f32.mxu1 %v26823_v40  ;;  %5763 = vmatprep.mubr.f32.mxu0 %v26823_v40 }
0x1384   :  { %v5475_v32 = vadd.f32 0.5, %v5474_v38 }
0x1385   :  { %19818 = vmatpush1.bf16.msra.mxu1 %v27183_v56  ;;  %19826 = vmatpush1.bf16.msra.mxu0 %v27184_v49 }
0x1386   :  { %15902 = vmatprep.subr.msk.mxu1 %vm695_vm2, %v24390_v57  ;;  %15905 = vmatprep.subr.msk.mxu0 %vm695_vm2, %v24397_v23  ;;  %v27231_v57 = vld [vmem:[#allocation38_spill] sm:$0xff] }
0x1388   :  { %15900 = vmatmul.mubr.msk.f32.vlgmr.msra.gmra.mrb[58].mxu1 %vm403_vm1, %v24373_v5  ;;  %15901 = vmatmul.mubr.msk.f32.vlgmr.msra.gmra.mrb[56].mxu0 %vm403_vm1, %v24373_v5 }
0x1389   :  { %15903 = vmatpush1.msk.msra.mxu1 %vm695_vm2, %v24408_v19  ;;  %15906 = vmatpush1.msk.msra.mxu0 %vm695_vm2, %v24415_v0  ;;  %v27229_v0 = vld [vmem:[#allocation39_spill] sm:$0xff]  ;;  %v27230_v19 = vld [vmem:[#allocation42_spill] sm:$0xff] }
0x138a   :  { %5837 = vmatprep.mubr.f32.mxu1 %v26823_v40  ;;  %5908 = vmatprep.mubr.f32.mxu0 %v26823_v40 }
0x138b   :  { %15908 = vmatprep.subr.msk.mxu1 %vm695_vm2, %v24429_v22  ;;  %15911 = vmatprep.subr.msk.mxu0 %vm695_vm2, %v24436_v52  ;;  %v27227_v52 = vld [vmem:[#allocation37_spill] sm:$0xff] }
0x138c   :  { %15904 = vmatmul.mubr.msk.f32.vlgmr.msra.gmra.mrb[56].mxu1 %vm691_vm3, %v24422_v44  ;;  %15907 = vmatmul.mubr.msk.f32.vlgmr.msra.gmra.mrb[54].mxu0 %vm691_vm3, %v24422_v44  ;;  %v27228_v22 = vld [vmem:[#allocation41_spill] sm:$0xff] }
0x138d   :  { %15909 = vmatpush1.msk.msra.mxu1 %vm695_vm2, %v24447_v16  ;;  %15912 = vmatpush1.msk.msra.mxu0 %vm695_vm2, %v24454_v9  ;;  %v27205_v9 = vld [vmem:[#allocation31_spill] sm:$0xff] }
0x138e   :  { %5979 = vmatprep.mubr.f32.mxu1 %v26823_v40  ;;  %6050 = vmatprep.mubr.f32.mxu0 %v26823_v40 }
0x138f   :  { %19828 = vmatprep.subr.bf16.mxu1 %v27193_v37  ;;  %19860 = vmatprep.subr.bf16.mxu0 %v27194_v51  ;;  %v27203_v51 = vld [vmem:[#allocation29_spill] sm:$0xff]  ;;  %v27204_v37 = vld [vmem:[#allocation30_spill] sm:$0xff] }
0x1390   :  { %15910 = vmatmul.mubr.msk.f32.vlgmr.msra.gmra.mrb[58].mxu1 %vm691_vm3, %v24422_v44  ;;  %15913 = vmatmul.mubr.msk.f32.vlgmr.msra.gmra.mrb[56].mxu0 %vm691_vm3, %v24422_v44 }
0x1391   :  { %19830 = vmatpush3.bf16.msra.mxu1 %v27195_v31  ;;  %19862 = vmatpush3.bf16.msra.mxu0 %v27196_v7  ;;  %v27206_v31 = vld [vmem:[#allocation32_spill] sm:$0xff]  ;;  %v27207_v7 = vld [vmem:[#allocation33_spill] sm:$0xff] }
0x1392   :  { %19832 = vmatprep.subr.bf16.mxu1 %v27197_v6  ;;  %19864 = vmatprep.subr.bf16.mxu0 %v27198_v18  ;;  %v27208_v6 = vld [vmem:[#allocation34_spill] sm:$0xff]  ;;  %v27209_v18 = vld [vmem:[#allocation35_spill] sm:$0xff] }
0x1395   :  { %19834 = vmatpush3.bf16.msra.mxu1 %v27199_v21  ;;  %19866 = vmatpush3.bf16.msra.mxu0 %v27200_v45  ;;  %v27210_v21 = vld [vmem:[#allocation36_spill] sm:$0xff]  ;;  %v27211_v45 = vld [vmem:[#allocation45_spill] sm:$0xff] }
0x1396   :  { %19836 = vmatprep.subr.bf16.mxu1 %v27201_v26  ;;  %19868 = vmatprep.subr.bf16.mxu0 %v27202_v25  ;;  %v27212_v26 = vld [vmem:[#allocation46_spill] sm:$0xff]  ;;  %v27213_v25 = vld [vmem:[#allocation47_spill] sm:$0xff] }
0x1399   :  { %19838 = vmatpush3.bf16.msra.mxu1 %v27203_v51  ;;  %19870 = vmatpush3.bf16.msra.mxu0 %v27204_v37  ;;  %v27214_v51 = vld [vmem:[#allocation48_spill] sm:$0xff]  ;;  %v27215_v37 = vld [vmem:[#allocation49_spill] sm:$0xff] }
0x139a   :  { %19840 = vmatprep.subr.bf16.mxu1 %v27205_v9  ;;  %19872 = vmatprep.subr.bf16.mxu0 %v27206_v31  ;;  %v27216_v9 = vld [vmem:[#allocation50_spill] sm:$0xff]  ;;  %v27217_v31 = vld [vmem:[#allocation51_spill] sm:$0xff] }
0x139d   :  { %19842 = vmatpush3.bf16.msra.mxu1 %v27207_v7  ;;  %19874 = vmatpush3.bf16.msra.mxu0 %v27208_v6  ;;  %v27218_v7 = vld [vmem:[#allocation52_spill] sm:$0xff]  ;;  %v27219_v6 = vld [vmem:[#allocation53_spill] sm:$0xff] }
0x139e   :  { %19844 = vmatprep.subr.bf16.mxu1 %v27209_v18  ;;  %19876 = vmatprep.subr.bf16.mxu0 %v27210_v21  ;;  %v27220_v18 = vld [vmem:[#allocation54_spill] sm:$0xff]  ;;  %v27221_v21 = vld [vmem:[#allocation55_spill] sm:$0xff] }
0x13a1   :  { %19846 = vmatpush3.bf16.msra.mxu1 %v27211_v45  ;;  %19878 = vmatpush3.bf16.msra.mxu0 %v27212_v26  ;;  %v27222_v45 = vld [vmem:[#allocation56_spill] sm:$0xff]  ;;  %v27223_v26 = vld [vmem:[#allocation57_spill] sm:$0xff] }
0x13a2   :  { %19848 = vmatprep.subr.bf16.mxu1 %v27213_v25  ;;  %19880 = vmatprep.subr.bf16.mxu0 %v27214_v51  ;;  %v27224_v25 = vld [vmem:[#allocation58_spill] sm:$0xff]  ;;  %v27225_v51 = vld [vmem:[#allocation59_spill] sm:$0xff] }
0x13a5   :  { %19850 = vmatpush3.bf16.msra.mxu1 %v27215_v37  ;;  %19882 = vmatpush3.bf16.msra.mxu0 %v27216_v9  ;;  %v27226_v37 = vld [vmem:[#allocation60_spill] sm:$0xff] }
0x13a6   :  { %19852 = vmatprep.subr.bf16.mxu1 %v27217_v31  ;;  %19884 = vmatprep.subr.bf16.mxu0 %v27218_v7 }
0x13a9   :  { %19854 = vmatpush3.bf16.msra.mxu1 %v27219_v6  ;;  %19886 = vmatpush3.bf16.msra.mxu0 %v27220_v18 }
0x13aa   :  { %19856 = vmatprep.subr.bf16.mxu1 %v27221_v21  ;;  %19888 = vmatprep.subr.bf16.mxu0 %v27222_v45 }
0x13ad   :  { %19858 = vmatpush3.bf16.msra.mxu1 %v27223_v26  ;;  %19890 = vmatpush3.bf16.msra.mxu0 %v27224_v25 }
0x13ae   :  { %19892 = vmatprep.subr.bf16.mxu1 %v27225_v51  ;;  %19924 = vmatprep.subr.bf16.mxu0 %v27226_v37  ;;  %v27232_v51 = vld [vmem:[#allocation43_spill] sm:$0xff] }
0x145f   :  { %v5839_v9 = vpop.f32.mrb[56].mxu1  ;;  %v5910_v31 = vpop.f32.mrb[54].mxu0 }
0x1460   :  { %v5841_v16 = vpop.f32.mrb[57].mxu1  ;;  %v5912_v7 = vpop.f32.mrb[55].mxu0  ;;  %v6057_v6 = vadd.f32 %v5839_v9, %v27227_v52  ;;  %v6059_v18 = vadd.f32 %v5910_v31, %v27228_v22  ;;  %v27233_v52 = vld [vmem:[#allocation40_spill] sm:$0xff] }
0x1461   :  { %v6058_v21 = vadd.f32 %v5841_v16, %v27229_v0  ;;  %v6060_v45 = vadd.f32 %v5912_v7, %v27230_v19  ;;  %v27234_v22 = vld [vmem:[#allocation44_spill] sm:$0xff] }
0x1462   :  { %v6065_v47 = vsel %vm1053_vm4, %v6057_v6, -inf  ;;  %v6067_v9 = vsel %vm1053_vm4, %v6059_v18, -inf }
0x1463   :  { %v5981_v23 = vpop.f32.mrb[58].mxu1  ;;  %v6052_v26 = vpop.f32.mrb[56].mxu0  ;;  %v6066_v7 = vsel %vm1053_vm4, %v6058_v21, -inf  ;;  %v6068_v19 = vsel %vm1053_vm4, %v6060_v45, -inf }
0x1464   :  { %v24503_v25 = vadd.f32 %v5981_v23, %v27231_v57  ;;  %v24506_v49 = vadd.f32 %v6052_v26, %v27232_v51  ;;  %v5983_v37 = vpop.f32.mrb[59].mxu1  ;;  %v6054_v56 = vpop.f32.mrb[57].mxu0 }
0x1465   :  { %v6062_v31 = vadd.f32 %v5983_v37, %v27233_v52  ;;  %v6064_v16 = vadd.f32 %v6054_v56, %v27234_v22 }
0x1466   :  { %v6069_v23 = vsel %vm1053_vm4, %v24503_v25, -inf  ;;  %v6073_v26 = vsel %vm1053_vm4, %v24506_v49, -inf }
0x1467   :  { %v6070_v51 = vmax.f32 %v6065_v47, %v6069_v23  ;;  %v6074_v57 = vmax.f32 %v6067_v9, %v6073_v26  ;;  %v6071_v0 = vsel %vm1053_vm4, %v6062_v31, -inf  ;;  %v6075_v46 = vsel %vm1053_vm4, %v6064_v16, -inf }
0x1468   :  { %v6072_v43 = vmax.f32 %v6066_v7, %v6071_v0  ;;  %v6076_v37 = vmax.f32 %v6068_v19, %v6075_v46  ;;  %v27240_v7 = vld [vmem:[#allocation75_spill] sm:$0xff] }
0x146a   :  { %v6077_v52 = vmax.f32 %v6070_v51, %v6072_v43  ;;  %v6078_v56 = vmax.f32 %v6074_v57, %v6076_v37  ;;  %v27235_v51 = vld [vmem:[#allocation70_spill] sm:$0xff]  ;;  %v27241_v37 = vld [vmem:[#allocation76_spill] sm:$0xff] }
0x146c   :  { %v6079_v22 = vmax.f32 %v6077_v52, %v6078_v56 }
0x146e   :  { %6080 = vmax.xlane.f32.xlu1 %v6079_v22 }
0x147f   :  { %6843 = vperm.xlu1 %21593, %v5475_v32  }
0x14fb   :  { %v6081_v50 = vpop.xlane.xlu1 %6080 }
0x14fc   :  { %v6082_v47 = vsub.f32 %v6057_v6, %v6081_v50  ;;  %v6083_v9 = vsub.f32 %v6058_v21, %v6081_v50  ;;  %v6084_v23 = vsub.f32 %v6059_v18, %v6081_v50  ;;  %v6085_v26 = vsub.f32 %v6060_v45, %v6081_v50  ;;  %v27236_v6 = vld [vmem:[#allocation71_spill] sm:$0xff]  ;;  %v27237_v18 = vld [vmem:[#allocation72_spill] sm:$0xff]  ;;  %v27238_v45 = vld [vmem:[#allocation73_spill] sm:$0xff] }
0x14fd   :  { %v6087_v41 = vsub.f32 %v6062_v31, %v6081_v50  ;;  %v6089_v43 = vsub.f32 %v6064_v16, %v6081_v50  ;;  %v6086_v21 = vsub.f32 %v24503_v25, %v6081_v50  ;;  %v27239_v31 = vld [vmem:[#allocation74_spill] sm:$0xff]  ;;  %v6088_v16 = vsub.f32 %v24506_v49, %v6081_v50  ;;  %v27246_v25 = vld [vmem:[#allocation81_spill] sm:$0xff]  ;;  %v27248_v50 = vld [vmem:[#allocation83_spill] sm:$0xff] }
0x14fe   :  { %v6090_v62 = vmul.f32 1.442695, %v6082_v47  ;;  %v6092_v0 = vmul.f32 1.442695, %v6083_v9  ;;  %v6094_v46 = vmul.f32 1.442695, %v6084_v23 }
0x14ff   :  { %v6096_v57 = vmul.f32 1.442695, %v6085_v26  ;;  %v6100_v19 = vmul.f32 1.442695, %v6087_v41  ;;  %v6104_v22 = vmul.f32 1.442695, %v6089_v43 }
0x1500   :  { %21680 = vpow2.f32 %v6090_v62  ;;  %v6098_v56 = vmul.f32 1.442695, %v6086_v21  ;;  %v27242_v47 = vld [vmem:[#allocation77_spill] sm:$0xff]  ;;  %v27243_v9 = vld [vmem:[#allocation78_spill] sm:$0xff]  ;;  %v6102_v23 = vmul.f32 1.442695, %v6088_v16 }
0x1501   :  { %21682 = vpow2.f32 %v6092_v0  ;;  %v27244_v26 = vld [vmem:[#allocation79_spill] sm:$0xff]  ;;  %v27245_v0 = vld [vmem:[#allocation80_spill] sm:$0xff]  ;;  %v27250_v43 = vld [vmem:[#allocation85_spill] sm:$0xff] }
0x1502   :  { %21684 = vpow2.f32 %v6094_v46  ;;  %v27247_v46 = vld [vmem:[#allocation82_spill] sm:$0xff]  ;;  %v27249_v49 = vld [vmem:[#allocation84_spill] sm:$0xff]  ;;  %v27254_v21 = vld [vmem:[#allocation89_spill] sm:$0xff] }
0x1503   :  { %21686 = vpow2.f32 %v6096_v57  ;;  %v27251_v57 = vld [vmem:[#allocation86_spill] sm:$0xff]  ;;  %v27255_v16 = vld [vmem:[#allocation91_spill] sm:$0xff] }
0x1504   :  { %21688 = vpow2.f32 %v6100_v19  ;;  %v27252_v19 = vld [vmem:[#allocation87_spill] sm:$0xff] }
0x1505   :  { %21690 = vpow2.f32 %v6104_v22  ;;  %v27253_v22 = vld [vmem:[#allocation88_spill] sm:$0xff] }
0x1506   :  { %21692 = vpow2.f32 %v6098_v56 }
0x1507   :  { %21694 = vpow2.f32 %v6102_v23  ;;  %v27257_v23 = vld [vmem:[#allocation92_spill] sm:$0xff] }
0x150a   :  { %v24523_v42 = vpop.eup %21680 }
0x150b   :  { %v24525_v38 = vpop.eup %21682 }
0x150c   :  { %v24527_v32 = vpop.eup %21684  ;;  %6170 = vmatprep.mubr.f32.mxu1 %v24525_v38 }
0x150d   :  { %v24530_v52 = vpop.eup %21686  ;;  %6171 = vmatmul.mubr.f32.vlgmr.msra.gmra.mrb[60].mxu1 %v24523_v42 }
0x150e   :  { %6240 = vmatprep.mubr.f32.mxu0 %v24530_v52  ;;  %19894 = vmatpush3.bf16.msra.mxu1 %v26933_v2  ;;  %v24535_v41 = vpop.eup %21688 }
0x150f   :  { %6241 = vmatmul.mubr.f32.vlgmr.msra.gmra.mrb[58].mxu0 %v24527_v32  ;;  %19896 = vmatprep.subr.bf16.mxu1 %v26934_v10  ;;  %v24541_v62 = vpop.eup %21690 }
0x1510   :  { %19926 = vmatpush3.bf16.msra.mxu0 %v26935_v15  ;;  %6310 = vmatprep.mubr.f32.mxu1 %v24535_v41  ;;  %v24573_v56 = vpop.eup %21692 }
0x1511   :  { %19928 = vmatprep.subr.bf16.mxu0 %v26936_v11  ;;  %6380 = vmatprep.mubr.f32.mxu0 %v24541_v62 }
0x1512   :  { %19898 = vmatpush3.bf16.msra.mxu1 %v26937_v13 }
0x1513   :  { %19900 = vmatprep.subr.bf16.mxu1 %v27085_v54 }
0x1514   :  { %19930 = vmatpush3.bf16.msra.mxu0 %v27086_v36 }
0x1515   :  { %19932 = vmatprep.subr.bf16.mxu0 %v27087_v55 }
0x1516   :  { %19902 = vmatpush3.bf16.msra.mxu1 %v27088_v28 }
0x1517   :  { %19904 = vmatprep.subr.bf16.mxu1 %v27235_v51 }
0x1518   :  { %19934 = vmatpush3.bf16.msra.mxu0 %v27236_v6 }
0x1519   :  { %19936 = vmatprep.subr.bf16.mxu0 %v27237_v18 }
0x151a   :  { %19906 = vmatpush3.bf16.msra.mxu1 %v27238_v45 }
0x151b   :  { %19908 = vmatprep.subr.bf16.mxu1 %v27239_v31 }
0x151c   :  { %19938 = vmatpush3.bf16.msra.mxu0 %v27240_v7 }
0x151d   :  { %19940 = vmatprep.subr.bf16.mxu0 %v27241_v37 }
0x151e   :  { %19910 = vmatpush3.bf16.msra.mxu1 %v27242_v47 }
0x151f   :  { %19912 = vmatprep.subr.bf16.mxu1 %v27243_v9 }
0x1520   :  { %19942 = vmatpush3.bf16.msra.mxu0 %v27244_v26 }
0x1521   :  { %19944 = vmatprep.subr.bf16.mxu0 %v27245_v0 }
0x1522   :  { %19914 = vmatpush3.bf16.msra.mxu1 %v27246_v25 }
0x1523   :  { %19916 = vmatprep.subr.bf16.mxu1 %v27247_v46  ;;  %v27256_v46 = vld [vmem:[#allocation90_spill] sm:$0xff] }
0x1524   :  { %19946 = vmatpush3.bf16.msra.mxu0 %v27248_v50 }
0x1525   :  { %19948 = vmatprep.subr.bf16.mxu0 %v27249_v49  ;;  %v24578_v49 = vpop.eup %21694 }
0x1526   :  { %19918 = vmatpush3.bf16.msra.mxu1 %v27250_v43  ;;  %v27258_v43 = vld [vmem:[#allocation93_spill] sm:$0xff] }
0x1527   :  { %19920 = vmatprep.subr.bf16.mxu1 %v27251_v57 }
0x1528   :  { %19950 = vmatpush3.bf16.msra.mxu0 %v27252_v19  ;;  %v27263_v19 = vld [vmem:[#allocation99_spill] sm:$0xff] }
0x1529   :  { %19952 = vmatprep.subr.bf16.mxu0 %v27253_v22  ;;  %v27259_v22 = vld [vmem:[#allocation95_spill] sm:$0xff] }
0x152a   :  { %19922 = vmatpush3.bf16.msra.mxu1 %v27254_v21  ;;  %v27260_v21 = vld [vmem:[#allocation94_spill] sm:$0xff] }
0x152b   :  { %19956 = vmatprep.subr.bf16.mxu1 %v27255_v16  ;;  %v27261_v16 = vld [vmem:[#allocation96_spill] sm:$0xff] }
0x152c   :  { %19954 = vmatpush3.bf16.msra.mxu0 %v27256_v46  ;;  %v27262_v46 = vld [vmem:[#allocation97_spill] sm:$0xff] }
0x152d   :  { %6311 = vmatmul.mubr.f32.vlgmr.msra.gmra.mrb[62].mxu1 %v24573_v56  ;;  %19964 = vmatprep.subr.bf16.mxu0 %v27257_v23  ;;  %v27264_v23 = vld [vmem:[#allocation98_spill] sm:$0xff] }
0x152e   :  { %19958 = vmatpush1.bf16.msra.mxu1 %v27258_v43  ;;  %6455 = vmatprep.mubr.f32.mxu1 %v26823_v40 }
0x152f   :  { %6381 = vmatmul.mubr.f32.vlgmr.msra.gmra.mrb[60].mxu0 %v24578_v49  ;;  %19960 = vmatprep.subr.bf16.mxu1 %v27259_v22 }
0x1530   :  { %19966 = vmatpush1.bf16.msra.mxu0 %v27260_v21  ;;  %6526 = vmatprep.mubr.f32.mxu0 %v26823_v40 }
0x1531   :  { %19968 = vmatprep.subr.bf16.mxu0 %v27261_v16 }
0x1532   :  { %19962 = vmatpush1.bf16.msra.mxu1 %v27262_v46 }
0x1533   :  { %19972 = vmatprep.subr.bf16.mxu1 %v27263_v19 }
0x1534   :  { %19970 = vmatpush1.bf16.msra.mxu0 %v27264_v23 }
0x1535   :  { %19980 = vmatprep.subr.bf16.mxu0 %v26972_v60 }
0x15e0   :  { %v16974_v43 = vpop.f32.mrb[60].mxu1 }
0x15e1   :  { %v16975_v57 = vpop.f32.mrb[61].mxu1 }
0x15e2   :  { %v17009_v50 = vpop.f32.mrb[58].mxu0  ;;  %v16976_v25 = vadd.f32 %v16975_v57, %v16974_v43  ;;  %v27277_v43 = vld [vmem:[#allocation130_spill] sm:$0xff]  ;;  %v27278_v57 = vld [vmem:[#allocation131_spill] sm:$0xff] }
0x15e3   :  { %v17010_v0 = vpop.f32.mrb[59].mxu0 }
0x15e4   :  { %v17011_v22 = vadd.f32 %v17010_v0, %v17009_v50  ;;  %v27273_v0 = vld [vmem:[#allocation125_spill] sm:$0xff] }
0x15e5   :  { %v27276_v50 = vld [vmem:[#allocation129_spill] sm:$0xff] }
0x15e6   :  { %v6243_v26 = vadd.f32 %v17011_v22, %v16976_v25  ;;  %v27274_v25 = vld [vmem:[#allocation126_spill] sm:$0xff]  ;;  %v27280_v22 = vld [vmem:[#allocation133_spill] sm:$0xff] }
0x1600   :  { %v17044_v21 = vpop.f32.mrb[62].mxu1 }
0x1601   :  { %v17045_v9 = vpop.f32.mrb[63].mxu1 }
0x1602   :  { %v17079_v47 = vpop.f32.mrb[60].mxu0  ;;  %v17046_v37 = vadd.f32 %v17045_v9, %v17044_v21  ;;  %v27270_v9 = vld [vmem:[#allocation122_spill] sm:$0xff] }
0x1603   :  { %v17080_v16 = vpop.f32.mrb[61].mxu0  ;;  %v27281_v21 = vld [vmem:[#allocation134_spill] sm:$0xff] }
0x1604   :  { %v6313_v7 = vadd.f32 %v17046_v37, %v6243_v26  ;;  %v17081_v46 = vadd.f32 %v17080_v16, %v17079_v47  ;;  %v27268_v37 = vld [vmem:[#allocation120_spill] sm:$0xff]  ;;  %v27269_v47 = vld [vmem:[#allocation121_spill] sm:$0xff]  ;;  %v27282_v16 = vld [vmem:[#allocation135_spill] sm:$0xff] }
0x1605   :  { %v27272_v26 = vld [vmem:[#allocation124_spill] sm:$0xff] }
0x1606   :  { %v6383_v31 = vadd.f32 %v17081_v46, %v6313_v7  ;;  %v27267_v7 = vld [vmem:[#allocation119_spill] sm:$0xff] }
0x1607   :  { %v27275_v46 = vld [vmem:[#allocation127_spill] sm:$0xff] }
0x1608   :  { %21696 = vrcp.f32 %v6383_v31  ;;  %v27266_v31 = vld [vmem:[#allocation118_spill] sm:$0xff] }
0x1612   :  { %v21697_v19 = vpop.eup %21696 }
0x1613   :  { %v6387_v23 = vmul.f32 %v21697_v19, %v24368_v34  ;;  %v24610_v34 = vld [vmem:[%s26323_s6] sm:$0x7f]  ;;  %v27279_v19 = vld [vmem:[#allocation132_spill] sm:$0xff] }
0x1615   :  { %15914 = vmatmul.mubr.msk.f32.vlgmr.msra.gmra.mrb[64].mxu1 %vm403_vm1, %v6387_v23  ;;  %15915 = vmatmul.mubr.msk.f32.vlgmr.msra.gmra.mrb[62].mxu0 %vm403_vm1, %v6387_v23 }
0x1616   :  { %19974 = vmatpush1.bf16.msra.mxu1 %v26973_v29  ;;  %19982 = vmatpush1.bf16.msra.mxu0 %v26974_v24 }
0x1617   :  { %19976 = vmatprep.subr.bf16.mxu1 %v26975_v48  ;;  %19984 = vmatprep.subr.bf16.mxu0 %v26976_v39 }
0x1618   :  { %6597 = vmatprep.mubr.f32.mxu1 %v26823_v40  ;;  %6668 = vmatprep.mubr.f32.mxu0 %v26823_v40 }
0x161a   :  { %19978 = vmatpush1.bf16.msra.mxu1 %v26977_v14  ;;  %19986 = vmatpush1.bf16.msra.mxu0 %v26978_v63 }
0x161b   :  { %19987 = vmatprep.subr.bf16.mxu1 %v26979_v12  ;;  %18532 = vmatprep.subr.mxu0 %v26823_v40 }
0x161d   :  { %15916 = vmatmul.mubr.msk.f32.vlgmr.msra.gmra.mrb[66].mxu1 %vm403_vm1, %v6387_v23  ;;  %15917 = vmatmul.mubr.msk.f32.vlgmr.msra.gmra.mrb[64].mxu0 %vm403_vm1, %v6387_v23  ;;  %v27283_v23 = vld [vmem:[#allocation137_spill] sm:$0xff] }
0x161e   :  { %19989 = vmatpush3.bf16.msra.mxu1 %v26980_v61  ;;  %18533 = vmatpush3.msk.msra.mxu0 %vm695_vm2, %v24610_v34 }
0x161f   :  { %19990 = vmatprep.subr.bf16.mxu1 %v26979_v12  ;;  %18534 = vmatprep.mubr.msk.f32.mxu0 %vm21923_vm5, %v26823_v40 }
0x1620   :  { %18529 = vmatprep.mubr.msk.f32.mxu1 %vm21923_vm5, %v26823_v40  ;;  %19994 = vmatprep.subr.bf16.mxu0 %v27120_v4 }
0x1621   :  { %18535 = vmatmul.mubr.msk.f32.vlgmr.msra.gmra.mrb[66].mxu0 %vm691_vm3, %v24422_v44  ;;  %v27265_v44 = vld [vmem:[#allocation117_spill] sm:$0xff] }
0x1622   :  { %19992 = vmatpush3.bf16.msra.mxu1 %v27121_v53  ;;  %19996 = vmatpush3.bf16.msra.mxu0 %v27122_v8 }
0x1623   :  { %20026 = vmatprep.subr.bf16.mxu1 %v27123_v3  ;;  %19998 = vmatprep.subr.bf16.mxu0 %v27124_v30 }
0x1625   :  { %18530 = vmatmul.mubr.msk.f32.vlgmr.msra.gmra.mrb[68].mxu1 %vm403_vm1, %v24373_v5  ;;  %v27271_v5 = vld [vmem:[#allocation123_spill] sm:$0xff] }
0x1626   :  { %20028 = vmatpush3.bf16.msra.mxu1 %v27125_v27  ;;  %20000 = vmatpush3.bf16.msra.mxu0 %v27126_v33 }
0x1627   :  { %20030 = vmatprep.subr.bf16.mxu1 %v27127_v59  ;;  %20002 = vmatprep.subr.bf16.mxu0 %v27128_v17 }
0x162a   :  { %20032 = vmatpush3.bf16.msra.mxu1 %v27265_v44  ;;  %20004 = vmatpush3.bf16.msra.mxu0 %v27266_v31 }
0x162b   :  { %20034 = vmatprep.subr.bf16.mxu1 %v27267_v7  ;;  %20006 = vmatprep.subr.bf16.mxu0 %v27268_v37 }
0x162e   :  { %20036 = vmatpush3.bf16.msra.mxu1 %v27269_v47  ;;  %20008 = vmatpush3.bf16.msra.mxu0 %v27270_v9 }
0x162f   :  { %20038 = vmatprep.subr.bf16.mxu1 %v27271_v5  ;;  %20010 = vmatprep.subr.bf16.mxu0 %v27272_v26 }
0x1632   :  { %20040 = vmatpush3.bf16.msra.mxu1 %v27273_v0  ;;  %20012 = vmatpush3.bf16.msra.mxu0 %v27274_v25  ;;  %v27284_v25 = vld [vmem:[#allocation136_spill] sm:$0xff] }
0x1633   :  { %20042 = vmatprep.subr.bf16.mxu1 %v27275_v46  ;;  %20014 = vmatprep.subr.bf16.mxu0 %v27140_v35  ;;  %v27285_v46 = vld [vmem:[#allocation139_spill] sm:$0xff] }
0x1636   :  { %20044 = vmatpush3.bf16.msra.mxu1 %v27276_v50  ;;  %20016 = vmatpush3.bf16.msra.mxu0 %v27277_v43 }
0x1637   :  { %20046 = vmatprep.subr.bf16.mxu1 %v27278_v57  ;;  %20018 = vmatprep.subr.bf16.mxu0 %v27279_v19  ;;  %v27286_v57 = vld [vmem:[#allocation142_spill] sm:$0xff] }
0x163a   :  { %20048 = vmatpush3.bf16.msra.mxu1 %v27280_v22  ;;  %20020 = vmatpush3.bf16.msra.mxu0 %v27281_v21 }
0x163b   :  { %20050 = vmatprep.subr.bf16.mxu1 %v27282_v16  ;;  %20022 = vmatprep.subr.bf16.mxu0 %v27283_v23 }
0x163e   :  { %20052 = vmatpush3.bf16.msra.mxu1 %v27284_v25  ;;  %20024 = vmatpush3.bf16.msra.mxu0 %v27285_v46 }
0x163f   :  { %20054 = vmatprep.subr.bf16.mxu1 %v27013_v1  ;;  %20058 = vmatprep.subr.bf16.mxu0 %v27014_v20  ;;  %v27287_v20 = vld [vmem:[#allocation143_spill] sm:$0xff]  ;;  %v27290_v1 = vld [vmem:[#allocation146_spill] sm:$0xff] }
0x1642   :  { %20056 = vmatpush3.bf16.msra.mxu1 %v27151_v58  ;;  %v27288_v58 = vld [vmem:[#allocation144_spill] sm:$0xff] }
0x1643   :  { %20090 = vmatprep.subr.bf16.mxu1 %v27286_v57  ;;  %v27289_v57 = vld [vmem:[#allocation145_spill] sm:$0xff] }
0x16e8   :  { %v6457_v19 = vpop.f32.mrb[64].mxu1  ;;  %v6528_v22 = vpop.f32.mrb[62].mxu0 }
0x16e9   :  { %v6459_v43 = vpop.f32.mrb[65].mxu1  ;;  %v6530_v21 = vpop.f32.mrb[63].mxu0  ;;  %v6675_v25 = vmul.f32 %v24523_v42, %v6457_v19  ;;  %v6677_v46 = vmul.f32 %v24527_v32, %v6528_v22  ;;  %v27291_v19 = vld [vmem:[#allocation147_spill] sm:$0xff]  ;;  %v27294_v22 = vld [vmem:[#allocation150_spill] sm:$0xff] }
0x16ea   :  { %v6676_v16 = vmul.f32 %v24525_v38, %v6459_v43  ;;  %v6678_v23 = vmul.f32 %v24530_v52, %v6530_v21 }
0x16ec   :  { %6911 = vmatprep.mubr.f32.mxu0 %v6676_v16  ;;  %6981 = vmatprep.mubr.f32.mxu1 %v6678_v23  ;;  %v27295_v23 = vld [vmem:[#allocation151_spill] sm:$0xff] }
0x16ed   :  { %6912 = vmatmul.mubr.f32.vlgmr.msra.gmra.mrb[68].mxu0 %v6675_v25  ;;  %6982 = vmatmul.mubr.f32.vlgmr.msra.gmra.mrb[70].mxu1 %v6677_v46  ;;  %v27292_v25 = vld [vmem:[#allocation148_spill] sm:$0xff]  ;;  %v27293_v46 = vld [vmem:[#allocation149_spill] sm:$0xff] }
0x16ee   :  { %20060 = vmatpush3.bf16.msra.mxu0 %v27287_v20  ;;  %20092 = vmatpush3.bf16.msra.mxu1 %v27288_v58 }
0x16ef   :  { %20062 = vmatprep.subr.bf16.mxu0 %v27289_v57  ;;  %20094 = vmatprep.subr.bf16.mxu1 %v27290_v1  ;;  %v27296_v1 = vld [vmem:[#allocation152_spill] sm:$0xff]  ;;  %v27297_v57 = vld [vmem:[#allocation153_spill] sm:$0xff] }
0x16f0   :  { %v6599_v50 = vpop.f32.mrb[66].mxu1  ;;  %v6670_v38 = vpop.f32.mrb[64].mxu0 }
0x16f1   :  { %v6601_v43 = vpop.f32.mrb[67].mxu1  ;;  %v6672_v52 = vpop.f32.mrb[65].mxu0 }
0x16f2   :  { %v6680_v42 = vmul.f32 %v24535_v41, %v6601_v43  ;;  %v6682_v32 = vmul.f32 %v24541_v62, %v6672_v52  ;;  %20064 = vmatpush3.bf16.msra.mxu0 %v27291_v19  ;;  %20096 = vmatpush3.bf16.msra.mxu1 %v27292_v25  ;;  %v27298_v41 = vld [vmem:[#allocation154_spill] sm:$0xff]  ;;  %v27299_v25 = vld [vmem:[#allocation155_spill] sm:$0xff] }
0x16f3   :  { %20066 = vmatprep.subr.bf16.mxu0 %v27293_v46  ;;  %20098 = vmatprep.subr.bf16.mxu1 %v27294_v22  ;;  %v27300_v46 = vld [vmem:[#allocation156_spill] sm:$0xff]  ;;  %v27301_v22 = vld [vmem:[#allocation62_spill] sm:$0xff] }
0x16f4   :  { %7051 = vmatprep.mubr.f32.mxu0 %v6680_v42  ;;  %7121 = vmatprep.mubr.f32.mxu1 %v6682_v32  ;;  %v6819_v21 = vpop.f32.mrb[66].mxu0  ;;  %v27302_v32 = vld [vmem:[#allocation157_spill] sm:$0xff] }
0x16f5   :  { %v18536_v16 = vpop.f32.mrb[67].mxu0 }
0x16f6   :  { %20068 = vmatpush3.bf16.msra.mxu0 %v27295_v23  ;;  %20100 = vmatpush3.bf16.msra.mxu1 %v27296_v1  ;;  %v27303_v16 = vld [vmem:[#allocation158_spill] sm:$0xff] }
0x16f7   :  { %20070 = vmatprep.subr.bf16.mxu0 %v27297_v57  ;;  %20102 = vmatprep.subr.bf16.mxu1 %v27298_v41  ;;  %v27304_v57 = vld [vmem:[#allocation160_spill] sm:$0xff]  ;;  %v27305_v41 = vld [vmem:[#allocation161_spill] sm:$0xff] }
0x16f8   :  { %v6749_v62 = vpop.f32.mrb[68].mxu1 }
0x16f9   :  { %v6820_v43 = vadd.f32 %v6819_v21, %v6749_v62  ;;  %v18531_v52 = vpop.f32.mrb[69].mxu1  ;;  %v27306_v21 = vld [vmem:[#allocation162_spill] sm:$0xff]  ;;  %v27307_v62 = vld [vmem:[#allocation163_spill] sm:$0xff] }
0x16fa   :  { %20072 = vmatpush3.bf16.msra.mxu0 %v27299_v25  ;;  %20104 = vmatpush3.bf16.msra.mxu1 %v27300_v46  ;;  %v27308_v52 = vld [vmem:[#allocation164_spill] sm:$0xff]  ;;  %v27313_v46 = vld [vmem:[#allocation169_spill] sm:$0xff] }
0x16fb   :  { %v24679_v42 = vadd.f32 %v27301_v22, %v6820_v43  ;;  %20074 = vmatprep.subr.bf16.mxu0 %v27302_v32  ;;  %20106 = vmatprep.subr.bf16.mxu1 %v27303_v16  ;;  %v27309_v22 = vld [vmem:[#allocation165_spill] sm:$0xff]  ;;  %v27310_v43 = vld [vmem:[#allocation166_spill] sm:$0xff]  ;;  %v27311_v32 = vld [vmem:[#allocation167_spill] sm:$0xff] }
0x16fc   :  { %v27312_v16 = vld [vmem:[#allocation168_spill] sm:$0xff] }
0x16fd   :  { %v6824_v1 = vsel %vm1822_vm6, %v24679_v42, -inf }
0x16fe   :  { %20076 = vmatpush3.bf16.msra.mxu0 %v27304_v57  ;;  %20108 = vmatpush3.bf16.msra.mxu1 %v27305_v41  ;;  %v27314_v57 = vld [vmem:[#allocation170_spill] sm:$0xff]  ;;  %v27315_v41 = vld [vmem:[#allocation171_spill] sm:$0xff] }
0x16ff   :  { %6825 = vmax.xlane.f32.xlu0 %v6824_v1  ;;  %20078 = vmatprep.subr.bf16.mxu0 %v27306_v21  ;;  %v27316_v1 = vld [vmem:[#allocation172_spill] sm:$0xff]  ;;  %v27317_v21 = vld [vmem:[#allocation173_spill] sm:$0xff] }
0x1700   :  { %20110 = vmatprep.subr.bf16.mxu1 %v27307_v62  ;;  %v27318_v62 = vld [vmem:[#allocation3_spill] sm:$0xff] }
0x1702   :  { %20080 = vmatpush3.bf16.msra.mxu0 %v27308_v52  ;;  %20112 = vmatpush3.bf16.msra.mxu1 %v27309_v22  ;;  %v6679_v52 = vmul.f32 %v24573_v56, %v6599_v50  ;;  %v6681_v22 = vmul.f32 %v24578_v49, %v6670_v38  ;;  %v27324_v56 = vld [vmem:[#allocation9_spill] sm:$0xff]  ;;  %v27325_v49 = vld [vmem:[#allocation10_spill] sm:$0xff]  ;;  %v27326_v50 = vld [vmem:[#allocation11_spill] sm:$0xff] }
0x1703   :  { %20082 = vmatprep.subr.bf16.mxu0 %v27310_v43  ;;  %20114 = vmatprep.subr.bf16.mxu1 %v27311_v32  ;;  %v27319_v43 = vld [vmem:[#allocation4_spill] sm:$0xff] }
0x1704   :  { %v27327_v38 = vld [vmem:[#allocation12_spill] sm:$0xff] }
0x1706   :  { %20084 = vmatpush3.bf16.msra.mxu0 %v27312_v16  ;;  %20116 = vmatpush3.bf16.msra.mxu1 %v27313_v46  ;;  %v27320_v16 = vld [vmem:[#allocation5_spill] sm:$0xff]  ;;  %v27321_v46 = vld [vmem:[#allocation6_spill] sm:$0xff] }
0x1707   :  { %20086 = vmatprep.subr.bf16.mxu0 %v27314_v57  ;;  %20118 = vmatprep.subr.bf16.mxu1 %v27315_v41  ;;  %v27322_v57 = vld [vmem:[#allocation7_spill] sm:$0xff]  ;;  %v27323_v41 = vld [vmem:[#allocation8_spill] sm:$0xff] }
0x170a   :  { %20088 = vmatpush3.bf16.msra.mxu0 %v27316_v1  ;;  %20120 = vmatpush3.bf16.msra.mxu1 %v27317_v21 }
0x170b   :  { %20122 = vmatprep.subr.bf16.mxu0 %v27318_v62  ;;  %20130 = vmatprep.subr.bf16.mxu1 %v27319_v43 }
0x170d   :  { %7052 = vmatmul.mubr.f32.vlgmr.msra.gmra.mrb[70].mxu0 %v6679_v52  ;;  %7122 = vmatmul.mubr.f32.vlgmr.msra.gmra.mrb[72].mxu1 %v6681_v22 }
0x170e   :  { %20124 = vmatpush1.bf16.msra.mxu0 %v27320_v16  ;;  %20132 = vmatpush1.bf16.msra.mxu1 %v27321_v46 }
0x170f   :  { %20126 = vmatprep.subr.bf16.mxu0 %v27322_v57  ;;  %20134 = vmatprep.subr.bf16.mxu1 %v27323_v41 }
0x1710   :  { %7217 = vmatprep.mubr.f32.mxu0 %v26823_v40  ;;  %7288 = vmatprep.mubr.f32.mxu1 %v26823_v40 }
0x1712   :  { %20128 = vmatpush1.bf16.msra.mxu0 %v27324_v56  ;;  %20136 = vmatpush1.bf16.msra.mxu1 %v27325_v49 }
0x1713   :  { %20138 = vmatprep.subr.bf16.mxu0 %v27326_v50  ;;  %20146 = vmatprep.subr.bf16.mxu1 %v27327_v38 }
0x178c   :  { %v6826_v52 = vpop.xlane.xlu0 %6825 }
0x178d   :  { %v6827_v22 = vsub.f32 %v24679_v42, %v6826_v52 }
0x178f   :  { %v6828_v46 = vmul.f32 1.442695, %v6827_v22  ;;  %v6844_v22 = vpop.permute.xlu1 %6843 }
0x1791   :  { %21698 = vpow2.f32 %v6828_v46 }
0x179b   :  { %v21699_v57 = vpop.eup %21698 }
0x179c   :  { %v6830_v41 = vsel %vm1822_vm6, %v21699_v57, 0.0 }
0x179d   :  { %6831 = vadd.xlane.f32.xlu0 %v6830_v41 }
0x17c0   :  { %v17121_v16 = vpop.f32.mrb[68].mxu0  ;;  %v17156_v43 = vpop.f32.mrb[70].mxu1 }
0x17c1   :  { %v17122_v62 = vpop.f32.mrb[69].mxu0  ;;  %v17157_v21 = vpop.f32.mrb[71].mxu1 }
0x17c2   :  { %v17123_v56 = vadd.f32 %v17122_v62, %v17121_v16  ;;  %v17158_v1 = vadd.f32 %v17157_v21, %v17156_v43  ;;  %v15921_v16 = vmul.f32 -1.442695, %v24679_v42 }
0x17e0   :  { %v17191_v49 = vpop.f32.mrb[70].mxu0  ;;  %v17226_v32 = vpop.f32.mrb[72].mxu1 }
0x17e1   :  { %v17192_v50 = vpop.f32.mrb[71].mxu0  ;;  %v17227_v25 = vpop.f32.mrb[73].mxu1 }
0x17e2   :  { %v17193_v38 = vadd.f32 %v17192_v50, %v17191_v49  ;;  %v17228_v23 = vadd.f32 %v17227_v25, %v17226_v32  ;;  %v27331_v49 = vld [vmem:[#allocation16_spill] sm:$0xff]  ;;  %v27332_v50 = vld [vmem:[#allocation17_spill] sm:$0xff] }
0x182a   :  { %v6832_v19 = vpop.xlane.xlu0 %6831 }
0x182b   :  { %21700 = vrcp.f32 %v6832_v19 }
0x182c   :  { %21702 = vpow2.f32 %v15921_v16  ;;  %v24752_v16 = vld [vmem:[%s26317_s1 + $0x8] sm:$0x3] }
0x1835   :  { %v21701_v52 = vpop.eup %21700 }
0x1836   :  { %v6834_v46 = vmul.f32 %v21701_v52, %v21699_v57  ;;  %v21703_v21 = vpop.eup %21702  ;;  %v27334_v52 = vld [vmem:[#allocation63_spill] sm:$0xff] }
0x1837   :  { %v6838_v62 = vadd.f32 1.0, %v21703_v21  ;;  %v27338_v21 = vld [vmem:[#allocation101_spill] sm:$0xff] }
0x1838   :  { %v6846_v58 = vmul.f32 %v6844_v22, %v6834_v46  ;;  %v27335_v46 = vld [vmem:[#allocation64_spill] sm:$0xff]  ;;  %v27336_v22 = vld [vmem:[#allocation65_spill] sm:$0xff] }
0x1839   :  { %21704 = vrcp.f32 %v6838_v62  ;;  %v27339_v62 = vld [vmem:[#allocation102_spill] sm:$0xff] }
0x183a   :  { %v6914_v20 = vadd.f32 %v17123_v56, %v6846_v58  ;;  %v27330_v56 = vld [vmem:[#allocation15_spill] sm:$0xff] }
0x183c   :  { %v6984_v41 = vadd.f32 %v17158_v1, %v6914_v20  ;;  %v27329_v1 = vld [vmem:[#allocation14_spill] sm:$0xff] }
0x183e   :  { %v7054_v35 = vadd.f32 %v17193_v38, %v6984_v41  ;;  %v27333_v38 = vld [vmem:[#allocation18_spill] sm:$0xff]  ;;  %v27337_v41 = vld [vmem:[#allocation100_spill] sm:$0xff] }
0x1840   :  { %v7124_v0 = vadd.f32 %v17228_v23, %v7054_v35 }
0x1842   :  { %7128 = vrot.lane.b32.xlu0 %v7124_v0, %s21925_s10 }
0x1843   :  { %v21705_v43 = vpop.eup %21704 }
0x18b4   :  { %v7129_v25 = vpop.permute.xlu0 %7128 }
0x18b5   :  { %v7131_v32 = vmul.f32 %v21705_v43, %v7129_v25  ;;  %v27340_v43 = vld [vmem:[#allocation103_spill] sm:$0xff] }
0x18b6   :  { %v27341_v25 = vld [vmem:[#allocation159_spill] sm:$0xff] }
0x18b7   :  { %7133 = vrot.lane.b32.xlu1 %v7131_v32, %s21926_s4  ;;  %v27342_v32 = vld [vmem:[#allocation19_spill] sm:$0xff] }
0x1929   :  { %v7134_v57 = vpop.permute.xlu1 %7133 }
0x192a   :  { %v24718_v19 = vsub.f32 %v7124_v0, %v7134_v57  ;;  %v27328_v0 = vld [vmem:[#allocation13_spill] sm:$0xff]  ;;  %v27343_v57 = vld [vmem:[#allocation20_spill] sm:$0xff] }
0x192c   :  { %v7143_v20 = vsel %vm1822_vm6, %v24718_v19, 0.0 }
0x192d   :  { %7144 = vadd.xlane.f32.xlu1 %v7143_v20  ;;  %v27344_v20 = vld [vmem:[#allocation21_spill] sm:$0xff] }
0x19ba   :  { %v7145_v35 = vpop.xlane.xlu1 %7144 }
0x19bb   :  { %vm7146_vm10 = vcmp.eq.f32.partialorder %v7145_v35, 0.0 }
0x19bc   :  { %v7147_v58 = vsel %vm7146_vm10, 1.0, %v7145_v35  ;;  %v27345_v35 = vld [vmem:[#allocation22_spill] sm:$0xff] }
0x19bd   :  { %21706 = vrcp.f32 %v7147_v58  ;;  %v27346_v58 = vld [vmem:[#allocation23_spill] sm:$0xff] }
0x19c7   :  { %v21707_v23 = vpop.eup %21706 }
0x19c8   :  { %v24723_v42 = vmul.f32 %v21707_v23, %v24718_v19  ;;  %v27347_v23 = vld [vmem:[#allocation24_spill] sm:$0xff] }
0x19ca   :  { %15924 = vmatmul.mubr.msk.f32.vlgmr.msra.gmra.mrb[72].mxu0 %vm403_vm1, %v24723_v42  ;;  %15925 = vmatmul.mubr.msk.f32.vlgmr.msra.gmra.mrb[74].mxu1 %vm403_vm1, %v24723_v42 }
0x19cb   :  { %20140 = vmatpush1.bf16.msra.mxu0 %v27328_v0  ;;  %20148 = vmatpush1.bf16.msra.mxu1 %v27329_v1 }
0x19cc   :  { %20142 = vmatprep.subr.bf16.mxu0 %v27330_v56  ;;  %20150 = vmatprep.subr.bf16.mxu1 %v27331_v49  ;;  %v27380_v56 = vld [vmem:[#allocation38_spill] sm:$0xff] }
0x19cd   :  { %7359 = vmatprep.mubr.f32.mxu0 %v26823_v40  ;;  %7430 = vmatprep.mubr.f32.mxu1 %v26823_v40 }
0x19cf   :  { %20144 = vmatpush1.bf16.msra.mxu0 %v27332_v50  ;;  %20152 = vmatpush1.bf16.msra.mxu1 %v27333_v38  ;;  %v27378_v38 = vld [vmem:[#allocation39_spill] sm:$0xff]  ;;  %v27379_v50 = vld [vmem:[#allocation42_spill] sm:$0xff] }
0x19d0   :  { %15928 = vmatprep.subr.msk.mxu0 %vm695_vm2, %v27334_v52  ;;  %15931 = vmatprep.subr.msk.mxu1 %vm695_vm2, %v27335_v46  ;;  %v27348_v52 = vld [vmem:[#allocation25_spill] sm:$0xff]  ;;  %v27349_v46 = vld [vmem:[#allocation26_spill] sm:$0xff] }
0x19d2   :  { %15926 = vmatmul.mubr.msk.f32.vlgmr.msra.gmra.mrb[74].mxu0 %vm403_vm1, %v24723_v42  ;;  %15927 = vmatmul.mubr.msk.f32.vlgmr.msra.gmra.mrb[76].mxu1 %vm403_vm1, %v24723_v42 }
0x19d3   :  { %15929 = vmatpush1.msk.msra.mxu0 %vm695_vm2, %v27336_v22  ;;  %15932 = vmatpush1.msk.msra.mxu1 %vm695_vm2, %v27337_v41  ;;  %v27350_v22 = vld [vmem:[#allocation27_spill] sm:$0xff]  ;;  %v27351_v41 = vld [vmem:[#allocation28_spill] sm:$0xff] }
0x19d4   :  { %7504 = vmatprep.mubr.f32.mxu0 %v26823_v40  ;;  %7575 = vmatprep.mubr.f32.mxu1 %v26823_v40 }
0x19d5   :  { %15934 = vmatprep.subr.msk.mxu0 %vm695_vm2, %v27338_v21  ;;  %15937 = vmatprep.subr.msk.mxu1 %vm695_vm2, %v27339_v62  ;;  %v27352_v21 = vld [vmem:[#allocation29_spill] sm:$0xff]  ;;  %v27353_v62 = vld [vmem:[#allocation30_spill] sm:$0xff] }
0x19d6   :  { %15930 = vmatmul.mubr.msk.f32.vlgmr.msra.gmra.mrb[72].mxu0 %vm691_vm3, %v24752_v16  ;;  %15933 = vmatmul.mubr.msk.f32.vlgmr.msra.gmra.mrb[74].mxu1 %vm691_vm3, %v24752_v16 }
0x19d7   :  { %15935 = vmatpush1.msk.msra.mxu0 %vm695_vm2, %v27340_v43  ;;  %15938 = vmatpush1.msk.msra.mxu1 %vm695_vm2, %v27341_v25  ;;  %v27354_v43 = vld [vmem:[#allocation31_spill] sm:$0xff]  ;;  %v27355_v25 = vld [vmem:[#allocation32_spill] sm:$0xff] }
0x19d8   :  { %7646 = vmatprep.mubr.f32.mxu0 %v26823_v40  ;;  %7717 = vmatprep.mubr.f32.mxu1 %v26823_v40 }
0x19d9   :  { %20154 = vmatprep.subr.bf16.mxu0 %v27342_v32  ;;  %20186 = vmatprep.subr.bf16.mxu1 %v27343_v57  ;;  %v27376_v57 = vld [vmem:[#allocation37_spill] sm:$0xff] }
0x19da   :  { %15936 = vmatmul.mubr.msk.f32.vlgmr.msra.gmra.mrb[74].mxu0 %vm691_vm3, %v24752_v16  ;;  %15939 = vmatmul.mubr.msk.f32.vlgmr.msra.gmra.mrb[76].mxu1 %vm691_vm3, %v24752_v16  ;;  %v27377_v32 = vld [vmem:[#allocation41_spill] sm:$0xff] }
0x19db   :  { %20156 = vmatpush3.bf16.msra.mxu0 %v27344_v20  ;;  %20188 = vmatpush3.bf16.msra.mxu1 %v27345_v35  ;;  %v27356_v35 = vld [vmem:[#allocation33_spill] sm:$0xff] }
0x19dc   :  { %20158 = vmatprep.subr.bf16.mxu0 %v27346_v58  ;;  %20190 = vmatprep.subr.bf16.mxu1 %v27347_v23  ;;  %v27357_v58 = vld [vmem:[#allocation34_spill] sm:$0xff]  ;;  %v27358_v23 = vld [vmem:[#allocation35_spill] sm:$0xff] }
0x19df   :  { %20160 = vmatpush3.bf16.msra.mxu0 %v27348_v52  ;;  %20192 = vmatpush3.bf16.msra.mxu1 %v27349_v46  ;;  %v27359_v52 = vld [vmem:[#allocation36_spill] sm:$0xff]  ;;  %v27360_v46 = vld [vmem:[#allocation45_spill] sm:$0xff] }
0x19e0   :  { %20162 = vmatprep.subr.bf16.mxu0 %v27350_v22  ;;  %20194 = vmatprep.subr.bf16.mxu1 %v27351_v41  ;;  %v27361_v22 = vld [vmem:[#allocation46_spill] sm:$0xff]  ;;  %v27362_v41 = vld [vmem:[#allocation47_spill] sm:$0xff] }
0x19e3   :  { %20164 = vmatpush3.bf16.msra.mxu0 %v27352_v21  ;;  %20196 = vmatpush3.bf16.msra.mxu1 %v27353_v62  ;;  %v27363_v21 = vld [vmem:[#allocation48_spill] sm:$0xff]  ;;  %v27364_v62 = vld [vmem:[#allocation49_spill] sm:$0xff] }
0x19e4   :  { %20166 = vmatprep.subr.bf16.mxu0 %v27354_v43  ;;  %20198 = vmatprep.subr.bf16.mxu1 %v27355_v25  ;;  %v27365_v43 = vld [vmem:[#allocation50_spill] sm:$0xff]  ;;  %v27366_v25 = vld [vmem:[#allocation51_spill] sm:$0xff] }
0x19e7   :  { %20168 = vmatpush3.bf16.msra.mxu0 %v27356_v35  ;;  %20200 = vmatpush3.bf16.msra.mxu1 %v27357_v58  ;;  %v27367_v35 = vld [vmem:[#allocation52_spill] sm:$0xff]  ;;  %v27368_v58 = vld [vmem:[#allocation53_spill] sm:$0xff] }
0x19e8   :  { %20170 = vmatprep.subr.bf16.mxu0 %v27358_v23  ;;  %20202 = vmatprep.subr.bf16.mxu1 %v27359_v52  ;;  %v27369_v23 = vld [vmem:[#allocation54_spill] sm:$0xff]  ;;  %v27370_v52 = vld [vmem:[#allocation55_spill] sm:$0xff] }
0x19eb   :  { %20172 = vmatpush3.bf16.msra.mxu0 %v27360_v46  ;;  %20204 = vmatpush3.bf16.msra.mxu1 %v27361_v22  ;;  %v27371_v46 = vld [vmem:[#allocation56_spill] sm:$0xff]  ;;  %v27372_v22 = vld [vmem:[#allocation57_spill] sm:$0xff] }
0x19ec   :  { %20174 = vmatprep.subr.bf16.mxu0 %v27362_v41  ;;  %20206 = vmatprep.subr.bf16.mxu1 %v27363_v21  ;;  %v27373_v41 = vld [vmem:[#allocation58_spill] sm:$0xff]  ;;  %v27374_v21 = vld [vmem:[#allocation59_spill] sm:$0xff] }
0x19ef   :  { %20176 = vmatpush3.bf16.msra.mxu0 %v27364_v62  ;;  %20208 = vmatpush3.bf16.msra.mxu1 %v27365_v43  ;;  %v27375_v62 = vld [vmem:[#allocation60_spill] sm:$0xff] }
0x19f0   :  { %20178 = vmatprep.subr.bf16.mxu0 %v27366_v25  ;;  %20210 = vmatprep.subr.bf16.mxu1 %v27367_v35 }
0x19f3   :  { %20180 = vmatpush3.bf16.msra.mxu0 %v27368_v58  ;;  %20212 = vmatpush3.bf16.msra.mxu1 %v27369_v23 }
0x19f4   :  { %20182 = vmatprep.subr.bf16.mxu0 %v27370_v52  ;;  %20214 = vmatprep.subr.bf16.mxu1 %v27371_v46 }
0x19f7   :  { %20184 = vmatpush3.bf16.msra.mxu0 %v27372_v22  ;;  %20216 = vmatpush3.bf16.msra.mxu1 %v27373_v41 }
0x19f8   :  { %20218 = vmatprep.subr.bf16.mxu0 %v27374_v21  ;;  %20250 = vmatprep.subr.bf16.mxu1 %v27375_v62  ;;  %v27381_v21 = vld [vmem:[#allocation43_spill] sm:$0xff] }
0x1aa9   :  { %v7506_v43 = vpop.f32.mrb[72].mxu0  ;;  %v7577_v25 = vpop.f32.mrb[74].mxu1 }
0x1aaa   :  { %v7508_v20 = vpop.f32.mrb[73].mxu0  ;;  %v7579_v35 = vpop.f32.mrb[75].mxu1  ;;  %v7724_v58 = vadd.f32 %v7506_v43, %v27376_v57  ;;  %v7726_v23 = vadd.f32 %v7577_v25, %v27377_v32  ;;  %v27382_v57 = vld [vmem:[#allocation40_spill] sm:$0xff] }
0x1aab   :  { %v7725_v52 = vadd.f32 %v7508_v20, %v27378_v38  ;;  %v7727_v46 = vadd.f32 %v7579_v35, %v27379_v50  ;;  %v27383_v32 = vld [vmem:[#allocation44_spill] sm:$0xff] }
0x1aac   :  { %v7732_v26 = vsel %vm1053_vm4, %v7724_v58, -inf  ;;  %v7734_v43 = vsel %vm1053_vm4, %v7726_v23, -inf }
0x1aad   :  { %v7648_v49 = vpop.f32.mrb[74].mxu0  ;;  %v7719_v22 = vpop.f32.mrb[76].mxu1  ;;  %v7733_v35 = vsel %vm1053_vm4, %v7725_v52, -inf  ;;  %v7735_v50 = vsel %vm1053_vm4, %v7727_v46, -inf }
0x1aae   :  { %v24813_v41 = vadd.f32 %v7648_v49, %v27380_v56  ;;  %v24816_v1 = vadd.f32 %v7719_v22, %v27381_v21  ;;  %v7650_v62 = vpop.f32.mrb[75].mxu0  ;;  %v7721_v0 = vpop.f32.mrb[77].mxu1 }
0x1aaf   :  { %v7729_v25 = vadd.f32 %v7650_v62, %v27382_v57  ;;  %v7731_v20 = vadd.f32 %v7721_v0, %v27383_v32 }
0x1ab0   :  { %v7736_v49 = vsel %vm1053_vm4, %v24813_v41, -inf  ;;  %v7740_v22 = vsel %vm1053_vm4, %v24816_v1, -inf }
0x1ab1   :  { %v7737_v21 = vmax.f32 %v7732_v26, %v7736_v49  ;;  %v7741_v56 = vmax.f32 %v7734_v43, %v7740_v22  ;;  %v7738_v38 = vsel %vm1053_vm4, %v7729_v25, -inf  ;;  %v7742_v5 = vsel %vm1053_vm4, %v7731_v20, -inf }
0x1ab2   :  { %v7739_v9 = vmax.f32 %v7733_v35, %v7738_v38  ;;  %v7743_v62 = vmax.f32 %v7735_v50, %v7742_v5  ;;  %v27386_v38 = vld [vmem:[#allocation76_spill] sm:$0xff]  ;;  %v27397_v35 = vld [vmem:[#allocation87_spill] sm:$0xff] }
0x1ab4   :  { %v7744_v57 = vmax.f32 %v7737_v21, %v7739_v9  ;;  %v7745_v0 = vmax.f32 %v7741_v56, %v7743_v62  ;;  %v27392_v21 = vld [vmem:[#allocation82_spill] sm:$0xff]  ;;  %v27398_v62 = vld [vmem:[#allocation88_spill] sm:$0xff] }
0x1ab6   :  { %v7746_v32 = vmax.f32 %v7744_v57, %v7745_v0  ;;  %v27387_v57 = vld [vmem:[#allocation77_spill] sm:$0xff] }
0x1ab7   :  { %v27399_v0 = vld [vmem:[#allocation89_spill] sm:$0xff] }
0x1ab8   :  { %7747 = vmax.xlane.f32.xlu0 %v7746_v32 }
0x1b45   :  { %v7748_v47 = vpop.xlane.xlu0 %7747 }
0x1b46   :  { %v7749_v37 = vsub.f32 %v7724_v58, %v7748_v47  ;;  %v7750_v7 = vsub.f32 %v7725_v52, %v7748_v47  ;;  %v7751_v31 = vsub.f32 %v7726_v23, %v7748_v47  ;;  %v7752_v44 = vsub.f32 %v7727_v46, %v7748_v47  ;;  %v27388_v58 = vld [vmem:[#allocation78_spill] sm:$0xff]  ;;  %v27389_v52 = vld [vmem:[#allocation79_spill] sm:$0xff]  ;;  %v27390_v46 = vld [vmem:[#allocation80_spill] sm:$0xff] }
0x1b47   :  { %v7754_v17 = vsub.f32 %v7729_v25, %v7748_v47  ;;  %v7756_v43 = vsub.f32 %v7731_v20, %v7748_v47  ;;  %v27395_v25 = vld [vmem:[#allocation85_spill] sm:$0xff]  ;;  %v27396_v20 = vld [vmem:[#allocation86_spill] sm:$0xff] }
0x1b48   :  { %v7757_v59 = vmul.f32 1.442695, %v7749_v37  ;;  %v7759_v33 = vmul.f32 1.442695, %v7750_v7  ;;  %v7761_v26 = vmul.f32 1.442695, %v7751_v31  ;;  %v7755_v31 = vsub.f32 %v24816_v1, %v7748_v47 }
0x1b49   :  { %v7763_v49 = vmul.f32 1.442695, %v7752_v44  ;;  %v7767_v22 = vmul.f32 1.442695, %v7754_v17  ;;  %v7771_v9 = vmul.f32 1.442695, %v7756_v43  ;;  %v7753_v17 = vsub.f32 %v24813_v41, %v7748_v47 }
0x1b4a   :  { %21708 = vpow2.f32 %v7757_v59  ;;  %v27384_v44 = vld [vmem:[#allocation74_spill] sm:$0xff]  ;;  %v27385_v37 = vld [vmem:[#allocation75_spill] sm:$0xff]  ;;  %v7769_v23 = vmul.f32 1.442695, %v7755_v31  ;;  %v27391_v41 = vld [vmem:[#allocation81_spill] sm:$0xff] }
0x1b4b   :  { %21710 = vpow2.f32 %v7759_v33  ;;  %v7765_v32 = vmul.f32 1.442695, %v7753_v17  ;;  %v27393_v47 = vld [vmem:[#allocation83_spill] sm:$0xff]  ;;  %v27394_v1 = vld [vmem:[#allocation84_spill] sm:$0xff]  ;;  %v27403_v17 = vld [vmem:[#allocation93_spill] sm:$0xff] }
0x1b4c   :  { %21712 = vpow2.f32 %v7761_v26  ;;  %v27400_v26 = vld [vmem:[#allocation91_spill] sm:$0xff] }
0x1b4d   :  { %21714 = vpow2.f32 %v7763_v49  ;;  %v27401_v49 = vld [vmem:[#allocation90_spill] sm:$0xff]  ;;  %v27404_v31 = vld [vmem:[#allocation95_spill] sm:$0xff] }
0x1b4e   :  { %21716 = vpow2.f32 %v7767_v22  ;;  %v27402_v22 = vld [vmem:[#allocation92_spill] sm:$0xff] }
0x1b4f   :  { %21718 = vpow2.f32 %v7771_v9 }
0x1b50   :  { %21720 = vpow2.f32 %v7765_v32  ;;  %v27405_v32 = vld [vmem:[#allocation94_spill] sm:$0xff] }
0x1b51   :  { %21722 = vpow2.f32 %v7769_v23  ;;  %v27406_v23 = vld [vmem:[#allocation96_spill] sm:$0xff] }
0x1b54   :  { %v24830_v5 = vpop.eup %21708 }
0x1b55   :  { %v24832_v56 = vpop.eup %21710 }
0x1b56   :  { %v24834_v50 = vpop.eup %21712  ;;  %7837 = vmatprep.mubr.f32.mxu0 %v24832_v56 }
0x1b57   :  { %v24837_v7 = vpop.eup %21714  ;;  %7838 = vmatmul.mubr.f32.vlgmr.msra.gmra.mrb[76].mxu0 %v24830_v5 }
0x1b58   :  { %7907 = vmatprep.mubr.f32.mxu1 %v24837_v7  ;;  %20220 = vmatpush3.bf16.msra.mxu0 %v26933_v2  ;;  %v24842_v33 = vpop.eup %21716 }
0x1b59   :  { %7908 = vmatmul.mubr.f32.vlgmr.msra.gmra.mrb[78].mxu1 %v24834_v50  ;;  %20222 = vmatprep.subr.bf16.mxu0 %v26934_v10  ;;  %v24848_v59 = vpop.eup %21718 }
0x1b5a   :  { %20252 = vmatpush3.bf16.msra.mxu1 %v26935_v15  ;;  %7977 = vmatprep.mubr.f32.mxu0 %v24842_v33  ;;  %v24880_v43 = vpop.eup %21720 }
0x1b5b   :  { %20254 = vmatprep.subr.bf16.mxu1 %v26936_v11  ;;  %8047 = vmatprep.mubr.f32.mxu1 %v24848_v59  ;;  %v24885_v9 = vpop.eup %21722 }
0x1b5c   :  { %20224 = vmatpush3.bf16.msra.mxu0 %v26937_v13 }
0x1b5d   :  { %20226 = vmatprep.subr.bf16.mxu0 %v27085_v54 }
0x1b5e   :  { %20256 = vmatpush3.bf16.msra.mxu1 %v27086_v36 }
0x1b5f   :  { %20258 = vmatprep.subr.bf16.mxu1 %v27087_v55 }
0x1b60   :  { %20228 = vmatpush3.bf16.msra.mxu0 %v27088_v28 }
0x1b61   :  { %20230 = vmatprep.subr.bf16.mxu0 %v27235_v51 }
0x1b62   :  { %20260 = vmatpush3.bf16.msra.mxu1 %v27236_v6 }
0x1b63   :  { %20262 = vmatprep.subr.bf16.mxu1 %v27237_v18 }
0x1b64   :  { %20232 = vmatpush3.bf16.msra.mxu0 %v27238_v45 }
0x1b65   :  { %20234 = vmatprep.subr.bf16.mxu0 %v27384_v44 }
0x1b66   :  { %20264 = vmatpush3.bf16.msra.mxu1 %v27385_v37 }
0x1b67   :  { %20266 = vmatprep.subr.bf16.mxu1 %v27386_v38 }
0x1b68   :  { %20236 = vmatpush3.bf16.msra.mxu0 %v27387_v57 }
0x1b69   :  { %20238 = vmatprep.subr.bf16.mxu0 %v27388_v58 }
0x1b6a   :  { %20268 = vmatpush3.bf16.msra.mxu1 %v27389_v52 }
0x1b6b   :  { %20270 = vmatprep.subr.bf16.mxu1 %v27390_v46 }
0x1b6c   :  { %20240 = vmatpush3.bf16.msra.mxu0 %v27391_v41 }
0x1b6d   :  { %20242 = vmatprep.subr.bf16.mxu0 %v27392_v21 }
0x1b6e   :  { %20272 = vmatpush3.bf16.msra.mxu1 %v27393_v47 }
0x1b6f   :  { %20274 = vmatprep.subr.bf16.mxu1 %v27394_v1 }
0x1b70   :  { %20244 = vmatpush3.bf16.msra.mxu0 %v27395_v25 }
0x1b71   :  { %20246 = vmatprep.subr.bf16.mxu0 %v27396_v20 }
0x1b72   :  { %20276 = vmatpush3.bf16.msra.mxu1 %v27397_v35 }
0x1b73   :  { %20278 = vmatprep.subr.bf16.mxu1 %v27398_v62 }
0x1b74   :  { %20248 = vmatpush3.bf16.msra.mxu0 %v27399_v0 }
0x1b75   :  { %20282 = vmatprep.subr.bf16.mxu0 %v27400_v26  ;;  %v27408_v26 = vld [vmem:[#allocation99_spill] sm:$0xff] }
0x1b76   :  { %20280 = vmatpush3.bf16.msra.mxu1 %v27401_v49  ;;  %v27407_v49 = vld [vmem:[#allocation97_spill] sm:$0xff] }
0x1b77   :  { %7978 = vmatmul.mubr.f32.vlgmr.msra.gmra.mrb[78].mxu0 %v24880_v43  ;;  %20290 = vmatprep.subr.bf16.mxu1 %v27402_v22  ;;  %v27409_v22 = vld [vmem:[#allocation98_spill] sm:$0xff] }
0x1b78   :  { %20284 = vmatpush1.bf16.msra.mxu0 %v27403_v17  ;;  %8122 = vmatprep.mubr.f32.mxu0 %v26823_v40 }
0x1b79   :  { %8048 = vmatmul.mubr.f32.vlgmr.msra.gmra.mrb[80].mxu1 %v24885_v9  ;;  %20286 = vmatprep.subr.bf16.mxu0 %v27404_v31 }
0x1b7a   :  { %20292 = vmatpush1.bf16.msra.mxu1 %v27405_v32  ;;  %8193 = vmatprep.mubr.f32.mxu1 %v26823_v40 }
0x1b7b   :  { %20294 = vmatprep.subr.bf16.mxu1 %v27406_v23 }
0x1b7c   :  { %20288 = vmatpush1.bf16.msra.mxu0 %v27407_v49 }
0x1b7d   :  { %20298 = vmatprep.subr.bf16.mxu0 %v27408_v26 }
0x1b7e   :  { %20296 = vmatpush1.bf16.msra.mxu1 %v27409_v22 }
0x1b7f   :  { %20306 = vmatprep.subr.bf16.mxu1 %v26972_v60 }
0x1c2a   :  { %v17261_v17 = vpop.f32.mrb[76].mxu0 }
0x1c2b   :  { %v17262_v0 = vpop.f32.mrb[77].mxu0 }
0x1c2c   :  { %v17296_v62 = vpop.f32.mrb[78].mxu1  ;;  %v17263_v35 = vadd.f32 %v17262_v0, %v17261_v17  ;;  %v27423_v0 = vld [vmem:[#allocation127_spill] sm:$0xff] }
0x1c2d   :  { %v17297_v20 = vpop.f32.mrb[79].mxu1  ;;  %v27427_v17 = vld [vmem:[#allocation131_spill] sm:$0xff] }
0x1c2e   :  { %v17298_v31 = vadd.f32 %v17297_v20, %v17296_v62  ;;  %v27420_v20 = vld [vmem:[#allocation124_spill] sm:$0xff]  ;;  %v27422_v62 = vld [vmem:[#allocation126_spill] sm:$0xff] }
0x1c30   :  { %v7910_v25 = vadd.f32 %v17298_v31, %v17263_v35  ;;  %v27421_v35 = vld [vmem:[#allocation125_spill] sm:$0xff]  ;;  %v27428_v31 = vld [vmem:[#allocation132_spill] sm:$0xff] }
0x1c4a   :  { %v17331_v32 = vpop.f32.mrb[78].mxu0 }
0x1c4b   :  { %v17332_v1 = vpop.f32.mrb[79].mxu0 }
0x1c4c   :  { %v17366_v47 = vpop.f32.mrb[80].mxu1  ;;  %v17333_v21 = vadd.f32 %v17332_v1, %v17331_v32  ;;  %v27417_v1 = vld [vmem:[#allocation121_spill] sm:$0xff] }
0x1c4d   :  { %v17367_v23 = vpop.f32.mrb[81].mxu1  ;;  %v27429_v32 = vld [vmem:[#allocation133_spill] sm:$0xff] }
0x1c4e   :  { %v7980_v41 = vadd.f32 %v17333_v21, %v7910_v25  ;;  %v17368_v49 = vadd.f32 %v17367_v23, %v17366_v47  ;;  %v27415_v21 = vld [vmem:[#allocation119_spill] sm:$0xff]  ;;  %v27416_v47 = vld [vmem:[#allocation120_spill] sm:$0xff]  ;;  %v27418_v25 = vld [vmem:[#allocation122_spill] sm:$0xff] }
0x1c4f   :  { %v27430_v23 = vld [vmem:[#allocation134_spill] sm:$0xff] }
0x1c50   :  { %v8050_v46 = vadd.f32 %v17368_v49, %v7980_v41  ;;  %v27414_v41 = vld [vmem:[#allocation118_spill] sm:$0xff]  ;;  %v27425_v49 = vld [vmem:[#allocation129_spill] sm:$0xff] }
0x1c52   :  { %21724 = vrcp.f32 %v8050_v46  ;;  %v27412_v46 = vld [vmem:[#allocation116_spill] sm:$0xff] }
0x1c5c   :  { %v21725_v26 = vpop.eup %21724 }
0x1c5d   :  { %v8054_v22 = vmul.f32 %v21725_v26, %v24718_v19  ;;  %v27411_v19 = vld [vmem:[#allocation115_spill] sm:$0xff]  ;;  %v27424_v26 = vld [vmem:[#allocation128_spill] sm:$0xff] }
0x1c5f   :  { %15940 = vmatmul.mubr.msk.f32.vlgmr.msra.gmra.mrb[80].mxu0 %vm403_vm1, %v8054_v22  ;;  %15941 = vmatmul.mubr.msk.f32.vlgmr.msra.gmra.mrb[82].mxu1 %vm403_vm1, %v8054_v22 }
0x1c60   :  { %20300 = vmatpush1.bf16.msra.mxu0 %v26973_v29  ;;  %20308 = vmatpush1.bf16.msra.mxu1 %v26974_v24 }
0x1c61   :  { %20302 = vmatprep.subr.bf16.mxu0 %v26975_v48  ;;  %20310 = vmatprep.subr.bf16.mxu1 %v26976_v39 }
0x1c62   :  { %8264 = vmatprep.mubr.f32.mxu0 %v26823_v40  ;;  %8335 = vmatprep.mubr.f32.mxu1 %v26823_v40 }
0x1c64   :  { %20304 = vmatpush1.bf16.msra.mxu0 %v26977_v14  ;;  %20312 = vmatpush1.bf16.msra.mxu1 %v26978_v63 }
0x1c65   :  { %20313 = vmatprep.subr.bf16.mxu0 %v26979_v12  ;;  %18548 = vmatprep.subr.mxu1 %v26823_v40 }
0x1c67   :  { %15942 = vmatmul.mubr.msk.f32.vlgmr.msra.gmra.mrb[82].mxu0 %vm403_vm1, %v8054_v22  ;;  %15943 = vmatmul.mubr.msk.f32.vlgmr.msra.gmra.mrb[84].mxu1 %vm403_vm1, %v8054_v22  ;;  %v27426_v22 = vld [vmem:[#allocation130_spill] sm:$0xff] }
0x1c68   :  { %20315 = vmatpush3.bf16.msra.mxu0 %v26980_v61  ;;  %18549 = vmatpush3.msk.msra.mxu1 %vm695_vm2, %v24610_v34  ;;  %v27410_v34 = vld [vmem:[#allocation114_spill] sm:$0xff] }
0x1c69   :  { %20316 = vmatprep.subr.bf16.mxu0 %v26979_v12  ;;  %18550 = vmatprep.mubr.msk.f32.mxu1 %vm21923_vm5, %v26823_v40 }
0x1c6a   :  { %18545 = vmatprep.mubr.msk.f32.mxu0 %vm21923_vm5, %v26823_v40  ;;  %20320 = vmatprep.subr.bf16.mxu1 %v27120_v4 }
0x1c6b   :  { %18551 = vmatmul.mubr.msk.f32.vlgmr.msra.gmra.mrb[86].mxu1 %vm691_vm3, %v24752_v16  ;;  %v27413_v16 = vld [vmem:[#allocation117_spill] sm:$0xff] }
0x1c6c   :  { %20318 = vmatpush3.bf16.msra.mxu0 %v27121_v53  ;;  %20322 = vmatpush3.bf16.msra.mxu1 %v27122_v8 }
0x1c6d   :  { %20352 = vmatprep.subr.bf16.mxu0 %v27123_v3  ;;  %20324 = vmatprep.subr.bf16.mxu1 %v27124_v30 }
0x1c6f   :  { %18546 = vmatmul.mubr.msk.f32.vlgmr.msra.gmra.mrb[84].mxu0 %vm403_vm1, %v24723_v42  ;;  %v27419_v42 = vld [vmem:[#allocation123_spill] sm:$0xff] }
0x1c70   :  { %20354 = vmatpush3.bf16.msra.mxu0 %v27125_v27  ;;  %20326 = vmatpush3.bf16.msra.mxu1 %v27410_v34 }
0x1c71   :  { %20356 = vmatprep.subr.bf16.mxu0 %v27411_v19  ;;  %20328 = vmatprep.subr.bf16.mxu1 %v27412_v46  ;;  %v15949_v46 = vld [vmem:[%s26325_s0 + $0xa] sm:$0x3] }
0x1c72   :  { %v8808_v19 = vmul.f32 0.5, %v15949_v46 }
0x1c74   :  { %20358 = vmatpush3.bf16.msra.mxu0 %v27413_v16  ;;  %20330 = vmatpush3.bf16.msra.mxu1 %v27414_v41  ;;  %v8809_v34 = vadd.f32 0.5, %v8808_v19 }
0x1c75   :  { %20360 = vmatprep.subr.bf16.mxu0 %v27415_v21  ;;  %20332 = vmatprep.subr.bf16.mxu1 %v27416_v47 }
0x1c78   :  { %20362 = vmatpush3.bf16.msra.mxu0 %v27417_v1  ;;  %20334 = vmatpush3.bf16.msra.mxu1 %v27418_v25 }
0x1c79   :  { %20364 = vmatprep.subr.bf16.mxu0 %v27419_v42  ;;  %20336 = vmatprep.subr.bf16.mxu1 %v27420_v20  ;;  %v27431_v20 = vld [vmem:[#allocation135_spill] sm:$0xff] }
0x1c7c   :  { %20366 = vmatpush3.bf16.msra.mxu0 %v27421_v35  ;;  %20338 = vmatpush3.bf16.msra.mxu1 %v27422_v62  ;;  %v27432_v35 = vld [vmem:[#allocation137_spill] sm:$0xff]  ;;  %v27433_v62 = vld [vmem:[#allocation136_spill] sm:$0xff] }
0x1c7d   :  { %20368 = vmatprep.subr.bf16.mxu0 %v27423_v0  ;;  %20340 = vmatprep.subr.bf16.mxu1 %v27424_v26  ;;  %v27434_v0 = vld [vmem:[#allocation139_spill] sm:$0xff]  ;;  %v27435_v26 = vld [vmem:[#allocation138_spill] sm:$0xff] }
0x1c80   :  { %20370 = vmatpush3.bf16.msra.mxu0 %v27425_v49  ;;  %20342 = vmatpush3.bf16.msra.mxu1 %v27426_v22  ;;  %v27436_v49 = vld [vmem:[#allocation141_spill] sm:$0xff]  ;;  %v27437_v22 = vld [vmem:[#allocation140_spill] sm:$0xff] }
0x1c81   :  { %20372 = vmatprep.subr.bf16.mxu0 %v27427_v17  ;;  %20344 = vmatprep.subr.bf16.mxu1 %v27428_v31  ;;  %v27438_v17 = vld [vmem:[#allocation142_spill] sm:$0xff] }
0x1c84   :  { %20374 = vmatpush3.bf16.msra.mxu0 %v27429_v32  ;;  %20346 = vmatpush3.bf16.msra.mxu1 %v27430_v23 }
0x1c85   :  { %20376 = vmatprep.subr.bf16.mxu0 %v27431_v20  ;;  %20348 = vmatprep.subr.bf16.mxu1 %v27432_v35 }
0x1c88   :  { %20378 = vmatpush3.bf16.msra.mxu0 %v27433_v62  ;;  %20350 = vmatpush3.bf16.msra.mxu1 %v27434_v0 }
0x1c89   :  { %20380 = vmatprep.subr.bf16.mxu0 %v27435_v26  ;;  %20384 = vmatprep.subr.bf16.mxu1 %v27436_v49  ;;  %v27439_v49 = vld [vmem:[#allocation143_spill] sm:$0xff]  ;;  %v27442_v26 = vld [vmem:[#allocation146_spill] sm:$0xff] }
0x1c8c   :  { %20382 = vmatpush3.bf16.msra.mxu0 %v27437_v22  ;;  %v27440_v22 = vld [vmem:[#allocation144_spill] sm:$0xff] }
0x1c8d   :  { %20416 = vmatprep.subr.bf16.mxu0 %v27438_v17  ;;  %v27441_v17 = vld [vmem:[#allocation145_spill] sm:$0xff] }
0x1d32   :  { %v8124_v31 = vpop.f32.mrb[80].mxu0  ;;  %v8195_v32 = vpop.f32.mrb[82].mxu1 }
0x1d33   :  { %v8126_v42 = vpop.f32.mrb[81].mxu0  ;;  %v8197_v23 = vpop.f32.mrb[83].mxu1  ;;  %v8342_v62 = vmul.f32 %v24830_v5, %v8124_v31  ;;  %v8344_v0 = vmul.f32 %v24834_v50, %v8195_v32 }
0x1d34   :  { %v8343_v20 = vmul.f32 %v24832_v56, %v8126_v42  ;;  %v8345_v35 = vmul.f32 %v24837_v7, %v8197_v23  ;;  %v27447_v23 = vld [vmem:[#allocation151_spill] sm:$0xff] }
0x1d36   :  { %8578 = vmatprep.mubr.f32.mxu1 %v8343_v20  ;;  %8648 = vmatprep.mubr.f32.mxu0 %v8345_v35  ;;  %v27443_v20 = vld [vmem:[#allocation147_spill] sm:$0xff]  ;;  %v27444_v35 = vld [vmem:[#allocation148_spill] sm:$0xff] }
0x1d37   :  { %8579 = vmatmul.mubr.f32.vlgmr.msra.gmra.mrb[88].mxu1 %v8342_v62  ;;  %8649 = vmatmul.mubr.f32.vlgmr.msra.gmra.mrb[86].mxu0 %v8344_v0  ;;  %v27445_v62 = vld [vmem:[#allocation149_spill] sm:$0xff]  ;;  %v27446_v0 = vld [vmem:[#allocation150_spill] sm:$0xff] }
0x1d38   :  { %20386 = vmatpush3.bf16.msra.mxu1 %v27439_v49  ;;  %20418 = vmatpush3.bf16.msra.mxu0 %v27440_v22 }
0x1d39   :  { %20388 = vmatprep.subr.bf16.mxu1 %v27441_v17  ;;  %20420 = vmatprep.subr.bf16.mxu0 %v27442_v26  ;;  %v27448_v26 = vld [vmem:[#allocation152_spill] sm:$0xff]  ;;  %v27449_v17 = vld [vmem:[#allocation153_spill] sm:$0xff] }
0x1d3a   :  { %v8266_v25 = vpop.f32.mrb[82].mxu0  ;;  %v8337_v56 = vpop.f32.mrb[84].mxu1 }
0x1d3b   :  { %v8268_v42 = vpop.f32.mrb[83].mxu0  ;;  %v8339_v7 = vpop.f32.mrb[85].mxu1 }
0x1d3c   :  { %v8347_v5 = vmul.f32 %v24842_v33, %v8268_v42  ;;  %v8349_v50 = vmul.f32 %v24848_v59, %v8339_v7  ;;  %20390 = vmatpush3.bf16.msra.mxu1 %v27443_v20  ;;  %20422 = vmatpush3.bf16.msra.mxu0 %v27444_v35  ;;  %v27450_v33 = vld [vmem:[#allocation154_spill] sm:$0xff]  ;;  %v27451_v35 = vld [vmem:[#allocation155_spill] sm:$0xff] }
0x1d3d   :  { %20392 = vmatprep.subr.bf16.mxu1 %v27445_v62  ;;  %20424 = vmatprep.subr.bf16.mxu0 %v27446_v0  ;;  %v27452_v62 = vld [vmem:[#allocation156_spill] sm:$0xff] }
0x1d3e   :  { %8718 = vmatprep.mubr.f32.mxu1 %v8347_v5  ;;  %8788 = vmatprep.mubr.f32.mxu0 %v8349_v50  ;;  %v8486_v31 = vpop.f32.mrb[86].mxu1  ;;  %v24983_v5 = vld [vmem:[%s26324_s8] ss:$0 sm:$0xff] }
0x1d3f   :  { %v18552_v32 = vpop.f32.mrb[87].mxu1  ;;  %27453 = vst [vmem:[#allocation174_spill] sm:$0xff] %v24983_v5 }
0x1d40   :  { %20394 = vmatpush3.bf16.msra.mxu1 %v27447_v23  ;;  %20426 = vmatpush3.bf16.msra.mxu0 %v27448_v26  ;;  %v27454_v32 = vld [vmem:[#allocation157_spill] sm:$0xff] }
0x1d41   :  { %20396 = vmatprep.subr.bf16.mxu1 %v27449_v17  ;;  %20428 = vmatprep.subr.bf16.mxu0 %v27450_v33  ;;  %v27455_v17 = vld [vmem:[#allocation158_spill] sm:$0xff]  ;;  %v27460_v33 = vld [vmem:[#allocation164_spill] sm:$0xff]  ;;  %v27465_v26 = vld [vmem:[#allocation169_spill] sm:$0xff] }
0x1d42   :  { %v8416_v59 = vpop.f32.mrb[84].mxu0 }
0x1d43   :  { %v8487_v42 = vadd.f32 %v8486_v31, %v8416_v59  ;;  %v18547_v7 = vpop.f32.mrb[85].mxu0  ;;  %v27456_v59 = vld [vmem:[#allocation160_spill] sm:$0xff] }
0x1d44   :  { %20398 = vmatpush3.bf16.msra.mxu1 %v27451_v35  ;;  %20430 = vmatpush3.bf16.msra.mxu0 %v27452_v62  ;;  %v27457_v7 = vld [vmem:[#allocation161_spill] sm:$0xff]  ;;  %v27458_v62 = vld [vmem:[#allocation162_spill] sm:$0xff]  ;;  %v27459_v35 = vld [vmem:[#allocation163_spill] sm:$0xff] }
0x1d45   :  { %v24986_v50 = vadd.f32 %v24983_v5, %v8487_v42  ;;  %20400 = vmatprep.subr.bf16.mxu1 %v27454_v32  ;;  %20432 = vmatprep.subr.bf16.mxu0 %v27455_v17  ;;  %v27461_v42 = vld [vmem:[#allocation165_spill] sm:$0xff]  ;;  %v27462_v5 = vld [vmem:[#allocation166_spill] sm:$0xff]  ;;  %v27463_v32 = vld [vmem:[#allocation167_spill] sm:$0xff] }
0x1d46   :  { %v27464_v17 = vld [vmem:[#allocation168_spill] sm:$0xff] }
0x1d47   :  { %v8491_v31 = vsel %vm1822_vm6, %v24986_v50, -inf }
0x1d48   :  { %20402 = vmatpush3.bf16.msra.mxu1 %v27456_v59  ;;  %20434 = vmatpush3.bf16.msra.mxu0 %v27457_v7  ;;  %v27466_v59 = vld [vmem:[#allocation170_spill] sm:$0xff]  ;;  %v27467_v7 = vld [vmem:[#allocation171_spill] sm:$0xff] }
0x1d49   :  { %8492 = vmax.xlane.f32.xlu0 %v8491_v31  ;;  %20404 = vmatprep.subr.bf16.mxu1 %v27458_v62  ;;  %v27468_v31 = vld [vmem:[#allocation172_spill] sm:$0xff]  ;;  %v27469_v62 = vld [vmem:[#allocation173_spill] sm:$0xff] }
0x1d4a   :  { %20436 = vmatprep.subr.bf16.mxu0 %v27459_v35 }
0x1d4c   :  { %20406 = vmatpush3.bf16.msra.mxu1 %v27460_v33  ;;  %20438 = vmatpush3.bf16.msra.mxu0 %v27461_v42  ;;  %v15923_v42 = vld [vmem:[%s26325_s0 + $0x8] sm:$0x3] }
0x1d4d   :  { %20408 = vmatprep.subr.bf16.mxu1 %v27462_v5  ;;  %20440 = vmatprep.subr.bf16.mxu0 %v27463_v32  ;;  %v8346_v5 = vmul.f32 %v24880_v43, %v8266_v25  ;;  %v8348_v32 = vmul.f32 %v24885_v9, %v8337_v56  ;;  %v27470_v33 = vld [vmem:[#allocation3_spill] sm:$0xff]  ;;  %v27476_v9 = vld [vmem:[#allocation9_spill] sm:$0xff]  ;;  %v27477_v25 = vld [vmem:[#allocation10_spill] sm:$0xff] }
0x1d4e   :  { %v27478_v56 = vld [vmem:[#allocation11_spill] sm:$0xff] }
0x1d50   :  { %20410 = vmatpush3.bf16.msra.mxu1 %v27464_v17  ;;  %20442 = vmatpush3.bf16.msra.mxu0 %v27465_v26  ;;  %v27471_v17 = vld [vmem:[#allocation4_spill] sm:$0xff] }
0x1d51   :  { %20412 = vmatprep.subr.bf16.mxu1 %v27466_v59  ;;  %20444 = vmatprep.subr.bf16.mxu0 %v27467_v7  ;;  %v7141_v59 = vmul.f32 0.5, %v15923_v42  ;;  %v27472_v7 = vld [vmem:[#allocation5_spill] sm:$0xff]  ;;  %v27475_v26 = vld [vmem:[#allocation8_spill] sm:$0xff] }
0x1d53   :  { %v7142_v43 = vadd.f32 0.5, %v7141_v59 }
0x1d54   :  { %20414 = vmatpush3.bf16.msra.mxu1 %v27468_v31  ;;  %20446 = vmatpush3.bf16.msra.mxu0 %v27469_v62  ;;  %v27473_v31 = vld [vmem:[#allocation6_spill] sm:$0xff]  ;;  %v27474_v62 = vld [vmem:[#allocation7_spill] sm:$0xff] }
0x1d55   :  { %20448 = vmatprep.subr.bf16.mxu1 %v27470_v33  ;;  %20456 = vmatprep.subr.bf16.mxu0 %v27471_v17 }
0x1d57   :  { %8719 = vmatmul.mubr.f32.vlgmr.msra.gmra.mrb[90].mxu1 %v8346_v5  ;;  %8789 = vmatmul.mubr.f32.vlgmr.msra.gmra.mrb[88].mxu0 %v8348_v32  ;;  %v27479_v5 = vld [vmem:[#allocation12_spill] sm:$0xff] }
0x1d58   :  { %20450 = vmatpush1.bf16.msra.mxu1 %v27472_v7  ;;  %20458 = vmatpush1.bf16.msra.mxu0 %v27473_v31 }
0x1d59   :  { %20452 = vmatprep.subr.bf16.mxu1 %v27474_v62  ;;  %20460 = vmatprep.subr.bf16.mxu0 %v27475_v26 }
0x1d5a   :  { %8884 = vmatprep.mubr.f32.mxu1 %v26823_v40  ;;  %8955 = vmatprep.mubr.f32.mxu0 %v26823_v40 }
0x1d5c   :  { %20454 = vmatpush1.bf16.msra.mxu1 %v27476_v9  ;;  %20462 = vmatpush1.bf16.msra.mxu0 %v27477_v25 }
0x1d5d   :  { %20464 = vmatprep.subr.bf16.mxu1 %v27478_v56  ;;  %20472 = vmatprep.subr.bf16.mxu0 %v27479_v5 }
0x1d5f   :  { %8510 = vperm.xlu0 %21592, %v7142_v43  }
0x1dd6   :  { %v8493_v32 = vpop.xlane.xlu0 %8492 }
0x1dd7   :  { %v8494_v42 = vsub.f32 %v24986_v50, %v8493_v32 }
0x1dd9   :  { %v8495_v62 = vmul.f32 1.442695, %v8494_v42 }
0x1ddb   :  { %21726 = vpow2.f32 %v8495_v62 }
0x1dde   :  { %v8511_v42 = vpop.permute.xlu0 %8510 }
0x1de5   :  { %v21727_v26 = vpop.eup %21726 }
0x1de6   :  { %v8497_v31 = vsel %vm1822_vm6, %v21727_v26, 0.0 }
0x1de7   :  { %8498 = vadd.xlane.f32.xlu1 %v8497_v31 }
0x1e0a   :  { %v17408_v7 = vpop.f32.mrb[88].mxu1  ;;  %v17443_v59 = vpop.f32.mrb[86].mxu0 }
0x1e0b   :  { %v17409_v17 = vpop.f32.mrb[89].mxu1  ;;  %v17444_v9 = vpop.f32.mrb[87].mxu0 }
0x1e0c   :  { %v17410_v33 = vadd.f32 %v17409_v17, %v17408_v7  ;;  %v17445_v25 = vadd.f32 %v17444_v9, %v17443_v59  ;;  %v15947_v17 = vmul.f32 -1.442695, %v24986_v50  ;;  %v27482_v50 = vld [vmem:[#allocation14_spill] sm:$0xff]  ;;  %v27485_v59 = vld [vmem:[#allocation17_spill] sm:$0xff] }
0x1e2a   :  { %v17478_v35 = vpop.f32.mrb[90].mxu1  ;;  %v17513_v56 = vpop.f32.mrb[88].mxu0 }
0x1e2b   :  { %v17479_v23 = vpop.f32.mrb[91].mxu1  ;;  %v17514_v5 = vpop.f32.mrb[89].mxu0 }
0x1e2c   :  { %v17480_v43 = vadd.f32 %v17479_v23, %v17478_v35  ;;  %v17515_v0 = vadd.f32 %v17514_v5, %v17513_v56  ;;  %v27484_v5 = vld [vmem:[#allocation16_spill] sm:$0xff] }
0x1e74   :  { %v8499_v20 = vpop.xlane.xlu1 %8498 }
0x1e75   :  { %21728 = vrcp.f32 %v8499_v20 }
0x1e76   :  { %21730 = vpow2.f32 %v15947_v17  ;;  %v25082_v17 = vld [vmem:[%s26317_s1 + $0xa] sm:$0x3] }
0x1e7f   :  { %v21729_v32 = vpop.eup %21728 }
0x1e80   :  { %v8501_v62 = vmul.f32 %v21729_v32, %v21727_v26  ;;  %v21731_v7 = vpop.eup %21730  ;;  %v25050_v32 = vld [vmem:[%s26750_s3 + $0x8] sm:$0x7f] }
0x1e81   :  { %v8505_v9 = vadd.f32 1.0, %v21731_v7  ;;  %27487 = vst [vmem:[#allocation67_spill] sm:$0xff] %v25050_v32  ;;  %v25089_v7 = vld [vmem:[%s26750_s3 + $0x28] sm:$0x7f] }
0x1e82   :  { %v8513_v22 = vmul.f32 %v8511_v42, %v8501_v62  ;;  %v25057_v62 = vld [vmem:[%s26750_s3 + $0x18] sm:$0x7f]  ;;  %v25068_v42 = vld [vmem:[%s26750_s3] sm:$0x7f]  ;;  %27491 = vst [vmem:[#allocation70_spill] sm:$0xff] %v25089_v7 }
0x1e83   :  { %21732 = vrcp.f32 %v8505_v9  ;;  %27488 = vst [vmem:[#allocation68_spill] sm:$0xff] %v25057_v62  ;;  %27489 = vst [vmem:[#allocation69_spill] sm:$0xff] %v25068_v42  ;;  %v25096_v9 = vld [vmem:[%s26750_s3 + $0x38] sm:$0x7f] }
0x1e84   :  { %v8581_v49 = vadd.f32 %v17410_v33, %v8513_v22  ;;  %27492 = vst [vmem:[#allocation71_spill] sm:$0xff] %v25096_v9 }
0x1e86   :  { %v8651_v31 = vadd.f32 %v17445_v25, %v8581_v49  ;;  %v27483_v25 = vld [vmem:[#allocation15_spill] sm:$0xff] }
0x1e88   :  { %v8721_v1 = vadd.f32 %v17480_v43, %v8651_v31  ;;  %v27486_v43 = vld [vmem:[#allocation18_spill] sm:$0xff]  ;;  %v25075_v31 = vld [vmem:[%s26750_s3 + $0x10] sm:$0x7f] }
0x1e89   :  { %27490 = vst [vmem:[#allocation61_spill] sm:$0xff] %v25075_v31 }
0x1e8a   :  { %v8791_v47 = vadd.f32 %v17515_v0, %v8721_v1 }
0x1e8c   :  { %8795 = vrot.lane.b32.xlu1 %v8791_v47, %s21925_s10 }
0x1e8d   :  { %v21733_v35 = vpop.eup %21732 }
0x1efe   :  { %v8796_v23 = vpop.permute.xlu1 %8795 }
0x1eff   :  { %v8798_v56 = vmul.f32 %v21733_v35, %v8796_v23  ;;  %v25107_v35 = vld [vmem:[%s26750_s3 + $0x20] sm:$0x7f]  ;;  %v25114_v23 = vld [vmem:[%s26750_s3 + $0x30] sm:$0x7f] }
0x1f00   :  { %27493 = vst [vmem:[#allocation72_spill] sm:$0xff] %v25107_v35  ;;  %27494 = vst [vmem:[#allocation73_spill] sm:$0xff] %v25114_v23 }
0x1f01   :  { %8800 = vrot.lane.b32.xlu1 %v8798_v56, %s21926_s4  ;;  %v27495_v56 = vld [vmem:[#allocation19_spill] sm:$0xff] }
0x1f73   :  { %v8801_v26 = vpop.permute.xlu1 %8800 }
0x1f74   :  { %v25028_v20 = vsub.f32 %v8791_v47, %v8801_v26  ;;  %v27481_v47 = vld [vmem:[#allocation13_spill] sm:$0xff]  ;;  %v27496_v26 = vld [vmem:[#allocation20_spill] sm:$0xff] }
0x1f76   :  { %v8810_v49 = vsel %vm1822_vm6, %v25028_v20, 0.0 }
0x1f77   :  { %8811 = vadd.xlane.f32.xlu0 %v8810_v49  ;;  %v27497_v49 = vld [vmem:[#allocation21_spill] sm:$0xff] }
0x2004   :  { %v8812_v1 = vpop.xlane.xlu0 %8811 }
0x2005   :  { %vm8813_vm11 = vcmp.eq.f32.partialorder %v8812_v1, 0.0 }
0x2006   :  { %v8814_v22 = vsel %vm8813_vm11, 1.0, %v8812_v1  ;;  %v27498_v1 = vld [vmem:[#allocation22_spill] sm:$0xff] }
0x2007   :  { %21734 = vrcp.f32 %v8814_v22  ;;  %v27499_v22 = vld [vmem:[#allocation23_spill] sm:$0xff] }
0x2011   :  { %v21735_v0 = vpop.eup %21734 }
0x2012   :  { %v25033_v33 = vmul.f32 %v21735_v0, %v25028_v20  ;;  %v27500_v0 = vld [vmem:[#allocation24_spill] sm:$0xff] }
0x2014   :  { %27480 = vst [vmem:[#allocation66_spill] sm:$0xff] %v25033_v33  ;;  %15950 = vmatmul.mubr.msk.f32.vlgmr.msra.gmra.mrb[92].mxu1 %vm403_vm1, %v25033_v33  ;;  %15951 = vmatmul.mubr.msk.f32.vlgmr.msra.gmra.mrb[90].mxu0 %vm403_vm1, %v25033_v33 }
0x2015   :  { %20466 = vmatpush1.bf16.msra.mxu1 %v27481_v47  ;;  %20474 = vmatpush1.bf16.msra.mxu0 %v27482_v50 }
0x2016   :  { %20468 = vmatprep.subr.bf16.mxu1 %v27483_v25  ;;  %20476 = vmatprep.subr.bf16.mxu0 %v27484_v5  ;;  %v27533_v25 = vld [vmem:[#allocation38_spill] sm:$0xff] }
0x2017   :  { %9026 = vmatprep.mubr.f32.mxu1 %v26823_v40  ;;  %9097 = vmatprep.mubr.f32.mxu0 %v26823_v40 }
0x2019   :  { %20470 = vmatpush1.bf16.msra.mxu1 %v27485_v59  ;;  %20478 = vmatpush1.bf16.msra.mxu0 %v27486_v43  ;;  %v27531_v43 = vld [vmem:[#allocation39_spill] sm:$0xff]  ;;  %v27532_v59 = vld [vmem:[#allocation42_spill] sm:$0xff] }
0x201a   :  { %15954 = vmatprep.subr.msk.mxu1 %vm695_vm2, %v25050_v32  ;;  %15957 = vmatprep.subr.msk.mxu0 %vm695_vm2, %v25057_v62  ;;  %v27529_v62 = vld [vmem:[#allocation37_spill] sm:$0xff] }
0x201b   :  { %v27530_v32 = vld [vmem:[#allocation41_spill] sm:$0xff] }
0x201c   :  { %15952 = vmatmul.mubr.msk.f32.vlgmr.msra.gmra.mrb[94].mxu1 %vm403_vm1, %v25033_v33  ;;  %15953 = vmatmul.mubr.msk.f32.vlgmr.msra.gmra.mrb[92].mxu0 %vm403_vm1, %v25033_v33 }
0x201d   :  { %15955 = vmatpush1.msk.msra.mxu1 %vm695_vm2, %v25068_v42  ;;  %15958 = vmatpush1.msk.msra.mxu0 %vm695_vm2, %v25075_v31  ;;  %v27507_v31 = vld [vmem:[#allocation31_spill] sm:$0xff] }
0x201e   :  { %9171 = vmatprep.mubr.f32.mxu1 %v26823_v40  ;;  %9242 = vmatprep.mubr.f32.mxu0 %v26823_v40 }
0x201f   :  { %15960 = vmatprep.subr.msk.mxu1 %vm695_vm2, %v25089_v7  ;;  %15963 = vmatprep.subr.msk.mxu0 %vm695_vm2, %v25096_v9  ;;  %v27505_v9 = vld [vmem:[#allocation29_spill] sm:$0xff]  ;;  %v27506_v7 = vld [vmem:[#allocation30_spill] sm:$0xff] }
0x2020   :  { %15956 = vmatmul.mubr.msk.f32.vlgmr.msra.gmra.mrb[92].mxu1 %vm691_vm3, %v25082_v17  ;;  %15959 = vmatmul.mubr.msk.f32.vlgmr.msra.gmra.mrb[90].mxu0 %vm691_vm3, %v25082_v17 }
0x2021   :  { %15961 = vmatpush1.msk.msra.mxu1 %vm695_vm2, %v25107_v35  ;;  %15964 = vmatpush1.msk.msra.mxu0 %vm695_vm2, %v25114_v23  ;;  %v27501_v23 = vld [vmem:[#allocation25_spill] sm:$0xff]  ;;  %v27502_v35 = vld [vmem:[#allocation26_spill] sm:$0xff] }
0x2022   :  { %9313 = vmatprep.mubr.f32.mxu1 %v26823_v40  ;;  %9384 = vmatprep.mubr.f32.mxu0 %v26823_v40 }
0x2023   :  { %20480 = vmatprep.subr.bf16.mxu1 %v27495_v56  ;;  %20512 = vmatprep.subr.bf16.mxu0 %v27496_v26  ;;  %v27503_v56 = vld [vmem:[#allocation27_spill] sm:$0xff]  ;;  %v27504_v26 = vld [vmem:[#allocation28_spill] sm:$0xff] }
0x2024   :  { %15962 = vmatmul.mubr.msk.f32.vlgmr.msra.gmra.mrb[94].mxu1 %vm691_vm3, %v25082_v17  ;;  %15965 = vmatmul.mubr.msk.f32.vlgmr.msra.gmra.mrb[92].mxu0 %vm691_vm3, %v25082_v17 }
0x2025   :  { %20482 = vmatpush3.bf16.msra.mxu1 %v27497_v49  ;;  %20514 = vmatpush3.bf16.msra.mxu0 %v27498_v1  ;;  %v27508_v49 = vld [vmem:[#allocation32_spill] sm:$0xff]  ;;  %v27509_v1 = vld [vmem:[#allocation33_spill] sm:$0xff] }
0x2026   :  { %20484 = vmatprep.subr.bf16.mxu1 %v27499_v22  ;;  %20516 = vmatprep.subr.bf16.mxu0 %v27500_v0  ;;  %v27510_v22 = vld [vmem:[#allocation34_spill] sm:$0xff]  ;;  %v27511_v0 = vld [vmem:[#allocation35_spill] sm:$0xff] }
0x2029   :  { %20486 = vmatpush3.bf16.msra.mxu1 %v27501_v23  ;;  %20518 = vmatpush3.bf16.msra.mxu0 %v27502_v35  ;;  %v27512_v23 = vld [vmem:[#allocation36_spill] sm:$0xff]  ;;  %v27513_v35 = vld [vmem:[#allocation45_spill] sm:$0xff] }
0x202a   :  { %20488 = vmatprep.subr.bf16.mxu1 %v27503_v56  ;;  %20520 = vmatprep.subr.bf16.mxu0 %v27504_v26  ;;  %v27514_v56 = vld [vmem:[#allocation46_spill] sm:$0xff]  ;;  %v27515_v26 = vld [vmem:[#allocation47_spill] sm:$0xff] }
0x202d   :  { %20490 = vmatpush3.bf16.msra.mxu1 %v27505_v9  ;;  %20522 = vmatpush3.bf16.msra.mxu0 %v27506_v7  ;;  %v27516_v9 = vld [vmem:[#allocation48_spill] sm:$0xff]  ;;  %v27517_v7 = vld [vmem:[#allocation49_spill] sm:$0xff] }
0x202e   :  { %20492 = vmatprep.subr.bf16.mxu1 %v27507_v31  ;;  %20524 = vmatprep.subr.bf16.mxu0 %v27508_v49  ;;  %v27518_v31 = vld [vmem:[#allocation50_spill] sm:$0xff]  ;;  %v27519_v49 = vld [vmem:[#allocation51_spill] sm:$0xff] }
0x2031   :  { %20494 = vmatpush3.bf16.msra.mxu1 %v27509_v1  ;;  %20526 = vmatpush3.bf16.msra.mxu0 %v27510_v22  ;;  %v27520_v1 = vld [vmem:[#allocation52_spill] sm:$0xff]  ;;  %v27521_v22 = vld [vmem:[#allocation53_spill] sm:$0xff] }
0x2032   :  { %20496 = vmatprep.subr.bf16.mxu1 %v27511_v0  ;;  %20528 = vmatprep.subr.bf16.mxu0 %v27512_v23  ;;  %v27522_v0 = vld [vmem:[#allocation54_spill] sm:$0xff]  ;;  %v27523_v23 = vld [vmem:[#allocation55_spill] sm:$0xff] }
0x2035   :  { %20498 = vmatpush3.bf16.msra.mxu1 %v27513_v35  ;;  %20530 = vmatpush3.bf16.msra.mxu0 %v27514_v56  ;;  %v27524_v35 = vld [vmem:[#allocation56_spill] sm:$0xff]  ;;  %v27525_v56 = vld [vmem:[#allocation57_spill] sm:$0xff] }
0x2036   :  { %20500 = vmatprep.subr.bf16.mxu1 %v27515_v26  ;;  %20532 = vmatprep.subr.bf16.mxu0 %v27516_v9  ;;  %v27526_v26 = vld [vmem:[#allocation58_spill] sm:$0xff]  ;;  %v27527_v9 = vld [vmem:[#allocation59_spill] sm:$0xff] }
0x2039   :  { %20502 = vmatpush3.bf16.msra.mxu1 %v27517_v7  ;;  %20534 = vmatpush3.bf16.msra.mxu0 %v27518_v31  ;;  %v27528_v7 = vld [vmem:[#allocation60_spill] sm:$0xff] }
0x203a   :  { %20504 = vmatprep.subr.bf16.mxu1 %v27519_v49  ;;  %20536 = vmatprep.subr.bf16.mxu0 %v27520_v1 }
0x203d   :  { %20506 = vmatpush3.bf16.msra.mxu1 %v27521_v22  ;;  %20538 = vmatpush3.bf16.msra.mxu0 %v27522_v0 }
0x203e   :  { %20508 = vmatprep.subr.bf16.mxu1 %v27523_v23  ;;  %20540 = vmatprep.subr.bf16.mxu0 %v27524_v35 }
0x2041   :  { %20510 = vmatpush3.bf16.msra.mxu1 %v27525_v56  ;;  %20542 = vmatpush3.bf16.msra.mxu0 %v27526_v26 }
0x2042   :  { %20544 = vmatprep.subr.bf16.mxu1 %v27527_v9  ;;  %20576 = vmatprep.subr.bf16.mxu0 %v27528_v7  ;;  %v27534_v9 = vld [vmem:[#allocation43_spill] sm:$0xff] }
0x20f3   :  { %v9173_v31 = vpop.f32.mrb[92].mxu1  ;;  %v9244_v49 = vpop.f32.mrb[90].mxu0 }
0x20f4   :  { %v9175_v42 = vpop.f32.mrb[93].mxu1  ;;  %v9246_v1 = vpop.f32.mrb[91].mxu0  ;;  %v9391_v22 = vadd.f32 %v9173_v31, %v27529_v62  ;;  %v9393_v0 = vadd.f32 %v9244_v49, %v27530_v32  ;;  %v27535_v62 = vld [vmem:[#allocation40_spill] sm:$0xff] }
0x20f5   :  { %v9392_v23 = vadd.f32 %v9175_v42, %v27531_v43  ;;  %v9394_v35 = vadd.f32 %v9246_v1, %v27532_v59  ;;  %v27536_v32 = vld [vmem:[#allocation44_spill] sm:$0xff] }
0x20f6   :  { %v9399_v21 = vsel %vm1053_vm4, %v9391_v22, -inf  ;;  %v9401_v31 = vsel %vm1053_vm4, %v9393_v0, -inf }
0x20f7   :  { %v9315_v5 = vpop.f32.mrb[94].mxu1  ;;  %v9386_v56 = vpop.f32.mrb[92].mxu0  ;;  %v9400_v1 = vsel %vm1053_vm4, %v9392_v23, -inf  ;;  %v9402_v59 = vsel %vm1053_vm4, %v9394_v35, -inf }
0x20f8   :  { %v25163_v26 = vadd.f32 %v9315_v5, %v27533_v25  ;;  %v25166_v50 = vadd.f32 %v9386_v56, %v27534_v9  ;;  %v9317_v7 = vpop.f32.mrb[95].mxu1  ;;  %v9388_v47 = vpop.f32.mrb[93].mxu0 }
0x20f9   :  { %v9396_v49 = vadd.f32 %v9317_v7, %v27535_v62  ;;  %v9398_v42 = vadd.f32 %v9388_v47, %v27536_v32 }
0x20fa   :  { %v9403_v5 = vsel %vm1053_vm4, %v25163_v26, -inf  ;;  %v9407_v56 = vsel %vm1053_vm4, %v25166_v50, -inf }
0x20fb   :  { %v9404_v9 = vmax.f32 %v9399_v21, %v9403_v5  ;;  %v9408_v25 = vmax.f32 %v9401_v31, %v9407_v56  ;;  %v9405_v43 = vsel %vm1053_vm4, %v9396_v49, -inf  ;;  %v9409_v41 = vsel %vm1053_vm4, %v9398_v42, -inf }
0x20fc   :  { %v9406_v16 = vmax.f32 %v9400_v1, %v9405_v43  ;;  %v9410_v7 = vmax.f32 %v9402_v59, %v9409_v41  ;;  %v27543_v1 = vld [vmem:[#allocation86_spill] sm:$0xff] }
0x20fe   :  { %v9411_v62 = vmax.f32 %v9404_v9, %v9406_v16  ;;  %v9412_v47 = vmax.f32 %v9408_v25, %v9410_v7  ;;  %v27544_v7 = vld [vmem:[#allocation87_spill] sm:$0xff] }
0x2100   :  { %v9413_v32 = vmax.f32 %v9411_v62, %v9412_v47  ;;  %v27545_v47 = vld [vmem:[#allocation88_spill] sm:$0xff] }
0x2102   :  { %9414 = vmax.xlane.f32.xlu1 %v9413_v32 }
0x2113   :  { %10177 = vperm.xlu1 %21593, %v8809_v34  }
0x218f   :  { %v9415_v27 = vpop.xlane.xlu1 %9414 }
0x2190   :  { %v9416_v21 = vsub.f32 %v9391_v22, %v9415_v27  ;;  %v9417_v31 = vsub.f32 %v9392_v23, %v9415_v27  ;;  %v9418_v5 = vsub.f32 %v9393_v0, %v9415_v27  ;;  %v9419_v56 = vsub.f32 %v9394_v35, %v9415_v27  ;;  %v27537_v0 = vld [vmem:[#allocation80_spill] sm:$0xff] }
0x2191   :  { %v9421_v33 = vsub.f32 %v9396_v49, %v9415_v27  ;;  %v9423_v16 = vsub.f32 %v9398_v42, %v9415_v27  ;;  %v9420_v9 = vsub.f32 %v25163_v26, %v9415_v27  ;;  %v9422_v35 = vsub.f32 %v25166_v50, %v9415_v27  ;;  %v27538_v26 = vld [vmem:[#allocation81_spill] sm:$0xff]  ;;  %v27539_v49 = vld [vmem:[#allocation82_spill] sm:$0xff]  ;;  %v27540_v27 = vld [vmem:[#allocation83_spill] sm:$0xff] }
0x2192   :  { %v9424_v30 = vmul.f32 1.442695, %v9416_v21  ;;  %v9426_v43 = vmul.f32 1.442695, %v9417_v31  ;;  %v9428_v41 = vmul.f32 1.442695, %v9418_v5 }
0x2193   :  { %v9430_v25 = vmul.f32 1.442695, %v9419_v56  ;;  %v9434_v59 = vmul.f32 1.442695, %v9421_v33  ;;  %v9438_v32 = vmul.f32 1.442695, %v9423_v16 }
0x2194   :  { %21736 = vpow2.f32 %v9424_v30  ;;  %v9432_v23 = vmul.f32 1.442695, %v9420_v9  ;;  %v9436_v22 = vmul.f32 1.442695, %v9422_v35  ;;  %v27541_v50 = vld [vmem:[#allocation84_spill] sm:$0xff]  ;;  %v27542_v42 = vld [vmem:[#allocation85_spill] sm:$0xff] }
0x2195   :  { %21738 = vpow2.f32 %v9426_v43  ;;  %v27546_v21 = vld [vmem:[#allocation89_spill] sm:$0xff]  ;;  %v27547_v31 = vld [vmem:[#allocation91_spill] sm:$0xff]  ;;  %v27548_v56 = vld [vmem:[#allocation90_spill] sm:$0xff] }
0x2196   :  { %21740 = vpow2.f32 %v9428_v41  ;;  %v27549_v43 = vld [vmem:[#allocation92_spill] sm:$0xff]  ;;  %v27550_v16 = vld [vmem:[#allocation93_spill] sm:$0xff]  ;;  %v27555_v35 = vld [vmem:[#allocation99_spill] sm:$0xff] }
0x2197   :  { %21742 = vpow2.f32 %v9430_v25  ;;  %v27551_v25 = vld [vmem:[#allocation95_spill] sm:$0xff]  ;;  %v27554_v9 = vld [vmem:[#allocation97_spill] sm:$0xff] }
0x2198   :  { %21744 = vpow2.f32 %v9434_v59  ;;  %v27552_v59 = vld [vmem:[#allocation94_spill] sm:$0xff] }
0x2199   :  { %21746 = vpow2.f32 %v9438_v32  ;;  %v27553_v32 = vld [vmem:[#allocation96_spill] sm:$0xff] }
0x219a   :  { %21748 = vpow2.f32 %v9432_v23  ;;  %v27556_v23 = vld [vmem:[#allocation98_spill] sm:$0xff] }
0x219b   :  { %21750 = vpow2.f32 %v9436_v22 }
0x219e   :  { %v25183_v34 = vpop.eup %21736 }
0x219f   :  { %v25185_v19 = vpop.eup %21738 }
0x21a0   :  { %v25187_v46 = vpop.eup %21740  ;;  %9504 = vmatprep.mubr.f32.mxu1 %v25185_v19 }
0x21a1   :  { %v25190_v62 = vpop.eup %21742  ;;  %9505 = vmatmul.mubr.f32.vlgmr.msra.gmra.mrb[96].mxu1 %v25183_v34 }
0x21a2   :  { %9574 = vmatprep.mubr.f32.mxu0 %v25190_v62  ;;  %20546 = vmatpush3.bf16.msra.mxu1 %v26933_v2  ;;  %v25195_v30 = vpop.eup %21744 }
0x21a3   :  { %9575 = vmatmul.mubr.f32.vlgmr.msra.gmra.mrb[94].mxu0 %v25187_v46  ;;  %20548 = vmatprep.subr.bf16.mxu1 %v26934_v10  ;;  %v25201_v33 = vpop.eup %21746 }
0x21a4   :  { %20578 = vmatpush3.bf16.msra.mxu0 %v26935_v15  ;;  %9644 = vmatprep.mubr.f32.mxu1 %v25195_v30  ;;  %v25233_v5 = vpop.eup %21748 }
0x21a5   :  { %20580 = vmatprep.subr.bf16.mxu0 %v26936_v11  ;;  %9714 = vmatprep.mubr.f32.mxu0 %v25201_v33  ;;  %v25238_v41 = vpop.eup %21750 }
0x21a6   :  { %20550 = vmatpush3.bf16.msra.mxu1 %v26937_v13 }
0x21a7   :  { %20552 = vmatprep.subr.bf16.mxu1 %v27085_v54 }
0x21a8   :  { %20582 = vmatpush3.bf16.msra.mxu0 %v27086_v36 }
0x21a9   :  { %20584 = vmatprep.subr.bf16.mxu0 %v27087_v55 }
0x21aa   :  { %20554 = vmatpush3.bf16.msra.mxu1 %v27088_v28 }
0x21ab   :  { %20556 = vmatprep.subr.bf16.mxu1 %v27235_v51 }
0x21ac   :  { %20586 = vmatpush3.bf16.msra.mxu0 %v27236_v6 }
0x21ad   :  { %20588 = vmatprep.subr.bf16.mxu0 %v27237_v18 }
0x21ae   :  { %20558 = vmatpush3.bf16.msra.mxu1 %v27238_v45 }
0x21af   :  { %20560 = vmatprep.subr.bf16.mxu1 %v27384_v44 }
0x21b0   :  { %20590 = vmatpush3.bf16.msra.mxu0 %v27385_v37 }
0x21b1   :  { %20592 = vmatprep.subr.bf16.mxu0 %v27386_v38 }
0x21b2   :  { %20562 = vmatpush3.bf16.msra.mxu1 %v27387_v57 }
0x21b3   :  { %20564 = vmatprep.subr.bf16.mxu1 %v27388_v58 }
0x21b4   :  { %20594 = vmatpush3.bf16.msra.mxu0 %v27389_v52 }
0x21b5   :  { %20596 = vmatprep.subr.bf16.mxu0 %v27537_v0 }
0x21b6   :  { %20566 = vmatpush3.bf16.msra.mxu1 %v27538_v26 }
0x21b7   :  { %20568 = vmatprep.subr.bf16.mxu1 %v27539_v49 }
0x21b8   :  { %20598 = vmatpush3.bf16.msra.mxu0 %v27540_v27 }
0x21b9   :  { %20600 = vmatprep.subr.bf16.mxu0 %v27541_v50 }
0x21ba   :  { %20570 = vmatpush3.bf16.msra.mxu1 %v27542_v42 }
0x21bb   :  { %20572 = vmatprep.subr.bf16.mxu1 %v27543_v1 }
0x21bc   :  { %20602 = vmatpush3.bf16.msra.mxu0 %v27544_v7 }
0x21bd   :  { %20604 = vmatprep.subr.bf16.mxu0 %v27545_v47 }
0x21be   :  { %20574 = vmatpush3.bf16.msra.mxu1 %v27546_v21 }
0x21bf   :  { %20608 = vmatprep.subr.bf16.mxu1 %v27547_v31 }
0x21c0   :  { %20606 = vmatpush3.bf16.msra.mxu0 %v27548_v56 }
0x21c1   :  { %9645 = vmatmul.mubr.f32.vlgmr.msra.gmra.mrb[98].mxu1 %v25233_v5  ;;  %20616 = vmatprep.subr.bf16.mxu0 %v27549_v43 }
0x21c2   :  { %20610 = vmatpush1.bf16.msra.mxu1 %v27550_v16  ;;  %9789 = vmatprep.mubr.f32.mxu1 %v26823_v40 }
0x21c3   :  { %9715 = vmatmul.mubr.f32.vlgmr.msra.gmra.mrb[96].mxu0 %v25238_v41  ;;  %20612 = vmatprep.subr.bf16.mxu1 %v27551_v25 }
0x21c4   :  { %20618 = vmatpush1.bf16.msra.mxu0 %v27552_v59  ;;  %9860 = vmatprep.mubr.f32.mxu0 %v26823_v40 }
0x21c5   :  { %20620 = vmatprep.subr.bf16.mxu0 %v27553_v32 }
0x21c6   :  { %20614 = vmatpush1.bf16.msra.mxu1 %v27554_v9 }
0x21c7   :  { %20624 = vmatprep.subr.bf16.mxu1 %v27555_v35 }
0x21c8   :  { %20622 = vmatpush1.bf16.msra.mxu0 %v27556_v23 }
0x21c9   :  { %20632 = vmatprep.subr.bf16.mxu0 %v26972_v60 }
0x2274   :  { %v17548_v22 = vpop.f32.mrb[96].mxu1 }
0x2275   :  { %v17549_v16 = vpop.f32.mrb[97].mxu1 }
0x2276   :  { %v17583_v43 = vpop.f32.mrb[94].mxu0  ;;  %v17550_v56 = vadd.f32 %v17549_v16, %v17548_v22  ;;  %v27568_v16 = vld [vmem:[#allocation121_spill] sm:$0xff]  ;;  %v27575_v22 = vld [vmem:[#allocation128_spill] sm:$0xff] }
0x2277   :  { %v17584_v31 = vpop.f32.mrb[95].mxu0 }
0x2278   :  { %v17585_v25 = vadd.f32 %v17584_v31, %v17583_v43  ;;  %v27565_v31 = vld [vmem:[#allocation118_spill] sm:$0xff]  ;;  %v27567_v43 = vld [vmem:[#allocation120_spill] sm:$0xff] }
0x227a   :  { %v9577_v21 = vadd.f32 %v17585_v25, %v17550_v56  ;;  %v27566_v56 = vld [vmem:[#allocation119_spill] sm:$0xff]  ;;  %v27569_v25 = vld [vmem:[#allocation122_spill] sm:$0xff] }
0x2294   :  { %v17618_v59 = vpop.f32.mrb[98].mxu1 }
0x2295   :  { %v17619_v47 = vpop.f32.mrb[99].mxu1 }
0x2296   :  { %v17653_v7 = vpop.f32.mrb[96].mxu0  ;;  %v17620_v1 = vadd.f32 %v17619_v47, %v17618_v59  ;;  %v27562_v47 = vld [vmem:[#allocation115_spill] sm:$0xff] }
0x2297   :  { %v17654_v32 = vpop.f32.mrb[97].mxu0  ;;  %v27570_v59 = vld [vmem:[#allocation123_spill] sm:$0xff] }
0x2298   :  { %v9647_v42 = vadd.f32 %v17620_v1, %v9577_v21  ;;  %v17655_v9 = vadd.f32 %v17654_v32, %v17653_v7  ;;  %v27560_v1 = vld [vmem:[#allocation113_spill] sm:$0xff]  ;;  %v27561_v7 = vld [vmem:[#allocation114_spill] sm:$0xff]  ;;  %v27563_v21 = vld [vmem:[#allocation116_spill] sm:$0xff] }
0x2299   :  { %v27571_v32 = vld [vmem:[#allocation124_spill] sm:$0xff] }
0x229a   :  { %v9717_v50 = vadd.f32 %v17655_v9, %v9647_v42  ;;  %v27559_v42 = vld [vmem:[#allocation66_spill] sm:$0xff]  ;;  %v27572_v9 = vld [vmem:[#allocation125_spill] sm:$0xff] }
0x229c   :  { %21752 = vrcp.f32 %v9717_v50  ;;  %v27558_v50 = vld [vmem:[#allocation112_spill] sm:$0xff] }
0x22a6   :  { %v21753_v35 = vpop.eup %21752 }
0x22a7   :  { %v9721_v23 = vmul.f32 %v21753_v35, %v25028_v20  ;;  %v25270_v20 = vld [vmem:[%s26323_s6] sm:$0x7f] }
0x22a8   :  { %27557 = vst [vmem:[#allocation62_spill] sm:$0xff] %v25270_v20  ;;  %v27573_v35 = vld [vmem:[#allocation126_spill] sm:$0xff] }
0x22a9   :  { %15966 = vmatmul.mubr.msk.f32.vlgmr.msra.gmra.mrb[100].mxu1 %vm403_vm1, %v9721_v23  ;;  %15967 = vmatmul.mubr.msk.f32.vlgmr.msra.gmra.mrb[98].mxu0 %vm403_vm1, %v9721_v23 }
0x22aa   :  { %20626 = vmatpush1.bf16.msra.mxu1 %v26973_v29  ;;  %20634 = vmatpush1.bf16.msra.mxu0 %v26974_v24 }
0x22ab   :  { %20628 = vmatprep.subr.bf16.mxu1 %v26975_v48  ;;  %20636 = vmatprep.subr.bf16.mxu0 %v26976_v39 }
0x22ac   :  { %9931 = vmatprep.mubr.f32.mxu1 %v26823_v40  ;;  %10002 = vmatprep.mubr.f32.mxu0 %v26823_v40 }
0x22ae   :  { %20630 = vmatpush1.bf16.msra.mxu1 %v26977_v14  ;;  %20638 = vmatpush1.bf16.msra.mxu0 %v26978_v63 }
0x22af   :  { %20639 = vmatprep.subr.bf16.mxu1 %v26979_v12  ;;  %18564 = vmatprep.subr.mxu0 %v26823_v40 }
0x22b1   :  { %15968 = vmatmul.mubr.msk.f32.vlgmr.msra.gmra.mrb[102].mxu1 %vm403_vm1, %v9721_v23  ;;  %15969 = vmatmul.mubr.msk.f32.vlgmr.msra.gmra.mrb[100].mxu0 %vm403_vm1, %v9721_v23  ;;  %v27574_v23 = vld [vmem:[#allocation127_spill] sm:$0xff] }
0x22b2   :  { %20641 = vmatpush3.bf16.msra.mxu1 %v26980_v61  ;;  %18565 = vmatpush3.msk.msra.mxu0 %vm695_vm2, %v25270_v20 }
0x22b3   :  { %20642 = vmatprep.subr.bf16.mxu1 %v26979_v12  ;;  %18566 = vmatprep.mubr.msk.f32.mxu0 %vm21923_vm5, %v26823_v40 }
0x22b4   :  { %18561 = vmatprep.mubr.msk.f32.mxu1 %vm21923_vm5, %v26823_v40  ;;  %20646 = vmatprep.subr.bf16.mxu0 %v27120_v4 }
0x22b5   :  { %18567 = vmatmul.mubr.msk.f32.vlgmr.msra.gmra.mrb[102].mxu0 %vm691_vm3, %v25082_v17  ;;  %v27564_v17 = vld [vmem:[#allocation117_spill] sm:$0xff] }
0x22b6   :  { %20644 = vmatpush3.bf16.msra.mxu1 %v27121_v53  ;;  %20648 = vmatpush3.bf16.msra.mxu0 %v27122_v8 }
0x22b7   :  { %20678 = vmatprep.subr.bf16.mxu1 %v27123_v3  ;;  %20650 = vmatprep.subr.bf16.mxu0 %v27558_v50 }
0x22b9   :  { %18562 = vmatmul.mubr.msk.f32.vlgmr.msra.gmra.mrb[104].mxu1 %vm403_vm1, %v27559_v42  ;;  %v27576_v42 = vld [vmem:[#allocation129_spill] sm:$0xff] }
0x22ba   :  { %20680 = vmatpush3.bf16.msra.mxu1 %v27560_v1  ;;  %20652 = vmatpush3.bf16.msra.mxu0 %v27561_v7 }
0x22bb   :  { %20682 = vmatprep.subr.bf16.mxu1 %v27562_v47  ;;  %20654 = vmatprep.subr.bf16.mxu0 %v27563_v21 }
0x22be   :  { %20684 = vmatpush3.bf16.msra.mxu1 %v27564_v17  ;;  %20656 = vmatpush3.bf16.msra.mxu0 %v27565_v31 }
0x22bf   :  { %20686 = vmatprep.subr.bf16.mxu1 %v27566_v56  ;;  %20658 = vmatprep.subr.bf16.mxu0 %v27567_v43  ;;  %v27577_v56 = vld [vmem:[#allocation130_spill] sm:$0xff]  ;;  %v27578_v43 = vld [vmem:[#allocation131_spill] sm:$0xff] }
0x22c2   :  { %20688 = vmatpush3.bf16.msra.mxu1 %v27568_v16  ;;  %20660 = vmatpush3.bf16.msra.mxu0 %v27569_v25  ;;  %v27579_v16 = vld [vmem:[#allocation132_spill] sm:$0xff]  ;;  %v27580_v25 = vld [vmem:[#allocation133_spill] sm:$0xff] }
0x22c3   :  { %20690 = vmatprep.subr.bf16.mxu1 %v27570_v59  ;;  %20662 = vmatprep.subr.bf16.mxu0 %v27571_v32  ;;  %v27581_v59 = vld [vmem:[#allocation134_spill] sm:$0xff]  ;;  %v27582_v32 = vld [vmem:[#allocation135_spill] sm:$0xff] }
0x22c6   :  { %20692 = vmatpush3.bf16.msra.mxu1 %v27572_v9  ;;  %20664 = vmatpush3.bf16.msra.mxu0 %v27573_v35  ;;  %v27583_v9 = vld [vmem:[#allocation137_spill] sm:$0xff]  ;;  %v27584_v35 = vld [vmem:[#allocation136_spill] sm:$0xff] }
0x22c7   :  { %20694 = vmatprep.subr.bf16.mxu1 %v27574_v23  ;;  %20666 = vmatprep.subr.bf16.mxu0 %v27575_v22  ;;  %v27585_v23 = vld [vmem:[#allocation139_spill] sm:$0xff]  ;;  %v27586_v22 = vld [vmem:[#allocation138_spill] sm:$0xff] }
0x22ca   :  { %20696 = vmatpush3.bf16.msra.mxu1 %v27576_v42  ;;  %20668 = vmatpush3.bf16.msra.mxu0 %v27577_v56  ;;  %v27587_v42 = vld [vmem:[#allocation141_spill] sm:$0xff]  ;;  %v27588_v56 = vld [vmem:[#allocation140_spill] sm:$0xff] }
0x22cb   :  { %20698 = vmatprep.subr.bf16.mxu1 %v27578_v43  ;;  %20670 = vmatprep.subr.bf16.mxu0 %v27579_v16  ;;  %v27589_v43 = vld [vmem:[#allocation142_spill] sm:$0xff] }
0x22ce   :  { %20700 = vmatpush3.bf16.msra.mxu1 %v27580_v25  ;;  %20672 = vmatpush3.bf16.msra.mxu0 %v27581_v59 }
0x22cf   :  { %20702 = vmatprep.subr.bf16.mxu1 %v27582_v32  ;;  %20674 = vmatprep.subr.bf16.mxu0 %v27583_v9 }
0x22d2   :  { %20704 = vmatpush3.bf16.msra.mxu1 %v27584_v35  ;;  %20676 = vmatpush3.bf16.msra.mxu0 %v27585_v23 }
0x22d3   :  { %20706 = vmatprep.subr.bf16.mxu1 %v27586_v22  ;;  %20710 = vmatprep.subr.bf16.mxu0 %v27587_v42  ;;  %v27590_v42 = vld [vmem:[#allocation143_spill] sm:$0xff]  ;;  %v27593_v22 = vld [vmem:[#allocation146_spill] sm:$0xff] }
0x22d6   :  { %20708 = vmatpush3.bf16.msra.mxu1 %v27588_v56  ;;  %v27591_v56 = vld [vmem:[#allocation144_spill] sm:$0xff] }
0x22d7   :  { %20742 = vmatprep.subr.bf16.mxu1 %v27589_v43  ;;  %v27592_v43 = vld [vmem:[#allocation145_spill] sm:$0xff] }
0x237c   :  { %v9791_v16 = vpop.f32.mrb[100].mxu1  ;;  %v9862_v25 = vpop.f32.mrb[98].mxu0 }
0x237d   :  { %v9793_v31 = vpop.f32.mrb[101].mxu1  ;;  %v9864_v59 = vpop.f32.mrb[99].mxu0  ;;  %v10009_v35 = vmul.f32 %v25183_v34, %v9791_v16  ;;  %v10011_v23 = vmul.f32 %v25187_v46, %v9862_v25  ;;  %v27594_v16 = vld [vmem:[#allocation147_spill] sm:$0xff]  ;;  %v27595_v25 = vld [vmem:[#allocation148_spill] sm:$0xff] }
0x237e   :  { %v10010_v32 = vmul.f32 %v25185_v19, %v9793_v31  ;;  %v10012_v9 = vmul.f32 %v25190_v62, %v9864_v59  ;;  %v27596_v59 = vld [vmem:[#allocation149_spill] sm:$0xff] }
0x2380   :  { %10245 = vmatprep.mubr.f32.mxu0 %v10010_v32  ;;  %10315 = vmatprep.mubr.f32.mxu1 %v10012_v9  ;;  %v27597_v32 = vld [vmem:[#allocation150_spill] sm:$0xff] }
0x2381   :  { %10246 = vmatmul.mubr.f32.vlgmr.msra.gmra.mrb[104].mxu0 %v10009_v35  ;;  %10316 = vmatmul.mubr.f32.vlgmr.msra.gmra.mrb[106].mxu1 %v10011_v23  ;;  %v27598_v23 = vld [vmem:[#allocation151_spill] sm:$0xff] }
0x2382   :  { %20712 = vmatpush3.bf16.msra.mxu0 %v27590_v42  ;;  %20744 = vmatpush3.bf16.msra.mxu1 %v27591_v56 }
0x2383   :  { %20714 = vmatprep.subr.bf16.mxu0 %v27592_v43  ;;  %20746 = vmatprep.subr.bf16.mxu1 %v27593_v22  ;;  %v27599_v22 = vld [vmem:[#allocation152_spill] sm:$0xff]  ;;  %v27600_v43 = vld [vmem:[#allocation153_spill] sm:$0xff] }
0x2384   :  { %v9933_v17 = vpop.f32.mrb[102].mxu1  ;;  %v10004_v19 = vpop.f32.mrb[100].mxu0 }
0x2385   :  { %v9935_v31 = vpop.f32.mrb[103].mxu1  ;;  %v10006_v62 = vpop.f32.mrb[101].mxu0 }
0x2386   :  { %v10014_v34 = vmul.f32 %v25195_v30, %v9935_v31  ;;  %v10016_v46 = vmul.f32 %v25201_v33, %v10006_v62  ;;  %20716 = vmatpush3.bf16.msra.mxu0 %v27594_v16  ;;  %20748 = vmatpush3.bf16.msra.mxu1 %v27595_v25  ;;  %v27601_v30 = vld [vmem:[#allocation154_spill] sm:$0xff]  ;;  %v27602_v25 = vld [vmem:[#allocation155_spill] sm:$0xff] }
0x2387   :  { %20718 = vmatprep.subr.bf16.mxu0 %v27596_v59  ;;  %20750 = vmatprep.subr.bf16.mxu1 %v27597_v32  ;;  %v27603_v59 = vld [vmem:[#allocation156_spill] sm:$0xff]  ;;  %v27604_v32 = vld [vmem:[#allocation174_spill] sm:$0xff] }
0x2388   :  { %10385 = vmatprep.mubr.f32.mxu0 %v10014_v34  ;;  %10455 = vmatprep.mubr.f32.mxu1 %v10016_v46  ;;  %v10153_v9 = vpop.f32.mrb[102].mxu0  ;;  %v27605_v46 = vld [vmem:[#allocation157_spill] sm:$0xff] }
0x2389   :  { %v18568_v35 = vpop.f32.mrb[103].mxu0 }
0x238a   :  { %20720 = vmatpush3.bf16.msra.mxu0 %v27598_v23  ;;  %20752 = vmatpush3.bf16.msra.mxu1 %v27599_v22  ;;  %v27606_v35 = vld [vmem:[#allocation158_spill] sm:$0xff] }
0x238b   :  { %20722 = vmatprep.subr.bf16.mxu0 %v27600_v43  ;;  %20754 = vmatprep.subr.bf16.mxu1 %v27601_v30  ;;  %v27607_v43 = vld [vmem:[#allocation160_spill] sm:$0xff]  ;;  %v27608_v30 = vld [vmem:[#allocation161_spill] sm:$0xff] }
0x238c   :  { %v10083_v33 = vpop.f32.mrb[104].mxu1 }
0x238d   :  { %v10154_v31 = vadd.f32 %v10153_v9, %v10083_v33  ;;  %v18563_v62 = vpop.f32.mrb[105].mxu1  ;;  %v27609_v9 = vld [vmem:[#allocation162_spill] sm:$0xff]  ;;  %v27610_v33 = vld [vmem:[#allocation163_spill] sm:$0xff] }
0x238e   :  { %20724 = vmatpush3.bf16.msra.mxu0 %v27602_v25  ;;  %20756 = vmatpush3.bf16.msra.mxu1 %v27603_v59  ;;  %v27611_v62 = vld [vmem:[#allocation164_spill] sm:$0xff]  ;;  %v27616_v59 = vld [vmem:[#allocation169_spill] sm:$0xff] }
0x238f   :  { %v25339_v34 = vadd.f32 %v27604_v32, %v10154_v31  ;;  %20726 = vmatprep.subr.bf16.mxu0 %v27605_v46  ;;  %20758 = vmatprep.subr.bf16.mxu1 %v27606_v35  ;;  %v27612_v32 = vld [vmem:[#allocation165_spill] sm:$0xff]  ;;  %v27613_v31 = vld [vmem:[#allocation166_spill] sm:$0xff]  ;;  %v27614_v46 = vld [vmem:[#allocation167_spill] sm:$0xff] }
0x2390   :  { %v27615_v35 = vld [vmem:[#allocation168_spill] sm:$0xff] }
0x2391   :  { %v10158_v22 = vsel %vm1822_vm6, %v25339_v34, -inf }
0x2392   :  { %20728 = vmatpush3.bf16.msra.mxu0 %v27607_v43  ;;  %20760 = vmatpush3.bf16.msra.mxu1 %v27608_v30  ;;  %v27617_v43 = vld [vmem:[#allocation170_spill] sm:$0xff]  ;;  %v27618_v30 = vld [vmem:[#allocation171_spill] sm:$0xff] }
0x2393   :  { %10159 = vmax.xlane.f32.xlu0 %v10158_v22  ;;  %20730 = vmatprep.subr.bf16.mxu0 %v27609_v9  ;;  %v27619_v22 = vld [vmem:[#allocation172_spill] sm:$0xff]  ;;  %v27620_v9 = vld [vmem:[#allocation173_spill] sm:$0xff] }
0x2394   :  { %20762 = vmatprep.subr.bf16.mxu1 %v27610_v33  ;;  %v27621_v33 = vld [vmem:[#allocation3_spill] sm:$0xff] }
0x2396   :  { %20732 = vmatpush3.bf16.msra.mxu0 %v27611_v62  ;;  %20764 = vmatpush3.bf16.msra.mxu1 %v27612_v32  ;;  %v10013_v62 = vmul.f32 %v25233_v5, %v9933_v17  ;;  %v10015_v32 = vmul.f32 %v25238_v41, %v10004_v19  ;;  %v27627_v5 = vld [vmem:[#allocation9_spill] sm:$0xff]  ;;  %v27628_v41 = vld [vmem:[#allocation10_spill] sm:$0xff]  ;;  %v27629_v17 = vld [vmem:[#allocation11_spill] sm:$0xff] }
0x2397   :  { %20734 = vmatprep.subr.bf16.mxu0 %v27613_v31  ;;  %20766 = vmatprep.subr.bf16.mxu1 %v27614_v46  ;;  %v27622_v31 = vld [vmem:[#allocation4_spill] sm:$0xff] }
0x2398   :  { %v27630_v19 = vld [vmem:[#allocation12_spill] sm:$0xff] }
0x239a   :  { %20736 = vmatpush3.bf16.msra.mxu0 %v27615_v35  ;;  %20768 = vmatpush3.bf16.msra.mxu1 %v27616_v59  ;;  %v27623_v35 = vld [vmem:[#allocation5_spill] sm:$0xff]  ;;  %v27624_v59 = vld [vmem:[#allocation6_spill] sm:$0xff] }
0x239b   :  { %20738 = vmatprep.subr.bf16.mxu0 %v27617_v43  ;;  %20770 = vmatprep.subr.bf16.mxu1 %v27618_v30  ;;  %v27625_v43 = vld [vmem:[#allocation7_spill] sm:$0xff]  ;;  %v27626_v30 = vld [vmem:[#allocation8_spill] sm:$0xff] }
0x239e   :  { %20740 = vmatpush3.bf16.msra.mxu0 %v27619_v22  ;;  %20772 = vmatpush3.bf16.msra.mxu1 %v27620_v9 }
0x239f   :  { %20774 = vmatprep.subr.bf16.mxu0 %v27621_v33  ;;  %20782 = vmatprep.subr.bf16.mxu1 %v27622_v31 }
0x23a1   :  { %10386 = vmatmul.mubr.f32.vlgmr.msra.gmra.mrb[106].mxu0 %v10013_v62  ;;  %10456 = vmatmul.mubr.f32.vlgmr.msra.gmra.mrb[108].mxu1 %v10015_v32 }
0x23a2   :  { %20776 = vmatpush1.bf16.msra.mxu0 %v27623_v35  ;;  %20784 = vmatpush1.bf16.msra.mxu1 %v27624_v59 }
0x23a3   :  { %20778 = vmatprep.subr.bf16.mxu0 %v27625_v43  ;;  %20786 = vmatprep.subr.bf16.mxu1 %v27626_v30 }
0x23a4   :  { %10551 = vmatprep.mubr.f32.mxu0 %v26823_v40  ;;  %10622 = vmatprep.mubr.f32.mxu1 %v26823_v40 }
0x23a6   :  { %20780 = vmatpush1.bf16.msra.mxu0 %v27627_v5  ;;  %20788 = vmatpush1.bf16.msra.mxu1 %v27628_v41 }
0x23a7   :  { %20790 = vmatprep.subr.bf16.mxu0 %v27629_v17  ;;  %20798 = vmatprep.subr.bf16.mxu1 %v27630_v19 }
0x2420   :  { %v10160_v62 = vpop.xlane.xlu0 %10159 }
0x2421   :  { %v10161_v32 = vsub.f32 %v25339_v34, %v10160_v62 }
0x2423   :  { %v10162_v59 = vmul.f32 1.442695, %v10161_v32  ;;  %v10178_v32 = vpop.permute.xlu1 %10177 }
0x2425   :  { %21754 = vpow2.f32 %v10162_v59 }
0x242f   :  { %v21755_v43 = vpop.eup %21754 }
0x2430   :  { %v10164_v30 = vsel %vm1822_vm6, %v21755_v43, 0.0 }
0x2431   :  { %10165 = vadd.xlane.f32.xlu0 %v10164_v30 }
0x2454   :  { %v17695_v35 = vpop.f32.mrb[104].mxu0  ;;  %v17730_v31 = vpop.f32.mrb[106].mxu1 }
0x2455   :  { %v17696_v33 = vpop.f32.mrb[105].mxu0  ;;  %v17731_v9 = vpop.f32.mrb[107].mxu1 }
0x2456   :  { %v17697_v5 = vadd.f32 %v17696_v33, %v17695_v35  ;;  %v17732_v22 = vadd.f32 %v17731_v9, %v17730_v31  ;;  %v15973_v35 = vmul.f32 -1.442695, %v25339_v34 }
0x2474   :  { %v17765_v41 = vpop.f32.mrb[106].mxu0  ;;  %v17800_v46 = vpop.f32.mrb[108].mxu1 }
0x2475   :  { %v17766_v17 = vpop.f32.mrb[107].mxu0  ;;  %v17801_v25 = vpop.f32.mrb[109].mxu1 }
0x2476   :  { %v17767_v19 = vadd.f32 %v17766_v17, %v17765_v41  ;;  %v17802_v23 = vadd.f32 %v17801_v25, %v17800_v46  ;;  %v27635_v41 = vld [vmem:[#allocation16_spill] sm:$0xff]  ;;  %v27636_v17 = vld [vmem:[#allocation17_spill] sm:$0xff] }
0x24be   :  { %v10166_v16 = vpop.xlane.xlu0 %10165 }
0x24bf   :  { %21756 = vrcp.f32 %v10166_v16 }
0x24c0   :  { %21758 = vpow2.f32 %v15973_v35  ;;  %v25412_v35 = vld [vmem:[%s26317_s1 + $0xc] sm:$0x3] }
0x24c1   :  { %27642 = vst [vmem:[#allocation64_spill] sm:$0xff] %v25412_v35 }
0x24c9   :  { %v21757_v62 = vpop.eup %21756 }
0x24ca   :  { %v10168_v59 = vmul.f32 %v21757_v62, %v21755_v43  ;;  %v21759_v9 = vpop.eup %21758  ;;  %v27638_v62 = vld [vmem:[#allocation67_spill] sm:$0xff] }
0x24cb   :  { %v10172_v33 = vadd.f32 1.0, %v21759_v9  ;;  %v27643_v9 = vld [vmem:[#allocation70_spill] sm:$0xff] }
0x24cc   :  { %v10180_v56 = vmul.f32 %v10178_v32, %v10168_v59  ;;  %v27639_v59 = vld [vmem:[#allocation68_spill] sm:$0xff]  ;;  %v27640_v32 = vld [vmem:[#allocation69_spill] sm:$0xff] }
0x24cd   :  { %21760 = vrcp.f32 %v10172_v33  ;;  %v27644_v33 = vld [vmem:[#allocation71_spill] sm:$0xff] }
0x24ce   :  { %v10248_v42 = vadd.f32 %v17697_v5, %v10180_v56  ;;  %v27634_v5 = vld [vmem:[#allocation15_spill] sm:$0xff] }
0x24d0   :  { %v10318_v30 = vadd.f32 %v17732_v22, %v10248_v42  ;;  %v27633_v22 = vld [vmem:[#allocation14_spill] sm:$0xff] }
0x24d2   :  { %v10388_v21 = vadd.f32 %v17767_v19, %v10318_v30  ;;  %v27637_v19 = vld [vmem:[#allocation18_spill] sm:$0xff]  ;;  %v27641_v30 = vld [vmem:[#allocation61_spill] sm:$0xff] }
0x24d4   :  { %v10458_v47 = vadd.f32 %v17802_v23, %v10388_v21 }
0x24d6   :  { %10462 = vrot.lane.b32.xlu0 %v10458_v47, %s21925_s10 }
0x24d7   :  { %v21761_v31 = vpop.eup %21760 }
0x2548   :  { %v10463_v25 = vpop.permute.xlu0 %10462 }
0x2549   :  { %v10465_v46 = vmul.f32 %v21761_v31, %v10463_v25  ;;  %v27645_v31 = vld [vmem:[#allocation72_spill] sm:$0xff]  ;;  %v27646_v25 = vld [vmem:[#allocation73_spill] sm:$0xff] }
0x254b   :  { %10467 = vrot.lane.b32.xlu1 %v10465_v46, %s21926_s4  ;;  %v27647_v46 = vld [vmem:[#allocation19_spill] sm:$0xff] }
0x25bd   :  { %v10468_v43 = vpop.permute.xlu1 %10467 }
0x25be   :  { %v25378_v16 = vsub.f32 %v10458_v47, %v10468_v43  ;;  %v27632_v47 = vld [vmem:[#allocation13_spill] sm:$0xff]  ;;  %v27648_v43 = vld [vmem:[#allocation20_spill] sm:$0xff] }
0x25c0   :  { %v10477_v56 = vsel %vm1822_vm6, %v25378_v16, 0.0 }
0x25c1   :  { %10478 = vadd.xlane.f32.xlu1 %v10477_v56  ;;  %v27649_v56 = vld [vmem:[#allocation21_spill] sm:$0xff] }
0x264e   :  { %v10479_v21 = vpop.xlane.xlu1 %10478 }
0x264f   :  { %vm10480_vm12 = vcmp.eq.f32.partialorder %v10479_v21, 0.0 }
0x2650   :  { %v10481_v42 = vsel %vm10480_vm12, 1.0, %v10479_v21  ;;  %v27650_v21 = vld [vmem:[#allocation22_spill] sm:$0xff] }
0x2651   :  { %21762 = vrcp.f32 %v10481_v42  ;;  %v27651_v42 = vld [vmem:[#allocation23_spill] sm:$0xff] }
0x265b   :  { %v21763_v23 = vpop.eup %21762 }
0x265c   :  { %v25383_v34 = vmul.f32 %v21763_v23, %v25378_v16  ;;  %v27652_v23 = vld [vmem:[#allocation24_spill] sm:$0xff] }
0x265e   :  { %27631 = vst [vmem:[#allocation63_spill] sm:$0xff] %v25383_v34  ;;  %15976 = vmatmul.mubr.msk.f32.vlgmr.msra.gmra.mrb[108].mxu0 %vm403_vm1, %v25383_v34  ;;  %15977 = vmatmul.mubr.msk.f32.vlgmr.msra.gmra.mrb[110].mxu1 %vm403_vm1, %v25383_v34 }
0x265f   :  { %20792 = vmatpush1.bf16.msra.mxu0 %v27632_v47  ;;  %20800 = vmatpush1.bf16.msra.mxu1 %v27633_v22 }
0x2660   :  { %20794 = vmatprep.subr.bf16.mxu0 %v27634_v5  ;;  %20802 = vmatprep.subr.bf16.mxu1 %v27635_v41  ;;  %v27685_v5 = vld [vmem:[#allocation38_spill] sm:$0xff] }
0x2661   :  { %10693 = vmatprep.mubr.f32.mxu0 %v26823_v40  ;;  %10764 = vmatprep.mubr.f32.mxu1 %v26823_v40 }
0x2663   :  { %20796 = vmatpush1.bf16.msra.mxu0 %v27636_v17  ;;  %20804 = vmatpush1.bf16.msra.mxu1 %v27637_v19  ;;  %v27683_v19 = vld [vmem:[#allocation39_spill] sm:$0xff]  ;;  %v27684_v17 = vld [vmem:[#allocation42_spill] sm:$0xff] }
0x2664   :  { %15980 = vmatprep.subr.msk.mxu0 %vm695_vm2, %v27638_v62  ;;  %15983 = vmatprep.subr.msk.mxu1 %vm695_vm2, %v27639_v59  ;;  %v27653_v62 = vld [vmem:[#allocation25_spill] sm:$0xff]  ;;  %v27654_v59 = vld [vmem:[#allocation26_spill] sm:$0xff] }
0x2666   :  { %15978 = vmatmul.mubr.msk.f32.vlgmr.msra.gmra.mrb[110].mxu0 %vm403_vm1, %v25383_v34  ;;  %15979 = vmatmul.mubr.msk.f32.vlgmr.msra.gmra.mrb[112].mxu1 %vm403_vm1, %v25383_v34 }
0x2667   :  { %15981 = vmatpush1.msk.msra.mxu0 %vm695_vm2, %v27640_v32  ;;  %15984 = vmatpush1.msk.msra.mxu1 %vm695_vm2, %v27641_v30  ;;  %v27655_v32 = vld [vmem:[#allocation27_spill] sm:$0xff]  ;;  %v27656_v30 = vld [vmem:[#allocation28_spill] sm:$0xff] }
0x2668   :  { %10838 = vmatprep.mubr.f32.mxu0 %v26823_v40  ;;  %10909 = vmatprep.mubr.f32.mxu1 %v26823_v40 }
0x2669   :  { %15986 = vmatprep.subr.msk.mxu0 %vm695_vm2, %v27643_v9  ;;  %15989 = vmatprep.subr.msk.mxu1 %vm695_vm2, %v27644_v33  ;;  %v27657_v9 = vld [vmem:[#allocation29_spill] sm:$0xff]  ;;  %v27658_v33 = vld [vmem:[#allocation30_spill] sm:$0xff] }
0x266a   :  { %15982 = vmatmul.mubr.msk.f32.vlgmr.msra.gmra.mrb[108].mxu0 %vm691_vm3, %v25412_v35  ;;  %15985 = vmatmul.mubr.msk.f32.vlgmr.msra.gmra.mrb[110].mxu1 %vm691_vm3, %v25412_v35 }
0x266b   :  { %15987 = vmatpush1.msk.msra.mxu0 %vm695_vm2, %v27645_v31  ;;  %15990 = vmatpush1.msk.msra.mxu1 %vm695_vm2, %v27646_v25  ;;  %v27659_v31 = vld [vmem:[#allocation31_spill] sm:$0xff]  ;;  %v27660_v25 = vld [vmem:[#allocation32_spill] sm:$0xff] }
0x266c   :  { %10980 = vmatprep.mubr.f32.mxu0 %v26823_v40  ;;  %11051 = vmatprep.mubr.f32.mxu1 %v26823_v40 }
0x266d   :  { %20806 = vmatprep.subr.bf16.mxu0 %v27647_v46  ;;  %20838 = vmatprep.subr.bf16.mxu1 %v27648_v43  ;;  %v27681_v43 = vld [vmem:[#allocation37_spill] sm:$0xff] }
0x266e   :  { %15988 = vmatmul.mubr.msk.f32.vlgmr.msra.gmra.mrb[110].mxu0 %vm691_vm3, %v25412_v35  ;;  %15991 = vmatmul.mubr.msk.f32.vlgmr.msra.gmra.mrb[112].mxu1 %vm691_vm3, %v25412_v35  ;;  %v27682_v46 = vld [vmem:[#allocation41_spill] sm:$0xff] }
0x266f   :  { %20808 = vmatpush3.bf16.msra.mxu0 %v27649_v56  ;;  %20840 = vmatpush3.bf16.msra.mxu1 %v27650_v21  ;;  %v27661_v21 = vld [vmem:[#allocation33_spill] sm:$0xff] }
0x2670   :  { %20810 = vmatprep.subr.bf16.mxu0 %v27651_v42  ;;  %20842 = vmatprep.subr.bf16.mxu1 %v27652_v23  ;;  %v27662_v42 = vld [vmem:[#allocation34_spill] sm:$0xff]  ;;  %v27663_v23 = vld [vmem:[#allocation35_spill] sm:$0xff] }
0x2673   :  { %20812 = vmatpush3.bf16.msra.mxu0 %v27653_v62  ;;  %20844 = vmatpush3.bf16.msra.mxu1 %v27654_v59  ;;  %v27664_v62 = vld [vmem:[#allocation36_spill] sm:$0xff]  ;;  %v27665_v59 = vld [vmem:[#allocation45_spill] sm:$0xff] }
0x2674   :  { %20814 = vmatprep.subr.bf16.mxu0 %v27655_v32  ;;  %20846 = vmatprep.subr.bf16.mxu1 %v27656_v30  ;;  %v27666_v32 = vld [vmem:[#allocation46_spill] sm:$0xff]  ;;  %v27667_v30 = vld [vmem:[#allocation47_spill] sm:$0xff] }
0x2677   :  { %20816 = vmatpush3.bf16.msra.mxu0 %v27657_v9  ;;  %20848 = vmatpush3.bf16.msra.mxu1 %v27658_v33  ;;  %v27668_v9 = vld [vmem:[#allocation48_spill] sm:$0xff]  ;;  %v27669_v33 = vld [vmem:[#allocation49_spill] sm:$0xff] }
0x2678   :  { %20818 = vmatprep.subr.bf16.mxu0 %v27659_v31  ;;  %20850 = vmatprep.subr.bf16.mxu1 %v27660_v25  ;;  %v27670_v31 = vld [vmem:[#allocation50_spill] sm:$0xff]  ;;  %v27671_v25 = vld [vmem:[#allocation51_spill] sm:$0xff] }
0x267b   :  { %20820 = vmatpush3.bf16.msra.mxu0 %v27661_v21  ;;  %20852 = vmatpush3.bf16.msra.mxu1 %v27662_v42  ;;  %v27672_v21 = vld [vmem:[#allocation52_spill] sm:$0xff]  ;;  %v27673_v42 = vld [vmem:[#allocation53_spill] sm:$0xff] }
0x267c   :  { %20822 = vmatprep.subr.bf16.mxu0 %v27663_v23  ;;  %20854 = vmatprep.subr.bf16.mxu1 %v27664_v62  ;;  %v27674_v23 = vld [vmem:[#allocation54_spill] sm:$0xff]  ;;  %v27675_v62 = vld [vmem:[#allocation55_spill] sm:$0xff] }
0x267f   :  { %20824 = vmatpush3.bf16.msra.mxu0 %v27665_v59  ;;  %20856 = vmatpush3.bf16.msra.mxu1 %v27666_v32  ;;  %v27676_v59 = vld [vmem:[#allocation56_spill] sm:$0xff]  ;;  %v27677_v32 = vld [vmem:[#allocation57_spill] sm:$0xff] }
0x2680   :  { %20826 = vmatprep.subr.bf16.mxu0 %v27667_v30  ;;  %20858 = vmatprep.subr.bf16.mxu1 %v27668_v9  ;;  %v27678_v30 = vld [vmem:[#allocation58_spill] sm:$0xff]  ;;  %v27679_v9 = vld [vmem:[#allocation59_spill] sm:$0xff] }
0x2683   :  { %20828 = vmatpush3.bf16.msra.mxu0 %v27669_v33  ;;  %20860 = vmatpush3.bf16.msra.mxu1 %v27670_v31  ;;  %v27680_v33 = vld [vmem:[#allocation60_spill] sm:$0xff] }
0x2684   :  { %20830 = vmatprep.subr.bf16.mxu0 %v27671_v25  ;;  %20862 = vmatprep.subr.bf16.mxu1 %v27672_v21 }
0x2687   :  { %20832 = vmatpush3.bf16.msra.mxu0 %v27673_v42  ;;  %20864 = vmatpush3.bf16.msra.mxu1 %v27674_v23 }
0x2688   :  { %20834 = vmatprep.subr.bf16.mxu0 %v27675_v62  ;;  %20866 = vmatprep.subr.bf16.mxu1 %v27676_v59 }
0x268b   :  { %20836 = vmatpush3.bf16.msra.mxu0 %v27677_v32  ;;  %20868 = vmatpush3.bf16.msra.mxu1 %v27678_v30 }
0x268c   :  { %20870 = vmatprep.subr.bf16.mxu0 %v27679_v9  ;;  %20902 = vmatprep.subr.bf16.mxu1 %v27680_v33  ;;  %v27686_v9 = vld [vmem:[#allocation43_spill] sm:$0xff] }
0x273d   :  { %v10840_v31 = vpop.f32.mrb[108].mxu0  ;;  %v10911_v25 = vpop.f32.mrb[110].mxu1 }
0x273e   :  { %v10842_v56 = vpop.f32.mrb[109].mxu0  ;;  %v10913_v21 = vpop.f32.mrb[111].mxu1  ;;  %v11058_v42 = vadd.f32 %v10840_v31, %v27681_v43  ;;  %v11060_v23 = vadd.f32 %v10911_v25, %v27682_v46  ;;  %v27687_v43 = vld [vmem:[#allocation40_spill] sm:$0xff] }
0x273f   :  { %v11059_v62 = vadd.f32 %v10842_v56, %v27683_v19  ;;  %v11061_v59 = vadd.f32 %v10913_v21, %v27684_v17  ;;  %v27688_v46 = vld [vmem:[#allocation44_spill] sm:$0xff] }
0x2740   :  { %v11066_v7 = vsel %vm1053_vm4, %v11058_v42, -inf  ;;  %v11068_v31 = vsel %vm1053_vm4, %v11060_v23, -inf }
0x2741   :  { %v10982_v41 = vpop.f32.mrb[110].mxu0  ;;  %v11053_v32 = vpop.f32.mrb[112].mxu1  ;;  %v11067_v21 = vsel %vm1053_vm4, %v11059_v62, -inf  ;;  %v11069_v17 = vsel %vm1053_vm4, %v11061_v59, -inf }
0x2742   :  { %v25473_v30 = vadd.f32 %v10982_v41, %v27685_v5  ;;  %v25476_v22 = vadd.f32 %v11053_v32, %v27686_v9  ;;  %v10984_v33 = vpop.f32.mrb[111].mxu0  ;;  %v11055_v47 = vpop.f32.mrb[113].mxu1 }
0x2743   :  { %v11063_v25 = vadd.f32 %v10984_v33, %v27687_v43  ;;  %v11065_v56 = vadd.f32 %v11055_v47, %v27688_v46 }
0x2744   :  { %v11070_v41 = vsel %vm1053_vm4, %v25473_v30, -inf  ;;  %v11074_v32 = vsel %vm1053_vm4, %v25476_v22, -inf }
0x2745   :  { %v11071_v9 = vmax.f32 %v11066_v7, %v11070_v41  ;;  %v11075_v5 = vmax.f32 %v11068_v31, %v11074_v32  ;;  %v11072_v19 = vsel %vm1053_vm4, %v11063_v25, -inf  ;;  %v11076_v1 = vsel %vm1053_vm4, %v11065_v56, -inf }
0x2746   :  { %v11073_v34 = vmax.f32 %v11067_v21, %v11072_v19  ;;  %v11077_v33 = vmax.f32 %v11069_v17, %v11076_v1  ;;  %v27700_v21 = vld [vmem:[#allocation94_spill] sm:$0xff] }
0x2748   :  { %v11078_v43 = vmax.f32 %v11071_v9, %v11073_v34  ;;  %v11079_v47 = vmax.f32 %v11075_v5, %v11077_v33  ;;  %v27701_v33 = vld [vmem:[#allocation96_spill] sm:$0xff] }
0x274a   :  { %v11080_v46 = vmax.f32 %v11078_v43, %v11079_v47  ;;  %v27693_v43 = vld [vmem:[#allocation88_spill] sm:$0xff]  ;;  %v27702_v47 = vld [vmem:[#allocation97_spill] sm:$0xff] }
0x274c   :  { %11081 = vmax.xlane.f32.xlu0 %v11080_v46  ;;  %v27692_v46 = vld [vmem:[#allocation87_spill] sm:$0xff] }
0x27d9   :  { %v11082_v50 = vpop.xlane.xlu0 %11081 }
0x27da   :  { %v11083_v3 = vsub.f32 %v11058_v42, %v11082_v50  ;;  %v11084_v8 = vsub.f32 %v11059_v62, %v11082_v50  ;;  %v11085_v53 = vsub.f32 %v11060_v23, %v11082_v50  ;;  %v11086_v35 = vsub.f32 %v11061_v59, %v11082_v50  ;;  %v27694_v42 = vld [vmem:[#allocation89_spill] sm:$0xff]  ;;  %v27695_v23 = vld [vmem:[#allocation91_spill] sm:$0xff]  ;;  %v27696_v59 = vld [vmem:[#allocation90_spill] sm:$0xff] }
0x27db   :  { %v11088_v4 = vsub.f32 %v11063_v25, %v11082_v50  ;;  %v11090_v31 = vsub.f32 %v11065_v56, %v11082_v50  ;;  %v27698_v25 = vld [vmem:[#allocation93_spill] sm:$0xff]  ;;  %v27699_v56 = vld [vmem:[#allocation95_spill] sm:$0xff] }
0x27dc   :  { %v11091_v20 = vmul.f32 1.442695, %v11083_v3  ;;  %v11093_v61 = vmul.f32 1.442695, %v11084_v8  ;;  %v11095_v7 = vmul.f32 1.442695, %v11085_v53  ;;  %v11087_v53 = vsub.f32 %v25473_v30, %v11082_v50 }
0x27dd   :  { %v11097_v41 = vmul.f32 1.442695, %v11086_v35  ;;  %v11101_v32 = vmul.f32 1.442695, %v11088_v4  ;;  %v11105_v1 = vmul.f32 1.442695, %v11090_v31  ;;  %v11089_v3 = vsub.f32 %v25476_v22, %v11082_v50 }
0x27de   :  { %21764 = vpow2.f32 %v11091_v20  ;;  %v11099_v20 = vmul.f32 1.442695, %v11087_v53  ;;  %v27689_v50 = vld [vmem:[#allocation84_spill] sm:$0xff]  ;;  %v27690_v22 = vld [vmem:[#allocation85_spill] sm:$0xff]  ;;  %v27691_v35 = vld [vmem:[#allocation86_spill] sm:$0xff] }
0x27df   :  { %21766 = vpow2.f32 %v11093_v61  ;;  %v11103_v19 = vmul.f32 1.442695, %v11089_v3  ;;  %v27697_v30 = vld [vmem:[#allocation92_spill] sm:$0xff]  ;;  %v27704_v31 = vld [vmem:[#allocation98_spill] sm:$0xff] }
0x27e0   :  { %21768 = vpow2.f32 %v11095_v7  ;;  %v27703_v7 = vld [vmem:[#allocation99_spill] sm:$0xff] }
0x27e1   :  { %21770 = vpow2.f32 %v11097_v41 }
0x27e2   :  { %21772 = vpow2.f32 %v11101_v32 }
0x27e3   :  { %21774 = vpow2.f32 %v11105_v1 }
0x27e4   :  { %21776 = vpow2.f32 %v11099_v20 }
0x27e5   :  { %21778 = vpow2.f32 %v11103_v19 }
0x27e8   :  { %v25490_v34 = vpop.eup %21764 }
0x27e9   :  { %v25492_v5 = vpop.eup %21766 }
0x27ea   :  { %v25494_v17 = vpop.eup %21768  ;;  %11171 = vmatprep.mubr.f32.mxu0 %v25492_v5 }
0x27eb   :  { %v25497_v8 = vpop.eup %21770  ;;  %11172 = vmatmul.mubr.f32.vlgmr.msra.gmra.mrb[112].mxu0 %v25490_v34 }
0x27ec   :  { %11241 = vmatprep.mubr.f32.mxu1 %v25497_v8  ;;  %20872 = vmatpush3.bf16.msra.mxu0 %v26933_v2  ;;  %v25502_v61 = vpop.eup %21772 }
0x27ed   :  { %11242 = vmatmul.mubr.f32.vlgmr.msra.gmra.mrb[114].mxu1 %v25494_v17  ;;  %20874 = vmatprep.subr.bf16.mxu0 %v26934_v10  ;;  %v25508_v4 = vpop.eup %21774 }
0x27ee   :  { %20904 = vmatpush3.bf16.msra.mxu1 %v26935_v15  ;;  %11311 = vmatprep.mubr.f32.mxu0 %v25502_v61  ;;  %v25540_v62 = vpop.eup %21776 }
0x27ef   :  { %20906 = vmatprep.subr.bf16.mxu1 %v26936_v11  ;;  %11381 = vmatprep.mubr.f32.mxu1 %v25508_v4  ;;  %v25545_v9 = vpop.eup %21778 }
0x27f0   :  { %20876 = vmatpush3.bf16.msra.mxu0 %v26937_v13 }
0x27f1   :  { %20878 = vmatprep.subr.bf16.mxu0 %v27085_v54 }
0x27f2   :  { %20908 = vmatpush3.bf16.msra.mxu1 %v27086_v36 }
0x27f3   :  { %20910 = vmatprep.subr.bf16.mxu1 %v27087_v55 }
0x27f4   :  { %20880 = vmatpush3.bf16.msra.mxu0 %v27088_v28 }
0x27f5   :  { %20882 = vmatprep.subr.bf16.mxu0 %v27235_v51 }
0x27f6   :  { %20912 = vmatpush3.bf16.msra.mxu1 %v27236_v6 }
0x27f7   :  { %20914 = vmatprep.subr.bf16.mxu1 %v27237_v18 }
0x27f8   :  { %20884 = vmatpush3.bf16.msra.mxu0 %v27238_v45 }
0x27f9   :  { %20886 = vmatprep.subr.bf16.mxu0 %v27384_v44 }
0x27fa   :  { %20916 = vmatpush3.bf16.msra.mxu1 %v27385_v37 }
0x27fb   :  { %20918 = vmatprep.subr.bf16.mxu1 %v27386_v38 }
0x27fc   :  { %20888 = vmatpush3.bf16.msra.mxu0 %v27387_v57 }
0x27fd   :  { %20890 = vmatprep.subr.bf16.mxu0 %v27388_v58 }
0x27fe   :  { %20920 = vmatpush3.bf16.msra.mxu1 %v27389_v52 }
0x27ff   :  { %20922 = vmatprep.subr.bf16.mxu1 %v27537_v0 }
0x2800   :  { %20892 = vmatpush3.bf16.msra.mxu0 %v27538_v26 }
0x2801   :  { %20894 = vmatprep.subr.bf16.mxu0 %v27539_v49 }
0x2802   :  { %20924 = vmatpush3.bf16.msra.mxu1 %v27540_v27 }
0x2803   :  { %20926 = vmatprep.subr.bf16.mxu1 %v27689_v50 }
0x2804   :  { %20896 = vmatpush3.bf16.msra.mxu0 %v27690_v22 }
0x2805   :  { %20898 = vmatprep.subr.bf16.mxu0 %v27691_v35 }
0x2806   :  { %20928 = vmatpush3.bf16.msra.mxu1 %v27692_v46 }
0x2807   :  { %20930 = vmatprep.subr.bf16.mxu1 %v27693_v43 }
0x2808   :  { %20900 = vmatpush3.bf16.msra.mxu0 %v27694_v42 }
0x2809   :  { %20934 = vmatprep.subr.bf16.mxu0 %v27695_v23 }
0x280a   :  { %20932 = vmatpush3.bf16.msra.mxu1 %v27696_v59 }
0x280b   :  { %11312 = vmatmul.mubr.f32.vlgmr.msra.gmra.mrb[114].mxu0 %v25540_v62  ;;  %20942 = vmatprep.subr.bf16.mxu1 %v27697_v30 }
0x280c   :  { %20936 = vmatpush1.bf16.msra.mxu0 %v27698_v25  ;;  %11456 = vmatprep.mubr.f32.mxu0 %v26823_v40 }
0x280d   :  { %11382 = vmatmul.mubr.f32.vlgmr.msra.gmra.mrb[116].mxu1 %v25545_v9  ;;  %20938 = vmatprep.subr.bf16.mxu0 %v27699_v56 }
0x280e   :  { %20944 = vmatpush1.bf16.msra.mxu1 %v27700_v21  ;;  %11527 = vmatprep.mubr.f32.mxu1 %v26823_v40 }
0x280f   :  { %20946 = vmatprep.subr.bf16.mxu1 %v27701_v33 }
0x2810   :  { %20940 = vmatpush1.bf16.msra.mxu0 %v27702_v47 }
0x2811   :  { %20950 = vmatprep.subr.bf16.mxu0 %v27703_v7 }
0x2812   :  { %20948 = vmatpush1.bf16.msra.mxu1 %v27704_v31 }
0x2813   :  { %20958 = vmatprep.subr.bf16.mxu1 %v26972_v60 }
0x28be   :  { %v17835_v41 = vpop.f32.mrb[112].mxu0 }
0x28bf   :  { %v17836_v32 = vpop.f32.mrb[113].mxu0 }
0x28c0   :  { %v17870_v1 = vpop.f32.mrb[114].mxu1  ;;  %v17837_v53 = vadd.f32 %v17836_v32, %v17835_v41  ;;  %v27716_v41 = vld [vmem:[#allocation115_spill] sm:$0xff]  ;;  %v27717_v32 = vld [vmem:[#allocation116_spill] sm:$0xff] }
0x28c1   :  { %v17871_v3 = vpop.f32.mrb[115].mxu1 }
0x28c2   :  { %v17872_v20 = vadd.f32 %v17871_v3, %v17870_v1  ;;  %v27718_v1 = vld [vmem:[#allocation117_spill] sm:$0xff]  ;;  %v27720_v3 = vld [vmem:[#allocation119_spill] sm:$0xff] }
0x28c4   :  { %v11244_v19 = vadd.f32 %v17872_v20, %v17837_v53  ;;  %v27719_v53 = vld [vmem:[#allocation118_spill] sm:$0xff]  ;;  %v27721_v20 = vld [vmem:[#allocation120_spill] sm:$0xff] }
0x28de   :  { %v17905_v21 = vpop.f32.mrb[114].mxu0 }
0x28df   :  { %v17906_v56 = vpop.f32.mrb[115].mxu0 }
0x28e0   :  { %v17940_v25 = vpop.f32.mrb[116].mxu1  ;;  %v17907_v30 = vadd.f32 %v17906_v56, %v17905_v21  ;;  %v27710_v56 = vld [vmem:[#allocation110_spill] sm:$0xff]  ;;  %v27711_v21 = vld [vmem:[#allocation111_spill] sm:$0xff] }
0x28e1   :  { %v17941_v33 = vpop.f32.mrb[117].mxu1 }
0x28e2   :  { %v11314_v59 = vadd.f32 %v17907_v30, %v11244_v19  ;;  %v17942_v47 = vadd.f32 %v17941_v33, %v17940_v25  ;;  %v27708_v30 = vld [vmem:[#allocation64_spill] sm:$0xff]  ;;  %v27709_v25 = vld [vmem:[#allocation109_spill] sm:$0xff] }
0x28e3   :  { %v27712_v33 = vld [vmem:[#allocation112_spill] sm:$0xff]  ;;  %v27722_v19 = vld [vmem:[#allocation121_spill] sm:$0xff] }
0x28e4   :  { %v11384_v23 = vadd.f32 %v17942_v47, %v11314_v59  ;;  %v27707_v59 = vld [vmem:[#allocation108_spill] sm:$0xff]  ;;  %v27713_v47 = vld [vmem:[#allocation63_spill] sm:$0xff] }
0x28e6   :  { %21780 = vrcp.f32 %v11384_v23  ;;  %v27706_v23 = vld [vmem:[#allocation62_spill] sm:$0xff] }
0x28f0   :  { %v21781_v7 = vpop.eup %21780 }
0x28f1   :  { %v11388_v31 = vmul.f32 %v21781_v7, %v25378_v16  ;;  %v27705_v16 = vld [vmem:[#allocation107_spill] sm:$0xff]  ;;  %v27714_v7 = vld [vmem:[#allocation113_spill] sm:$0xff] }
0x28f3   :  { %15992 = vmatmul.mubr.msk.f32.vlgmr.msra.gmra.mrb[116].mxu0 %vm403_vm1, %v11388_v31  ;;  %15993 = vmatmul.mubr.msk.f32.vlgmr.msra.gmra.mrb[118].mxu1 %vm403_vm1, %v11388_v31 }
0x28f4   :  { %20952 = vmatpush1.bf16.msra.mxu0 %v26973_v29  ;;  %20960 = vmatpush1.bf16.msra.mxu1 %v26974_v24 }
0x28f5   :  { %20954 = vmatprep.subr.bf16.mxu0 %v26975_v48  ;;  %20962 = vmatprep.subr.bf16.mxu1 %v26976_v39 }
0x28f6   :  { %11598 = vmatprep.mubr.f32.mxu0 %v26823_v40  ;;  %11669 = vmatprep.mubr.f32.mxu1 %v26823_v40 }
0x28f8   :  { %20956 = vmatpush1.bf16.msra.mxu0 %v26977_v14  ;;  %20964 = vmatpush1.bf16.msra.mxu1 %v26978_v63 }
0x28f9   :  { %20965 = vmatprep.subr.bf16.mxu0 %v26979_v12  ;;  %18580 = vmatprep.subr.mxu1 %v26823_v40 }
0x28fb   :  { %15994 = vmatmul.mubr.msk.f32.vlgmr.msra.gmra.mrb[118].mxu0 %vm403_vm1, %v11388_v31  ;;  %15995 = vmatmul.mubr.msk.f32.vlgmr.msra.gmra.mrb[120].mxu1 %vm403_vm1, %v11388_v31  ;;  %v27715_v31 = vld [vmem:[#allocation114_spill] sm:$0xff] }
0x28fc   :  { %20967 = vmatpush3.bf16.msra.mxu0 %v27705_v16  ;;  %18581 = vmatpush3.msk.msra.mxu1 %vm695_vm2, %v27706_v23  ;;  %v27723_v23 = vld [vmem:[#allocation122_spill] sm:$0xff] }
0x28fd   :  { %20968 = vmatprep.subr.bf16.mxu0 %v26979_v12  ;;  %18582 = vmatprep.mubr.msk.f32.mxu1 %vm21923_vm5, %v26823_v40 }
0x28fe   :  { %18577 = vmatprep.mubr.msk.f32.mxu0 %vm21923_vm5, %v26823_v40  ;;  %20972 = vmatprep.subr.bf16.mxu1 %v27707_v59  ;;  %v16001_v59 = vld [vmem:[%s26325_s0 + $0xe] sm:$0x3] }
0x28ff   :  { %18583 = vmatmul.mubr.msk.f32.vlgmr.msra.gmra.mrb[122].mxu1 %vm691_vm3, %v27708_v30  ;;  %v27724_v30 = vld [vmem:[#allocation123_spill] sm:$0xff]  ;;  %v12142_v16 = vmul.f32 0.5, %v16001_v59 }
0x2900   :  { %20970 = vmatpush3.bf16.msra.mxu0 %v27709_v25  ;;  %20974 = vmatpush3.bf16.msra.mxu1 %v27710_v56 }
0x2901   :  { %21004 = vmatprep.subr.bf16.mxu0 %v27711_v21  ;;  %20976 = vmatprep.subr.bf16.mxu1 %v27712_v33  ;;  %v12143_v12 = vadd.f32 0.5, %v12142_v16 }
0x2903   :  { %18578 = vmatmul.mubr.msk.f32.vlgmr.msra.gmra.mrb[120].mxu0 %vm403_vm1, %v27713_v47  ;;  %v27725_v47 = vld [vmem:[#allocation124_spill] sm:$0xff] }
0x2904   :  { %21006 = vmatpush3.bf16.msra.mxu0 %v27714_v7  ;;  %20978 = vmatpush3.bf16.msra.mxu1 %v27715_v31  ;;  %v27726_v31 = vld [vmem:[#allocation125_spill] sm:$0xff] }
0x2905   :  { %21008 = vmatprep.subr.bf16.mxu0 %v27716_v41  ;;  %20980 = vmatprep.subr.bf16.mxu1 %v27717_v32  ;;  %v27727_v41 = vld [vmem:[#allocation126_spill] sm:$0xff]  ;;  %v27728_v32 = vld [vmem:[#allocation127_spill] sm:$0xff] }
0x2908   :  { %21010 = vmatpush3.bf16.msra.mxu0 %v27718_v1  ;;  %20982 = vmatpush3.bf16.msra.mxu1 %v27719_v53  ;;  %v27729_v1 = vld [vmem:[#allocation128_spill] sm:$0xff]  ;;  %v27730_v53 = vld [vmem:[#allocation129_spill] sm:$0xff] }
0x2909   :  { %21012 = vmatprep.subr.bf16.mxu0 %v27720_v3  ;;  %20984 = vmatprep.subr.bf16.mxu1 %v27721_v20  ;;  %v27731_v3 = vld [vmem:[#allocation130_spill] sm:$0xff]  ;;  %v27732_v20 = vld [vmem:[#allocation131_spill] sm:$0xff] }
0x290c   :  { %21014 = vmatpush3.bf16.msra.mxu0 %v27722_v19  ;;  %20986 = vmatpush3.bf16.msra.mxu1 %v27723_v23  ;;  %v27733_v19 = vld [vmem:[#allocation132_spill] sm:$0xff]  ;;  %v27734_v23 = vld [vmem:[#allocation133_spill] sm:$0xff] }
0x290d   :  { %21016 = vmatprep.subr.bf16.mxu0 %v27724_v30  ;;  %20988 = vmatprep.subr.bf16.mxu1 %v27725_v47  ;;  %v27735_v30 = vld [vmem:[#allocation134_spill] sm:$0xff]  ;;  %v27736_v47 = vld [vmem:[#allocation135_spill] sm:$0xff] }
0x2910   :  { %21018 = vmatpush3.bf16.msra.mxu0 %v27726_v31  ;;  %20990 = vmatpush3.bf16.msra.mxu1 %v27727_v41  ;;  %v27737_v31 = vld [vmem:[#allocation137_spill] sm:$0xff]  ;;  %v27738_v41 = vld [vmem:[#allocation136_spill] sm:$0xff] }
0x2911   :  { %21020 = vmatprep.subr.bf16.mxu0 %v27728_v32  ;;  %20992 = vmatprep.subr.bf16.mxu1 %v27729_v1  ;;  %v27739_v32 = vld [vmem:[#allocation139_spill] sm:$0xff]  ;;  %v27740_v1 = vld [vmem:[#allocation138_spill] sm:$0xff] }
0x2914   :  { %21022 = vmatpush3.bf16.msra.mxu0 %v27730_v53  ;;  %20994 = vmatpush3.bf16.msra.mxu1 %v27731_v3  ;;  %v27741_v53 = vld [vmem:[#allocation141_spill] sm:$0xff]  ;;  %v27742_v3 = vld [vmem:[#allocation140_spill] sm:$0xff] }
0x2915   :  { %21024 = vmatprep.subr.bf16.mxu0 %v27732_v20  ;;  %20996 = vmatprep.subr.bf16.mxu1 %v27733_v19  ;;  %v27743_v20 = vld [vmem:[#allocation142_spill] sm:$0xff] }
0x2918   :  { %21026 = vmatpush3.bf16.msra.mxu0 %v27734_v23  ;;  %20998 = vmatpush3.bf16.msra.mxu1 %v27735_v30 }
0x2919   :  { %21028 = vmatprep.subr.bf16.mxu0 %v27736_v47  ;;  %21000 = vmatprep.subr.bf16.mxu1 %v27737_v31 }
0x291c   :  { %21030 = vmatpush3.bf16.msra.mxu0 %v27738_v41  ;;  %21002 = vmatpush3.bf16.msra.mxu1 %v27739_v32 }
0x291d   :  { %21032 = vmatprep.subr.bf16.mxu0 %v27740_v1  ;;  %21036 = vmatprep.subr.bf16.mxu1 %v27741_v53  ;;  %v27744_v53 = vld [vmem:[#allocation143_spill] sm:$0xff]  ;;  %v27747_v1 = vld [vmem:[#allocation146_spill] sm:$0xff] }
0x2920   :  { %21034 = vmatpush3.bf16.msra.mxu0 %v27742_v3  ;;  %v27745_v3 = vld [vmem:[#allocation144_spill] sm:$0xff] }
0x2921   :  { %21068 = vmatprep.subr.bf16.mxu0 %v27743_v20  ;;  %v27746_v20 = vld [vmem:[#allocation145_spill] sm:$0xff] }
0x29c6   :  { %v11458_v19 = vpop.f32.mrb[116].mxu0  ;;  %v11529_v23 = vpop.f32.mrb[118].mxu1 }
0x29c7   :  { %v11460_v7 = vpop.f32.mrb[117].mxu0  ;;  %v11531_v30 = vpop.f32.mrb[119].mxu1  ;;  %v11676_v41 = vmul.f32 %v25490_v34, %v11458_v19  ;;  %v11678_v32 = vmul.f32 %v25494_v17, %v11529_v23  ;;  %v27748_v19 = vld [vmem:[#allocation147_spill] sm:$0xff] }
0x29c8   :  { %v11677_v47 = vmul.f32 %v25492_v5, %v11460_v7  ;;  %v11679_v31 = vmul.f32 %v25497_v8, %v11531_v30 }
0x29ca   :  { %11912 = vmatprep.mubr.f32.mxu1 %v11677_v47  ;;  %11982 = vmatprep.mubr.f32.mxu0 %v11679_v31  ;;  %v27749_v31 = vld [vmem:[#allocation148_spill] sm:$0xff]  ;;  %v27752_v47 = vld [vmem:[#allocation151_spill] sm:$0xff] }
0x29cb   :  { %11913 = vmatmul.mubr.f32.vlgmr.msra.gmra.mrb[124].mxu1 %v11676_v41  ;;  %11983 = vmatmul.mubr.f32.vlgmr.msra.gmra.mrb[122].mxu0 %v11678_v32  ;;  %v27750_v41 = vld [vmem:[#allocation149_spill] sm:$0xff]  ;;  %v27751_v32 = vld [vmem:[#allocation150_spill] sm:$0xff] }
0x29cc   :  { %21038 = vmatpush3.bf16.msra.mxu1 %v27744_v53  ;;  %21070 = vmatpush3.bf16.msra.mxu0 %v27745_v3 }
0x29cd   :  { %21040 = vmatprep.subr.bf16.mxu1 %v27746_v20  ;;  %21072 = vmatprep.subr.bf16.mxu0 %v27747_v1  ;;  %v27753_v1 = vld [vmem:[#allocation152_spill] sm:$0xff]  ;;  %v27754_v20 = vld [vmem:[#allocation153_spill] sm:$0xff] }
0x29ce   :  { %v11600_v33 = vpop.f32.mrb[118].mxu0  ;;  %v11671_v5 = vpop.f32.mrb[120].mxu1 }
0x29cf   :  { %v11602_v7 = vpop.f32.mrb[119].mxu0  ;;  %v11673_v8 = vpop.f32.mrb[121].mxu1 }
0x29d0   :  { %v11681_v34 = vmul.f32 %v25502_v61, %v11602_v7  ;;  %v11683_v17 = vmul.f32 %v25508_v4, %v11673_v8  ;;  %21042 = vmatpush3.bf16.msra.mxu1 %v27748_v19  ;;  %21074 = vmatpush3.bf16.msra.mxu0 %v27749_v31  ;;  %v27755_v61 = vld [vmem:[#allocation154_spill] sm:$0xff]  ;;  %v27756_v31 = vld [vmem:[#allocation155_spill] sm:$0xff] }
0x29d1   :  { %21044 = vmatprep.subr.bf16.mxu1 %v27750_v41  ;;  %21076 = vmatprep.subr.bf16.mxu0 %v27751_v32  ;;  %v27757_v41 = vld [vmem:[#allocation156_spill] sm:$0xff] }
0x29d2   :  { %12052 = vmatprep.mubr.f32.mxu1 %v11681_v34  ;;  %12122 = vmatprep.mubr.f32.mxu0 %v11683_v17  ;;  %v11820_v23 = vpop.f32.mrb[122].mxu1  ;;  %v25643_v34 = vld [vmem:[%s26324_s8] ss:$0 sm:$0xff] }
0x29d3   :  { %v18584_v30 = vpop.f32.mrb[123].mxu1  ;;  %27758 = vst [vmem:[#allocation65_spill] sm:$0xff] %v25643_v34 }
0x29d4   :  { %21046 = vmatpush3.bf16.msra.mxu1 %v27752_v47  ;;  %21078 = vmatpush3.bf16.msra.mxu0 %v27753_v1  ;;  %v27759_v30 = vld [vmem:[#allocation157_spill] sm:$0xff] }
0x29d5   :  { %21048 = vmatprep.subr.bf16.mxu1 %v27754_v20  ;;  %21080 = vmatprep.subr.bf16.mxu0 %v27755_v61  ;;  %v27760_v20 = vld [vmem:[#allocation158_spill] sm:$0xff]  ;;  %v27765_v61 = vld [vmem:[#allocation164_spill] sm:$0xff]  ;;  %v27770_v1 = vld [vmem:[#allocation169_spill] sm:$0xff] }
0x29d6   :  { %v11750_v4 = vpop.f32.mrb[120].mxu0 }
0x29d7   :  { %v11821_v7 = vadd.f32 %v11820_v23, %v11750_v4  ;;  %v18579_v8 = vpop.f32.mrb[121].mxu0  ;;  %v27761_v4 = vld [vmem:[#allocation160_spill] sm:$0xff] }
0x29d8   :  { %21050 = vmatpush3.bf16.msra.mxu1 %v27756_v31  ;;  %21082 = vmatpush3.bf16.msra.mxu0 %v27757_v41  ;;  %v27762_v8 = vld [vmem:[#allocation161_spill] sm:$0xff]  ;;  %v27763_v41 = vld [vmem:[#allocation162_spill] sm:$0xff]  ;;  %v27764_v31 = vld [vmem:[#allocation163_spill] sm:$0xff] }
0x29d9   :  { %v25646_v17 = vadd.f32 %v25643_v34, %v11821_v7  ;;  %21052 = vmatprep.subr.bf16.mxu1 %v27759_v30  ;;  %21084 = vmatprep.subr.bf16.mxu0 %v27760_v20  ;;  %v27766_v7 = vld [vmem:[#allocation165_spill] sm:$0xff]  ;;  %v27767_v34 = vld [vmem:[#allocation166_spill] sm:$0xff]  ;;  %v27768_v30 = vld [vmem:[#allocation167_spill] sm:$0xff] }
0x29da   :  { %v27769_v20 = vld [vmem:[#allocation168_spill] sm:$0xff] }
0x29db   :  { %v11825_v23 = vsel %vm1822_vm6, %v25646_v17, -inf }
0x29dc   :  { %21054 = vmatpush3.bf16.msra.mxu1 %v27761_v4  ;;  %21086 = vmatpush3.bf16.msra.mxu0 %v27762_v8  ;;  %v27771_v4 = vld [vmem:[#allocation170_spill] sm:$0xff]  ;;  %v27772_v8 = vld [vmem:[#allocation171_spill] sm:$0xff] }
0x29dd   :  { %11826 = vmax.xlane.f32.xlu0 %v11825_v23  ;;  %21056 = vmatprep.subr.bf16.mxu1 %v27763_v41  ;;  %v27773_v23 = vld [vmem:[#allocation172_spill] sm:$0xff]  ;;  %v27774_v41 = vld [vmem:[#allocation173_spill] sm:$0xff] }
0x29de   :  { %21088 = vmatprep.subr.bf16.mxu0 %v27764_v31 }
0x29e0   :  { %21058 = vmatpush3.bf16.msra.mxu1 %v27765_v61  ;;  %21090 = vmatpush3.bf16.msra.mxu0 %v27766_v7  ;;  %v15975_v7 = vld [vmem:[%s26325_s0 + $0xc] sm:$0x3]  ;;  %v27775_v61 = vld [vmem:[#allocation3_spill] sm:$0xff] }
0x29e1   :  { %21060 = vmatprep.subr.bf16.mxu1 %v27767_v34  ;;  %21092 = vmatprep.subr.bf16.mxu0 %v27768_v30  ;;  %v11680_v34 = vmul.f32 %v25540_v62, %v11600_v33  ;;  %v11682_v30 = vmul.f32 %v25545_v9, %v11671_v5  ;;  %v27781_v9 = vld [vmem:[#allocation9_spill] sm:$0xff]  ;;  %v27782_v33 = vld [vmem:[#allocation10_spill] sm:$0xff]  ;;  %v27784_v5 = vld [vmem:[#allocation12_spill] sm:$0xff] }
0x29e4   :  { %21062 = vmatpush3.bf16.msra.mxu1 %v27769_v20  ;;  %21094 = vmatpush3.bf16.msra.mxu0 %v27770_v1  ;;  %v27776_v20 = vld [vmem:[#allocation4_spill] sm:$0xff] }
0x29e5   :  { %21064 = vmatprep.subr.bf16.mxu1 %v27771_v4  ;;  %21096 = vmatprep.subr.bf16.mxu0 %v27772_v8  ;;  %v10475_v4 = vmul.f32 0.5, %v15975_v7  ;;  %v27777_v8 = vld [vmem:[#allocation5_spill] sm:$0xff]  ;;  %v27780_v1 = vld [vmem:[#allocation8_spill] sm:$0xff] }
0x29e7   :  { %v10476_v62 = vadd.f32 0.5, %v10475_v4 }
0x29e8   :  { %21066 = vmatpush3.bf16.msra.mxu1 %v27773_v23  ;;  %21098 = vmatpush3.bf16.msra.mxu0 %v27774_v41  ;;  %v27778_v23 = vld [vmem:[#allocation6_spill] sm:$0xff]  ;;  %v27779_v41 = vld [vmem:[#allocation7_spill] sm:$0xff] }
0x29e9   :  { %21100 = vmatprep.subr.bf16.mxu1 %v27775_v61  ;;  %21108 = vmatprep.subr.bf16.mxu0 %v27776_v20  ;;  %v27783_v20 = vld [vmem:[#allocation11_spill] sm:$0xff] }
0x29eb   :  { %12053 = vmatmul.mubr.f32.vlgmr.msra.gmra.mrb[126].mxu1 %v11680_v34  ;;  %12123 = vmatmul.mubr.f32.vlgmr.msra.gmra.mrb[124].mxu0 %v11682_v30 }
0x29ec   :  { %21102 = vmatpush1.bf16.msra.mxu1 %v27777_v8  ;;  %21110 = vmatpush1.bf16.msra.mxu0 %v27778_v23 }
0x29ed   :  { %21104 = vmatprep.subr.bf16.mxu1 %v27779_v41  ;;  %21112 = vmatprep.subr.bf16.mxu0 %v27780_v1 }
0x29ee   :  { %12218 = vmatprep.mubr.f32.mxu1 %v26823_v40  ;;  %12289 = vmatprep.mubr.f32.mxu0 %v26823_v40 }
0x29f0   :  { %21106 = vmatpush1.bf16.msra.mxu1 %v27781_v9  ;;  %21114 = vmatpush1.bf16.msra.mxu0 %v27782_v33 }
0x29f1   :  { %21116 = vmatprep.subr.bf16.mxu1 %v27783_v20  ;;  %21124 = vmatprep.subr.bf16.mxu0 %v27784_v5 }
0x29f3   :  { %11844 = vperm.xlu0 %21592, %v10476_v62  }
0x2a6a   :  { %v11827_v61 = vpop.xlane.xlu0 %11826 }
0x2a6b   :  { %v11828_v34 = vsub.f32 %v25646_v17, %v11827_v61 }
0x2a6d   :  { %v11829_v41 = vmul.f32 1.442695, %v11828_v34 }
0x2a6f   :  { %21782 = vpow2.f32 %v11829_v41 }
0x2a72   :  { %v11845_v41 = vpop.permute.xlu0 %11844 }
0x2a79   :  { %v21783_v1 = vpop.eup %21782 }
0x2a7a   :  { %v11831_v30 = vsel %vm1822_vm6, %v21783_v1, 0.0 }
0x2a7b   :  { %11832 = vadd.xlane.f32.xlu1 %v11831_v30 }
0x2a9e   :  { %v17982_v8 = vpop.f32.mrb[124].mxu1  ;;  %v18017_v4 = vpop.f32.mrb[122].mxu0 }
0x2a9f   :  { %v17983_v7 = vpop.f32.mrb[125].mxu1  ;;  %v18018_v23 = vpop.f32.mrb[123].mxu0 }
0x2aa0   :  { %v17984_v9 = vadd.f32 %v17983_v7, %v17982_v8  ;;  %v18019_v33 = vadd.f32 %v18018_v23, %v18017_v4  ;;  %v15999_v8 = vmul.f32 -1.442695, %v25646_v17 }
0x2abe   :  { %v18052_v31 = vpop.f32.mrb[126].mxu1  ;;  %v18087_v20 = vpop.f32.mrb[124].mxu0 }
0x2abf   :  { %v18053_v47 = vpop.f32.mrb[127].mxu1  ;;  %v18088_v5 = vpop.f32.mrb[125].mxu0 }
0x2ac0   :  { %v18054_v62 = vadd.f32 %v18053_v47, %v18052_v31  ;;  %v18089_v32 = vadd.f32 %v18088_v5, %v18087_v20  ;;  %v27789_v20 = vld [vmem:[#allocation16_spill] sm:$0xff]  ;;  %v27790_v5 = vld [vmem:[#allocation17_spill] sm:$0xff] }
0x2b08   :  { %v11833_v19 = vpop.xlane.xlu1 %11832 }
0x2b09   :  { %21784 = vrcp.f32 %v11833_v19 }
0x2b0a   :  { %21786 = vpow2.f32 %v15999_v8  ;;  %v25730_v8 = vld [vmem:[%s26317_s1 + $0xe] sm:$0x3] }
0x2b0b   :  { %27792 = vst [vmem:[#allocation101_spill] sm:$0xff] %v25730_v8 }
0x2b13   :  { %v21785_v61 = vpop.eup %21784 }
0x2b14   :  { %v11835_v34 = vmul.f32 %v21785_v61, %v21783_v1  ;;  %v21787_v4 = vpop.eup %21786  ;;  %v21912_v61 = vld [vmem:[%s26750_s3 + $0x8] sm:$0x7f] }
0x2b15   :  { %v11839_v7 = vadd.f32 1.0, %v21787_v4  ;;  %v21916_v4 = vld [vmem:[%s26750_s3 + $0x28] sm:$0x7f] }
0x2b16   :  { %v11847_v3 = vmul.f32 %v11845_v41, %v11835_v34  ;;  %v21913_v34 = vld [vmem:[%s26750_s3 + $0x18] sm:$0x7f]  ;;  %v21914_v41 = vld [vmem:[%s26750_s3] sm:$0x7f] }
0x2b17   :  { %21788 = vrcp.f32 %v11839_v7  ;;  %v21917_v7 = vld [vmem:[%s26750_s3 + $0x38] sm:$0x7f] }
0x2b18   :  { %v11915_v53 = vadd.f32 %v17984_v9, %v11847_v3  ;;  %v27787_v9 = vld [vmem:[#allocation14_spill] sm:$0xff] }
0x2b1a   :  { %v11985_v30 = vadd.f32 %v18019_v33, %v11915_v53  ;;  %v27788_v33 = vld [vmem:[#allocation15_spill] sm:$0xff] }
0x2b1c   :  { %v12055_v21 = vadd.f32 %v18054_v62, %v11985_v30  ;;  %v27791_v62 = vld [vmem:[#allocation18_spill] sm:$0xff]  ;;  %v21915_v30 = vld [vmem:[%s26750_s3 + $0x10] sm:$0x7f] }
0x2b1e   :  { %v12125_v56 = vadd.f32 %v18089_v32, %v12055_v21 }
0x2b20   :  { %12129 = vrot.lane.b32.xlu1 %v12125_v56, %s21925_s10 }
0x2b21   :  { %v21789_v31 = vpop.eup %21788 }
0x2b92   :  { %v12130_v47 = vpop.permute.xlu1 %12129 }
0x2b93   :  { %v12132_v23 = vmul.f32 %v21789_v31, %v12130_v47  ;;  %v21918_v31 = vld [vmem:[%s26750_s3 + $0x20] sm:$0x7f]  ;;  %v21919_v47 = vld [vmem:[%s26750_s3 + $0x30] sm:$0x7f] }
0x2b95   :  { %12134 = vrot.lane.b32.xlu1 %v12132_v23, %s21926_s4  ;;  %v27793_v23 = vld [vmem:[#allocation19_spill] sm:$0xff] }
0x2c07   :  { %v12135_v19 = vpop.permute.xlu1 %12134 }
0x2c08   :  { %v25688_v1 = vsub.f32 %v12125_v56, %v12135_v19  ;;  %v27786_v56 = vld [vmem:[#allocation13_spill] sm:$0xff]  ;;  %v27794_v19 = vld [vmem:[#allocation20_spill] sm:$0xff] }
0x2c0a   :  { %v12144_v53 = vsel %vm1822_vm6, %v25688_v1, 0.0 }
0x2c0b   :  { %12145 = vadd.xlane.f32.xlu0 %v12144_v53  ;;  %v27795_v53 = vld [vmem:[#allocation21_spill] sm:$0xff] }
0x2c98   :  { %v12146_v21 = vpop.xlane.xlu0 %12145 }
0x2c99   :  { %vm12147_vm13 = vcmp.eq.f32.partialorder %v12146_v21, 0.0 }
0x2c9a   :  { %v12148_v3 = vsel %vm12147_vm13, 1.0, %v12146_v21  ;;  %v27796_v21 = vld [vmem:[#allocation22_spill] sm:$0xff] }
0x2c9b   :  { %21790 = vrcp.f32 %v12148_v3  ;;  %v27797_v3 = vld [vmem:[#allocation23_spill] sm:$0xff] }
0x2ca5   :  { %v21791_v32 = vpop.eup %21790 }
0x2ca6   :  { %v25693_v17 = vmul.f32 %v21791_v32, %v25688_v1  ;;  %v27798_v32 = vld [vmem:[#allocation24_spill] sm:$0xff] }
0x2ca8   :  { %27785 = vst [vmem:[#allocation100_spill] sm:$0xff] %v25693_v17  ;;  %16002 = vmatmul.mubr.msk.f32.vlgmr.msra.gmra.mrb[128].mxu1 %vm403_vm1, %v25693_v17  ;;  %16003 = vmatmul.mubr.msk.f32.vlgmr.msra.gmra.mrb[126].mxu0 %vm403_vm1, %v25693_v17 }
0x2ca9   :  { %21118 = vmatpush1.bf16.msra.mxu1 %v27786_v56  ;;  %21126 = vmatpush1.bf16.msra.mxu0 %v27787_v9  ;;  %v27799_v56 = vld [vmem:[#allocation25_spill] sm:$0xff]  ;;  %v27800_v9 = vld [vmem:[#allocation26_spill] sm:$0xff] }
0x2caa   :  { %21120 = vmatprep.subr.bf16.mxu1 %v27788_v33  ;;  %21128 = vmatprep.subr.bf16.mxu0 %v27789_v20  ;;  %v27801_v33 = vld [vmem:[#allocation27_spill] sm:$0xff]  ;;  %v27802_v20 = vld [vmem:[#allocation28_spill] sm:$0xff] }
0x2cab   :  { %12360 = vmatprep.mubr.f32.mxu1 %v26823_v40  ;;  %12431 = vmatprep.mubr.f32.mxu0 %v26823_v40 }
0x2cad   :  { %21122 = vmatpush1.bf16.msra.mxu1 %v27790_v5  ;;  %21130 = vmatpush1.bf16.msra.mxu0 %v27791_v62  ;;  %v27803_v5 = vld [vmem:[#allocation29_spill] sm:$0xff]  ;;  %v27804_v62 = vld [vmem:[#allocation30_spill] sm:$0xff] }
0x2cae   :  { %16006 = vmatprep.subr.msk.mxu1 %vm695_vm2, %v21912_v61  ;;  %16009 = vmatprep.subr.msk.mxu0 %vm695_vm2, %v21913_v34  ;;  %v27805_v61 = vld [vmem:[#allocation31_spill] sm:$0xff]  ;;  %v27806_v34 = vld [vmem:[#allocation32_spill] sm:$0xff] }
0x2cb0   :  { %16004 = vmatmul.mubr.msk.f32.vlgmr.msra.gmra.mrb[130].mxu1 %vm403_vm1, %v25693_v17  ;;  %16005 = vmatmul.mubr.msk.f32.vlgmr.msra.gmra.mrb[128].mxu0 %vm403_vm1, %v25693_v17 }
0x2cb1   :  { %16007 = vmatpush1.msk.msra.mxu1 %vm695_vm2, %v21914_v41  ;;  %16010 = vmatpush1.msk.msra.mxu0 %vm695_vm2, %v21915_v30  ;;  %v27807_v41 = vld [vmem:[#allocation33_spill] sm:$0xff]  ;;  %v27808_v30 = vld [vmem:[#allocation34_spill] sm:$0xff] }
0x2cb2   :  { %12505 = vmatprep.mubr.f32.mxu1 %v26823_v40  ;;  %12576 = vmatprep.mubr.f32.mxu0 %v26823_v40 }
0x2cb3   :  { %16012 = vmatprep.subr.msk.mxu1 %vm695_vm2, %v21916_v4  ;;  %16015 = vmatprep.subr.msk.mxu0 %vm695_vm2, %v21917_v7  ;;  %v27809_v4 = vld [vmem:[#allocation35_spill] sm:$0xff]  ;;  %v27810_v7 = vld [vmem:[#allocation36_spill] sm:$0xff] }
0x2cb4   :  { %16008 = vmatmul.mubr.msk.f32.vlgmr.msra.gmra.mrb[128].mxu1 %vm691_vm3, %v25730_v8  ;;  %16011 = vmatmul.mubr.msk.f32.vlgmr.msra.gmra.mrb[126].mxu0 %vm691_vm3, %v25730_v8 }
0x2cb5   :  { %16013 = vmatpush1.msk.msra.mxu1 %vm695_vm2, %v21918_v31  ;;  %16016 = vmatpush1.msk.msra.mxu0 %vm695_vm2, %v21919_v47  ;;  %v27811_v31 = vld [vmem:[#allocation45_spill] sm:$0xff]  ;;  %v27812_v47 = vld [vmem:[#allocation46_spill] sm:$0xff] }
0x2cb6   :  { %12647 = vmatprep.mubr.f32.mxu1 %v26823_v40  ;;  %12718 = vmatprep.mubr.f32.mxu0 %v26823_v40 }
0x2cb7   :  { %21132 = vmatprep.subr.bf16.mxu1 %v27793_v23  ;;  %21164 = vmatprep.subr.bf16.mxu0 %v27794_v19  ;;  %v27813_v23 = vld [vmem:[#allocation47_spill] sm:$0xff]  ;;  %v27814_v19 = vld [vmem:[#allocation48_spill] sm:$0xff] }
0x2cb8   :  { %16014 = vmatmul.mubr.msk.f32.vlgmr.msra.gmra.mrb[130].mxu1 %vm691_vm3, %v25730_v8  ;;  %16017 = vmatmul.mubr.msk.f32.vlgmr.msra.gmra.mrb[128].mxu0 %vm691_vm3, %v25730_v8 }
0x2cb9   :  { %21134 = vmatpush3.bf16.msra.mxu1 %v27795_v53  ;;  %21166 = vmatpush3.bf16.msra.mxu0 %v27796_v21  ;;  %v27815_v53 = vld [vmem:[#allocation49_spill] sm:$0xff]  ;;  %v27816_v21 = vld [vmem:[#allocation50_spill] sm:$0xff] }
0x2cba   :  { %21136 = vmatprep.subr.bf16.mxu1 %v27797_v3  ;;  %21168 = vmatprep.subr.bf16.mxu0 %v27798_v32  ;;  %v27817_v3 = vld [vmem:[#allocation51_spill] sm:$0xff]  ;;  %v27818_v32 = vld [vmem:[#allocation52_spill] sm:$0xff] }
0x2cbd   :  { %21138 = vmatpush3.bf16.msra.mxu1 %v27799_v56  ;;  %21170 = vmatpush3.bf16.msra.mxu0 %v27800_v9  ;;  %v27819_v56 = vld [vmem:[#allocation53_spill] sm:$0xff]  ;;  %v27820_v9 = vld [vmem:[#allocation54_spill] sm:$0xff] }
0x2cbe   :  { %21140 = vmatprep.subr.bf16.mxu1 %v27801_v33  ;;  %21172 = vmatprep.subr.bf16.mxu0 %v27802_v20  ;;  %v27821_v33 = vld [vmem:[#allocation55_spill] sm:$0xff]  ;;  %v27822_v20 = vld [vmem:[#allocation56_spill] sm:$0xff] }
0x2cc1   :  { %21142 = vmatpush3.bf16.msra.mxu1 %v27803_v5  ;;  %21174 = vmatpush3.bf16.msra.mxu0 %v27804_v62  ;;  %v27823_v5 = vld [vmem:[#allocation57_spill] sm:$0xff]  ;;  %v27824_v62 = vld [vmem:[#allocation58_spill] sm:$0xff] }
0x2cc2   :  { %21144 = vmatprep.subr.bf16.mxu1 %v27805_v61  ;;  %21176 = vmatprep.subr.bf16.mxu0 %v27806_v34  ;;  %v27825_v61 = vld [vmem:[#allocation59_spill] sm:$0xff]  ;;  %v27826_v34 = vld [vmem:[#allocation60_spill] sm:$0xff] }
0x2cc5   :  { %21146 = vmatpush3.bf16.msra.mxu1 %v27807_v41  ;;  %21178 = vmatpush3.bf16.msra.mxu0 %v27808_v30 }
0x2cc6   :  { %21148 = vmatprep.subr.bf16.mxu1 %v27809_v4  ;;  %21180 = vmatprep.subr.bf16.mxu0 %v27810_v7 }
0x2cc9   :  { %21150 = vmatpush3.bf16.msra.mxu1 %v27811_v31  ;;  %21182 = vmatpush3.bf16.msra.mxu0 %v27812_v47  ;;  %v27827_v31 = vld [vmem:[#allocation37_spill] sm:$0xff] }
0x2cca   :  { %21152 = vmatprep.subr.bf16.mxu1 %v27813_v23  ;;  %21184 = vmatprep.subr.bf16.mxu0 %v27814_v19  ;;  %v27828_v23 = vld [vmem:[#allocation41_spill] sm:$0xff] }
0x2ccd   :  { %21154 = vmatpush3.bf16.msra.mxu1 %v27815_v53  ;;  %21186 = vmatpush3.bf16.msra.mxu0 %v27816_v21  ;;  %v27829_v53 = vld [vmem:[#allocation39_spill] sm:$0xff] }
0x2cce   :  { %21156 = vmatprep.subr.bf16.mxu1 %v27817_v3  ;;  %21188 = vmatprep.subr.bf16.mxu0 %v27818_v32  ;;  %v27830_v3 = vld [vmem:[#allocation42_spill] sm:$0xff] }
0x2cd1   :  { %21158 = vmatpush3.bf16.msra.mxu1 %v27819_v56  ;;  %21190 = vmatpush3.bf16.msra.mxu0 %v27820_v9 }
0x2cd2   :  { %21160 = vmatprep.subr.bf16.mxu1 %v27821_v33  ;;  %21192 = vmatprep.subr.bf16.mxu0 %v27822_v20  ;;  %v27831_v33 = vld [vmem:[#allocation38_spill] sm:$0xff] }
0x2cd5   :  { %21162 = vmatpush3.bf16.msra.mxu1 %v27823_v5  ;;  %21194 = vmatpush3.bf16.msra.mxu0 %v27824_v62  ;;  %v27832_v5 = vld [vmem:[#allocation43_spill] sm:$0xff] }
0x2cd6   :  { %21196 = vmatprep.subr.bf16.mxu1 %v27825_v61  ;;  %21228 = vmatprep.subr.bf16.mxu0 %v27826_v34 }
0x2d87   :  { %v12507_v41 = vpop.f32.mrb[128].mxu1  ;;  %v12578_v30 = vpop.f32.mrb[126].mxu0 }
0x2d88   :  { %v12509_v4 = vpop.f32.mrb[129].mxu1  ;;  %v12580_v7 = vpop.f32.mrb[127].mxu0  ;;  %v12725_v47 = vadd.f32 %v12507_v41, %v27827_v31  ;;  %v12727_v19 = vadd.f32 %v12578_v30, %v27828_v23  ;;  %v27833_v31 = vld [vmem:[#allocation40_spill] sm:$0xff] }
0x2d89   :  { %v12726_v21 = vadd.f32 %v12509_v4, %v27829_v53  ;;  %v12728_v32 = vadd.f32 %v12580_v7, %v27830_v3  ;;  %v27834_v23 = vld [vmem:[#allocation44_spill] sm:$0xff] }
0x2d8a   :  { %v12733_v17 = vsel %vm1053_vm4, %v12725_v47, -inf  ;;  %v12735_v41 = vsel %vm1053_vm4, %v12727_v19, -inf }
0x2d8b   :  { %v12649_v56 = vpop.f32.mrb[130].mxu1  ;;  %v12720_v9 = vpop.f32.mrb[128].mxu0  ;;  %v12734_v7 = vsel %vm1053_vm4, %v12726_v21, -inf  ;;  %v12736_v53 = vsel %vm1053_vm4, %v12728_v32, -inf }
0x2d8c   :  { %v25799_v20 = vadd.f32 %v12649_v56, %v27831_v33  ;;  %v25802_v62 = vadd.f32 %v12720_v9, %v27832_v5  ;;  %v12651_v61 = vpop.f32.mrb[131].mxu1  ;;  %v12722_v34 = vpop.f32.mrb[129].mxu0 }
0x2d8d   :  { %v12730_v30 = vadd.f32 %v12651_v61, %v27833_v31  ;;  %v12732_v4 = vadd.f32 %v12722_v34, %v27834_v23 }
0x2d8e   :  { %v12737_v3 = vsel %vm1053_vm4, %v25799_v20, -inf  ;;  %v12741_v56 = vsel %vm1053_vm4, %v25802_v62, -inf }
0x2d8f   :  { %v12738_v9 = vmax.f32 %v12733_v17, %v12737_v3  ;;  %v12742_v33 = vmax.f32 %v12735_v41, %v12741_v56  ;;  %v12739_v5 = vsel %vm1053_vm4, %v12730_v30, -inf  ;;  %v12743_v25 = vsel %vm1053_vm4, %v12732_v4, -inf }
0x2d90   :  { %v12740_v8 = vmax.f32 %v12734_v7, %v12739_v5  ;;  %v12744_v61 = vmax.f32 %v12736_v53, %v12743_v25  ;;  %v27853_v5 = vld [vmem:[#allocation110_spill] sm:$0xff] }
0x2d92   :  { %v12745_v31 = vmax.f32 %v12738_v9, %v12740_v8  ;;  %v12746_v34 = vmax.f32 %v12742_v33, %v12744_v61  ;;  %v27854_v61 = vld [vmem:[#allocation111_spill] sm:$0xff] }
0x2d94   :  { %v12747_v23 = vmax.f32 %v12745_v31, %v12746_v34  ;;  %v27855_v31 = vld [vmem:[#allocation112_spill] sm:$0xff] }
0x2d95   :  { %v27856_v34 = vld [vmem:[#allocation100_spill] sm:$0xff] }
0x2d96   :  { %12748 = vmax.xlane.f32.xlu1 %v12747_v23  ;;  %v27857_v23 = vld [vmem:[#allocation113_spill] sm:$0xff] }
0x2da7   :  { %13511 = vperm.xlu1 %21593, %v12143_v12  }
0x2e23   :  { %v12749_v63 = vpop.xlane.xlu1 %12748 }
0x2e24   :  { %v12750_v17 = vsub.f32 %v12725_v47, %v12749_v63  ;;  %v12751_v41 = vsub.f32 %v12726_v21, %v12749_v63  ;;  %v12752_v3 = vsub.f32 %v12727_v19, %v12749_v63  ;;  %v12753_v56 = vsub.f32 %v12728_v32, %v12749_v63 }
0x2e25   :  { %v12755_v14 = vsub.f32 %v12730_v30, %v12749_v63  ;;  %v12757_v8 = vsub.f32 %v12732_v4, %v12749_v63  ;;  %v27851_v30 = vld [vmem:[#allocation101_spill] sm:$0xff] }
0x2e26   :  { %v12758_v39 = vmul.f32 1.442695, %v12750_v17  ;;  %v12760_v7 = vmul.f32 1.442695, %v12751_v41  ;;  %v12762_v25 = vmul.f32 1.442695, %v12752_v3 }
0x2e27   :  { %v12764_v53 = vmul.f32 1.442695, %v12753_v56  ;;  %v12768_v9 = vmul.f32 1.442695, %v12755_v14  ;;  %v12772_v33 = vmul.f32 1.442695, %v12757_v8 }
0x2e28   :  { %21792 = vpow2.f32 %v12758_v39  ;;  %v27852_v4 = vld [vmem:[#allocation109_spill] sm:$0xff]  ;;  %v27858_v17 = vld [vmem:[#allocation114_spill] sm:$0xff]  ;;  %v27859_v41 = vld [vmem:[#allocation115_spill] sm:$0xff] }
0x2e29   :  { %21794 = vpow2.f32 %v12760_v7  ;;  %v27860_v3 = vld [vmem:[#allocation116_spill] sm:$0xff]  ;;  %v27861_v56 = vld [vmem:[#allocation117_spill] sm:$0xff]  ;;  %v27862_v7 = vld [vmem:[#allocation118_spill] sm:$0xff] }
0x2e2a   :  { %21796 = vpow2.f32 %v12762_v25  ;;  %v27863_v25 = vld [vmem:[#allocation119_spill] sm:$0xff]  ;;  %v27864_v8 = vld [vmem:[#allocation120_spill] sm:$0xff] }
0x2e2b   :  { %21798 = vpow2.f32 %v12764_v53  ;;  %v27865_v53 = vld [vmem:[#allocation121_spill] sm:$0xff] }
0x2e2c   :  { %21800 = vpow2.f32 %v12768_v9  ;;  %v27866_v9 = vld [vmem:[#allocation122_spill] sm:$0xff] }
0x2e2d   :  { %21802 = vpow2.f32 %v12772_v33  ;;  %v27867_v33 = vld [vmem:[#allocation123_spill] sm:$0xff] }
0x2e32   :  { %v25819_v12 = vpop.eup %21792 }
0x2e33   :  { %v25821_v16 = vpop.eup %21794 }
0x2e34   :  { %v25823_v59 = vpop.eup %21796  ;;  %12838 = vmatprep.mubr.f32.mxu1 %v25821_v16 }
0x2e35   :  { %v25826_v47 = vpop.eup %21798  ;;  %12839 = vmatmul.mubr.f32.vlgmr.msra.gmra.mrb[132].mxu1 %v25819_v12 }
0x2e36   :  { %12908 = vmatprep.mubr.f32.mxu0 %v25826_v47  ;;  %21198 = vmatpush3.bf16.msra.mxu1 %v26933_v2  ;;  %v25831_v39 = vpop.eup %21800  ;;  %v12754_v2 = vsub.f32 %v25799_v20, %v12749_v63  ;;  %v27846_v20 = vld [vmem:[#allocation105_spill] sm:$0xff] }
0x2e37   :  { %12909 = vmatmul.mubr.f32.vlgmr.msra.gmra.mrb[130].mxu0 %v25823_v59  ;;  %21200 = vmatprep.subr.bf16.mxu1 %v26934_v10  ;;  %v25837_v14 = vpop.eup %21802  ;;  %v12756_v10 = vsub.f32 %v25802_v62, %v12749_v63  ;;  %v27847_v62 = vld [vmem:[#allocation106_spill] sm:$0xff] }
0x2e38   :  { %21230 = vmatpush3.bf16.msra.mxu0 %v26935_v15  ;;  %12978 = vmatprep.mubr.f32.mxu1 %v25831_v39  ;;  %v12766_v15 = vmul.f32 1.442695, %v12754_v2  ;;  %v27868_v2 = vld [vmem:[#allocation124_spill] sm:$0xff] }
0x2e39   :  { %21232 = vmatprep.subr.bf16.mxu0 %v26936_v11  ;;  %13048 = vmatprep.mubr.f32.mxu0 %v25837_v14  ;;  %v12770_v11 = vmul.f32 1.442695, %v12756_v10  ;;  %v27869_v10 = vld [vmem:[#allocation125_spill] sm:$0xff] }
0x2e3a   :  { %21202 = vmatpush3.bf16.msra.mxu1 %v26937_v13  ;;  %21804 = vpow2.f32 %v12766_v15  ;;  %v27835_v13 = vld [vmem:[#allocation91_spill] sm:$0xff]  ;;  %v27870_v15 = vld [vmem:[#allocation126_spill] sm:$0xff] }
0x2e3b   :  { %21204 = vmatprep.subr.bf16.mxu1 %v27085_v54  ;;  %21806 = vpow2.f32 %v12770_v11  ;;  %v27836_v54 = vld [vmem:[#allocation90_spill] sm:$0xff]  ;;  %v27871_v11 = vld [vmem:[#allocation127_spill] sm:$0xff] }
0x2e3c   :  { %21234 = vmatpush3.bf16.msra.mxu0 %v27086_v36  ;;  %v27837_v36 = vld [vmem:[#allocation92_spill] sm:$0xff] }
0x2e3d   :  { %21236 = vmatprep.subr.bf16.mxu0 %v27087_v55 }
0x2e3e   :  { %21206 = vmatpush3.bf16.msra.mxu1 %v27088_v28  ;;  %v27838_v28 = vld [vmem:[#allocation93_spill] sm:$0xff] }
0x2e3f   :  { %21208 = vmatprep.subr.bf16.mxu1 %v27235_v51  ;;  %v27839_v51 = vld [vmem:[#allocation95_spill] sm:$0xff] }
0x2e40   :  { %21238 = vmatpush3.bf16.msra.mxu0 %v27236_v6  ;;  %v27840_v6 = vld [vmem:[#allocation94_spill] sm:$0xff] }
0x2e41   :  { %21240 = vmatprep.subr.bf16.mxu0 %v27237_v18  ;;  %v27841_v18 = vld [vmem:[#allocation96_spill] sm:$0xff] }
0x2e42   :  { %21210 = vmatpush3.bf16.msra.mxu1 %v27238_v45  ;;  %v27842_v45 = vld [vmem:[#allocation97_spill] sm:$0xff] }
0x2e43   :  { %21212 = vmatprep.subr.bf16.mxu1 %v27384_v44  ;;  %v27843_v44 = vld [vmem:[#allocation99_spill] sm:$0xff] }
0x2e44   :  { %21242 = vmatpush3.bf16.msra.mxu0 %v27385_v37  ;;  %v25869_v63 = vpop.eup %21804  ;;  %v27844_v37 = vld [vmem:[#allocation98_spill] sm:$0xff] }
0x2e45   :  { %21244 = vmatprep.subr.bf16.mxu0 %v27386_v38  ;;  %v25874_v55 = vpop.eup %21806 }
0x2e46   :  { %21214 = vmatpush3.bf16.msra.mxu1 %v27387_v57 }
0x2e47   :  { %21216 = vmatprep.subr.bf16.mxu1 %v27388_v58 }
0x2e48   :  { %21246 = vmatpush3.bf16.msra.mxu0 %v27389_v52 }
0x2e49   :  { %21248 = vmatprep.subr.bf16.mxu0 %v27537_v0 }
0x2e4a   :  { %21218 = vmatpush3.bf16.msra.mxu1 %v27538_v26 }
0x2e4b   :  { %21220 = vmatprep.subr.bf16.mxu1 %v27539_v49 }
0x2e4c   :  { %21250 = vmatpush3.bf16.msra.mxu0 %v27540_v27 }
0x2e4d   :  { %21252 = vmatprep.subr.bf16.mxu0 %v27689_v50 }
0x2e4e   :  { %21222 = vmatpush3.bf16.msra.mxu1 %v27690_v22 }
0x2e4f   :  { %21224 = vmatprep.subr.bf16.mxu1 %v27691_v35 }
0x2e50   :  { %21254 = vmatpush3.bf16.msra.mxu0 %v27692_v46 }
0x2e51   :  { %21256 = vmatprep.subr.bf16.mxu0 %v27693_v43 }
0x2e52   :  { %21226 = vmatpush3.bf16.msra.mxu1 %v27694_v42 }
0x2e53   :  { %21260 = vmatprep.subr.bf16.mxu1 %v27835_v13  ;;  %v27872_v13 = vld [vmem:[#allocation128_spill] sm:$0xff] }
0x2e54   :  { %21258 = vmatpush3.bf16.msra.mxu0 %v27836_v54  ;;  %v27873_v54 = vld [vmem:[#allocation129_spill] sm:$0xff] }
0x2e55   :  { %12979 = vmatmul.mubr.f32.vlgmr.msra.gmra.mrb[134].mxu1 %v25869_v63  ;;  %21268 = vmatprep.subr.bf16.mxu0 %v27837_v36  ;;  %v27874_v36 = vld [vmem:[#allocation130_spill] sm:$0xff] }
0x2e56   :  { %21262 = vmatpush1.bf16.msra.mxu1 %v27838_v28  ;;  %13123 = vmatprep.mubr.f32.mxu1 %v26823_v40  ;;  %v27875_v28 = vld [vmem:[#allocation131_spill] sm:$0xff] }
0x2e57   :  { %13049 = vmatmul.mubr.f32.vlgmr.msra.gmra.mrb[132].mxu0 %v25874_v55  ;;  %21264 = vmatprep.subr.bf16.mxu1 %v27839_v51  ;;  %v27876_v51 = vld [vmem:[#allocation132_spill] sm:$0xff] }
0x2e58   :  { %21270 = vmatpush1.bf16.msra.mxu0 %v27840_v6  ;;  %13194 = vmatprep.mubr.f32.mxu0 %v26823_v40  ;;  %v27877_v6 = vld [vmem:[#allocation133_spill] sm:$0xff] }
0x2e59   :  { %21272 = vmatprep.subr.bf16.mxu0 %v27841_v18  ;;  %v27878_v18 = vld [vmem:[#allocation134_spill] sm:$0xff] }
0x2e5a   :  { %21266 = vmatpush1.bf16.msra.mxu1 %v27842_v45  ;;  %v27879_v45 = vld [vmem:[#allocation135_spill] sm:$0xff] }
0x2e5b   :  { %21276 = vmatprep.subr.bf16.mxu1 %v27843_v44  ;;  %v27880_v44 = vld [vmem:[#allocation137_spill] sm:$0xff] }
0x2e5c   :  { %21274 = vmatpush1.bf16.msra.mxu0 %v27844_v37  ;;  %v27881_v37 = vld [vmem:[#allocation136_spill] sm:$0xff] }
0x2e5d   :  { %21284 = vmatprep.subr.bf16.mxu0 %v26972_v60  ;;  %v27845_v60 = vld [vmem:[#allocation104_spill] sm:$0xff] }
0x2f08   :  { %v18122_v38 = vpop.f32.mrb[132].mxu1 }
0x2f09   :  { %v18123_v57 = vpop.f32.mrb[133].mxu1 }
0x2f0a   :  { %v18157_v58 = vpop.f32.mrb[130].mxu0  ;;  %v18124_v52 = vadd.f32 %v18123_v57, %v18122_v38  ;;  %v27882_v38 = vld [vmem:[#allocation139_spill] sm:$0xff]  ;;  %v27883_v57 = vld [vmem:[#allocation138_spill] sm:$0xff] }
0x2f0b   :  { %v18158_v0 = vpop.f32.mrb[131].mxu0 }
0x2f0c   :  { %v18159_v26 = vadd.f32 %v18158_v0, %v18157_v58  ;;  %v27884_v58 = vld [vmem:[#allocation141_spill] sm:$0xff]  ;;  %v27886_v0 = vld [vmem:[#allocation142_spill] sm:$0xff] }
0x2f0e   :  { %v12911_v49 = vadd.f32 %v18159_v26, %v18124_v52  ;;  %v27885_v52 = vld [vmem:[#allocation140_spill] sm:$0xff] }
0x2f28   :  { %v18192_v27 = vpop.f32.mrb[134].mxu1 }
0x2f29   :  { %v18193_v50 = vpop.f32.mrb[135].mxu1 }
0x2f2a   :  { %v18227_v22 = vpop.f32.mrb[132].mxu0  ;;  %v18194_v35 = vadd.f32 %v18193_v50, %v18192_v27 }
0x2f2b   :  { %v18228_v46 = vpop.f32.mrb[133].mxu0 }
0x2f2c   :  { %v12981_v43 = vadd.f32 %v18194_v35, %v12911_v49  ;;  %v18229_v42 = vadd.f32 %v18228_v46, %v18227_v22 }
0x2f2e   :  { %v13051_v19 = vadd.f32 %v18229_v42, %v12981_v43  ;;  %v27887_v42 = vld [vmem:[#allocation143_spill] sm:$0xff] }
0x2f30   :  { %21808 = vrcp.f32 %v13051_v19  ;;  %v27888_v19 = vld [vmem:[#allocation144_spill] sm:$0xff] }
0x2f3a   :  { %v21809_v21 = vpop.eup %21808 }
0x2f3b   :  { %v13055_v32 = vmul.f32 %v21809_v21, %v25688_v1  ;;  %v27848_v1 = vmov 0.0|0.0   ;;  %v27889_v21 = vld [vmem:[#allocation145_spill] sm:$0xff] }
0x2f3d   :  { %16018 = vmatmul.mubr.msk.f32.vlgmr.msra.gmra.mrb[136].mxu1 %vm403_vm1, %v13055_v32  ;;  %16019 = vmatmul.mubr.msk.f32.vlgmr.msra.gmra.mrb[134].mxu0 %vm403_vm1, %v13055_v32 }
0x2f3e   :  { %21278 = vmatpush1.bf16.msra.mxu1 %v26973_v29  ;;  %21286 = vmatpush1.bf16.msra.mxu0 %v26974_v24  ;;  %v27849_v29 = vld [vmem:[#allocation107_spill] sm:$0xff] }
0x2f3f   :  { %21280 = vmatprep.subr.bf16.mxu1 %v26975_v48  ;;  %21288 = vmatprep.subr.bf16.mxu0 %v27845_v60  ;;  %v21920_v24 = vld [vmem:[%s26323_s6] sm:$0x7f]  ;;  %v27850_v48 = vld [vmem:[#allocation108_spill] sm:$0xff] }
0x2f40   :  { %13265 = vmatprep.mubr.f32.mxu1 %v26823_v40  ;;  %13336 = vmatprep.mubr.f32.mxu0 %v26823_v40 }
0x2f42   :  { %21282 = vmatpush1.bf16.msra.mxu1 %v27846_v20  ;;  %21290 = vmatpush1.bf16.msra.mxu0 %v27847_v62  ;;  %v27891_v62 = vld [vmem:[#allocation147_spill] sm:$0xff] }
0x2f43   :  { %21291 = vmatprep.subr.bf16.mxu1 %v27848_v1  ;;  %18596 = vmatprep.subr.mxu0 %v26823_v40 }
0x2f45   :  { %16020 = vmatmul.mubr.msk.f32.vlgmr.msra.gmra.mrb[138].mxu1 %vm403_vm1, %v13055_v32  ;;  %16021 = vmatmul.mubr.msk.f32.vlgmr.msra.gmra.mrb[136].mxu0 %vm403_vm1, %v13055_v32  ;;  %v27890_v32 = vld [vmem:[#allocation146_spill] sm:$0xff] }
0x2f46   :  { %21293 = vmatpush3.bf16.msra.mxu1 %v27849_v29  ;;  %18597 = vmatpush3.msk.msra.mxu0 %vm695_vm2, %v21920_v24  ;;  %v27892_v29 = vld [vmem:[#allocation148_spill] sm:$0xff]  ;;  %v27893_v24 = vld [vmem:[#allocation149_spill] sm:$0xff] }
0x2f47   :  { %21294 = vmatprep.subr.bf16.mxu1 %v27848_v1  ;;  %18593 = vmatprep.mubr.msk.f32.mxu1 %vm21923_vm5, %v26823_v40 }
0x2f48   :  { %18598 = vmatprep.mubr.msk.f32.mxu0 %vm21923_vm5, %v26823_v40  ;;  %21298 = vmatprep.subr.bf16.mxu0 %v27850_v48  ;;  %v27894_v48 = vld [vmem:[#allocation150_spill] sm:$0xff] }
0x2f49   :  { %18599 = vmatmul.mubr.msk.f32.vlgmr.msra.gmra.mrb[138].mxu0 %vm691_vm3, %v27851_v30 }
0x2f4a   :  { %21296 = vmatpush3.bf16.msra.mxu1 %v27852_v4  ;;  %21300 = vmatpush3.bf16.msra.mxu0 %v27853_v5  ;;  %v27895_v5 = vld [vmem:[#allocation151_spill] sm:$0xff] }
0x2f4b   :  { %21330 = vmatprep.subr.bf16.mxu1 %v27854_v61  ;;  %21302 = vmatprep.subr.bf16.mxu0 %v27855_v31  ;;  %v27896_v61 = vld [vmem:[#allocation152_spill] sm:$0xff]  ;;  %v27897_v31 = vld [vmem:[#allocation153_spill] sm:$0xff] }
0x2f4d   :  { %18594 = vmatmul.mubr.msk.f32.vlgmr.msra.gmra.mrb[140].mxu1 %vm403_vm1, %v27856_v34 }
0x2f4e   :  { %21332 = vmatpush3.bf16.msra.mxu1 %v27857_v23  ;;  %21304 = vmatpush3.bf16.msra.mxu0 %v27858_v17  ;;  %v27899_v17 = vld [vmem:[#allocation155_spill] sm:$0xff] }
0x2f4f   :  { %21334 = vmatprep.subr.bf16.mxu1 %v27859_v41  ;;  %21306 = vmatprep.subr.bf16.mxu0 %v27860_v3  ;;  %v27900_v41 = vld [vmem:[#allocation156_spill] sm:$0xff]  ;;  %v27901_v3 = vld [vmem:[#allocation65_spill] sm:$0xff] }
0x2f52   :  { %21336 = vmatpush3.bf16.msra.mxu1 %v27861_v56  ;;  %21308 = vmatpush3.bf16.msra.mxu0 %v27862_v7  ;;  %v27902_v7 = vld [vmem:[#allocation157_spill] sm:$0xff] }
0x2f53   :  { %21338 = vmatprep.subr.bf16.mxu1 %v27863_v25  ;;  %21310 = vmatprep.subr.bf16.mxu0 %v27864_v8  ;;  %v27903_v25 = vld [vmem:[#allocation158_spill] sm:$0xff] }
0x2f56   :  { %21340 = vmatpush3.bf16.msra.mxu1 %v27865_v53  ;;  %21312 = vmatpush3.bf16.msra.mxu0 %v27866_v9  ;;  %v27904_v53 = vld [vmem:[#allocation160_spill] sm:$0xff]  ;;  %v27905_v9 = vld [vmem:[#allocation161_spill] sm:$0xff] }
0x2f57   :  { %21342 = vmatprep.subr.bf16.mxu1 %v27867_v33  ;;  %21314 = vmatprep.subr.bf16.mxu0 %v27868_v2  ;;  %v27906_v33 = vld [vmem:[#allocation162_spill] sm:$0xff]  ;;  %v27907_v2 = vld [vmem:[#allocation163_spill] sm:$0xff] }
0x2f5a   :  { %21344 = vmatpush3.bf16.msra.mxu1 %v27869_v10  ;;  %21316 = vmatpush3.bf16.msra.mxu0 %v27870_v15  ;;  %v27908_v10 = vld [vmem:[#allocation164_spill] sm:$0xff]  ;;  %v27909_v15 = vld [vmem:[#allocation165_spill] sm:$0xff] }
0x2f5b   :  { %21346 = vmatprep.subr.bf16.mxu1 %v27871_v11  ;;  %21318 = vmatprep.subr.bf16.mxu0 %v27872_v13  ;;  %v27910_v11 = vld [vmem:[#allocation166_spill] sm:$0xff]  ;;  %v27911_v13 = vld [vmem:[#allocation167_spill] sm:$0xff] }
0x2f5e   :  { %21348 = vmatpush3.bf16.msra.mxu1 %v27873_v54  ;;  %21320 = vmatpush3.bf16.msra.mxu0 %v27874_v36  ;;  %v27912_v54 = vld [vmem:[#allocation168_spill] sm:$0xff]  ;;  %v27913_v36 = vld [vmem:[#allocation169_spill] sm:$0xff] }
0x2f5f   :  { %21350 = vmatprep.subr.bf16.mxu1 %v27875_v28  ;;  %21322 = vmatprep.subr.bf16.mxu0 %v27876_v51  ;;  %v27914_v28 = vld [vmem:[#allocation170_spill] sm:$0xff]  ;;  %v27915_v51 = vld [vmem:[#allocation171_spill] sm:$0xff] }
0x2f62   :  { %21352 = vmatpush3.bf16.msra.mxu1 %v27877_v6  ;;  %21324 = vmatpush3.bf16.msra.mxu0 %v27878_v18  ;;  %v27916_v6 = vld [vmem:[#allocation172_spill] sm:$0xff]  ;;  %v27917_v18 = vld [vmem:[#allocation173_spill] sm:$0xff] }
0x2f63   :  { %21354 = vmatprep.subr.bf16.mxu1 %v27879_v45  ;;  %21326 = vmatprep.subr.bf16.mxu0 %v27880_v44 }
0x2f66   :  { %21356 = vmatpush3.bf16.msra.mxu1 %v27881_v37  ;;  %21328 = vmatpush3.bf16.msra.mxu0 %v27882_v38  ;;  %v13806_v37 = vld [vmem:[%s26326_s13] sm:$0xff] }
0x2f67   :  { %21358 = vmatprep.subr.bf16.mxu1 %v27883_v57  ;;  %21362 = vmatprep.subr.bf16.mxu0 %v27884_v58  ;;  %v13809_v57 = vld [vmem:[%s26326_s13 + $0x18] sm:$0xff]  ;;  %v26017_v58 = vld [vmem:[%s26327_s12] sm:$0x3f] }
0x2f6a   :  { %21360 = vmatpush3.bf16.msra.mxu1 %v27885_v52  ;;  %v13816_v52 = vld [vmem:[%s26328_s2] sm:$0x3] }
0x2f6b   :  { %21394 = vmatprep.subr.bf16.mxu1 %v27886_v0 }
0x3010   :  { %v13125_v26 = vpop.f32.mrb[136].mxu1  ;;  %v13196_v49 = vpop.f32.mrb[134].mxu0 }
0x3011   :  { %v13127_v27 = vpop.f32.mrb[137].mxu1  ;;  %v13198_v50 = vpop.f32.mrb[135].mxu0  ;;  %v13343_v46 = vmul.f32 %v25819_v12, %v13125_v26  ;;  %v13345_v43 = vmul.f32 %v25823_v59, %v13196_v49 }
0x3012   :  { %v13344_v22 = vmul.f32 %v25821_v16, %v13127_v27  ;;  %v13346_v35 = vmul.f32 %v25826_v47, %v13198_v50 }
0x3014   :  { %13579 = vmatprep.mubr.f32.mxu0 %v13344_v22  ;;  %13649 = vmatprep.mubr.f32.mxu1 %v13346_v35 }
0x3015   :  { %13580 = vmatmul.mubr.f32.vlgmr.msra.gmra.mrb[140].mxu0 %v13343_v46  ;;  %13650 = vmatmul.mubr.f32.vlgmr.msra.gmra.mrb[142].mxu1 %v13345_v43 }
0x3016   :  { %21364 = vmatpush3.bf16.msra.mxu0 %v27887_v42  ;;  %21396 = vmatpush3.bf16.msra.mxu1 %v27888_v19 }
0x3017   :  { %21366 = vmatprep.subr.bf16.mxu0 %v27889_v21  ;;  %21398 = vmatprep.subr.bf16.mxu1 %v27890_v32 }
0x3018   :  { %v13267_v60 = vpop.f32.mrb[138].mxu1  ;;  %v13338_v16 = vpop.f32.mrb[136].mxu0 }
0x3019   :  { %v13269_v20 = vpop.f32.mrb[139].mxu1  ;;  %v13340_v47 = vpop.f32.mrb[137].mxu0  ;;  %v13347_v45 = vmul.f32 %v25869_v63, %v13267_v60  ;;  %v13349_v44 = vmul.f32 %v25874_v55, %v13338_v16  ;;  %v13807_v63 = vld [vmem:[%s26326_s13 + $0x8] sm:$0xff]  ;;  %v13808_v55 = vld [vmem:[%s26326_s13 + $0x10] sm:$0xff] }
0x301a   :  { %v13348_v12 = vmul.f32 %v25831_v39, %v13269_v20  ;;  %v13350_v59 = vmul.f32 %v25837_v14, %v13340_v47  ;;  %21368 = vmatpush3.bf16.msra.mxu0 %v27891_v62  ;;  %21400 = vmatpush3.bf16.msra.mxu1 %v27892_v29  ;;  %v27898_v39 = vld [vmem:[#allocation154_spill] sm:$0xff]  ;;  %v26009_v38 = vpack.c.bf16 %v13807_v63, %v13806_v37  ;;  %v13813_v37 = vld [vmem:[%s26330_s15 + $0x10] sm:$0xff] }
0x301b   :  { %21370 = vmatprep.subr.bf16.mxu0 %v27893_v24  ;;  %21402 = vmatprep.subr.bf16.mxu1 %v27894_v48  ;;  %v26025_v0 = vpack.c.bf16 %v13809_v57, %v13808_v55  ;;  %v13814_v55 = vld [vmem:[%s26330_s15 + $0x18] sm:$0xff] }
0x301c   :  { %13719 = vmatprep.mubr.f32.mxu0 %v13348_v12  ;;  %13789 = vmatprep.mubr.f32.mxu1 %v13350_v59  ;;  %v13487_v30 = vpop.f32.mrb[138].mxu0  ;;  %v26073_v57 = vpack.c.bf16 %v13814_v55, %v13813_v37  ;;  %v16046_v37 = vld [vmem:[%s26328_s2 + $0x6] sm:$0x3] }
0x301d   :  { %v18600_v4 = vpop.f32.mrb[139].mxu0 }
0x301e   :  { %21372 = vmatpush3.bf16.msra.mxu0 %v27895_v5  ;;  %21404 = vmatpush3.bf16.msra.mxu1 %v27896_v61  ;;  %v13512_v61 = vpop.permute.xlu1 %13511 }
0x301f   :  { %21374 = vmatprep.subr.bf16.mxu0 %v27897_v31  ;;  %21406 = vmatprep.subr.bf16.mxu1 %v27898_v39 }
0x3020   :  { %v13417_v14 = vpop.f32.mrb[140].mxu1 }
0x3021   :  { %v13488_v34 = vadd.f32 %v13487_v30, %v13417_v14  ;;  %v18595_v23 = vpop.f32.mrb[141].mxu1 }
0x3022   :  { %21376 = vmatpush3.bf16.msra.mxu0 %v27899_v17  ;;  %21408 = vmatpush3.bf16.msra.mxu1 %v27900_v41 }
0x3023   :  { %v25972_v56 = vadd.f32 %v27901_v3, %v13488_v34  ;;  %21378 = vmatprep.subr.bf16.mxu0 %v27902_v7  ;;  %21410 = vmatprep.subr.bf16.mxu1 %v27903_v25  ;;  %v26048_v7 = vld [vmem:[%s26329_s14] ss:$0 sm:$0xff] }
0x3025   :  { %v13492_v8 = vsel %vm1822_vm6, %v25972_v56, -inf  ;;  %v16025_v17 = vmul.f32 -1.442695, %v25972_v56 }
0x3026   :  { %21380 = vmatpush3.bf16.msra.mxu0 %v27904_v53  ;;  %21412 = vmatpush3.bf16.msra.mxu1 %v27905_v9 }
0x3027   :  { %13493 = vmax.xlane.f32.xlu0 %v13492_v8  ;;  %21382 = vmatprep.subr.bf16.mxu0 %v27906_v33 }
0x3028   :  { %21414 = vmatprep.subr.bf16.mxu1 %v27907_v2 }
0x302a   :  { %21384 = vmatpush3.bf16.msra.mxu0 %v27908_v10  ;;  %21416 = vmatpush3.bf16.msra.mxu1 %v27909_v15 }
0x302b   :  { %21386 = vmatprep.subr.bf16.mxu0 %v27910_v11  ;;  %21418 = vmatprep.subr.bf16.mxu1 %v27911_v13 }
0x302e   :  { %21388 = vmatpush3.bf16.msra.mxu0 %v27912_v54  ;;  %21420 = vmatpush3.bf16.msra.mxu1 %v27913_v36 }
0x302f   :  { %21390 = vmatprep.subr.bf16.mxu0 %v27914_v28  ;;  %21422 = vmatprep.subr.bf16.mxu1 %v27915_v51 }
0x3032   :  { %21392 = vmatpush3.bf16.msra.mxu0 %v27916_v6  ;;  %21424 = vmatpush3.bf16.msra.mxu1 %v27917_v18 }
0x3033   :  { %21425 = vmatprep.subr.bf16.mxu0 %v27848_v1  ;;  %18612 = vmatprep.subr.mxu1 %v26823_v40 }
0x3035   :  { %13720 = vmatmul.mubr.f32.vlgmr.msra.gmra.mrb[142].mxu0 %v13347_v45  ;;  %13790 = vmatmul.mubr.f32.vlgmr.msra.gmra.mrb[144].mxu1 %v13349_v44  ;;  %v13811_v45 = vld [vmem:[%s26330_s15] sm:$0xff]  ;;  %v13812_v44 = vld [vmem:[%s26330_s15 + $0x8] sm:$0xff] }
0x3036   :  { %18609 = vmatprep.mubr.msk.f32.mxu0 %vm21923_vm5, %v26823_v40  ;;  %18614 = vmatprep.mubr.msk.f32.mxu1 %vm21923_vm5, %v26823_v40  ;;  %v26067_v63 = vpack.c.bf16 %v13812_v44, %v13811_v45 }
0x3037   :  { %18613 = vmatpush3.msk.msra.mxu1 %vm13894_vm14, %v26017_v58  ;;  %21427 = vmatpush3.bf16.msra.mxu0 %v26009_v38 }
0x3038   :  { %21428 = vmatprep.subr.bf16.mxu0 %v27848_v1  ;;  %21431 = vmatprep.subr.bf16.mxu1 %v27848_v1 }
0x3039   :  { %18615 = vmatmul.mubr.msk.f32.vlgmr.msra.gmra.mrb[146].mxu1 %vm13890_vm15, %v13816_v52 }
0x303a   :  { %18625 = vmatprep.mubr.msk.f32.mxu1 %vm21923_vm5, %v26823_v40  ;;  %21433 = vmatpush3.bf16.msra.mxu1 %v26067_v63 }
0x303b   :  { %21430 = vmatpush3.bf16.msra.mxu0 %v26025_v0  ;;  %21434 = vmatprep.subr.bf16.mxu1 %v27848_v1 }
0x303c   :  { %21437 = vmatprep.subr.bf16.mxu0 %v27848_v1 }
0x303e   :  { %18610 = vmatmul.mubr.f32.vlgmr.msra.gmra.mrb[144].mxu0 %v26823_v40  ;;  %21436 = vmatpush3.bf16.msra.mxu1 %v26073_v57 }
0x303f   :  { %21439 = vmatpush3.bf16.msra.mxu0 %v26009_v38  ;;  %18636 = vmatprep.mubr.msk.f32.mxu0 %vm21923_vm5, %v26823_v40 }
0x3040   :  { %21440 = vmatprep.subr.bf16.mxu0 %v27848_v1  ;;  %18639 = vmatprep.subr.mxu1 %v26823_v40 }
0x3043   :  { %21442 = vmatpush3.bf16.msra.mxu0 %v26025_v0 }
0x3044   :  { %21443 = vmatprep.subr.bf16.mxu0 %v27848_v1 }
0x30b4   :  { %v13494_v26 = vpop.xlane.xlu0 %13493 }
0x30b5   :  { %v13495_v49 = vsub.f32 %v25972_v56, %v13494_v26  ;;  %v22_v26 = vstv %s26331_s16 }
0x30b6   :  { %23 = vst [vmem:[#allocation2] sm:$0x1] %v22_v26 }
0x30b7   :  { %v13496_v27 = vmul.f32 1.442695, %v13495_v49 }
0x30b9   :  { %21810 = vpow2.f32 %v13496_v27 }
0x30c3   :  { %v21811_v50 = vpop.eup %21810 }
0x30c4   :  { %v13498_v22 = vsel %vm1822_vm6, %v21811_v50, 0.0 }
0x30c5   :  { %13499 = vadd.xlane.f32.xlu0 %v13498_v22  ;;  %v16032_v22 = vld [vmem:[%s26328_s2 + $0x2] sm:$0x3] }
0x30e8   :  { %v18269_v35 = vpop.f32.mrb[140].mxu0  ;;  %v18304_v46 = vpop.f32.mrb[142].mxu1 }
0x30e9   :  { %v18270_v43 = vpop.f32.mrb[141].mxu0  ;;  %v18305_v42 = vpop.f32.mrb[143].mxu1 }
0x30ea   :  { %v18271_v19 = vadd.f32 %v18270_v43, %v18269_v35  ;;  %v18306_v21 = vadd.f32 %v18305_v42, %v18304_v46  ;;  %v26106_v35 = vld [vmem:[#allocation2] ss:$0 sm:$0xff] }
0x3108   :  { %v18339_v32 = vpop.f32.mrb[142].mxu0  ;;  %v18374_v60 = vpop.f32.mrb[144].mxu1 }
0x3109   :  { %v18340_v16 = vpop.f32.mrb[143].mxu0  ;;  %v18375_v20 = vpop.f32.mrb[145].mxu1 }
0x310a   :  { %v18341_v47 = vadd.f32 %v18340_v16, %v18339_v32  ;;  %v18376_v12 = vadd.f32 %v18375_v20, %v18374_v60 }
0x310c   :  { %v13964_v59 = vpop.f32.mrb[146].mxu1 }
0x310d   :  { %v18616_v62 = vpop.f32.mrb[147].mxu1 }
0x3111   :  { %v13886_v29 = vpop.f32.mrb[144].mxu0 }
0x3112   :  { %v13965_v24 = vadd.f32 %v13964_v59, %v13886_v29  ;;  %v18611_v48 = vpop.f32.mrb[145].mxu0 }
0x3114   :  { %v13974_v25 = vadd.f32 %v26048_v7, %v13965_v24 }
0x3116   :  { %v16029_v56 = vmul.f32 -1.442695, %v13974_v25 }
0x3152   :  { %v13500_v30 = vpop.xlane.xlu0 %13499 }
0x3153   :  { %21812 = vrcp.f32 %v13500_v30 }
0x3154   :  { %21814 = vpow2.f32 %v16025_v17 }
0x315d   :  { %v21813_v4 = vpop.eup %21812 }
0x315e   :  { %v13502_v5 = vmul.f32 %v21813_v4, %v21811_v50  ;;  %v21815_v41 = vpop.eup %21814 }
0x315f   :  { %v13506_v3 = vadd.f32 1.0, %v21815_v41 }
0x3160   :  { %v13514_v31 = vmul.f32 %v13512_v61, %v13502_v5 }
0x3161   :  { %21816 = vrcp.f32 %v13506_v3 }
0x3162   :  { %v13582_v39 = vadd.f32 %v18271_v19, %v13514_v31  ;;  %21818 = vtanh.f32 %v13974_v25 }
0x3163   :  { %21820 = vpow2.f32 %v16029_v56 }
0x3164   :  { %v13652_v14 = vadd.f32 %v18306_v21, %v13582_v39 }
0x3166   :  { %v13722_v34 = vadd.f32 %v18341_v47, %v13652_v14 }
0x3168   :  { %v13792_v23 = vadd.f32 %v18376_v12, %v13722_v34  ;;  %v16039_v34 = vld [vmem:[%s26328_s2 + $0x4] sm:$0x3] }
0x316a   :  { %13796 = vrot.lane.b32.xlu0 %v13792_v23, %s21925_s10 }
0x316b   :  { %v21817_v8 = vpop.eup %21816 }
0x316c   :  { %v21819_v33 = vpop.eup %21818 }
0x316d   :  { %v21821_v2 = vpop.eup %21820 }
0x316e   :  { %v13978_v10 = vadd.f32 1.0, %v21821_v2 }
0x3170   :  { %21822 = vrcp.f32 %v13978_v10 }
0x317a   :  { %v21823_v13 = vpop.eup %21822 }
0x31dc   :  { %v13797_v53 = vpop.permute.xlu0 %13796 }
0x31dd   :  { %v13799_v9 = vmul.f32 %v21817_v8, %v13797_v53 }
0x31df   :  { %13801 = vrot.lane.b32.xlu1 %v13799_v9, %s21926_s4 }
0x31e3   :  { %13988 = vrot.lane.b32.xlu1 %v21819_v33, %s21927_s24 }
0x3251   :  { %v13802_v15 = vpop.permute.xlu1 %13801 }
0x3252   :  { %v13804_v11 = vsub.f32 %v13792_v23, %v13802_v15 }
0x3254   :  { %13983 = vrot.lane.b32.xlu0 %v13804_v11, %s21925_s10 }
0x3255   :  { %v13989_v54 = vpop.permute.xlu1 %13988 }
0x3256   :  { %v13991_v36 = vmul.f32 %v21823_v13, %v13989_v54 }
0x3258   :  { %13993 = vrot.lane.b32.xlu1 %v13991_v36, %s21925_s10 }
0x32c6   :  { %v13984_v28 = vpop.permute.xlu0 %13983 }
0x32c7   :  { %v13986_v51 = vmul.f32 %v21823_v13, %v13984_v28 }
0x32ca   :  { %v13994_v6 = vpop.permute.xlu1 %13993 }
0x32cb   :  { %v26055_v18 = vadd.f32 %v13994_v6, %v13986_v51 }
0x32cd   :  { %21824 = vtanh.f32 %v26055_v18 }
0x32d7   :  { %v21825_v52 = vpop.eup %21824 }
0x32d8   :  { %13999 = vrot.lane.b32.xlu0 %v21825_v52, %s21927_s24 }
0x334a   :  { %v14000_v49 = vpop.permute.xlu0 %13999 }
0x334b   :  { %v14002_v27 = vmul.f32 %v21823_v13, %v14000_v49 }
0x334d   :  { %14010 = vrot.lane.b32.xlu1 %v14002_v27, %s21925_s10 }
0x33bf   :  { %v14011_v50 = vpop.permute.xlu1 %14010 }
0x33c0   :  { %18626 = vmatmul.mubr.msk.f32.vlgmr.msra.gmra.mrb[148].mxu1 %vm403_vm1, %v14011_v50  ;;  %18637 = vmatmul.mubr.msk.f32.vlgmr.msra.gmra.mrb[146].mxu0 %vm403_vm1, %v14011_v50 }
0x33c1   :  { %18640 = vmatpush3.msk.msra.mxu1 %vm13894_vm14, %v26017_v58  ;;  %18641 = vmatprep.mubr.msk.f32.mxu1 %vm21923_vm5, %v26823_v40 }
0x33c2   :  { %21449 = vmatprep.subr.bf16.mxu1 %v27848_v1  ;;  %21445 = vmatpush3.bf16.msra.mxu0 %v26067_v63 }
0x33c3   :  { %21446 = vmatprep.subr.bf16.mxu0 %v27848_v1  ;;  %18652 = vmatprep.mubr.msk.f32.mxu0 %vm21923_vm5, %v26823_v40 }
0x33c4   :  { %18642 = vmatmul.mubr.msk.f32.vlgmr.msra.gmra.mrb[150].mxu1 %vm13890_vm15, %v16032_v22 }
0x33c5   :  { %21451 = vmatpush3.bf16.msra.mxu1 %v26009_v38  ;;  %18663 = vmatprep.mubr.msk.f32.mxu1 %vm21923_vm5, %v26823_v40 }
0x33c6   :  { %21452 = vmatprep.subr.bf16.mxu1 %v27848_v1  ;;  %21448 = vmatpush3.bf16.msra.mxu0 %v26073_v57 }
0x33c7   :  { %18666 = vmatprep.subr.mxu0 %v26823_v40 }
0x33c9   :  { %21454 = vmatpush3.bf16.msra.mxu1 %v26025_v0 }
0x33ca   :  { %21455 = vmatprep.subr.bf16.mxu1 %v27848_v1 }
0x3493   :  { %v14080_v46 = vpop.f32.mrb[148].mxu1  ;;  %v14154_v43 = vpop.f32.mrb[146].mxu0 }
0x3494   :  { %v14081_v42 = vadd.f32 %v26106_v35, %v14080_v46  ;;  %v18627_v19 = vpop.f32.mrb[149].mxu1  ;;  %v18638_v21 = vpop.f32.mrb[147].mxu0 }
0x3496   :  { %14085 = vst.msk [vmem:[%s26332_s17] sm:$0x3] %vm14084_vm0, %v14081_v42 }
0x3497   :  { %v14227_v32 = vpop.f32.mrb[150].mxu1 }
0x3498   :  { %v14228_v60 = vadd.f32 %v14227_v32, %v14154_v43  ;;  %v18643_v16 = vpop.f32.mrb[151].mxu1 }
0x349a   :  { %v14231_v20 = vadd.f32 %v26048_v7, %v14228_v60 }
0x349c   :  { %21826 = vtanh.f32 %v14231_v20  ;;  %v16036_v12 = vmul.f32 -1.442695, %v14231_v20 }
0x349e   :  { %21828 = vpow2.f32 %v16036_v12 }
0x34a6   :  { %v21827_v47 = vpop.eup %21826 }
0x34a7   :  { %14241 = vrot.lane.b32.xlu0 %v21827_v47, %s21927_s24 }
0x34a8   :  { %v21829_v59 = vpop.eup %21828 }
0x34a9   :  { %v14235_v62 = vadd.f32 1.0, %v21829_v59 }
0x34ab   :  { %21830 = vrcp.f32 %v14235_v62 }
0x34b5   :  { %v21831_v29 = vpop.eup %21830 }
0x34b6   :  { %v14239_v30 = vmul.f32 %v21831_v29, %v26055_v18 }
0x3519   :  { %v14242_v24 = vpop.permute.xlu0 %14241 }
0x351a   :  { %v14244_v48 = vmul.f32 %v21831_v29, %v14242_v24 }
0x351c   :  { %14246 = vrot.lane.b32.xlu1 %v14244_v48, %s21925_s10 }
0x358e   :  { %v14247_v4 = vpop.permute.xlu1 %14246 }
0x358f   :  { %v14249_v5 = vadd.f32 %v14247_v4, %v14239_v30  ;;  %v16053_v30 = vld [vmem:[%s26328_s2 + $0x8] sm:$0x3] }
0x3591   :  { %21832 = vtanh.f32 %v14249_v5 }
0x359b   :  { %v21833_v61 = vpop.eup %21832 }
0x359c   :  { %14252 = vrot.lane.b32.xlu0 %v21833_v61, %s21927_s24 }
0x360e   :  { %v14253_v31 = vpop.permute.xlu0 %14252 }
0x360f   :  { %v14255_v39 = vmul.f32 %v21831_v29, %v14253_v31 }
0x3611   :  { %14257 = vrot.lane.b32.xlu1 %v14255_v39, %s21925_s10 }
0x3683   :  { %v14258_v14 = vpop.permute.xlu1 %14257 }
0x3684   :  { %18653 = vmatmul.mubr.msk.f32.vlgmr.msra.gmra.mrb[148].mxu0 %vm403_vm1, %v14258_v14  ;;  %18664 = vmatmul.mubr.msk.f32.vlgmr.msra.gmra.mrb[152].mxu1 %vm403_vm1, %v14258_v14 }
0x3685   :  { %18667 = vmatpush3.msk.msra.mxu0 %vm13894_vm14, %v26017_v58  ;;  %18668 = vmatprep.mubr.msk.f32.mxu0 %vm21923_vm5, %v26823_v40 }
0x3686   :  { %21461 = vmatprep.subr.bf16.mxu0 %v27848_v1  ;;  %21457 = vmatpush3.bf16.msra.mxu1 %v26067_v63 }
0x3687   :  { %21458 = vmatprep.subr.bf16.mxu1 %v27848_v1  ;;  %18679 = vmatprep.mubr.msk.f32.mxu1 %vm21923_vm5, %v26823_v40 }
0x3688   :  { %18669 = vmatmul.mubr.msk.f32.vlgmr.msra.gmra.mrb[150].mxu0 %vm13890_vm15, %v16039_v34 }
0x3689   :  { %21463 = vmatpush3.bf16.msra.mxu0 %v26009_v38  ;;  %18690 = vmatprep.mubr.msk.f32.mxu0 %vm21923_vm5, %v26823_v40 }
0x368a   :  { %21464 = vmatprep.subr.bf16.mxu0 %v27848_v1  ;;  %21460 = vmatpush3.bf16.msra.mxu1 %v26073_v57 }
0x368b   :  { %18693 = vmatprep.subr.mxu1 %v26823_v40 }
0x368d   :  { %21466 = vmatpush3.bf16.msra.mxu0 %v26025_v0 }
0x368e   :  { %21467 = vmatprep.subr.bf16.mxu0 %v27848_v1 }
0x3757   :  { %v14327_v23 = vpop.f32.mrb[148].mxu0  ;;  %v14401_v17 = vpop.f32.mrb[152].mxu1 }
0x3758   :  { %v14328_v41 = vadd.f32 %v26106_v35, %v14327_v23  ;;  %v18654_v3 = vpop.f32.mrb[149].mxu0  ;;  %v18665_v25 = vpop.f32.mrb[153].mxu1 }
0x375a   :  { %16038 = vst.msk [vmem:[%s26332_s17 + $0x2] sm:$0x3] %vm14084_vm0, %v14328_v41 }
0x375b   :  { %v14474_v8 = vpop.f32.mrb[150].mxu0 }
0x375c   :  { %v14475_v53 = vadd.f32 %v14474_v8, %v14401_v17  ;;  %v18670_v9 = vpop.f32.mrb[151].mxu0 }
0x375e   :  { %v14478_v33 = vadd.f32 %v26048_v7, %v14475_v53 }
0x3760   :  { %21834 = vtanh.f32 %v14478_v33  ;;  %v16043_v2 = vmul.f32 -1.442695, %v14478_v33 }
0x3762   :  { %21836 = vpow2.f32 %v16043_v2 }
0x376a   :  { %v21835_v56 = vpop.eup %21834 }
0x376b   :  { %14488 = vrot.lane.b32.xlu0 %v21835_v56, %s21927_s24 }
0x376c   :  { %v21837_v10 = vpop.eup %21836 }
0x376d   :  { %v14482_v15 = vadd.f32 1.0, %v21837_v10 }
0x376f   :  { %21838 = vrcp.f32 %v14482_v15 }
0x3779   :  { %v21839_v11 = vpop.eup %21838 }
0x377a   :  { %v14486_v36 = vmul.f32 %v21839_v11, %v14249_v5 }
0x37dd   :  { %v14489_v13 = vpop.permute.xlu0 %14488 }
0x37de   :  { %v14491_v54 = vmul.f32 %v21839_v11, %v14489_v13 }
0x37e0   :  { %14493 = vrot.lane.b32.xlu1 %v14491_v54, %s21925_s10 }
0x3852   :  { %v14494_v28 = vpop.permute.xlu1 %14493 }
0x3853   :  { %v14496_v51 = vadd.f32 %v14494_v28, %v14486_v36  ;;  %v16060_v36 = vld [vmem:[%s26328_s2 + $0xa] sm:$0x3] }
0x3855   :  { %21840 = vtanh.f32 %v14496_v51 }
0x385f   :  { %v21841_v6 = vpop.eup %21840 }
0x3860   :  { %14499 = vrot.lane.b32.xlu0 %v21841_v6, %s21927_s24 }
0x38d2   :  { %v14500_v18 = vpop.permute.xlu0 %14499 }
0x38d3   :  { %v14502_v45 = vmul.f32 %v21839_v11, %v14500_v18 }
0x38d5   :  { %14504 = vrot.lane.b32.xlu1 %v14502_v45, %s21925_s10 }
0x3947   :  { %v14505_v44 = vpop.permute.xlu1 %14504 }
0x3948   :  { %18680 = vmatmul.mubr.msk.f32.vlgmr.msra.gmra.mrb[154].mxu1 %vm403_vm1, %v14505_v44  ;;  %18691 = vmatmul.mubr.msk.f32.vlgmr.msra.gmra.mrb[152].mxu0 %vm403_vm1, %v14505_v44 }
0x3949   :  { %18694 = vmatpush3.msk.msra.mxu1 %vm13894_vm14, %v26017_v58  ;;  %18695 = vmatprep.mubr.msk.f32.mxu1 %vm21923_vm5, %v26823_v40 }
0x394a   :  { %21473 = vmatprep.subr.bf16.mxu1 %v27848_v1  ;;  %21469 = vmatpush3.bf16.msra.mxu0 %v26067_v63 }
0x394b   :  { %21470 = vmatprep.subr.bf16.mxu0 %v27848_v1  ;;  %18706 = vmatprep.mubr.msk.f32.mxu0 %vm21923_vm5, %v26823_v40 }
0x394c   :  { %18696 = vmatmul.mubr.msk.f32.vlgmr.msra.gmra.mrb[156].mxu1 %vm13890_vm15, %v16046_v37 }
0x394d   :  { %21475 = vmatpush3.bf16.msra.mxu1 %v26009_v38  ;;  %18717 = vmatprep.mubr.msk.f32.mxu1 %vm21923_vm5, %v26823_v40 }
0x394e   :  { %21476 = vmatprep.subr.bf16.mxu1 %v27848_v1  ;;  %21472 = vmatpush3.bf16.msra.mxu0 %v26073_v57 }
0x394f   :  { %18720 = vmatprep.subr.mxu0 %v26823_v40 }
0x3951   :  { %21478 = vmatpush3.bf16.msra.mxu1 %v26025_v0 }
0x3952   :  { %21479 = vmatprep.subr.bf16.mxu1 %v27848_v1 }
0x3a1b   :  { %v14574_v55 = vpop.f32.mrb[154].mxu1  ;;  %v14648_v52 = vpop.f32.mrb[152].mxu0 }
0x3a1c   :  { %v14575_v26 = vadd.f32 %v26106_v35, %v14574_v55  ;;  %v18681_v49 = vpop.f32.mrb[155].mxu1  ;;  %v18692_v27 = vpop.f32.mrb[153].mxu0 }
0x3a1e   :  { %16045 = vst.msk [vmem:[%s26332_s17 + $0x4] sm:$0x3] %vm14084_vm0, %v14575_v26 }
0x3a1f   :  { %v14721_v50 = vpop.f32.mrb[156].mxu1 }
0x3a20   :  { %v14722_v22 = vadd.f32 %v14721_v50, %v14648_v52  ;;  %v18697_v46 = vpop.f32.mrb[157].mxu1 }
0x3a22   :  { %v14725_v43 = vadd.f32 %v26048_v7, %v14722_v22 }
0x3a24   :  { %21842 = vtanh.f32 %v14725_v43  ;;  %v16050_v19 = vmul.f32 -1.442695, %v14725_v43 }
0x3a26   :  { %21844 = vpow2.f32 %v16050_v19 }
0x3a2e   :  { %v21843_v42 = vpop.eup %21842 }
0x3a2f   :  { %14735 = vrot.lane.b32.xlu0 %v21843_v42, %s21927_s24 }
0x3a30   :  { %v21845_v21 = vpop.eup %21844 }
0x3a31   :  { %v14729_v32 = vadd.f32 1.0, %v21845_v21 }
0x3a33   :  { %21846 = vrcp.f32 %v14729_v32 }
0x3a3d   :  { %v21847_v60 = vpop.eup %21846 }
0x3a3e   :  { %v14733_v47 = vmul.f32 %v21847_v60, %v14496_v51 }
0x3aa1   :  { %v14736_v16 = vpop.permute.xlu0 %14735 }
0x3aa2   :  { %v14738_v20 = vmul.f32 %v21847_v60, %v14736_v16 }
0x3aa4   :  { %14740 = vrot.lane.b32.xlu1 %v14738_v20, %s21925_s10 }
0x3b16   :  { %v14741_v12 = vpop.permute.xlu1 %14740 }
0x3b17   :  { %v14743_v59 = vadd.f32 %v14741_v12, %v14733_v47  ;;  %v16067_v47 = vld [vmem:[%s26328_s2 + $0xc] sm:$0x3] }
0x3b19   :  { %21848 = vtanh.f32 %v14743_v59 }
0x3b23   :  { %v21849_v62 = vpop.eup %21848 }
0x3b24   :  { %14746 = vrot.lane.b32.xlu0 %v21849_v62, %s21927_s24 }
0x3b96   :  { %v14747_v29 = vpop.permute.xlu0 %14746 }
0x3b97   :  { %v14749_v24 = vmul.f32 %v21847_v60, %v14747_v29 }
0x3b99   :  { %14751 = vrot.lane.b32.xlu1 %v14749_v24, %s21925_s10 }
0x3c0b   :  { %v14752_v48 = vpop.permute.xlu1 %14751 }
0x3c0c   :  { %18707 = vmatmul.mubr.msk.f32.vlgmr.msra.gmra.mrb[154].mxu0 %vm403_vm1, %v14752_v48  ;;  %18718 = vmatmul.mubr.msk.f32.vlgmr.msra.gmra.mrb[158].mxu1 %vm403_vm1, %v14752_v48 }
0x3c0d   :  { %18721 = vmatpush3.msk.msra.mxu0 %vm13894_vm14, %v26017_v58  ;;  %18722 = vmatprep.mubr.msk.f32.mxu0 %vm21923_vm5, %v26823_v40 }
0x3c0e   :  { %21485 = vmatprep.subr.bf16.mxu0 %v27848_v1  ;;  %21481 = vmatpush3.bf16.msra.mxu1 %v26067_v63 }
0x3c0f   :  { %21482 = vmatprep.subr.bf16.mxu1 %v27848_v1  ;;  %18733 = vmatprep.mubr.msk.f32.mxu1 %vm21923_vm5, %v26823_v40 }
0x3c10   :  { %18723 = vmatmul.mubr.msk.f32.vlgmr.msra.gmra.mrb[156].mxu0 %vm13890_vm15, %v16053_v30 }
0x3c11   :  { %21487 = vmatpush3.bf16.msra.mxu0 %v26009_v38  ;;  %18744 = vmatprep.mubr.msk.f32.mxu0 %vm21923_vm5, %v26823_v40 }
0x3c12   :  { %21488 = vmatprep.subr.bf16.mxu0 %v27848_v1  ;;  %21484 = vmatpush3.bf16.msra.mxu1 %v26073_v57 }
0x3c13   :  { %18747 = vmatprep.subr.mxu1 %v26823_v40 }
0x3c15   :  { %21490 = vmatpush3.bf16.msra.mxu0 %v26025_v0 }
0x3c16   :  { %21491 = vmatprep.subr.bf16.mxu0 %v27848_v1 }
0x3cdf   :  { %v14821_v4 = vpop.f32.mrb[154].mxu0  ;;  %v14895_v5 = vpop.f32.mrb[158].mxu1 }
0x3ce0   :  { %v14822_v61 = vadd.f32 %v26106_v35, %v14821_v4  ;;  %v18708_v31 = vpop.f32.mrb[155].mxu0  ;;  %v18719_v39 = vpop.f32.mrb[159].mxu1 }
0x3ce2   :  { %16052 = vst.msk [vmem:[%s26332_s17 + $0x6] sm:$0x3] %vm14084_vm0, %v14822_v61 }
0x3ce3   :  { %v14968_v14 = vpop.f32.mrb[156].mxu0 }
0x3ce4   :  { %v14969_v34 = vadd.f32 %v14968_v14, %v14895_v5  ;;  %v18724_v23 = vpop.f32.mrb[157].mxu0 }
0x3ce6   :  { %v14972_v17 = vadd.f32 %v26048_v7, %v14969_v34 }
0x3ce8   :  { %21850 = vtanh.f32 %v14972_v17  ;;  %v16057_v3 = vmul.f32 -1.442695, %v14972_v17 }
0x3cea   :  { %21852 = vpow2.f32 %v16057_v3 }
0x3cf2   :  { %v21851_v41 = vpop.eup %21850 }
0x3cf3   :  { %14982 = vrot.lane.b32.xlu0 %v21851_v41, %s21927_s24 }
0x3cf4   :  { %v21853_v25 = vpop.eup %21852 }
0x3cf5   :  { %v14976_v8 = vadd.f32 1.0, %v21853_v25 }
0x3cf7   :  { %21854 = vrcp.f32 %v14976_v8 }
0x3d01   :  { %v21855_v53 = vpop.eup %21854 }
0x3d02   :  { %v14980_v56 = vmul.f32 %v21855_v53, %v14743_v59 }
0x3d65   :  { %v14983_v9 = vpop.permute.xlu0 %14982 }
0x3d66   :  { %v14985_v33 = vmul.f32 %v21855_v53, %v14983_v9  ;;  %v16074_v9 = vld [vmem:[%s26328_s2 + $0xe] sm:$0x3] }
0x3d68   :  { %14987 = vrot.lane.b32.xlu1 %v14985_v33, %s21925_s10 }
0x3dda   :  { %v14988_v2 = vpop.permute.xlu1 %14987 }
0x3ddb   :  { %v14990_v10 = vadd.f32 %v14988_v2, %v14980_v56 }
0x3ddd   :  { %21856 = vtanh.f32 %v14990_v10 }
0x3de7   :  { %v21857_v15 = vpop.eup %21856 }
0x3de8   :  { %14993 = vrot.lane.b32.xlu0 %v21857_v15, %s21927_s24 }
0x3e5a   :  { %v14994_v11 = vpop.permute.xlu0 %14993 }
0x3e5b   :  { %v14996_v13 = vmul.f32 %v21855_v53, %v14994_v11 }
0x3e5d   :  { %14998 = vrot.lane.b32.xlu1 %v14996_v13, %s21925_s10 }
0x3ecf   :  { %v14999_v54 = vpop.permute.xlu1 %14998 }
0x3ed0   :  { %18734 = vmatmul.mubr.msk.f32.vlgmr.msra.gmra.mrb[160].mxu1 %vm403_vm1, %v14999_v54  ;;  %18745 = vmatmul.mubr.msk.f32.vlgmr.msra.gmra.mrb[158].mxu0 %vm403_vm1, %v14999_v54 }
0x3ed1   :  { %18748 = vmatpush3.msk.msra.mxu1 %vm13894_vm14, %v26017_v58  ;;  %18749 = vmatprep.mubr.msk.f32.mxu1 %vm21923_vm5, %v26823_v40 }
0x3ed2   :  { %21497 = vmatprep.subr.bf16.mxu1 %v27848_v1  ;;  %21493 = vmatpush3.bf16.msra.mxu0 %v26067_v63 }
0x3ed3   :  { %21494 = vmatprep.subr.bf16.mxu0 %v27848_v1  ;;  %18760 = vmatprep.mubr.msk.f32.mxu0 %vm21923_vm5, %v26823_v40 }
0x3ed4   :  { %18750 = vmatmul.mubr.msk.f32.vlgmr.msra.gmra.mrb[162].mxu1 %vm13890_vm15, %v16060_v36 }
0x3ed5   :  { %21499 = vmatpush3.bf16.msra.mxu1 %v26009_v38  ;;  %18771 = vmatprep.mubr.msk.f32.mxu1 %vm21923_vm5, %v26823_v40 }
0x3ed6   :  { %21500 = vmatprep.subr.bf16.mxu1 %v27848_v1  ;;  %21496 = vmatpush3.bf16.msra.mxu0 %v26073_v57 }
0x3ed7   :  { %18774 = vmatprep.subr.mxu0 %v26823_v40 }
0x3ed9   :  { %21502 = vmatpush3.bf16.msra.mxu1 %v26025_v0 }
0x3eda   :  { %21503 = vmatprep.subr.bf16.mxu1 %v27848_v1 }
0x3fa3   :  { %v15068_v28 = vpop.f32.mrb[160].mxu1  ;;  %v15142_v51 = vpop.f32.mrb[158].mxu0 }
0x3fa4   :  { %v15069_v6 = vadd.f32 %v26106_v35, %v15068_v28  ;;  %v18735_v18 = vpop.f32.mrb[161].mxu1  ;;  %v18746_v45 = vpop.f32.mrb[159].mxu0 }
0x3fa6   :  { %16059 = vst.msk [vmem:[%s26332_s17 + $0x8] sm:$0x3] %vm14084_vm0, %v15069_v6 }
0x3fa7   :  { %v15215_v44 = vpop.f32.mrb[162].mxu1 }
0x3fa8   :  { %v15216_v37 = vadd.f32 %v15215_v44, %v15142_v51  ;;  %v18751_v55 = vpop.f32.mrb[163].mxu1 }
0x3faa   :  { %v15219_v52 = vadd.f32 %v26048_v7, %v15216_v37 }
0x3fac   :  { %21858 = vtanh.f32 %v15219_v52  ;;  %v16064_v49 = vmul.f32 -1.442695, %v15219_v52 }
0x3fae   :  { %21860 = vpow2.f32 %v16064_v49 }
0x3fb6   :  { %v21859_v26 = vpop.eup %21858 }
0x3fb7   :  { %15229 = vrot.lane.b32.xlu0 %v21859_v26, %s21927_s24 }
0x3fb8   :  { %v21861_v27 = vpop.eup %21860 }
0x3fb9   :  { %v15223_v50 = vadd.f32 1.0, %v21861_v27 }
0x3fbb   :  { %21862 = vrcp.f32 %v15223_v50 }
0x3fc5   :  { %v21863_v22 = vpop.eup %21862 }
0x3fc6   :  { %v15227_v42 = vmul.f32 %v21863_v22, %v14990_v10 }
0x4029   :  { %v15230_v46 = vpop.permute.xlu0 %15229 }
0x402a   :  { %v15232_v43 = vmul.f32 %v21863_v22, %v15230_v46 }
0x402c   :  { %15234 = vrot.lane.b32.xlu1 %v15232_v43, %s21925_s10 }
0x409e   :  { %v15235_v19 = vpop.permute.xlu1 %15234 }
0x409f   :  { %v15237_v21 = vadd.f32 %v15235_v19, %v15227_v42 }
0x40a1   :  { %21864 = vtanh.f32 %v15237_v21 }
0x40ab   :  { %v21865_v32 = vpop.eup %21864 }
0x40ac   :  { %15240 = vrot.lane.b32.xlu0 %v21865_v32, %s21927_s24 }
0x411e   :  { %v15241_v60 = vpop.permute.xlu0 %15240 }
0x411f   :  { %v15243_v16 = vmul.f32 %v21863_v22, %v15241_v60 }
0x4121   :  { %15245 = vrot.lane.b32.xlu1 %v15243_v16, %s21925_s10 }
0x4193   :  { %v15246_v20 = vpop.permute.xlu1 %15245 }
0x4194   :  { %18761 = vmatmul.mubr.msk.f32.vlgmr.msra.gmra.mrb[160].mxu0 %vm403_vm1, %v15246_v20  ;;  %18772 = vmatmul.mubr.msk.f32.vlgmr.msra.gmra.mrb[164].mxu1 %vm403_vm1, %v15246_v20 }
0x4195   :  { %18775 = vmatpush3.msk.msra.mxu0 %vm13894_vm14, %v26017_v58  ;;  %18776 = vmatprep.mubr.msk.f32.mxu0 %vm21923_vm5, %v26823_v40 }
0x4196   :  { %21509 = vmatprep.subr.bf16.mxu0 %v27848_v1  ;;  %21505 = vmatpush3.bf16.msra.mxu1 %v26067_v63 }
0x4197   :  { %21506 = vmatprep.subr.bf16.mxu1 %v27848_v1  ;;  %18787 = vmatprep.mubr.msk.f32.mxu1 %vm21923_vm5, %v26823_v40 }
0x4198   :  { %18777 = vmatmul.mubr.msk.f32.vlgmr.msra.gmra.mrb[162].mxu0 %vm13890_vm15, %v16067_v47 }
0x4199   :  { %21511 = vmatpush3.bf16.msra.mxu0 %v26009_v38  ;;  %18798 = vmatprep.mubr.msk.f32.mxu0 %vm21923_vm5, %v26823_v40 }
0x419a   :  { %21512 = vmatprep.subr.bf16.mxu0 %v27848_v1  ;;  %21508 = vmatpush3.bf16.msra.mxu1 %v26073_v57 }
0x419b   :  { %18801 = vmatprep.subr.mxu1 %v26823_v40 }
0x419d   :  { %21514 = vmatpush3.bf16.msra.mxu0 %v26025_v0 }
0x419e   :  { %21515 = vmatprep.subr.bf16.mxu0 %v27848_v1 }
0x4267   :  { %v15315_v12 = vpop.f32.mrb[160].mxu0  ;;  %v15389_v59 = vpop.f32.mrb[164].mxu1 }
0x4268   :  { %v15316_v62 = vadd.f32 %v26106_v35, %v15315_v12  ;;  %v18762_v29 = vpop.f32.mrb[161].mxu0  ;;  %v18773_v24 = vpop.f32.mrb[165].mxu1 }
0x426a   :  { %16066 = vst.msk [vmem:[%s26332_s17 + $0xa] sm:$0x3] %vm14084_vm0, %v15316_v62 }
0x426b   :  { %v15462_v38 = vpop.f32.mrb[162].mxu0 }
0x426c   :  { %v15463_v48 = vadd.f32 %v15462_v38, %v15389_v59  ;;  %v18778_v30 = vpop.f32.mrb[163].mxu0 }
0x426e   :  { %v15466_v4 = vadd.f32 %v26048_v7, %v15463_v48 }
0x4270   :  { %21866 = vtanh.f32 %v15466_v4  ;;  %v16071_v5 = vmul.f32 -1.442695, %v15466_v4 }
0x4272   :  { %21868 = vpow2.f32 %v16071_v5 }
0x427a   :  { %v21867_v0 = vpop.eup %21866 }
0x427b   :  { %15476 = vrot.lane.b32.xlu0 %v21867_v0, %s21927_s24 }
0x427c   :  { %v21869_v61 = vpop.eup %21868 }
0x427d   :  { %v15470_v31 = vadd.f32 1.0, %v21869_v61 }
0x427f   :  { %21870 = vrcp.f32 %v15470_v31 }
0x4289   :  { %v21871_v39 = vpop.eup %21870 }
0x428a   :  { %v15474_v23 = vmul.f32 %v21871_v39, %v15237_v21 }
0x42ed   :  { %v15477_v14 = vpop.permute.xlu0 %15476 }
0x42ee   :  { %v15479_v34 = vmul.f32 %v21871_v39, %v15477_v14 }
0x42f0   :  { %15481 = vrot.lane.b32.xlu1 %v15479_v34, %s21925_s10 }
0x4362   :  { %v15482_v17 = vpop.permute.xlu1 %15481 }
0x4363   :  { %v15484_v41 = vadd.f32 %v15482_v17, %v15474_v23 }
0x4365   :  { %21872 = vtanh.f32 %v15484_v41 }
0x436f   :  { %v21873_v3 = vpop.eup %21872 }
0x4370   :  { %15487 = vrot.lane.b32.xlu0 %v21873_v3, %s21927_s24 }
0x43e2   :  { %v15488_v25 = vpop.permute.xlu0 %15487 }
0x43e3   :  { %v15490_v8 = vmul.f32 %v21871_v39, %v15488_v25 }
0x43e5   :  { %15492 = vrot.lane.b32.xlu1 %v15490_v8, %s21925_s10 }
0x4457   :  { %v15493_v53 = vpop.permute.xlu1 %15492 }
0x4458   :  { %18788 = vmatmul.mubr.msk.f32.vlgmr.msra.gmra.mrb[166].mxu1 %vm403_vm1, %v15493_v53  ;;  %18799 = vmatmul.mubr.msk.f32.vlgmr.msra.gmra.mrb[164].mxu0 %vm403_vm1, %v15493_v53 }
0x4459   :  { %18802 = vmatpush3.msk.msra.mxu1 %vm13894_vm14, %v26017_v58  ;;  %18803 = vmatprep.mubr.msk.f32.mxu1 %vm21923_vm5, %v26823_v40 }
0x445a   :  { %21517 = vmatpush3.bf16.msra.mxu0 %v26067_v63  ;;  %18814 = vmatprep.mubr.msk.f32.mxu0 %vm21923_vm5, %v26823_v40 }
0x445b   :  { %21518 = vmatprep.subr.bf16.mxu0 %v27848_v1 }
0x445c   :  { %18804 = vmatmul.mubr.msk.f32.vlgmr.msra.gmra.mrb[168].mxu1 %vm13890_vm15, %v16074_v9 }
0x445e   :  { %21520 = vmatpush3.bf16.msra.mxu0 %v26073_v57 }
0x452b   :  { %v15562_v33 = vpop.f32.mrb[166].mxu1  ;;  %v15636_v58 = vpop.f32.mrb[164].mxu0 }
0x452c   :  { %v15563_v56 = vadd.f32 %v26106_v35, %v15562_v33  ;;  %v18789_v2 = vpop.f32.mrb[167].mxu1  ;;  %v18800_v10 = vpop.f32.mrb[165].mxu0 }
0x452e   :  { %16073 = vst.msk [vmem:[%s26332_s17 + $0xc] sm:$0x3] %vm14084_vm0, %v15563_v56 }
0x452f   :  { %v15709_v63 = vpop.f32.mrb[168].mxu1 }
0x4530   :  { %v15710_v15 = vadd.f32 %v15709_v63, %v15636_v58  ;;  %v18805_v40 = vpop.f32.mrb[169].mxu1 }
0x4532   :  { %v15713_v1 = vadd.f32 %v26048_v7, %v15710_v15 }
0x4534   :  { %21874 = vtanh.f32 %v15713_v1  ;;  %v16078_v57 = vmul.f32 -1.442695, %v15713_v1 }
0x4536   :  { %21876 = vpow2.f32 %v16078_v57 }
0x453e   :  { %v21875_v11 = vpop.eup %21874 }
0x453f   :  { %15723 = vrot.lane.b32.xlu0 %v21875_v11, %s21927_s24 }
0x4540   :  { %v21877_v13 = vpop.eup %21876 }
0x4541   :  { %v15717_v54 = vadd.f32 1.0, %v21877_v13 }
0x4543   :  { %21878 = vrcp.f32 %v15717_v54 }
0x454d   :  { %v21879_v36 = vpop.eup %21878 }
0x454e   :  { %v15721_v6 = vmul.f32 %v21879_v36, %v15484_v41 }
0x45b1   :  { %v15724_v28 = vpop.permute.xlu0 %15723 }
0x45b2   :  { %v15726_v51 = vmul.f32 %v21879_v36, %v15724_v28 }
0x45b4   :  { %15728 = vrot.lane.b32.xlu1 %v15726_v51, %s21925_s10 }
0x4626   :  { %v15729_v18 = vpop.permute.xlu1 %15728 }
0x4627   :  { %v15731_v45 = vadd.f32 %v15729_v18, %v15721_v6 }
0x4629   :  { %21880 = vtanh.f32 %v15731_v45 }
0x4633   :  { %v21881_v44 = vpop.eup %21880 }
0x4634   :  { %15734 = vrot.lane.b32.xlu0 %v21881_v44, %s21927_s24 }
0x46a6   :  { %v15735_v7 = vpop.permute.xlu0 %15734 }
0x46a7   :  { %v15737_v37 = vmul.f32 %v21879_v36, %v15735_v7 }
0x46a9   :  { %15739 = vrot.lane.b32.xlu1 %v15737_v37, %s21925_s10 }
0x471b   :  { %v15740_v55 = vpop.permute.xlu1 %15739 }
0x471c   :  { %18815 = vmatmul.mubr.msk.f32.vlgmr.msra.gmra.mrb[166].mxu0 %vm403_vm1, %v15740_v55 }
0x47ef   :  { %v15809_v52 = vpop.f32.mrb[166].mxu0 }
0x47f0   :  { %v15810_v26 = vadd.f32 %v26106_v35, %v15809_v52  ;;  %v18816_v49 = vpop.f32.mrb[167].mxu0 }
0x47f2   :  { %16080 = vst.msk [vmem:[%s26332_s17 + $0xe] sm:$0x3] %vm14084_vm0, %v15810_v26 }

</bundles_post_ra>
